<compile_context>
chip_gen: v7x
topology: tpu7x:2x2x1
jax: 0.10.0
libtpu: 0.0.40
codegen_flags: <defaults>
</compile_context>

<pallas_src>
import jax
import jax.numpy as jnp
from jax.experimental import pallas as pl
from jax.experimental.pallas import tpu as pltpu


def _ffn_kernel(x_ref, w1_ref, b1_ref, w2_ref, b2_ref, o_ref):
    # First matmul on the MXU: bf16 operands, f32 accumulation.
    h = jnp.dot(x_ref[...], w1_ref[...], preferred_element_type=jnp.float32)
    # Bias + ReLU epilogue in f32 (safe on v5e's VPU; hidden under MXU slack).
    h = jnp.maximum(h + b1_ref[...], 0.0)
    # Second matmul: bf16 operands again for the MXU fast path, f32 accumulation.
    out = jnp.dot(h.astype(jnp.bfloat16), w2_ref[...],
                  preferred_element_type=jnp.float32)
    o_ref[...] = (out + b2_ref[...]).astype(o_ref.dtype)


def prepare_ffn_params(w1, b1, w2, b2):
    """One-time param prep: bf16 weights (HBM/MXU friendly), f32 row-vector biases."""
    return (w1.astype(jnp.bfloat16),
            b1.reshape(1, -1).astype(jnp.float32),
            w2.astype(jnp.bfloat16),
            b2.reshape(1, -1).astype(jnp.float32))


def _pick_tm(M, tm_max):
    """Token-tile size.

    Big enough to amortize the ~0.35us/grid-step overhead, small enough to fit
    VMEM, and for small/medium M split into ~2 grid steps so the 'parallel'
    axis spans both v7x TensorCores. Multiples of 16 keep bf16 sublane packing
    clean; >=256 tiles stay 256-aligned for the MXU.
    """
    m16 = max(16, -(-M // 16) * 16)
    if m16 <= 2 * tm_max:
        half = -(-m16 // 2)
        if half >= 256:
            tm = -(-half // 256) * 256
        else:
            tm = -(-half // 16) * 16
        return min(tm, m16)
    return tm_max


def _build_ffn_call(M, d_model, d_ff, tm, out_dtype, single_buffer_weights):
    grid = (pl.cdiv(M, tm),)
    resident_kwargs = (
        {"pipeline_mode": pl.Buffered(1)} if single_buffer_weights else {})

    def resident(shape):
        # Constant index_map: streamed from HBM once, stays VMEM-resident.
        return pl.BlockSpec(shape, lambda m: (0,) * len(shape), **resident_kwargs)

    return pl.pallas_call(
        _ffn_kernel,
        out_shape=jax.ShapeDtypeStruct((M, d_model), out_dtype),
        grid_spec=pltpu.PrefetchScalarGridSpec(
            num_scalar_prefetch=0,
            grid=grid,
            in_specs=[
                pl.BlockSpec((tm, d_model), lambda m: (m, 0)),  # x tile
                resident((d_model, d_ff)),                      # W1 (resident)
                resident((1, d_ff)),                            # b1 (resident)
                resident((d_ff, d_model)),                      # W2 (resident)
                resident((1, d_model)),                         # b2 (resident)
            ],
            out_specs=pl.BlockSpec((tm, d_model), lambda m: (m, 0)),
        ),
        compiler_params=pltpu.CompilerParams(
            # Independent M tiles -> megacore-shardable on v7x. 48 MiB scoped
            # VMEM gives larger tiles headroom over v5e's 16 MiB default while
            # staying under v7x's 64 MiB physical VMEM.
            dimension_semantics=("parallel",),
            vmem_limit_bytes=48 * 1024 * 1024,
        ),
    )


def feed_forward(x, w1_bf, b1_2d, w2_bf, b2_2d, *, tm_max=512,
                 out_dtype=jnp.bfloat16):
    """x: (M, d_model) activations (pass bf16); params from prepare_ffn_params."""
    M, d_model = x.shape
    d_ff = w1_bf.shape[1]
    if x.dtype != jnp.bfloat16:
        # Callers should pre-cast activations to bf16; this guard costs one
        # extra un-hidden HBM pass over x and exists for convenience only.
        x = x.astype(jnp.bfloat16)

    tm = _pick_tm(M, tm_max)
    args = (x, w1_bf, b1_2d, w2_bf, b2_2d)
    try:
        out = _build_ffn_call(M, d_model, d_ff, tm, out_dtype,
                              single_buffer_weights=True)(*args)
        return jax.block_until_ready(out)  # surface any lowering error here
    except Exception:
        # Fallback for jax builds where pipeline_mode=pl.Buffered(1) is not
        # accepted by the Mosaic pallas_call lowering: weights get the default
        # double-buffering (still DMA'd only once via the constant index_map).
        return _build_ffn_call(M, d_model, d_ff, tm, out_dtype,
                               single_buffer_weights=False)(*args)


if __name__ == "__main__":
    d_model = 512
    d_ff = 4 * d_model
    batch, seq = 2, 8  # M = 16 tokens

    key = jax.random.PRNGKey(0)
    kx, kw1, kb1, kw2, kb2 = jax.random.split(key, 5)

    # Deterministic synthetic parameters (shapes match nn.Linear(d_model, d_ff)
    # and nn.Linear(d_ff, d_model), stored transposed as (in, out)).
    x = jax.random.normal(kx, (batch, seq, d_model), dtype=jnp.float32)
    w1 = jax.random.normal(kw1, (d_model, d_ff), dtype=jnp.float32) * 0.02
    b1 = jax.random.normal(kb1, (d_ff,), dtype=jnp.float32) * 0.02
    w2 = jax.random.normal(kw2, (d_ff, d_model), dtype=jnp.float32) * 0.02
    b2 = jax.random.normal(kb2, (d_model,), dtype=jnp.float32) * 0.02

    # One-time param prep (bf16 weights) + caller-side bf16 activations.
    w1_bf, b1_2d, w2_bf, b2_2d = prepare_ffn_params(w1, b1, w2, b2)
    x2d = x.reshape(batch * seq, d_model)
    x2d_bf = x2d.astype(jnp.bfloat16)

    out2d = feed_forward(x2d_bf, w1_bf, b1_2d, w2_bf, b2_2d)
    out = out2d.reshape(batch, seq, d_model)
    jax.block_until_ready(out)

    # f32 reference (same math as the PyTorch module). Tolerance covers bf16
    # operands / bf16 output with f32 accumulation on the MXU.
    ref = (jnp.maximum(x2d @ w1 + b1, 0.0) @ w2 + b2).reshape(batch, seq, d_model)
    assert out.shape == (batch, seq, d_model)
    assert out.dtype == jnp.bfloat16
    assert jnp.allclose(out.astype(jnp.float32), ref, atol=3e-2, rtol=3e-2)

    print("KERNEL_OK")
</pallas_src>

<mosaic_0001>
module attributes {stable_mosaic.version = 11 : i64} {
  func.func @_ffn_kernel(%arg0: i32, %arg1: memref<16x512xbf16, #tpu.memory_space<vmem>>, %arg2: memref<512x2048xbf16, #tpu.memory_space<vmem>>, %arg3: memref<1x2048xf32, #tpu.memory_space<vmem>>, %arg4: memref<2048x512xbf16, #tpu.memory_space<vmem>>, %arg5: memref<1x512xf32, #tpu.memory_space<vmem>>, %arg6: memref<16x512xbf16, #tpu.memory_space<vmem>>) attributes {dimension_semantics = [#tpu.dimension_semantics<parallel>], iteration_bounds = array<i64: 1>, scalar_prefetch = 0 : i64, scratch_operands = 0 : i64, tpu.core_type = #tpu.core_type<tc>, window_params = [{transform_indices = @transform_0, window_bounds = array<i64: 16, 512>}, {pipeline_mode = #tpu.pipeline_mode<synchronous>, transform_indices = @transform_1, window_bounds = array<i64: 512, 2048>}, {pipeline_mode = #tpu.pipeline_mode<synchronous>, transform_indices = @transform_2, window_bounds = array<i64: 1, 2048>}, {pipeline_mode = #tpu.pipeline_mode<synchronous>, transform_indices = @transform_3, window_bounds = array<i64: 2048, 512>}, {pipeline_mode = #tpu.pipeline_mode<synchronous>, transform_indices = @transform_4, window_bounds = array<i64: 1, 512>}, {transform_indices = @transform_5, window_bounds = array<i64: 16, 512>}]} {
    %c0 = arith.constant 0 : index
    %c0_0 = arith.constant 0 : index
    %0 = vector.load %arg1[%c0, %c0_0] : memref<16x512xbf16, #tpu.memory_space<vmem>>, vector<16x512xbf16>
    %c0_1 = arith.constant 0 : index
    %c0_2 = arith.constant 0 : index
    %1 = vector.load %arg2[%c0_1, %c0_2] : memref<512x2048xbf16, #tpu.memory_space<vmem>>, vector<512x2048xbf16>
    %cst = arith.constant dense<0.000000e+00> : vector<16x2048xf32>
    %2 = tpu.matmul %0, %1, %cst {dimension_numbers = #tpu.dot_dimension_numbers<[1], [0], [0], [1], [0, 0, 1, 1], [], []>} : vector<16x512xbf16>, vector<512x2048xbf16>, vector<16x2048xf32> -> vector<16x2048xf32>
    %c0_3 = arith.constant 0 : index
    %c0_4 = arith.constant 0 : index
    %3 = vector.load %arg3[%c0_3, %c0_4] : memref<1x2048xf32, #tpu.memory_space<vmem>>, vector<1x2048xf32>
    %4 = vector.broadcast %3 : vector<1x2048xf32> to vector<16x2048xf32>
    %5 = arith.addf %2, %4 : vector<16x2048xf32>
    %cst_5 = arith.constant 0.000000e+00 : f32
    %6 = vector.broadcast %cst_5 : f32 to vector<16x2048xf32>
    %7 = arith.maximumf %5, %6 : vector<16x2048xf32>
    %8 = arith.truncf %7 : vector<16x2048xf32> to vector<16x2048xbf16>
    %c0_6 = arith.constant 0 : index
    %c0_7 = arith.constant 0 : index
    %9 = vector.load %arg4[%c0_6, %c0_7] : memref<2048x512xbf16, #tpu.memory_space<vmem>>, vector<2048x512xbf16>
    %cst_8 = arith.constant dense<0.000000e+00> : vector<16x512xf32>
    %10 = tpu.matmul %8, %9, %cst_8 {dimension_numbers = #tpu.dot_dimension_numbers<[1], [0], [0], [1], [0, 0, 1, 1], [], []>} : vector<16x2048xbf16>, vector<2048x512xbf16>, vector<16x512xf32> -> vector<16x512xf32>
    %c0_9 = arith.constant 0 : index
    %c0_10 = arith.constant 0 : index
    %11 = vector.load %arg5[%c0_9, %c0_10] : memref<1x512xf32, #tpu.memory_space<vmem>>, vector<1x512xf32>
    %12 = vector.broadcast %11 : vector<1x512xf32> to vector<16x512xf32>
    %13 = arith.addf %10, %12 : vector<16x512xf32>
    %14 = arith.truncf %13 : vector<16x512xf32> to vector<16x512xbf16>
    %c0_11 = arith.constant 0 : index
    %c0_12 = arith.constant 0 : index
    %15 = vector.load %arg6[%c0_11, %c0_12] : memref<16x512xbf16, #tpu.memory_space<vmem>>, vector<16x512xbf16>
    tpu.vector_store %arg6[%c0_11, %c0_12], %14 {strides = array<i32>} : memref<16x512xbf16, #tpu.memory_space<vmem>>, vector<16x512xbf16>,
    return
  }
  func.func @transform_0(%arg0: i32) -> (i32, i32) {
    %c0_i32 = arith.constant 0 : i32
    %c0_i32_0 = arith.constant 0 : i32
    return %arg0, %c0_i32 : i32, i32
  }
  func.func @transform_1(%arg0: i32) -> (i32, i32) {
    %c0_i32 = arith.constant 0 : i32
    %c0_i32_0 = arith.constant 0 : i32
    %c0_i32_1 = arith.constant 0 : i32
    return %c0_i32, %c0_i32_0 : i32, i32
  }
  func.func @transform_2(%arg0: i32) -> (i32, i32) {
    %c0_i32 = arith.constant 0 : i32
    %c0_i32_0 = arith.constant 0 : i32
    %c0_i32_1 = arith.constant 0 : i32
    return %c0_i32, %c0_i32_0 : i32, i32
  }
  func.func @transform_3(%arg0: i32) -> (i32, i32) {
    %c0_i32 = arith.constant 0 : i32
    %c0_i32_0 = arith.constant 0 : i32
    %c0_i32_1 = arith.constant 0 : i32
    return %c0_i32, %c0_i32_0 : i32, i32
  }
  func.func @transform_4(%arg0: i32) -> (i32, i32) {
    %c0_i32 = arith.constant 0 : i32
    %c0_i32_0 = arith.constant 0 : i32
    %c0_i32_1 = arith.constant 0 : i32
    return %c0_i32, %c0_i32_0 : i32, i32
  }
  func.func @transform_5(%arg0: i32) -> (i32, i32) {
    %c0_i32 = arith.constant 0 : i32
    %c0_i32_0 = arith.constant 0 : i32
    return %arg0, %c0_i32 : i32, i32
  }
}

module attributes {stable_mosaic.version = 11 : i64} {
  func.func @_ffn_kernel(%arg0: i32, %arg1: memref<16x512xbf16, #tpu.memory_space<vmem>>, %arg2: memref<512x2048xbf16, #tpu.memory_space<vmem>>, %arg3: memref<1x2048xf32, #tpu.memory_space<vmem>>, %arg4: memref<2048x512xbf16, #tpu.memory_space<vmem>>, %arg5: memref<1x512xf32, #tpu.memory_space<vmem>>, %arg6: memref<16x512xbf16, #tpu.memory_space<vmem>>) attributes {dimension_semantics = [#tpu.dimension_semantics<parallel>], iteration_bounds = array<i64: 1>, scalar_prefetch = 0 : i64, scratch_operands = 0 : i64, tpu.core_type = #tpu.core_type<tc>, window_params = [{transform_indices = @transform_0, window_bounds = array<i64: 16, 512>}, {pipeline_mode = #tpu.pipeline_mode<synchronous>, transform_indices = @transform_1, window_bounds = array<i64: 512, 2048>}, {pipeline_mode = #tpu.pipeline_mode<synchronous>, transform_indices = @transform_2, window_bounds = array<i64: 1, 2048>}, {pipeline_mode = #tpu.pipeline_mode<synchronous>, transform_indices = @transform_3, window_bounds = array<i64: 2048, 512>}, {pipeline_mode = #tpu.pipeline_mode<synchronous>, transform_indices = @transform_4, window_bounds = array<i64: 1, 512>}, {transform_indices = @transform_5, window_bounds = array<i64: 16, 512>}]} {
    %c0 = arith.constant 0 : index
    %c0_0 = arith.constant 0 : index
    %0 = vector.load %arg1[%c0, %c0_0] : memref<16x512xbf16, #tpu.memory_space<vmem>>, vector<16x512xbf16>
    %c0_1 = arith.constant 0 : index
    %c0_2 = arith.constant 0 : index
    %1 = vector.load %arg2[%c0_1, %c0_2] : memref<512x2048xbf16, #tpu.memory_space<vmem>>, vector<512x2048xbf16>
    %cst = arith.constant dense<0.000000e+00> : vector<16x2048xf32>
    %2 = tpu.matmul %0, %1, %cst {dimension_numbers = #tpu.dot_dimension_numbers<[1], [0], [0], [1], [0, 0, 1, 1], [], []>} : vector<16x512xbf16>, vector<512x2048xbf16>, vector<16x2048xf32> -> vector<16x2048xf32>
    %c0_3 = arith.constant 0 : index
    %c0_4 = arith.constant 0 : index
    %3 = vector.load %arg3[%c0_3, %c0_4] : memref<1x2048xf32, #tpu.memory_space<vmem>>, vector<1x2048xf32>
    %4 = vector.broadcast %3 : vector<1x2048xf32> to vector<16x2048xf32>
    %5 = arith.addf %2, %4 : vector<16x2048xf32>
    %cst_5 = arith.constant 0.000000e+00 : f32
    %6 = vector.broadcast %cst_5 : f32 to vector<16x2048xf32>
    %7 = arith.maximumf %5, %6 : vector<16x2048xf32>
    %8 = arith.truncf %7 : vector<16x2048xf32> to vector<16x2048xbf16>
    %c0_6 = arith.constant 0 : index
    %c0_7 = arith.constant 0 : index
    %9 = vector.load %arg4[%c0_6, %c0_7] : memref<2048x512xbf16, #tpu.memory_space<vmem>>, vector<2048x512xbf16>
    %cst_8 = arith.constant dense<0.000000e+00> : vector<16x512xf32>
    %10 = tpu.matmul %8, %9, %cst_8 {dimension_numbers = #tpu.dot_dimension_numbers<[1], [0], [0], [1], [0, 0, 1, 1], [], []>} : vector<16x2048xbf16>, vector<2048x512xbf16>, vector<16x512xf32> -> vector<16x512xf32>
    %c0_9 = arith.constant 0 : index
    %c0_10 = arith.constant 0 : index
    %11 = vector.load %arg5[%c0_9, %c0_10] : memref<1x512xf32, #tpu.memory_space<vmem>>, vector<1x512xf32>
    %12 = vector.broadcast %11 : vector<1x512xf32> to vector<16x512xf32>
    %13 = arith.addf %10, %12 : vector<16x512xf32>
    %14 = arith.truncf %13 : vector<16x512xf32> to vector<16x512xbf16>
    %c0_11 = arith.constant 0 : index
    %c0_12 = arith.constant 0 : index
    %15 = vector.load %arg6[%c0_11, %c0_12] : memref<16x512xbf16, #tpu.memory_space<vmem>>, vector<16x512xbf16>
    tpu.vector_store %arg6[%c0_11, %c0_12], %14 {strides = array<i32>} : memref<16x512xbf16, #tpu.memory_space<vmem>>, vector<16x512xbf16>,
    return
  }
  func.func @transform_0(%arg0: i32) -> (i32, i32) {
    %c0_i32 = arith.constant 0 : i32
    %c0_i32_0 = arith.constant 0 : i32
    return %arg0, %c0_i32 : i32, i32
  }
  func.func @transform_1(%arg0: i32) -> (i32, i32) {
    %c0_i32 = arith.constant 0 : i32
    %c0_i32_0 = arith.constant 0 : i32
    %c0_i32_1 = arith.constant 0 : i32
    return %c0_i32, %c0_i32_0 : i32, i32
  }
  func.func @transform_2(%arg0: i32) -> (i32, i32) {
    %c0_i32 = arith.constant 0 : i32
    %c0_i32_0 = arith.constant 0 : i32
    %c0_i32_1 = arith.constant 0 : i32
    return %c0_i32, %c0_i32_0 : i32, i32
  }
  func.func @transform_3(%arg0: i32) -> (i32, i32) {
    %c0_i32 = arith.constant 0 : i32
    %c0_i32_0 = arith.constant 0 : i32
    %c0_i32_1 = arith.constant 0 : i32
    return %c0_i32, %c0_i32_0 : i32, i32
  }
  func.func @transform_4(%arg0: i32) -> (i32, i32) {
    %c0_i32 = arith.constant 0 : i32
    %c0_i32_0 = arith.constant 0 : i32
    %c0_i32_1 = arith.constant 0 : i32
    return %c0_i32, %c0_i32_0 : i32, i32
  }
  func.func @transform_5(%arg0: i32) -> (i32, i32) {
    %c0_i32 = arith.constant 0 : i32
    %c0_i32_0 = arith.constant 0 : i32
    return %arg0, %c0_i32 : i32, i32
  }
}

</mosaic_0001>

<bundles_post_ra>
// kernel: tpu_custom_call.1
= control target key start
LH: loop header
LB: loop body
LE: loop exit
PB: predicated region body
PF: predicated region fallthrough
CT: control target
= control target key end

     0   :  { %10 = vsyncpa [#allocation3], 0  ;;  %s10201_s0 = inlined_call_operand.hbm [shape: bf16[16,512], index: 0, kind: input, shape index: {}]   ;;  %s10202_s1 = inlined_call_operand.hbm [shape: bf16[512,2048], index: 1, kind: input, shape index: {}]   ;;  %s10203_s2 = inlined_call_operand.hbm [shape: f32[1,2048], index: 2, kind: input, shape index: {}]   ;;  %s10204_s3 = inlined_call_operand.hbm [shape: bf16[2048,512], index: 3, kind: input, shape index: {}]   ;;  %s10205_s4 = inlined_call_operand.hbm [shape: f32[1,512], index: 4, kind: input, shape index: {}]   ;;  %s10206_s5 = inlined_call_operand.hbm [shape: bf16[16,512], index: 5, kind: output, shape index: {}]  }
   0x1   :  { %11 = vsyncpa [#allocation6], 0 }
   0x2   :  { %12 = vsyncpa [#allocation9], 0 }
   0x3   :  { %13 = vsyncpa [#allocation4], 0  ;;  %s9926_s18 = smov [#allocation5]   ;;  %s9786_s22 = scalar_lea.hbm %s10202_s1, 65536 }
   0x4   :  { %s31_s19 = sshll.u32 %s9926_s18, 4  ;;  %p9787_p0 = scmp.ne.s32.totalorder %s10202_s1, %s9786_s22  ;;  %s32_s19 = int_to_ptr.vmem [resolvable:$true] %s31_s19 }
   0x5   :  { %p9790_p1 = scmp.lt.u32.totalorder %s9786_s22, %s10202_s1 }
   0x7   :  { %p9792_p2 = pnand %p9790_p1, %p9787_p0 }
   0x9   :  { %9795 = shalt.err (!%p9792_p2)
}
   0xa   :  { %s9796_s27 = scalar_lea.vmem %s32_s19, 65536  ;;  %p9801_p4 = scmp.lt.s32.totalorder %s32_s19, %s32_s19 }
   0xb   :  { %p9797_p3 = scmp.ne.s32.totalorder %s32_s19, %s9796_s27  ;;  %p9802_p5 = scmp.lt.s32.totalorder %s9796_s27, %s9796_s27 }
   0xd   :  { %p9803_p6 = por %p9802_p5, %p9801_p4 }
   0xf   :  { %p9804_p7 = pnand %p9803_p6, %p9797_p3 }
  0x11   :  { %9807 = shalt.err (!%p9804_p7)
}
  0x12   :  { %s9927_s28 = smov 1024   ;;  %s9928_s29 = smov 64  }
  0x13   :  { %37 = dma.hbm_to_vmem [thread:$0]  %s10202_s1, 65536, %s32_s19, [#allocation6], %s9927_s28, %s9927_s28, %s9928_s29  }
  0x14   :  { %s9929_s7 = smov [#allocation8]   ;;  %s9930_s9 = smov [#allocation2]  }
  0x15   :  { %s53_s8 = sshll.u32 %s9929_s7, 4  ;;  %s19_s10 = sshll.u32 %s9930_s9, 4  ;;  %s54_s8 = int_to_ptr.vmem [resolvable:$true] %s53_s8  ;;  %s20_s10 = int_to_ptr.vmem [resolvable:$true] %s19_s10 }
  0x16   :  { %s9808_s13 = scalar_lea.hbm %s10204_s3, 65536 }
  0x17   :  { %p9809_p8 = scmp.ne.s32.totalorder %s10204_s3, %s9808_s13  ;;  %p9812_p9 = scmp.lt.u32.totalorder %s9808_s13, %s10204_s3 }
  0x19   :  { %p9814_p10 = pnand %p9812_p9, %p9809_p8 }
  0x1b   :  { %9817 = shalt.err (!%p9814_p10)
}
  0x1c   :  { %s9818_s1 = scalar_lea.vmem %s54_s8, 65536  ;;  %p9823_p12 = scmp.lt.s32.totalorder %s54_s8, %s54_s8 }
  0x1d   :  { %p9819_p11 = scmp.ne.s32.totalorder %s54_s8, %s9818_s1  ;;  %p9824_p13 = scmp.lt.s32.totalorder %s9818_s1, %s9818_s1 }
  0x1f   :  { %p9825_p0 = por %p9824_p13, %p9823_p12 }
  0x21   :  { %p9826_p1 = pnand %p9825_p0, %p9819_p11 }
  0x23   :  { %9829 = shalt.err (!%p9826_p1)
}
  0x24   :  { %s9931_s18 = smov 256   ;;  %s9932_s19 = smov 16  }
  0x25   :  { %59 = dma.hbm_to_vmem [thread:$0]  %s10204_s3, 65536, %s54_s8, [#allocation9], %s9931_s18, %s9931_s18, %s9932_s19  }
  0x26   :  { %s9830_s24 = scalar_lea.hbm %s10201_s0, 512 }
  0x27   :  { %p9831_p2 = scmp.ne.s32.totalorder %s10201_s0, %s9830_s24  ;;  %p9834_p3 = scmp.lt.u32.totalorder %s9830_s24, %s10201_s0 }
  0x29   :  { %p9836_p4 = pnand %p9834_p3, %p9831_p2 }
  0x2b   :  { %9839 = shalt.err (!%p9836_p4)
}
  0x2c   :  { %s9840_s29 = scalar_lea.vmem %s20_s10, 512  ;;  %p9845_p6 = scmp.lt.s32.totalorder %s20_s10, %s20_s10 }
  0x2d   :  { %p9841_p5 = scmp.ne.s32.totalorder %s20_s10, %s9840_s29  ;;  %p9846_p7 = scmp.lt.s32.totalorder %s9840_s29, %s9840_s29 }
  0x2f   :  { %p9847_p8 = por %p9846_p7, %p9845_p6 }
  0x31   :  { %p9848_p9 = pnand %p9847_p8, %p9841_p5 }
  0x33   :  { %9851 = shalt.err (!%p9848_p9)
}
  0x34   :  { %25 = dma.hbm_to_vmem [thread:$0]  %s10201_s0, 512, %s20_s10, [#allocation3], %s9931_s18, %s9931_s18, %s9932_s19  }
  0x35   :  { %s9933_s6 = smov [#allocation7]   ;;  %s9934_s8 = smov [#allocation10]  }
  0x36   :  { %s44_s7 = sshll.u32 %s9933_s6, 4  ;;  %s66_s9 = sshll.u32 %s9934_s8, 4  ;;  %s45_s7 = int_to_ptr.vmem [resolvable:$true] %s44_s7  ;;  %s67_s9 = int_to_ptr.vmem [resolvable:$true] %s66_s9 }
  0x37   :  { %s9852_s13 = scalar_lea.hbm %s10203_s2, 256 }
  0x38   :  { %p9853_p10 = scmp.ne.s32.totalorder %s10203_s2, %s9852_s13  ;;  %p9856_p11 = scmp.lt.u32.totalorder %s9852_s13, %s10203_s2 }
  0x3a   :  { %p9858_p12 = pnand %p9856_p11, %p9853_p10 }
  0x3c   :  { %9861 = shalt.err (!%p9858_p12)
}
  0x3d   :  { %s9862_s0 = scalar_lea.vmem %s45_s7, 256  ;;  %p9867_p0 = scmp.lt.s32.totalorder %s45_s7, %s45_s7 }
  0x3e   :  { %p9863_p13 = scmp.ne.s32.totalorder %s45_s7, %s9862_s0  ;;  %p9868_p1 = scmp.lt.s32.totalorder %s9862_s0, %s9862_s0 }
  0x40   :  { %p9869_p2 = por %p9868_p1, %p9867_p0 }
  0x42   :  { %p9870_p3 = pnand %p9869_p2, %p9863_p13 }
  0x44   :  { %9873 = shalt.err (!%p9870_p3)
}
  0x45   :  { %47 = dma.hbm_to_vmem [thread:$0]  %s10203_s2, 256, %s45_s7, [#allocation6]  }
  0x46   :  { %s9874_s22 = scalar_lea.hbm %s10205_s4, 64 }
  0x47   :  { %p9875_p4 = scmp.ne.s32.totalorder %s10205_s4, %s9874_s22  ;;  %p9878_p5 = scmp.lt.u32.totalorder %s9874_s22, %s10205_s4 }
  0x49   :  { %p9880_p6 = pnand %p9878_p5, %p9875_p4 }
  0x4b   :  { %9883 = shalt.err (!%p9880_p6)
}
  0x4c   :  { %s9884_s27 = scalar_lea.vmem %s67_s9, 64  ;;  %p9889_p8 = scmp.lt.s32.totalorder %s67_s9, %s67_s9 }
  0x4d   :  { %p9885_p7 = scmp.ne.s32.totalorder %s67_s9, %s9884_s27  ;;  %p9890_p9 = scmp.lt.s32.totalorder %s9884_s27, %s9884_s27 }
  0x4f   :  { %p9891_p10 = por %p9890_p9, %p9889_p8 }
  0x51   :  { %p9892_p11 = pnand %p9891_p10, %p9885_p7 }
  0x53   :  { %9895 = shalt.err (!%p9892_p11)
}
  0x54   :  { %69 = dma.hbm_to_vmem [thread:$0]  %s10205_s4, 64, %s67_s9, [#allocation9]  }
  0x55   :  { %9918 = dma.done.wait [#allocation3], 512  }
  0x56   :  { %9919 = vsyncadd [#allocation3], 4294966784 }
  0x57   :  { %9920 = dma.done.wait [#allocation6], 65792  }
  0x58   :  { %9921 = vsyncadd [#allocation6], 4294901504 }
  0x59   :  { %9922 = dma.done.wait [#allocation9], 65600  }
  0x5a   :  { %9923 = vsyncadd [#allocation9], 4294901696  ;;  %v89_v0 = vld [vmem:[#allocation5] sm:$0xff]  ;;  %v90_v2 = vld [vmem:[#allocation5 + $0x8] sm:$0xff]  ;;  %s9935_s4 = smov [#allocation11]  }
  0x5b   :  { %v97_v1 = vld [vmem:[#allocation5 + $0x40] sm:$0xff]  ;;  %v98_v4 = vld [vmem:[#allocation5 + $0x48] sm:$0xff]  ;;  %s7816_s29 = sshll.u32 %s9935_s4, 4  ;;  %s7817_s29 = int_to_ptr.vmem [resolvable:$true] %s7816_s29 }
  0x5c   :  { %v7835_v3 = vcombine.high %v89_v0, %v97_v1  ;;  %v7834_v5 = vcombine.low %v89_v0, %v97_v1  ;;  %v105_v6 = vld [vmem:[#allocation5 + $0x80] sm:$0xff]  ;;  %v7837_v8 = vcombine.high %v90_v2, %v98_v4  ;;  %v7836_v9 = vcombine.low %v90_v2, %v98_v4  ;;  %v106_v11 = vld [vmem:[#allocation5 + $0x88] sm:$0xff]  ;;  %s9896_s3 = scalar_lea.vmem %s7817_s29, 512  ;;  %p9901_p13 = scmp.lt.s32.totalorder %s7817_s29, %s7817_s29 }
  0x5d   :  { %v113_v7 = vld [vmem:[#allocation5 + $0xc0] sm:$0xff]  ;;  %v114_v12 = vld [vmem:[#allocation5 + $0xc8] sm:$0xff]  ;;  %p9897_p12 = scmp.ne.s32.totalorder %s7817_s29, %s9896_s3  ;;  %p9902_p0 = scmp.lt.s32.totalorder %s9896_s3, %s9896_s3 }
  0x5e   :  { %v7851_v10 = vcombine.high %v105_v6, %v113_v7  ;;  %v121_v13 = vld [vmem:[#allocation5 + $0x100] sm:$0xff]  ;;  %3265 = vmatprep.subr.bf16.mxu0 %v7835_v3  ;;  %v7853_v14 = vcombine.high %v106_v11, %v114_v12  ;;  %v122_v16 = vld [vmem:[#allocation5 + $0x108] sm:$0xff]  ;;  %3351 = vmatprep.subr.bf16.mxu1 %v7837_v8  ;;  %v7850_v18 = vcombine.low %v105_v6, %v113_v7 }
  0x5f   :  { %v129_v15 = vld [vmem:[#allocation5 + $0x140] sm:$0xff]  ;;  %v130_v17 = vld [vmem:[#allocation5 + $0x148] sm:$0xff]  ;;  %3266 = vmatpush1.bf16.msra.mxu0 %v7834_v5  ;;  %3352 = vmatpush1.bf16.msra.mxu1 %v7836_v9  ;;  %v7852_v19 = vcombine.low %v106_v11, %v114_v12  ;;  %p9903_p1 = por %p9902_p0, %p9901_p13 }
  0x60   :  { %3267 = vmatprep.subr.bf16.mxu0 %v7851_v10  ;;  %v7867_v20 = vcombine.high %v121_v13, %v129_v15  ;;  %3353 = vmatprep.subr.bf16.mxu1 %v7853_v14  ;;  %v7869_v21 = vcombine.high %v122_v16, %v130_v17  ;;  %v137_v22 = vld [vmem:[#allocation5 + $0x180] sm:$0xff]  ;;  %v138_v24 = vld [vmem:[#allocation5 + $0x188] sm:$0xff]  ;;  %v7866_v26 = vcombine.low %v121_v13, %v129_v15 }
  0x61   :  { %v145_v23 = vld [vmem:[#allocation5 + $0x1c0] sm:$0xff]  ;;  %v146_v25 = vld [vmem:[#allocation5 + $0x1c8] sm:$0xff]  ;;  %v7868_v27 = vcombine.low %v122_v16, %v130_v17  ;;  %p9904_p2 = pnand %p9903_p1, %p9897_p12 }
  0x62   :  { %v7883_v28 = vcombine.high %v137_v22, %v145_v23  ;;  %v7885_v29 = vcombine.high %v138_v24, %v146_v25  ;;  %v153_v30 = vld [vmem:[#allocation5 + $0x200] sm:$0xff]  ;;  %v154_v32 = vld [vmem:[#allocation5 + $0x208] sm:$0xff]  ;;  %v7882_v34 = vcombine.low %v137_v22, %v145_v23  ;;  %v7884_v35 = vcombine.low %v138_v24, %v146_v25 }
  0x63   :  { %3268 = vmatpush1.bf16.msra.mxu0 %v7850_v18  ;;  %3354 = vmatpush1.bf16.msra.mxu1 %v7852_v19  ;;  %v161_v31 = vld [vmem:[#allocation5 + $0x240] sm:$0xff]  ;;  %v162_v33 = vld [vmem:[#allocation5 + $0x248] sm:$0xff] }
  0x64   :  { %3269 = vmatprep.subr.bf16.mxu0 %v7867_v20  ;;  %3355 = vmatprep.subr.bf16.mxu1 %v7869_v21  ;;  %v7899_v36 = vcombine.high %v153_v30, %v161_v31  ;;  %v7901_v37 = vcombine.high %v154_v32, %v162_v33  ;;  %v169_v38 = vld [vmem:[#allocation5 + $0x280] sm:$0xff]  ;;  %v170_v40 = vld [vmem:[#allocation5 + $0x288] sm:$0xff]  ;;  %v7898_v42 = vcombine.low %v153_v30, %v161_v31 }
  0x65   :  { %v177_v39 = vld [vmem:[#allocation5 + $0x2c0] sm:$0xff]  ;;  %v178_v41 = vld [vmem:[#allocation5 + $0x2c8] sm:$0xff]  ;;  %v7900_v43 = vcombine.low %v154_v32, %v162_v33 }
  0x66   :  { %v7915_v44 = vcombine.high %v169_v38, %v177_v39  ;;  %v7917_v45 = vcombine.high %v170_v40, %v178_v41  ;;  %v185_v46 = vld [vmem:[#allocation5 + $0x300] sm:$0xff]  ;;  %v186_v48 = vld [vmem:[#allocation5 + $0x308] sm:$0xff]  ;;  %v7914_v50 = vcombine.low %v169_v38, %v177_v39  ;;  %v7916_v51 = vcombine.low %v170_v40, %v178_v41 }
  0x67   :  { %3270 = vmatpush1.bf16.msra.mxu0 %v7866_v26  ;;  %3356 = vmatpush1.bf16.msra.mxu1 %v7868_v27  ;;  %v193_v47 = vld [vmem:[#allocation5 + $0x340] sm:$0xff]  ;;  %v194_v49 = vld [vmem:[#allocation5 + $0x348] sm:$0xff] }
  0x68   :  { %3271 = vmatprep.subr.bf16.mxu0 %v7883_v28  ;;  %3357 = vmatprep.subr.bf16.mxu1 %v7885_v29  ;;  %v7931_v52 = vcombine.high %v185_v46, %v193_v47  ;;  %v7933_v53 = vcombine.high %v186_v48, %v194_v49  ;;  %v201_v54 = vld [vmem:[#allocation5 + $0x380] sm:$0xff]  ;;  %v202_v57 = vld [vmem:[#allocation5 + $0x388] sm:$0xff]  ;;  %v7930_v59 = vcombine.low %v185_v46, %v193_v47 }
  0x69   :  { %v209_v55 = vld [vmem:[#allocation5 + $0x3c0] sm:$0xff]  ;;  %v210_v58 = vld [vmem:[#allocation5 + $0x3c8] sm:$0xff]  ;;  %v7932_v60 = vcombine.low %v186_v48, %v194_v49 }
  0x6a   :  { %v10032_v56 = vld [vmem:[#allocation2 + $0x4] ss:$16 sps:$4 sm:$0xff]   ;;  %v7947_v61 = vcombine.high %v201_v54, %v209_v55  ;;  %v7949_v62 = vcombine.high %v202_v57, %v210_v58  ;;  %v218_v1 = vld [vmem:[#allocation5 + $0x408] sm:$0xff]  ;;  %v7946_v3 = vcombine.low %v201_v54, %v209_v55  ;;  %v7948_v4 = vcombine.low %v202_v57, %v210_v58 }
  0x6b   :  { %3272 = vmatpush1.bf16.msra.mxu0 %v7882_v34  ;;  %3358 = vmatpush1.bf16.msra.mxu1 %v7884_v35  ;;  %v217_v63 = vld [vmem:[#allocation5 + $0x400] sm:$0xff]  ;;  %v226_v2 = vld [vmem:[#allocation5 + $0x448] sm:$0xff] }
  0x6c   :  { %3273 = vmatprep.subr.bf16.mxu0 %v7899_v36  ;;  %3359 = vmatprep.subr.bf16.mxu1 %v7901_v37  ;;  %v225_v0 = vld [vmem:[#allocation5 + $0x440] sm:$0xff]  ;;  %v7965_v6 = vcombine.high %v218_v1, %v226_v2  ;;  %v234_v9 = vld [vmem:[#allocation5 + $0x488] sm:$0xff]  ;;  %v7964_v12 = vcombine.low %v218_v1, %v226_v2 }
  0x6d   :  { %3297 = vmatprep.mubr.bf16.mxu0 %v10032_v56  ;;  %3383 = vmatprep.mubr.bf16.mxu1 %v10032_v56  ;;  %v7963_v5 = vcombine.high %v217_v63, %v225_v0  ;;  %v233_v7 = vld [vmem:[#allocation5 + $0x480] sm:$0xff]  ;;  %v242_v10 = vld [vmem:[#allocation5 + $0x4c8] sm:$0xff]  ;;  %v7962_v11 = vcombine.low %v217_v63, %v225_v0 }
  0x6e   :  { %v241_v8 = vld [vmem:[#allocation5 + $0x4c0] sm:$0xff]  ;;  %v7981_v14 = vcombine.high %v234_v9, %v242_v10  ;;  %v250_v17 = vld [vmem:[#allocation5 + $0x508] sm:$0xff]  ;;  %v7980_v20 = vcombine.low %v234_v9, %v242_v10 }
  0x6f   :  { %3274 = vmatpush1.bf16.msra.mxu0 %v7898_v42  ;;  %3360 = vmatpush1.bf16.msra.mxu1 %v7900_v43  ;;  %v7979_v13 = vcombine.high %v233_v7, %v241_v8  ;;  %v249_v15 = vld [vmem:[#allocation5 + $0x500] sm:$0xff]  ;;  %v258_v18 = vld [vmem:[#allocation5 + $0x548] sm:$0xff]  ;;  %v7978_v19 = vcombine.low %v233_v7, %v241_v8 }
  0x70   :  { %3275 = vmatprep.subr.bf16.mxu0 %v7915_v44  ;;  %3361 = vmatprep.subr.bf16.mxu1 %v7917_v45  ;;  %v257_v16 = vld [vmem:[#allocation5 + $0x540] sm:$0xff]  ;;  %v7997_v22 = vcombine.high %v250_v17, %v258_v18  ;;  %v266_v25 = vld [vmem:[#allocation5 + $0x588] sm:$0xff]  ;;  %v7996_v28 = vcombine.low %v250_v17, %v258_v18 }
  0x71   :  { %v7995_v21 = vcombine.high %v249_v15, %v257_v16  ;;  %v265_v23 = vld [vmem:[#allocation5 + $0x580] sm:$0xff]  ;;  %v274_v26 = vld [vmem:[#allocation5 + $0x5c8] sm:$0xff]  ;;  %v7994_v27 = vcombine.low %v249_v15, %v257_v16 }
  0x72   :  { %v273_v24 = vld [vmem:[#allocation5 + $0x5c0] sm:$0xff]  ;;  %v8013_v30 = vcombine.high %v266_v25, %v274_v26  ;;  %v282_v33 = vld [vmem:[#allocation5 + $0x608] sm:$0xff]  ;;  %v8012_v36 = vcombine.low %v266_v25, %v274_v26 }
  0x73   :  { %3276 = vmatpush1.bf16.msra.mxu0 %v7914_v50  ;;  %3362 = vmatpush1.bf16.msra.mxu1 %v7916_v51  ;;  %v8011_v29 = vcombine.high %v265_v23, %v273_v24  ;;  %v281_v31 = vld [vmem:[#allocation5 + $0x600] sm:$0xff]  ;;  %v290_v34 = vld [vmem:[#allocation5 + $0x648] sm:$0xff]  ;;  %v8010_v35 = vcombine.low %v265_v23, %v273_v24 }
  0x74   :  { %3277 = vmatprep.subr.bf16.mxu0 %v7931_v52  ;;  %3363 = vmatprep.subr.bf16.mxu1 %v7933_v53  ;;  %v289_v32 = vld [vmem:[#allocation5 + $0x640] sm:$0xff]  ;;  %v8029_v38 = vcombine.high %v282_v33, %v290_v34  ;;  %v298_v41 = vld [vmem:[#allocation5 + $0x688] sm:$0xff]  ;;  %v8028_v44 = vcombine.low %v282_v33, %v290_v34 }
  0x75   :  { %v8027_v37 = vcombine.high %v281_v31, %v289_v32  ;;  %v297_v39 = vld [vmem:[#allocation5 + $0x680] sm:$0xff]  ;;  %v306_v42 = vld [vmem:[#allocation5 + $0x6c8] sm:$0xff]  ;;  %v8026_v43 = vcombine.low %v281_v31, %v289_v32 }
  0x76   :  { %v305_v40 = vld [vmem:[#allocation5 + $0x6c0] sm:$0xff]  ;;  %v8045_v46 = vcombine.high %v298_v41, %v306_v42  ;;  %v314_v49 = vld [vmem:[#allocation5 + $0x708] sm:$0xff]  ;;  %v8044_v52 = vcombine.low %v298_v41, %v306_v42 }
  0x77   :  { %3278 = vmatpush1.bf16.msra.mxu0 %v7930_v59  ;;  %3364 = vmatpush1.bf16.msra.mxu1 %v7932_v60  ;;  %v8043_v45 = vcombine.high %v297_v39, %v305_v40  ;;  %v313_v47 = vld [vmem:[#allocation5 + $0x700] sm:$0xff]  ;;  %v322_v50 = vld [vmem:[#allocation5 + $0x748] sm:$0xff]  ;;  %v8042_v51 = vcombine.low %v297_v39, %v305_v40 }
  0x78   :  { %3279 = vmatprep.subr.bf16.mxu0 %v7947_v61  ;;  %3365 = vmatprep.subr.bf16.mxu1 %v7949_v62  ;;  %v321_v48 = vld [vmem:[#allocation5 + $0x740] sm:$0xff]  ;;  %v8061_v54 = vcombine.high %v314_v49, %v322_v50  ;;  %v330_v58 = vld [vmem:[#allocation5 + $0x788] sm:$0xff]  ;;  %v8060_v61 = vcombine.low %v314_v49, %v322_v50 }
  0x79   :  { %v8059_v53 = vcombine.high %v313_v47, %v321_v48  ;;  %v329_v55 = vld [vmem:[#allocation5 + $0x780] sm:$0xff]  ;;  %v338_v59 = vld [vmem:[#allocation5 + $0x7c8] sm:$0xff]  ;;  %v8058_v60 = vcombine.low %v313_v47, %v321_v48 }
  0x7a   :  { %v337_v57 = vld [vmem:[#allocation5 + $0x7c0] sm:$0xff]  ;;  %v8077_v63 = vcombine.high %v330_v58, %v338_v59  ;;  %v346_v2 = vld [vmem:[#allocation5 + $0x808] sm:$0xff] }
  0x7b   :  { %3280 = vmatpush1.bf16.msra.mxu0 %v7946_v3  ;;  %3366 = vmatpush1.bf16.msra.mxu1 %v7948_v4  ;;  %v8075_v62 = vcombine.high %v329_v55, %v337_v57  ;;  %v345_v0 = vld [vmem:[#allocation5 + $0x800] sm:$0xff]  ;;  %v354_v3 = vld [vmem:[#allocation5 + $0x848] sm:$0xff]  ;;  %v8074_v4 = vcombine.low %v329_v55, %v337_v57 }
  0x7c   :  { %3281 = vmatprep.subr.bf16.mxu0 %v7963_v5  ;;  %3367 = vmatprep.subr.bf16.mxu1 %v7965_v6  ;;  %v353_v1 = vld [vmem:[#allocation5 + $0x840] sm:$0xff]  ;;  %v8076_v5 = vcombine.low %v330_v58, %v338_v59  ;;  %v8093_v7 = vcombine.high %v346_v2, %v354_v3 }
  0x7d   :  { %v8091_v6 = vcombine.high %v345_v0, %v353_v1  ;;  %v361_v8 = vld [vmem:[#allocation5 + $0x880] sm:$0xff] }
  0x7e   :  { %v369_v9 = vld [vmem:[#allocation5 + $0x8c0] sm:$0xff] }
  0x7f   :  { %3282 = vmatpush1.bf16.msra.mxu0 %v7962_v11  ;;  %3368 = vmatpush1.bf16.msra.mxu1 %v7964_v12  ;;  %v9006_v10 = vld [vmem:[#allocation2] ss:$16 sps:$4 sm:$0xff]   ;;  %v362_v11 = vld [vmem:[#allocation5 + $0x888] sm:$0xff]  ;;  %v8107_v15 = vcombine.high %v361_v8, %v369_v9 }
  0x80   :  { %3283 = vmatprep.subr.bf16.mxu0 %v7979_v13  ;;  %3369 = vmatprep.subr.bf16.mxu1 %v7981_v14  ;;  %v370_v12 = vld [vmem:[#allocation5 + $0x8c8] sm:$0xff]  ;;  %v8090_v13 = vcombine.low %v345_v0, %v353_v1  ;;  %v8092_v14 = vcombine.low %v346_v2, %v354_v3  ;;  %v377_v17 = vld [vmem:[#allocation5 + $0x900] sm:$0xff] }
  0x81   :  { %v8109_v16 = vcombine.high %v362_v11, %v370_v12  ;;  %v385_v18 = vld [vmem:[#allocation5 + $0x940] sm:$0xff]  ;;  %v8108_v23 = vcombine.low %v362_v11, %v370_v12  ;;  %v490_v12 = vld [vmem:[#allocation5 + $0xc88] sm:$0xff] }
  0x82   :  { %v8123_v24 = vcombine.high %v377_v17, %v385_v18  ;;  %v393_v25 = vld [vmem:[#allocation5 + $0x980] sm:$0xff] }
  0x83   :  { %3284 = vmatpush1.bf16.msra.mxu0 %v7978_v19  ;;  %3370 = vmatpush1.bf16.msra.mxu1 %v7980_v20  ;;  %v9007_v19 = vld [vmem:[#allocation2 + $0xc] ss:$16 sps:$4 sm:$0xff]   ;;  %v401_v26 = vld [vmem:[#allocation5 + $0x9c0] sm:$0xff] }
  0x84   :  { %3285 = vmatprep.subr.bf16.mxu0 %v7995_v21  ;;  %3371 = vmatprep.subr.bf16.mxu1 %v7997_v22  ;;  %v378_v20 = vld [vmem:[#allocation5 + $0x908] sm:$0xff]  ;;  %v8106_v22 = vcombine.low %v361_v8, %v369_v9  ;;  %v8139_v32 = vcombine.high %v393_v25, %v401_v26  ;;  %v409_v33 = vld [vmem:[#allocation5 + $0xa00] sm:$0xff] }
  0x85   :  { %v386_v21 = vld [vmem:[#allocation5 + $0x948] sm:$0xff]  ;;  %v417_v34 = vld [vmem:[#allocation5 + $0xa40] sm:$0xff] }
  0x86   :  { %v8124_v31 = vcombine.low %v378_v20, %v386_v21  ;;  %v8155_v40 = vcombine.high %v409_v33, %v417_v34  ;;  %v425_v41 = vld [vmem:[#allocation5 + $0xa80] sm:$0xff] }
  0x87   :  { %3286 = vmatpush1.bf16.msra.mxu0 %v7994_v27  ;;  %3372 = vmatpush1.bf16.msra.mxu1 %v7996_v28  ;;  %v394_v27 = vld [vmem:[#allocation5 + $0x988] sm:$0xff]  ;;  %v8125_v28 = vcombine.high %v378_v20, %v386_v21  ;;  %v433_v42 = vld [vmem:[#allocation5 + $0xac0] sm:$0xff] }
  0x88   :  { %3287 = vmatprep.subr.bf16.mxu0 %v8011_v29  ;;  %3373 = vmatprep.subr.bf16.mxu1 %v8013_v30  ;;  %v402_v29 = vld [vmem:[#allocation5 + $0x9c8] sm:$0xff]  ;;  %v8122_v30 = vcombine.low %v377_v17, %v385_v18  ;;  %v8171_v48 = vcombine.high %v425_v41, %v433_v42  ;;  %v441_v49 = vld [vmem:[#allocation5 + $0xb00] sm:$0xff] }
  0x89   :  { %v8140_v39 = vcombine.low %v394_v27, %v402_v29  ;;  %v449_v50 = vld [vmem:[#allocation5 + $0xb40] sm:$0xff]  ;;  %v506_v20 = vld [vmem:[#allocation5 + $0xd08] sm:$0xff] }
  0x8a   :  { %v8187_v57 = vcombine.high %v441_v49, %v449_v50  ;;  %v457_v58 = vld [vmem:[#allocation5 + $0xb80] sm:$0xff] }
  0x8b   :  { %3288 = vmatpush1.bf16.msra.mxu0 %v8010_v35  ;;  %3374 = vmatpush1.bf16.msra.mxu1 %v8012_v36  ;;  %v410_v35 = vld [vmem:[#allocation5 + $0xa08] sm:$0xff]  ;;  %v8141_v36 = vcombine.high %v394_v27, %v402_v29  ;;  %v465_v59 = vld [vmem:[#allocation5 + $0xbc0] sm:$0xff] }
  0x8c   :  { %3289 = vmatprep.subr.bf16.mxu0 %v8027_v37  ;;  %3375 = vmatprep.subr.bf16.mxu1 %v8029_v38  ;;  %v418_v37 = vld [vmem:[#allocation5 + $0xa48] sm:$0xff]  ;;  %v8138_v38 = vcombine.low %v393_v25, %v401_v26  ;;  %v8203_v1 = vcombine.high %v457_v58, %v465_v59  ;;  %v473_v2 = vld [vmem:[#allocation5 + $0xc00] sm:$0xff] }
  0x8d   :  { %v8156_v47 = vcombine.low %v410_v35, %v418_v37  ;;  %v481_v3 = vld [vmem:[#allocation5 + $0xc40] sm:$0xff] }
  0x8e   :  { %v8219_v9 = vcombine.high %v473_v2, %v481_v3  ;;  %v497_v11 = vld [vmem:[#allocation5 + $0xcc0] sm:$0xff] }
  0x8f   :  { %3290 = vmatpush1.bf16.msra.mxu0 %v8026_v43  ;;  %3376 = vmatpush1.bf16.msra.mxu1 %v8028_v44  ;;  %v426_v43 = vld [vmem:[#allocation5 + $0xa88] sm:$0xff]  ;;  %v8157_v44 = vcombine.high %v410_v35, %v418_v37  ;;  %v505_v18 = vld [vmem:[#allocation5 + $0xd00] sm:$0xff] }
  0x90   :  { %3291 = vmatprep.subr.bf16.mxu0 %v8043_v45  ;;  %3377 = vmatprep.subr.bf16.mxu1 %v8045_v46  ;;  %v434_v45 = vld [vmem:[#allocation5 + $0xac8] sm:$0xff]  ;;  %v8154_v46 = vcombine.low %v409_v33, %v417_v34  ;;  %v521_v26 = vld [vmem:[#allocation5 + $0xd80] sm:$0xff] }
  0x91   :  { %v8172_v55 = vcombine.low %v426_v43, %v434_v45  ;;  %v529_v27 = vld [vmem:[#allocation5 + $0xdc0] sm:$0xff] }
  0x92   :  { %v8267_v33 = vcombine.high %v521_v26, %v529_v27  ;;  %v537_v34 = vld [vmem:[#allocation5 + $0xe00] sm:$0xff] }
  0x93   :  { %3292 = vmatpush1.bf16.msra.mxu0 %v8042_v51  ;;  %3378 = vmatpush1.bf16.msra.mxu1 %v8044_v52  ;;  %v442_v51 = vld [vmem:[#allocation5 + $0xb08] sm:$0xff]  ;;  %v8173_v52 = vcombine.high %v426_v43, %v434_v45  ;;  %v545_v35 = vld [vmem:[#allocation5 + $0xe40] sm:$0xff] }
  0x94   :  { %3293 = vmatprep.subr.bf16.mxu0 %v8059_v53  ;;  %3379 = vmatprep.subr.bf16.mxu1 %v8061_v54  ;;  %v450_v53 = vld [vmem:[#allocation5 + $0xb48] sm:$0xff]  ;;  %v8170_v54 = vcombine.low %v425_v41, %v433_v42  ;;  %v8283_v41 = vcombine.high %v537_v34, %v545_v35  ;;  %v553_v42 = vld [vmem:[#allocation5 + $0xe80] sm:$0xff] }
  0x95   :  { %v8188_v0 = vcombine.low %v442_v51, %v450_v53  ;;  %v561_v43 = vld [vmem:[#allocation5 + $0xec0] sm:$0xff] }
  0x97   :  { %3294 = vmatpush1.bf16.msra.mxu0 %v8058_v60  ;;  %3380 = vmatpush1.bf16.msra.mxu1 %v8060_v61  ;;  %v458_v60 = vld [vmem:[#allocation5 + $0xb88] sm:$0xff]  ;;  %v8189_v61 = vcombine.high %v442_v51, %v450_v53  ;;  %v577_v51 = vld [vmem:[#allocation5 + $0xf40] sm:$0xff] }
  0x98   :  { %3295 = vmatprep.subr.bf16.mxu0 %v8075_v62  ;;  %3381 = vmatprep.subr.bf16.mxu1 %v8077_v63  ;;  %v466_v62 = vld [vmem:[#allocation5 + $0xbc8] sm:$0xff]  ;;  %v8186_v63 = vcombine.low %v441_v49, %v449_v50  ;;  %v8299_v49 = vcombine.high %v553_v42, %v561_v43  ;;  %v569_v50 = vld [vmem:[#allocation5 + $0xf00] sm:$0xff] }
  0x99   :  { %v8204_v8 = vcombine.low %v458_v60, %v466_v62 }
  0x9b   :  { %3296 = vmatpush1.bf16.msra.mxu0 %v8074_v4  ;;  %3382 = vmatpush1.bf16.msra.mxu1 %v8076_v5  ;;  %v474_v4 = vld [vmem:[#allocation5 + $0xc08] sm:$0xff]  ;;  %v8205_v5 = vcombine.high %v458_v60, %v466_v62  ;;  %v593_v60 = vld [vmem:[#allocation5 + $0xfc0] sm:$0xff] }
  0x9c   :  { %3308 = vmatprep.subr.bf16.mxu0 %v8091_v6  ;;  %3394 = vmatprep.subr.bf16.mxu1 %v8093_v7  ;;  %v482_v6 = vld [vmem:[#allocation5 + $0xc48] sm:$0xff]  ;;  %v8202_v7 = vcombine.low %v457_v58, %v465_v59  ;;  %v8315_v58 = vcombine.high %v569_v50, %v577_v51  ;;  %v585_v59 = vld [vmem:[#allocation5 + $0xf80] sm:$0xff] }
  0x9e   :  { %3298 = vmatmul.mubr.bf16.vlgmr.msra.gmra.mrb[0].mxu0 %v9006_v10  ;;  %3384 = vmatmul.mubr.bf16.vlgmr.msra.gmra.mrb[0].mxu1 %v9006_v10  ;;  %v489_v10 = vld [vmem:[#allocation5 + $0xc80] sm:$0xff] }
  0x9f   :  { %3309 = vmatpush1.bf16.msra.mxu0 %v8090_v13  ;;  %3395 = vmatpush1.bf16.msra.mxu1 %v8092_v14  ;;  %v8221_v13 = vcombine.high %v474_v4, %v482_v6  ;;  %v498_v14 = vld [vmem:[#allocation5 + $0xcc8] sm:$0xff]  ;;  %v8235_v17 = vcombine.high %v489_v10, %v497_v11 }
  0xa0   :  { %3310 = vmatprep.subr.bf16.mxu0 %v8107_v15  ;;  %3396 = vmatprep.subr.bf16.mxu1 %v8109_v16  ;;  %v8218_v15 = vcombine.low %v473_v2, %v481_v3  ;;  %v8220_v16 = vcombine.low %v474_v4, %v482_v6  ;;  %v8237_v21 = vcombine.high %v490_v12, %v498_v14  ;;  %v91_v3 = vld [vmem:[#allocation5 + $0x10] sm:$0xff] }
  0xa1   :  { %3340 = vmatprep.mubr.bf16.mxu0 %v9007_v19  ;;  %3426 = vmatprep.mubr.bf16.mxu1 %v9007_v19  ;;  %v513_v19 = vld [vmem:[#allocation5 + $0xd40] sm:$0xff]  ;;  %v8331_v2 = vcombine.high %v585_v59, %v593_v60  ;;  %v99_v4 = vld [vmem:[#allocation5 + $0x50] sm:$0xff] }
  0xa2   :  { %v8251_v25 = vcombine.high %v505_v18, %v513_v19 }
  0xa3   :  { %3311 = vmatpush1.bf16.msra.mxu0 %v8106_v22  ;;  %3397 = vmatpush1.bf16.msra.mxu1 %v8108_v23  ;;  %v514_v22 = vld [vmem:[#allocation5 + $0xd48] sm:$0xff]  ;;  %v8234_v23 = vcombine.low %v489_v10, %v497_v11  ;;  %v7839_v11 = vcombine.high %v91_v3, %v99_v4 }
  0xa4   :  { %3312 = vmatprep.subr.bf16.mxu0 %v8123_v24  ;;  %3398 = vmatprep.subr.bf16.mxu1 %v8125_v28  ;;  %v8236_v24 = vcombine.low %v490_v12, %v498_v14  ;;  %v522_v28 = vld [vmem:[#allocation5 + $0xd88] sm:$0xff]  ;;  %v8253_v29 = vcombine.high %v506_v20, %v514_v22  ;;  %v107_v12 = vld [vmem:[#allocation5 + $0x90] sm:$0xff]  ;;  %v108_v14 = vld [vmem:[#allocation5 + $0x98] sm:$0xff] }
  0xa5   :  { %v9009_v10 = vld [vmem:[#allocation2 + $0x8] ss:$16 sps:$4 sm:$0xff]  }
  0xa7   :  { %3313 = vmatpush1.bf16.msra.mxu0 %v8122_v30  ;;  %3399 = vmatpush1.bf16.msra.mxu1 %v8124_v31  ;;  %v530_v30 = vld [vmem:[#allocation5 + $0xdc8] sm:$0xff]  ;;  %v8250_v31 = vcombine.low %v505_v18, %v513_v19 }
  0xa8   :  { %3314 = vmatprep.subr.bf16.mxu0 %v8139_v32  ;;  %3400 = vmatprep.subr.bf16.mxu1 %v8141_v36  ;;  %v8252_v32 = vcombine.low %v506_v20, %v514_v22  ;;  %v538_v36 = vld [vmem:[#allocation5 + $0xe08] sm:$0xff]  ;;  %v8269_v37 = vcombine.high %v522_v28, %v530_v30  ;;  %v123_v20 = vld [vmem:[#allocation5 + $0x110] sm:$0xff]  ;;  %v124_v22 = vld [vmem:[#allocation5 + $0x118] sm:$0xff] }
  0xab   :  { %3315 = vmatpush1.bf16.msra.mxu0 %v8138_v38  ;;  %3401 = vmatpush1.bf16.msra.mxu1 %v8140_v39  ;;  %v546_v38 = vld [vmem:[#allocation5 + $0xe48] sm:$0xff]  ;;  %v8266_v39 = vcombine.low %v521_v26, %v529_v27 }
  0xac   :  { %3316 = vmatprep.subr.bf16.mxu0 %v8155_v40  ;;  %3402 = vmatprep.subr.bf16.mxu1 %v8157_v44  ;;  %v8268_v40 = vcombine.low %v522_v28, %v530_v30  ;;  %v554_v44 = vld [vmem:[#allocation5 + $0xe88] sm:$0xff]  ;;  %v8285_v45 = vcombine.high %v538_v36, %v546_v38  ;;  %v139_v28 = vld [vmem:[#allocation5 + $0x190] sm:$0xff]  ;;  %v140_v30 = vld [vmem:[#allocation5 + $0x198] sm:$0xff] }
  0xaf   :  { %3317 = vmatpush1.bf16.msra.mxu0 %v8154_v46  ;;  %3403 = vmatpush1.bf16.msra.mxu1 %v8156_v47  ;;  %v562_v46 = vld [vmem:[#allocation5 + $0xec8] sm:$0xff]  ;;  %v8282_v47 = vcombine.low %v537_v34, %v545_v35 }
  0xb0   :  { %3318 = vmatprep.subr.bf16.mxu0 %v8171_v48  ;;  %3404 = vmatprep.subr.bf16.mxu1 %v8173_v52  ;;  %v8284_v48 = vcombine.low %v538_v36, %v546_v38  ;;  %v570_v52 = vld [vmem:[#allocation5 + $0xf08] sm:$0xff]  ;;  %v8301_v53 = vcombine.high %v554_v44, %v562_v46  ;;  %v155_v36 = vld [vmem:[#allocation5 + $0x210] sm:$0xff]  ;;  %v156_v38 = vld [vmem:[#allocation5 + $0x218] sm:$0xff] }
  0xb3   :  { %3319 = vmatpush1.bf16.msra.mxu0 %v8170_v54  ;;  %3405 = vmatpush1.bf16.msra.mxu1 %v8172_v55  ;;  %v578_v54 = vld [vmem:[#allocation5 + $0xf48] sm:$0xff]  ;;  %v8298_v55 = vcombine.low %v553_v42, %v561_v43 }
  0xb4   :  { %3320 = vmatprep.subr.bf16.mxu0 %v8187_v57  ;;  %3406 = vmatprep.subr.bf16.mxu1 %v8189_v61  ;;  %v8300_v57 = vcombine.low %v554_v44, %v562_v46  ;;  %v586_v61 = vld [vmem:[#allocation5 + $0xf88] sm:$0xff]  ;;  %v8317_v62 = vcombine.high %v570_v52, %v578_v54  ;;  %v171_v44 = vld [vmem:[#allocation5 + $0x290] sm:$0xff] }
  0xb7   :  { %3321 = vmatpush1.bf16.msra.mxu0 %v8186_v63  ;;  %3407 = vmatpush1.bf16.msra.mxu1 %v8188_v0  ;;  %v594_v63 = vld [vmem:[#allocation5 + $0xfc8] sm:$0xff]  ;;  %v8314_v0 = vcombine.low %v569_v50, %v577_v51  ;;  %v187_v51 = vld [vmem:[#allocation5 + $0x310] sm:$0xff] }
  0xb8   :  { %3322 = vmatprep.subr.bf16.mxu0 %v8203_v1  ;;  %3408 = vmatprep.subr.bf16.mxu1 %v8205_v5  ;;  %v8316_v1 = vcombine.low %v570_v52, %v578_v54  ;;  %v92_v5 = vld [vmem:[#allocation5 + $0x18] sm:$0xff]  ;;  %v8333_v6 = vcombine.high %v586_v61, %v594_v63  ;;  %v195_v52 = vld [vmem:[#allocation5 + $0x350] sm:$0xff] }
  0xbb   :  { %3323 = vmatpush1.bf16.msra.mxu0 %v8202_v7  ;;  %3409 = vmatpush1.bf16.msra.mxu1 %v8204_v8  ;;  %v100_v7 = vld [vmem:[#allocation5 + $0x58] sm:$0xff]  ;;  %v8330_v8 = vcombine.low %v585_v59, %v593_v60  ;;  %v7935_v59 = vcombine.high %v187_v51, %v195_v52  ;;  %v203_v60 = vld [vmem:[#allocation5 + $0x390] sm:$0xff] }
  0xbc   :  { %3324 = vmatprep.subr.bf16.mxu0 %v8219_v9  ;;  %3410 = vmatprep.subr.bf16.mxu1 %v8221_v13  ;;  %v8332_v9 = vcombine.low %v586_v61, %v594_v63  ;;  %v115_v13 = vld [vmem:[#allocation5 + $0xd0] sm:$0xff]  ;;  %v7840_v18 = vcombine.low %v92_v5, %v100_v7 }
  0xbd   :  { %v7855_v19 = vcombine.high %v107_v12, %v115_v13  ;;  %v211_v61 = vld [vmem:[#allocation5 + $0x3d0] sm:$0xff] }
  0xbf   :  { %3325 = vmatpush1.bf16.msra.mxu0 %v8218_v15  ;;  %3411 = vmatpush1.bf16.msra.mxu1 %v8220_v16  ;;  %v7841_v15 = vcombine.high %v92_v5, %v100_v7  ;;  %v116_v16 = vld [vmem:[#allocation5 + $0xd8] sm:$0xff]  ;;  %v227_v5 = vld [vmem:[#allocation5 + $0x450] sm:$0xff] }
  0xc0   :  { %3326 = vmatprep.subr.bf16.mxu0 %v8235_v17  ;;  %3412 = vmatprep.subr.bf16.mxu1 %v8237_v21  ;;  %v7838_v17 = vcombine.low %v91_v3, %v99_v4  ;;  %v131_v21 = vld [vmem:[#allocation5 + $0x150] sm:$0xff]  ;;  %v7856_v26 = vcombine.low %v108_v14, %v116_v16  ;;  %v7951_v3 = vcombine.high %v203_v60, %v211_v61 }
  0xc1   :  { %v7871_v27 = vcombine.high %v123_v20, %v131_v21  ;;  %v219_v4 = vld [vmem:[#allocation5 + $0x410] sm:$0xff] }
  0xc3   :  { %3327 = vmatpush1.bf16.msra.mxu0 %v8234_v23  ;;  %3413 = vmatpush1.bf16.msra.mxu1 %v8236_v24  ;;  %v7857_v23 = vcombine.high %v108_v14, %v116_v16  ;;  %v132_v24 = vld [vmem:[#allocation5 + $0x158] sm:$0xff] }
  0xc4   :  { %3328 = vmatprep.subr.bf16.mxu0 %v8251_v25  ;;  %3414 = vmatprep.subr.bf16.mxu1 %v8253_v29  ;;  %v7854_v25 = vcombine.low %v107_v12, %v115_v13  ;;  %v147_v29 = vld [vmem:[#allocation5 + $0x1d0] sm:$0xff]  ;;  %v7872_v34 = vcombine.low %v124_v22, %v132_v24  ;;  %v236_v14 = vld [vmem:[#allocation5 + $0x498] sm:$0xff] }
  0xc5   :  { %v7887_v35 = vcombine.high %v139_v28, %v147_v29  ;;  %v235_v12 = vld [vmem:[#allocation5 + $0x490] sm:$0xff]  ;;  %v244_v16 = vld [vmem:[#allocation5 + $0x4d8] sm:$0xff] }
  0xc6   :  { %v243_v13 = vld [vmem:[#allocation5 + $0x4d0] sm:$0xff] }
  0xc7   :  { %3329 = vmatpush1.bf16.msra.mxu0 %v8250_v31  ;;  %3415 = vmatpush1.bf16.msra.mxu1 %v8252_v32  ;;  %v7873_v31 = vcombine.high %v124_v22, %v132_v24  ;;  %v148_v32 = vld [vmem:[#allocation5 + $0x1d8] sm:$0xff] }
  0xc8   :  { %3330 = vmatprep.subr.bf16.mxu0 %v8267_v33  ;;  %3416 = vmatprep.subr.bf16.mxu1 %v8269_v37  ;;  %v7870_v33 = vcombine.low %v123_v20, %v131_v21  ;;  %v163_v37 = vld [vmem:[#allocation5 + $0x250] sm:$0xff]  ;;  %v7888_v42 = vcombine.low %v140_v30, %v148_v32  ;;  %v252_v22 = vld [vmem:[#allocation5 + $0x518] sm:$0xff] }
  0xc9   :  { %v7903_v43 = vcombine.high %v155_v36, %v163_v37  ;;  %v251_v20 = vld [vmem:[#allocation5 + $0x510] sm:$0xff]  ;;  %v260_v24 = vld [vmem:[#allocation5 + $0x558] sm:$0xff] }
  0xca   :  { %v259_v21 = vld [vmem:[#allocation5 + $0x550] sm:$0xff] }
  0xcb   :  { %3331 = vmatpush1.bf16.msra.mxu0 %v8266_v39  ;;  %3417 = vmatpush1.bf16.msra.mxu1 %v8268_v40  ;;  %v7889_v39 = vcombine.high %v140_v30, %v148_v32  ;;  %v164_v40 = vld [vmem:[#allocation5 + $0x258] sm:$0xff] }
  0xcc   :  { %3332 = vmatprep.subr.bf16.mxu0 %v8283_v41  ;;  %3418 = vmatprep.subr.bf16.mxu1 %v8285_v45  ;;  %v7886_v41 = vcombine.low %v139_v28, %v147_v29  ;;  %v172_v45 = vld [vmem:[#allocation5 + $0x298] sm:$0xff]  ;;  %v7905_v46 = vcombine.high %v156_v38, %v164_v40  ;;  %v267_v28 = vld [vmem:[#allocation5 + $0x590] sm:$0xff] }
  0xcd   :  { %v275_v29 = vld [vmem:[#allocation5 + $0x5d0] sm:$0xff]  ;;  %v268_v30 = vld [vmem:[#allocation5 + $0x598] sm:$0xff] }
  0xce   :  { %v276_v32 = vld [vmem:[#allocation5 + $0x5d8] sm:$0xff] }
  0xcf   :  { %3333 = vmatpush1.bf16.msra.mxu0 %v8282_v47  ;;  %3419 = vmatpush1.bf16.msra.mxu1 %v8284_v48  ;;  %v180_v47 = vld [vmem:[#allocation5 + $0x2d8] sm:$0xff]  ;;  %v7902_v48 = vcombine.low %v155_v36, %v163_v37  ;;  %v283_v36 = vld [vmem:[#allocation5 + $0x610] sm:$0xff] }
  0xd0   :  { %3334 = vmatprep.subr.bf16.mxu0 %v8299_v49  ;;  %3420 = vmatprep.subr.bf16.mxu1 %v8301_v53  ;;  %v7904_v49 = vcombine.low %v156_v38, %v164_v40  ;;  %v188_v53 = vld [vmem:[#allocation5 + $0x318] sm:$0xff]  ;;  %v7921_v54 = vcombine.high %v172_v45, %v180_v47  ;;  %v291_v37 = vld [vmem:[#allocation5 + $0x650] sm:$0xff] }
  0xd1   :  { %v284_v38 = vld [vmem:[#allocation5 + $0x618] sm:$0xff] }
  0xd2   :  { %v292_v40 = vld [vmem:[#allocation5 + $0x658] sm:$0xff] }
  0xd3   :  { %3335 = vmatpush1.bf16.msra.mxu0 %v8298_v55  ;;  %3421 = vmatpush1.bf16.msra.mxu1 %v8300_v57  ;;  %v196_v55 = vld [vmem:[#allocation5 + $0x358] sm:$0xff] }
  0xd4   :  { %3336 = vmatprep.subr.bf16.mxu0 %v8315_v58  ;;  %3422 = vmatprep.subr.bf16.mxu1 %v8317_v62  ;;  %v7920_v58 = vcombine.low %v172_v45, %v180_v47  ;;  %v204_v62 = vld [vmem:[#allocation5 + $0x398] sm:$0xff]  ;;  %v7937_v63 = vcombine.high %v188_v53, %v196_v55 }
  0xd5   :  { %v300_v45 = vld [vmem:[#allocation5 + $0x698] sm:$0xff] }
  0xd6   :  { %v308_v47 = vld [vmem:[#allocation5 + $0x6d8] sm:$0xff] }
  0xd7   :  { %3337 = vmatpush1.bf16.msra.mxu0 %v8314_v0  ;;  %3423 = vmatpush1.bf16.msra.mxu1 %v8316_v1  ;;  %v212_v0 = vld [vmem:[#allocation5 + $0x3d8] sm:$0xff]  ;;  %v7934_v1 = vcombine.low %v187_v51, %v195_v52  ;;  %v315_v51 = vld [vmem:[#allocation5 + $0x710] sm:$0xff] }
  0xd8   :  { %3338 = vmatprep.subr.bf16.mxu0 %v8331_v2  ;;  %3424 = vmatprep.subr.bf16.mxu1 %v8333_v6  ;;  %v7936_v2 = vcombine.low %v188_v53, %v196_v55  ;;  %v220_v6 = vld [vmem:[#allocation5 + $0x418] sm:$0xff]  ;;  %v7953_v7 = vcombine.high %v204_v62, %v212_v0  ;;  %v323_v52 = vld [vmem:[#allocation5 + $0x750] sm:$0xff] }
  0xd9   :  { %v316_v53 = vld [vmem:[#allocation5 + $0x718] sm:$0xff] }
  0xda   :  { %v324_v55 = vld [vmem:[#allocation5 + $0x758] sm:$0xff] }
  0xdb   :  { %3339 = vmatpush1.bf16.msra.mxu0 %v8330_v8  ;;  %3425 = vmatpush1.bf16.msra.mxu1 %v8332_v9  ;;  %v228_v8 = vld [vmem:[#allocation5 + $0x458] sm:$0xff]  ;;  %v7950_v9 = vcombine.low %v203_v60, %v211_v61  ;;  %v331_v60 = vld [vmem:[#allocation5 + $0x790] sm:$0xff] }
  0xdc   :  { %3437 = vmatprep.subr.bf16.mxu0 %v7839_v11  ;;  %3523 = vmatprep.subr.bf16.mxu1 %v7841_v15  ;;  %v7967_v11 = vcombine.high %v219_v4, %v227_v5  ;;  %v7969_v15 = vcombine.high %v220_v6, %v228_v8  ;;  %v339_v61 = vld [vmem:[#allocation5 + $0x7d0] sm:$0xff] }
  0xde   :  { %3341 = vmatmul.mubr.bf16.vlgmr.msra.gmra.mrb[0].mxu0 %v9009_v10  ;;  %3427 = vmatmul.mubr.bf16.vlgmr.msra.gmra.mrb[0].mxu1 %v9009_v10  ;;  %v7952_v10 = vcombine.low %v204_v62, %v212_v0  ;;  %v332_v62 = vld [vmem:[#allocation5 + $0x798] sm:$0xff] }
  0xdf   :  { %3438 = vmatpush1.bf16.msra.mxu0 %v7838_v17  ;;  %3524 = vmatpush1.bf16.msra.mxu1 %v7840_v18  ;;  %v7966_v17 = vcombine.low %v219_v4, %v227_v5  ;;  %v7968_v18 = vcombine.low %v220_v6, %v228_v8  ;;  %v340_v0 = vld [vmem:[#allocation5 + $0x7d8] sm:$0xff]  ;;  %v347_v4 = vld [vmem:[#allocation5 + $0x810] sm:$0xff] }
  0xe0   :  { %3439 = vmatprep.subr.bf16.mxu0 %v7855_v19  ;;  %3525 = vmatprep.subr.bf16.mxu1 %v7857_v23  ;;  %v7983_v19 = vcombine.high %v235_v12, %v243_v13  ;;  %v7985_v23 = vcombine.high %v236_v14, %v244_v16  ;;  %v355_v5 = vld [vmem:[#allocation5 + $0x850] sm:$0xff]  ;;  %v348_v6 = vld [vmem:[#allocation5 + $0x818] sm:$0xff] }
  0xe1   :  { %3469 = vmatprep.mubr.bf16.mxu0 %v10032_v56  ;;  %3555 = vmatprep.mubr.bf16.mxu1 %v10032_v56  ;;  %v179_v56 = vld [vmem:[#allocation5 + $0x2d0] sm:$0xff]  ;;  %v356_v8 = vld [vmem:[#allocation5 + $0x858] sm:$0xff] }
  0xe2   :  { %v7919_v50 = vcombine.high %v171_v44, %v179_v56  ;;  %v7918_v57 = vcombine.low %v171_v44, %v179_v56  ;;  %v299_v44 = vld [vmem:[#allocation5 + $0x690] sm:$0xff] }
  0xe3   :  { %3440 = vmatpush1.bf16.msra.mxu0 %v7854_v25  ;;  %3526 = vmatpush1.bf16.msra.mxu1 %v7856_v26  ;;  %v7982_v25 = vcombine.low %v235_v12, %v243_v13  ;;  %v7984_v26 = vcombine.low %v236_v14, %v244_v16  ;;  %v307_v56 = vld [vmem:[#allocation5 + $0x6d0] sm:$0xff]  ;;  %v364_v14 = vld [vmem:[#allocation5 + $0x898] sm:$0xff] }
  0xe4   :  { %3441 = vmatprep.subr.bf16.mxu0 %v7871_v27  ;;  %3527 = vmatprep.subr.bf16.mxu1 %v7873_v31  ;;  %v7999_v27 = vcombine.high %v251_v20, %v259_v21  ;;  %v8001_v31 = vcombine.high %v252_v22, %v260_v24  ;;  %v363_v12 = vld [vmem:[#allocation5 + $0x890] sm:$0xff]  ;;  %v372_v16 = vld [vmem:[#allocation5 + $0x8d8] sm:$0xff] }
  0xe5   :  { %v371_v13 = vld [vmem:[#allocation5 + $0x8d0] sm:$0xff] }
  0xe7   :  { %3442 = vmatpush1.bf16.msra.mxu0 %v7870_v33  ;;  %3528 = vmatpush1.bf16.msra.mxu1 %v7872_v34  ;;  %v7998_v33 = vcombine.low %v251_v20, %v259_v21  ;;  %v8000_v34 = vcombine.low %v252_v22, %v260_v24  ;;  %v379_v20 = vld [vmem:[#allocation5 + $0x910] sm:$0xff]  ;;  %v380_v22 = vld [vmem:[#allocation5 + $0x918] sm:$0xff] }
  0xe8   :  { %3443 = vmatprep.subr.bf16.mxu0 %v7887_v35  ;;  %3529 = vmatprep.subr.bf16.mxu1 %v7889_v39  ;;  %v8015_v35 = vcombine.high %v267_v28, %v275_v29  ;;  %v8017_v39 = vcombine.high %v268_v30, %v276_v32  ;;  %v387_v21 = vld [vmem:[#allocation5 + $0x950] sm:$0xff]  ;;  %v388_v24 = vld [vmem:[#allocation5 + $0x958] sm:$0xff] }
  0xeb   :  { %3444 = vmatpush1.bf16.msra.mxu0 %v7886_v41  ;;  %3530 = vmatpush1.bf16.msra.mxu1 %v7888_v42  ;;  %v8014_v41 = vcombine.low %v267_v28, %v275_v29  ;;  %v8016_v42 = vcombine.low %v268_v30, %v276_v32  ;;  %v8127_v28 = vcombine.high %v379_v20, %v387_v21  ;;  %v395_v29 = vld [vmem:[#allocation5 + $0x990] sm:$0xff] }
  0xec   :  { %3445 = vmatprep.subr.bf16.mxu0 %v7903_v43  ;;  %3531 = vmatprep.subr.bf16.mxu1 %v7905_v46  ;;  %v8031_v43 = vcombine.high %v283_v36, %v291_v37  ;;  %v8033_v46 = vcombine.high %v284_v38, %v292_v40  ;;  %v403_v30 = vld [vmem:[#allocation5 + $0x9d0] sm:$0xff]  ;;  %v8129_v32 = vcombine.high %v380_v22, %v388_v24 }
  0xef   :  { %3446 = vmatpush1.bf16.msra.mxu0 %v7902_v48  ;;  %3532 = vmatpush1.bf16.msra.mxu1 %v7904_v49  ;;  %v8030_v48 = vcombine.low %v283_v36, %v291_v37  ;;  %v8032_v49 = vcombine.low %v284_v38, %v292_v40  ;;  %v8128_v36 = vcombine.low %v380_v22, %v388_v24  ;;  %v411_v38 = vld [vmem:[#allocation5 + $0xa10] sm:$0xff]  ;;  %v412_v40 = vld [vmem:[#allocation5 + $0xa18] sm:$0xff] }
  0xf0   :  { %3447 = vmatprep.subr.bf16.mxu0 %v7919_v50  ;;  %3533 = vmatprep.subr.bf16.mxu1 %v7921_v54  ;;  %v8047_v50 = vcombine.high %v299_v44, %v307_v56  ;;  %v8049_v54 = vcombine.high %v300_v45, %v308_v47  ;;  %v8143_v37 = vcombine.high %v395_v29, %v403_v30  ;;  %v507_v22 = vld [vmem:[#allocation5 + $0xd10] sm:$0xff]  ;;  %v508_v24 = vld [vmem:[#allocation5 + $0xd18] sm:$0xff] }
  0xf3   :  { %3448 = vmatpush1.bf16.msra.mxu0 %v7918_v57  ;;  %3534 = vmatpush1.bf16.msra.mxu1 %v7920_v58  ;;  %v8046_v57 = vcombine.low %v299_v44, %v307_v56  ;;  %v8048_v58 = vcombine.low %v300_v45, %v308_v47  ;;  %v427_v45 = vld [vmem:[#allocation5 + $0xa90] sm:$0xff]  ;;  %v428_v47 = vld [vmem:[#allocation5 + $0xa98] sm:$0xff] }
  0xf4   :  { %3449 = vmatprep.subr.bf16.mxu0 %v7935_v59  ;;  %3535 = vmatprep.subr.bf16.mxu1 %v7937_v63  ;;  %v8063_v59 = vcombine.high %v315_v51, %v323_v52  ;;  %v8065_v63 = vcombine.high %v316_v53, %v324_v55 }
  0xf7   :  { %3450 = vmatpush1.bf16.msra.mxu0 %v7934_v1  ;;  %3536 = vmatpush1.bf16.msra.mxu1 %v7936_v2  ;;  %v8062_v1 = vcombine.low %v315_v51, %v323_v52  ;;  %v8064_v2 = vcombine.low %v316_v53, %v324_v55  ;;  %v443_v53 = vld [vmem:[#allocation5 + $0xb10] sm:$0xff]  ;;  %v444_v55 = vld [vmem:[#allocation5 + $0xb18] sm:$0xff] }
  0xf8   :  { %3451 = vmatprep.subr.bf16.mxu0 %v7951_v3  ;;  %3537 = vmatprep.subr.bf16.mxu1 %v7953_v7  ;;  %v8079_v3 = vcombine.high %v331_v60, %v339_v61  ;;  %v8081_v7 = vcombine.high %v332_v62, %v340_v0 }
  0xfb   :  { %3452 = vmatpush1.bf16.msra.mxu0 %v7950_v9  ;;  %3538 = vmatpush1.bf16.msra.mxu1 %v7952_v10  ;;  %v8078_v9 = vcombine.low %v331_v60, %v339_v61  ;;  %v8080_v10 = vcombine.low %v332_v62, %v340_v0  ;;  %v459_v62 = vld [vmem:[#allocation5 + $0xb90] sm:$0xff] }
  0xfc   :  { %3453 = vmatprep.subr.bf16.mxu0 %v7967_v11  ;;  %3539 = vmatprep.subr.bf16.mxu1 %v7969_v15  ;;  %v8095_v11 = vcombine.high %v347_v4, %v355_v5  ;;  %v8097_v15 = vcombine.high %v348_v6, %v356_v8 }
  0xff   :  { %3454 = vmatpush1.bf16.msra.mxu0 %v7966_v17  ;;  %3540 = vmatpush1.bf16.msra.mxu1 %v7968_v18  ;;  %v8094_v17 = vcombine.low %v347_v4, %v355_v5  ;;  %v8096_v18 = vcombine.low %v348_v6, %v356_v8  ;;  %v475_v6 = vld [vmem:[#allocation5 + $0xc10] sm:$0xff]  ;;  %v476_v8 = vld [vmem:[#allocation5 + $0xc18] sm:$0xff] }
 0x100   :  { %3455 = vmatprep.subr.bf16.mxu0 %v7983_v19  ;;  %3541 = vmatprep.subr.bf16.mxu1 %v7985_v23  ;;  %v8111_v19 = vcombine.high %v363_v12, %v371_v13  ;;  %v8113_v23 = vcombine.high %v364_v14, %v372_v16 }
 0x103   :  { %3456 = vmatpush1.bf16.msra.mxu0 %v7982_v25  ;;  %3542 = vmatpush1.bf16.msra.mxu1 %v7984_v26  ;;  %v9778_v25 = vld [vmem:[#allocation2] ss:$16 sps:$4 sm:$0xff]   ;;  %v8110_v26 = vcombine.low %v363_v12, %v371_v13 }
 0x104   :  { %3457 = vmatprep.subr.bf16.mxu0 %v7999_v27  ;;  %3543 = vmatprep.subr.bf16.mxu1 %v8001_v31  ;;  %v8112_v27 = vcombine.low %v364_v14, %v372_v16  ;;  %v396_v31 = vld [vmem:[#allocation5 + $0x998] sm:$0xff]  ;;  %v491_v14 = vld [vmem:[#allocation5 + $0xc90] sm:$0xff] }
 0x105   :  { %v492_v16 = vld [vmem:[#allocation5 + $0xc98] sm:$0xff] }
 0x107   :  { %3458 = vmatpush1.bf16.msra.mxu0 %v7998_v33  ;;  %3544 = vmatpush1.bf16.msra.mxu1 %v8000_v34  ;;  %v404_v33 = vld [vmem:[#allocation5 + $0x9d8] sm:$0xff] }
 0x108   :  { %3459 = vmatprep.subr.bf16.mxu0 %v8015_v35  ;;  %3545 = vmatprep.subr.bf16.mxu1 %v8017_v39  ;;  %v9779_v34 = vld [vmem:[#allocation2 + $0xc] ss:$16 sps:$4 sm:$0xff]   ;;  %v8126_v35 = vcombine.low %v379_v20, %v387_v21  ;;  %v419_v39 = vld [vmem:[#allocation5 + $0xa50] sm:$0xff]  ;;  %v8144_v44 = vcombine.low %v396_v31, %v404_v33 }
 0x109   :  { %v8159_v56 = vcombine.high %v411_v38, %v419_v39 }
 0x10b   :  { %3460 = vmatpush1.bf16.msra.mxu0 %v8014_v41  ;;  %3546 = vmatpush1.bf16.msra.mxu1 %v8016_v42  ;;  %v8145_v41 = vcombine.high %v396_v31, %v404_v33  ;;  %v420_v42 = vld [vmem:[#allocation5 + $0xa58] sm:$0xff]  ;;  %v531_v31 = vld [vmem:[#allocation5 + $0xdd0] sm:$0xff] }
 0x10c   :  { %3461 = vmatprep.subr.bf16.mxu0 %v8031_v43  ;;  %3547 = vmatprep.subr.bf16.mxu1 %v8033_v46  ;;  %v8142_v43 = vcombine.low %v395_v29, %v403_v30  ;;  %v435_v46 = vld [vmem:[#allocation5 + $0xad0] sm:$0xff]  ;;  %v8160_v51 = vcombine.low %v412_v40, %v420_v42 }
 0x10d   :  { %v8175_v52 = vcombine.high %v427_v45, %v435_v46  ;;  %v523_v30 = vld [vmem:[#allocation5 + $0xd90] sm:$0xff] }
 0x10f   :  { %3462 = vmatpush1.bf16.msra.mxu0 %v8030_v48  ;;  %3548 = vmatpush1.bf16.msra.mxu1 %v8032_v49  ;;  %v8161_v48 = vcombine.high %v412_v40, %v420_v42  ;;  %v436_v49 = vld [vmem:[#allocation5 + $0xad8] sm:$0xff] }
 0x110   :  { %3463 = vmatprep.subr.bf16.mxu0 %v8047_v50  ;;  %3549 = vmatprep.subr.bf16.mxu1 %v8049_v54  ;;  %v8158_v50 = vcombine.low %v411_v38, %v419_v39  ;;  %v451_v54 = vld [vmem:[#allocation5 + $0xb50] sm:$0xff]  ;;  %v8176_v60 = vcombine.low %v428_v47, %v436_v49  ;;  %v540_v40 = vld [vmem:[#allocation5 + $0xe18] sm:$0xff] }
 0x111   :  { %v8191_v61 = vcombine.high %v443_v53, %v451_v54  ;;  %v539_v38 = vld [vmem:[#allocation5 + $0xe10] sm:$0xff]  ;;  %v548_v42 = vld [vmem:[#allocation5 + $0xe58] sm:$0xff] }
 0x112   :  { %v547_v39 = vld [vmem:[#allocation5 + $0xe50] sm:$0xff] }
 0x113   :  { %3464 = vmatpush1.bf16.msra.mxu0 %v8046_v57  ;;  %3550 = vmatpush1.bf16.msra.mxu1 %v8048_v58  ;;  %v8177_v57 = vcombine.high %v428_v47, %v436_v49  ;;  %v452_v58 = vld [vmem:[#allocation5 + $0xb58] sm:$0xff] }
 0x114   :  { %3465 = vmatprep.subr.bf16.mxu0 %v8063_v59  ;;  %3551 = vmatprep.subr.bf16.mxu1 %v8065_v63  ;;  %v8174_v59 = vcombine.low %v427_v45, %v435_v46  ;;  %v467_v63 = vld [vmem:[#allocation5 + $0xbd0] sm:$0xff]  ;;  %v8193_v0 = vcombine.high %v444_v55, %v452_v58  ;;  %v8192_v4 = vcombine.low %v444_v55, %v452_v58  ;;  %v556_v47 = vld [vmem:[#allocation5 + $0xe98] sm:$0xff] }
 0x115   :  { %v8207_v5 = vcombine.high %v459_v62, %v467_v63  ;;  %v555_v45 = vld [vmem:[#allocation5 + $0xe90] sm:$0xff]  ;;  %v564_v49 = vld [vmem:[#allocation5 + $0xed8] sm:$0xff] }
 0x116   :  { %v563_v46 = vld [vmem:[#allocation5 + $0xed0] sm:$0xff]  ;;  %v572_v55 = vld [vmem:[#allocation5 + $0xf18] sm:$0xff] }
 0x117   :  { %3466 = vmatpush1.bf16.msra.mxu0 %v8062_v1  ;;  %3552 = vmatpush1.bf16.msra.mxu1 %v8064_v2  ;;  %v460_v1 = vld [vmem:[#allocation5 + $0xb98] sm:$0xff] }
 0x118   :  { %3467 = vmatprep.subr.bf16.mxu0 %v8079_v3  ;;  %3553 = vmatprep.subr.bf16.mxu1 %v8081_v7  ;;  %v468_v2 = vld [vmem:[#allocation5 + $0xbd8] sm:$0xff]  ;;  %v8190_v3 = vcombine.low %v443_v53, %v451_v54  ;;  %v483_v7 = vld [vmem:[#allocation5 + $0xc50] sm:$0xff] }
 0x119   :  { %v8208_v12 = vcombine.low %v460_v1, %v468_v2  ;;  %v8223_v13 = vcombine.high %v475_v6, %v483_v7  ;;  %v571_v53 = vld [vmem:[#allocation5 + $0xf10] sm:$0xff]  ;;  %v580_v58 = vld [vmem:[#allocation5 + $0xf58] sm:$0xff] }
 0x11a   :  { %v579_v54 = vld [vmem:[#allocation5 + $0xf50] sm:$0xff] }
 0x11b   :  { %3468 = vmatpush1.bf16.msra.mxu0 %v8078_v9  ;;  %3554 = vmatpush1.bf16.msra.mxu1 %v8080_v10  ;;  %v8209_v9 = vcombine.high %v460_v1, %v468_v2  ;;  %v484_v10 = vld [vmem:[#allocation5 + $0xc58] sm:$0xff]  ;;  %v8321_v1 = vcombine.high %v572_v55, %v580_v58 }
 0x11c   :  { %3480 = vmatprep.subr.bf16.mxu0 %v8095_v11  ;;  %3566 = vmatprep.subr.bf16.mxu1 %v8097_v15  ;;  %v8206_v11 = vcombine.low %v459_v62, %v467_v63  ;;  %v499_v15 = vld [vmem:[#allocation5 + $0xcd0] sm:$0xff]  ;;  %v8224_v20 = vcombine.low %v476_v8, %v484_v10  ;;  %v596_v2 = vld [vmem:[#allocation5 + $0xfd8] sm:$0xff] }
 0x11d   :  { %v8239_v21 = vcombine.high %v491_v14, %v499_v15  ;;  %v587_v62 = vld [vmem:[#allocation5 + $0xf90] sm:$0xff] }
 0x11e   :  { %3470 = vmatmul.mubr.bf16.vlgmr.msra.gmra.mrb[4].mxu0 %v9778_v25  ;;  %3556 = vmatmul.mubr.bf16.vlgmr.msra.gmra.mrb[4].mxu1 %v9778_v25  ;;  %v595_v63 = vld [vmem:[#allocation5 + $0xfd0] sm:$0xff] }
 0x11f   :  { %3481 = vmatpush1.bf16.msra.mxu0 %v8094_v17  ;;  %3567 = vmatpush1.bf16.msra.mxu1 %v8096_v18  ;;  %v8225_v17 = vcombine.high %v476_v8, %v484_v10  ;;  %v500_v18 = vld [vmem:[#allocation5 + $0xcd8] sm:$0xff]  ;;  %v94_v8 = vld [vmem:[#allocation5 + $0x28] sm:$0xff] }
 0x120   :  { %3482 = vmatprep.subr.bf16.mxu0 %v8111_v19  ;;  %3568 = vmatprep.subr.bf16.mxu1 %v8113_v23  ;;  %v8222_v19 = vcombine.low %v475_v6, %v483_v7  ;;  %v515_v23 = vld [vmem:[#allocation5 + $0xd50] sm:$0xff]  ;;  %v8241_v25 = vcombine.high %v492_v16, %v500_v18  ;;  %v93_v6 = vld [vmem:[#allocation5 + $0x20] sm:$0xff]  ;;  %v102_v10 = vld [vmem:[#allocation5 + $0x68] sm:$0xff] }
 0x121   :  { %3512 = vmatprep.mubr.bf16.mxu0 %v9779_v34  ;;  %3598 = vmatprep.mubr.bf16.mxu1 %v9779_v34  ;;  %v8255_v29 = vcombine.high %v507_v22, %v515_v23  ;;  %v532_v34 = vld [vmem:[#allocation5 + $0xdd8] sm:$0xff]  ;;  %v101_v7 = vld [vmem:[#allocation5 + $0x60] sm:$0xff] }
 0x123   :  { %3483 = vmatpush1.bf16.msra.mxu0 %v8110_v26  ;;  %3569 = vmatpush1.bf16.msra.mxu1 %v8112_v27  ;;  %v516_v26 = vld [vmem:[#allocation5 + $0xd58] sm:$0xff]  ;;  %v8238_v27 = vcombine.low %v491_v14, %v499_v15  ;;  %v109_v14 = vld [vmem:[#allocation5 + $0xa0] sm:$0xff] }
 0x124   :  { %3484 = vmatprep.subr.bf16.mxu0 %v8127_v28  ;;  %3570 = vmatprep.subr.bf16.mxu1 %v8129_v32  ;;  %v8240_v28 = vcombine.low %v492_v16, %v500_v18  ;;  %v524_v32 = vld [vmem:[#allocation5 + $0xd98] sm:$0xff]  ;;  %v8257_v33 = vcombine.high %v508_v24, %v516_v26  ;;  %v117_v15 = vld [vmem:[#allocation5 + $0xe0] sm:$0xff]  ;;  %v110_v16 = vld [vmem:[#allocation5 + $0xa8] sm:$0xff] }
 0x125   :  { %v118_v18 = vld [vmem:[#allocation5 + $0xe8] sm:$0xff] }
 0x127   :  { %3485 = vmatpush1.bf16.msra.mxu0 %v8126_v35  ;;  %3571 = vmatpush1.bf16.msra.mxu1 %v8128_v36  ;;  %v8254_v35 = vcombine.low %v507_v22, %v515_v23  ;;  %v8256_v36 = vcombine.low %v508_v24, %v516_v26  ;;  %v125_v22 = vld [vmem:[#allocation5 + $0x120] sm:$0xff]  ;;  %v126_v24 = vld [vmem:[#allocation5 + $0x128] sm:$0xff] }
 0x128   :  { %3486 = vmatprep.subr.bf16.mxu0 %v8143_v37  ;;  %3572 = vmatprep.subr.bf16.mxu1 %v8145_v41  ;;  %v8271_v37 = vcombine.high %v523_v30, %v531_v31  ;;  %v8273_v41 = vcombine.high %v524_v32, %v532_v34  ;;  %v133_v23 = vld [vmem:[#allocation5 + $0x160] sm:$0xff]  ;;  %v134_v26 = vld [vmem:[#allocation5 + $0x168] sm:$0xff] }
 0x12b   :  { %3487 = vmatpush1.bf16.msra.mxu0 %v8142_v43  ;;  %3573 = vmatpush1.bf16.msra.mxu1 %v8144_v44  ;;  %v8270_v43 = vcombine.low %v523_v30, %v531_v31  ;;  %v8272_v44 = vcombine.low %v524_v32, %v532_v34  ;;  %v7875_v30 = vcombine.high %v125_v22, %v133_v23  ;;  %v141_v31 = vld [vmem:[#allocation5 + $0x1a0] sm:$0xff] }
 0x12c   :  { %3488 = vmatprep.subr.bf16.mxu0 %v8159_v56  ;;  %3574 = vmatprep.subr.bf16.mxu1 %v8161_v48  ;;  %v8287_v56 = vcombine.high %v539_v38, %v547_v39  ;;  %v8289_v48 = vcombine.high %v540_v40, %v548_v42  ;;  %v149_v32 = vld [vmem:[#allocation5 + $0x1e0] sm:$0xff]  ;;  %v7877_v34 = vcombine.high %v126_v24, %v134_v26 }
 0x12f   :  { %3489 = vmatpush1.bf16.msra.mxu0 %v8158_v50  ;;  %3575 = vmatpush1.bf16.msra.mxu1 %v8160_v51  ;;  %v8286_v50 = vcombine.low %v539_v38, %v547_v39  ;;  %v8288_v51 = vcombine.low %v540_v40, %v548_v42  ;;  %v7876_v38 = vcombine.low %v126_v24, %v134_v26  ;;  %v157_v40 = vld [vmem:[#allocation5 + $0x220] sm:$0xff]  ;;  %v158_v42 = vld [vmem:[#allocation5 + $0x228] sm:$0xff] }
 0x130   :  { %3490 = vmatprep.subr.bf16.mxu0 %v8175_v52  ;;  %3576 = vmatprep.subr.bf16.mxu1 %v8177_v57  ;;  %v8303_v52 = vcombine.high %v555_v45, %v563_v46  ;;  %v8305_v57 = vcombine.high %v556_v47, %v564_v49  ;;  %v7891_v39 = vcombine.high %v141_v31, %v149_v32  ;;  %v253_v24 = vld [vmem:[#allocation5 + $0x520] sm:$0xff]  ;;  %v254_v26 = vld [vmem:[#allocation5 + $0x528] sm:$0xff] }
 0x133   :  { %3491 = vmatpush1.bf16.msra.mxu0 %v8174_v59  ;;  %3577 = vmatpush1.bf16.msra.mxu1 %v8176_v60  ;;  %v8302_v59 = vcombine.low %v555_v45, %v563_v46  ;;  %v8304_v60 = vcombine.low %v556_v47, %v564_v49  ;;  %v173_v47 = vld [vmem:[#allocation5 + $0x2a0] sm:$0xff]  ;;  %v174_v49 = vld [vmem:[#allocation5 + $0x2a8] sm:$0xff] }
 0x134   :  { %3492 = vmatprep.subr.bf16.mxu0 %v8191_v61  ;;  %3578 = vmatprep.subr.bf16.mxu1 %v8193_v0  ;;  %v8319_v61 = vcombine.high %v571_v53, %v579_v54  ;;  %v588_v0 = vld [vmem:[#allocation5 + $0xf98] sm:$0xff] }
 0x137   :  { %3493 = vmatpush1.bf16.msra.mxu0 %v8190_v3  ;;  %3579 = vmatpush1.bf16.msra.mxu1 %v8192_v4  ;;  %v8318_v3 = vcombine.low %v571_v53, %v579_v54  ;;  %v8320_v4 = vcombine.low %v572_v55, %v580_v58  ;;  %v189_v55 = vld [vmem:[#allocation5 + $0x320] sm:$0xff]  ;;  %v190_v58 = vld [vmem:[#allocation5 + $0x328] sm:$0xff] }
 0x138   :  { %3494 = vmatprep.subr.bf16.mxu0 %v8207_v5  ;;  %3580 = vmatprep.subr.bf16.mxu1 %v8209_v9  ;;  %v8335_v5 = vcombine.high %v587_v62, %v595_v63  ;;  %v8337_v9 = vcombine.high %v588_v0, %v596_v2 }
 0x13b   :  { %3495 = vmatpush1.bf16.msra.mxu0 %v8206_v11  ;;  %3581 = vmatpush1.bf16.msra.mxu1 %v8208_v12  ;;  %v8334_v11 = vcombine.low %v587_v62, %v595_v63  ;;  %v8336_v12 = vcombine.low %v588_v0, %v596_v2  ;;  %v205_v0 = vld [vmem:[#allocation5 + $0x3a0] sm:$0xff]  ;;  %v206_v2 = vld [vmem:[#allocation5 + $0x3a8] sm:$0xff] }
 0x13c   :  { %3496 = vmatprep.subr.bf16.mxu0 %v8223_v13  ;;  %3582 = vmatprep.subr.bf16.mxu1 %v8225_v17  ;;  %v7843_v13 = vcombine.high %v93_v6, %v101_v7  ;;  %v7845_v17 = vcombine.high %v94_v8, %v102_v10 }
 0x13f   :  { %3497 = vmatpush1.bf16.msra.mxu0 %v8222_v19  ;;  %3583 = vmatpush1.bf16.msra.mxu1 %v8224_v20  ;;  %v7842_v19 = vcombine.low %v93_v6, %v101_v7  ;;  %v7844_v20 = vcombine.low %v94_v8, %v102_v10  ;;  %v221_v8 = vld [vmem:[#allocation5 + $0x420] sm:$0xff]  ;;  %v222_v10 = vld [vmem:[#allocation5 + $0x428] sm:$0xff] }
 0x140   :  { %3498 = vmatprep.subr.bf16.mxu0 %v8239_v21  ;;  %3584 = vmatprep.subr.bf16.mxu1 %v8241_v25  ;;  %v7859_v21 = vcombine.high %v109_v14, %v117_v15  ;;  %v7861_v25 = vcombine.high %v110_v16, %v118_v18 }
 0x143   :  { %3499 = vmatpush1.bf16.msra.mxu0 %v8238_v27  ;;  %3585 = vmatpush1.bf16.msra.mxu1 %v8240_v28  ;;  %v9780_v27 = vld [vmem:[#allocation2 + $0x8] ss:$16 sps:$4 sm:$0xff]   ;;  %v7858_v28 = vcombine.low %v109_v14, %v117_v15 }
 0x144   :  { %3500 = vmatprep.subr.bf16.mxu0 %v8255_v29  ;;  %3586 = vmatprep.subr.bf16.mxu1 %v8257_v33  ;;  %v7860_v29 = vcombine.low %v110_v16, %v118_v18  ;;  %v142_v33 = vld [vmem:[#allocation5 + $0x1a8] sm:$0xff]  ;;  %v237_v16 = vld [vmem:[#allocation5 + $0x4a0] sm:$0xff] }
 0x145   :  { %v238_v18 = vld [vmem:[#allocation5 + $0x4a8] sm:$0xff] }
 0x147   :  { %3501 = vmatpush1.bf16.msra.mxu0 %v8254_v35  ;;  %3587 = vmatpush1.bf16.msra.mxu1 %v8256_v36  ;;  %v150_v35 = vld [vmem:[#allocation5 + $0x1e8] sm:$0xff]  ;;  %v9781_v36 = vld [vmem:[#allocation2 + $0x4] ss:$16 sps:$4 sm:$0xff]  }
 0x148   :  { %3502 = vmatprep.subr.bf16.mxu0 %v8271_v37  ;;  %3588 = vmatprep.subr.bf16.mxu1 %v8273_v41  ;;  %v7874_v37 = vcombine.low %v125_v22, %v133_v23  ;;  %v165_v41 = vld [vmem:[#allocation5 + $0x260] sm:$0xff]  ;;  %v7892_v45 = vcombine.low %v142_v33, %v150_v35 }
 0x149   :  { %v7907_v46 = vcombine.high %v157_v40, %v165_v41 }
 0x14b   :  { %3503 = vmatpush1.bf16.msra.mxu0 %v8270_v43  ;;  %3589 = vmatpush1.bf16.msra.mxu1 %v8272_v44  ;;  %v7893_v43 = vcombine.high %v142_v33, %v150_v35  ;;  %v166_v44 = vld [vmem:[#allocation5 + $0x268] sm:$0xff]  ;;  %v277_v33 = vld [vmem:[#allocation5 + $0x5e0] sm:$0xff] }
 0x14c   :  { %3504 = vmatprep.subr.bf16.mxu0 %v8287_v56  ;;  %3590 = vmatprep.subr.bf16.mxu1 %v8289_v48  ;;  %v7890_v56 = vcombine.low %v141_v31, %v149_v32  ;;  %v181_v48 = vld [vmem:[#allocation5 + $0x2e0] sm:$0xff]  ;;  %v7908_v53 = vcombine.low %v158_v42, %v166_v44 }
 0x14d   :  { %v7923_v54 = vcombine.high %v173_v47, %v181_v48  ;;  %v269_v32 = vld [vmem:[#allocation5 + $0x5a0] sm:$0xff] }
 0x14f   :  { %3505 = vmatpush1.bf16.msra.mxu0 %v8286_v50  ;;  %3591 = vmatpush1.bf16.msra.mxu1 %v8288_v51  ;;  %v7909_v50 = vcombine.high %v158_v42, %v166_v44  ;;  %v182_v51 = vld [vmem:[#allocation5 + $0x2e8] sm:$0xff] }
 0x150   :  { %3506 = vmatprep.subr.bf16.mxu0 %v8303_v52  ;;  %3592 = vmatprep.subr.bf16.mxu1 %v8305_v57  ;;  %v7906_v52 = vcombine.low %v157_v40, %v165_v41  ;;  %v197_v57 = vld [vmem:[#allocation5 + $0x360] sm:$0xff]  ;;  %v7924_v62 = vcombine.low %v174_v49, %v182_v51  ;;  %v286_v42 = vld [vmem:[#allocation5 + $0x628] sm:$0xff] }
 0x151   :  { %v7939_v63 = vcombine.high %v189_v55, %v197_v57  ;;  %v285_v40 = vld [vmem:[#allocation5 + $0x620] sm:$0xff]  ;;  %v294_v44 = vld [vmem:[#allocation5 + $0x668] sm:$0xff] }
 0x152   :  { %v293_v41 = vld [vmem:[#allocation5 + $0x660] sm:$0xff] }
 0x153   :  { %3507 = vmatpush1.bf16.msra.mxu0 %v8302_v59  ;;  %3593 = vmatpush1.bf16.msra.mxu1 %v8304_v60  ;;  %v7925_v59 = vcombine.high %v174_v49, %v182_v51  ;;  %v198_v60 = vld [vmem:[#allocation5 + $0x368] sm:$0xff] }
 0x154   :  { %3508 = vmatprep.subr.bf16.mxu0 %v8319_v61  ;;  %3594 = vmatprep.subr.bf16.mxu1 %v8321_v1  ;;  %v7922_v61 = vcombine.low %v173_v47, %v181_v48  ;;  %v213_v1 = vld [vmem:[#allocation5 + $0x3e0] sm:$0xff]  ;;  %v7940_v6 = vcombine.low %v190_v58, %v198_v60  ;;  %v302_v49 = vld [vmem:[#allocation5 + $0x6a8] sm:$0xff] }
 0x155   :  { %v7955_v7 = vcombine.high %v205_v0, %v213_v1  ;;  %v301_v47 = vld [vmem:[#allocation5 + $0x6a0] sm:$0xff]  ;;  %v310_v51 = vld [vmem:[#allocation5 + $0x6e8] sm:$0xff] }
 0x156   :  { %v309_v48 = vld [vmem:[#allocation5 + $0x6e0] sm:$0xff] }
 0x157   :  { %3509 = vmatpush1.bf16.msra.mxu0 %v8318_v3  ;;  %3595 = vmatpush1.bf16.msra.mxu1 %v8320_v4  ;;  %v7941_v3 = vcombine.high %v190_v58, %v198_v60  ;;  %v214_v4 = vld [vmem:[#allocation5 + $0x3e8] sm:$0xff] }
 0x158   :  { %3510 = vmatprep.subr.bf16.mxu0 %v8335_v5  ;;  %3596 = vmatprep.subr.bf16.mxu1 %v8337_v9  ;;  %v7938_v5 = vcombine.low %v189_v55, %v197_v57  ;;  %v229_v9 = vld [vmem:[#allocation5 + $0x460] sm:$0xff]  ;;  %v7956_v14 = vcombine.low %v206_v2, %v214_v4  ;;  %v318_v58 = vld [vmem:[#allocation5 + $0x728] sm:$0xff] }
 0x159   :  { %v7971_v15 = vcombine.high %v221_v8, %v229_v9  ;;  %v317_v55 = vld [vmem:[#allocation5 + $0x720] sm:$0xff]  ;;  %v326_v60 = vld [vmem:[#allocation5 + $0x768] sm:$0xff] }
 0x15a   :  { %v325_v57 = vld [vmem:[#allocation5 + $0x760] sm:$0xff] }
 0x15b   :  { %3511 = vmatpush1.bf16.msra.mxu0 %v8334_v11  ;;  %3597 = vmatpush1.bf16.msra.mxu1 %v8336_v12  ;;  %v7957_v11 = vcombine.high %v206_v2, %v214_v4  ;;  %v230_v12 = vld [vmem:[#allocation5 + $0x468] sm:$0xff] }
 0x15c   :  { %3609 = vmatprep.subr.bf16.mxu0 %v7843_v13  ;;  %3695 = vmatprep.subr.bf16.mxu1 %v7845_v17  ;;  %v7954_v13 = vcombine.low %v205_v0, %v213_v1  ;;  %v245_v17 = vld [vmem:[#allocation5 + $0x4e0] sm:$0xff]  ;;  %v7972_v22 = vcombine.low %v222_v10, %v230_v12  ;;  %v334_v2 = vld [vmem:[#allocation5 + $0x7a8] sm:$0xff] }
 0x15d   :  { %v7987_v23 = vcombine.high %v237_v16, %v245_v17  ;;  %v333_v0 = vld [vmem:[#allocation5 + $0x7a0] sm:$0xff]  ;;  %v342_v4 = vld [vmem:[#allocation5 + $0x7e8] sm:$0xff] }
 0x15e   :  { %3513 = vmatmul.mubr.bf16.vlgmr.msra.gmra.mrb[4].mxu0 %v9780_v27  ;;  %3599 = vmatmul.mubr.bf16.vlgmr.msra.gmra.mrb[4].mxu1 %v9780_v27  ;;  %v341_v1 = vld [vmem:[#allocation5 + $0x7e0] sm:$0xff] }
 0x15f   :  { %3610 = vmatpush1.bf16.msra.mxu0 %v7842_v19  ;;  %3696 = vmatpush1.bf16.msra.mxu1 %v7844_v20  ;;  %v7973_v19 = vcombine.high %v222_v10, %v230_v12  ;;  %v246_v20 = vld [vmem:[#allocation5 + $0x4e8] sm:$0xff] }
 0x160   :  { %3611 = vmatprep.subr.bf16.mxu0 %v7859_v21  ;;  %3697 = vmatprep.subr.bf16.mxu1 %v7861_v25  ;;  %v7970_v21 = vcombine.low %v221_v8, %v229_v9  ;;  %v261_v25 = vld [vmem:[#allocation5 + $0x560] sm:$0xff]  ;;  %v7989_v27 = vcombine.high %v238_v18, %v246_v20  ;;  %v350_v10 = vld [vmem:[#allocation5 + $0x828] sm:$0xff] }
 0x161   :  { %3641 = vmatprep.mubr.bf16.mxu0 %v9781_v36  ;;  %3727 = vmatprep.mubr.bf16.mxu1 %v9781_v36  ;;  %v8003_v31 = vcombine.high %v253_v24, %v261_v25  ;;  %v278_v36 = vld [vmem:[#allocation5 + $0x5e8] sm:$0xff]  ;;  %v349_v8 = vld [vmem:[#allocation5 + $0x820] sm:$0xff] }
 0x162   :  { %v357_v9 = vld [vmem:[#allocation5 + $0x860] sm:$0xff]  ;;  %v358_v12 = vld [vmem:[#allocation5 + $0x868] sm:$0xff] }
 0x163   :  { %3612 = vmatpush1.bf16.msra.mxu0 %v7858_v28  ;;  %3698 = vmatpush1.bf16.msra.mxu1 %v7860_v29  ;;  %v262_v28 = vld [vmem:[#allocation5 + $0x568] sm:$0xff]  ;;  %v7986_v29 = vcombine.low %v237_v16, %v245_v17  ;;  %v365_v16 = vld [vmem:[#allocation5 + $0x8a0] sm:$0xff] }
 0x164   :  { %3613 = vmatprep.subr.bf16.mxu0 %v7875_v30  ;;  %3699 = vmatprep.subr.bf16.mxu1 %v7877_v34  ;;  %v7988_v30 = vcombine.low %v238_v18, %v246_v20  ;;  %v270_v34 = vld [vmem:[#allocation5 + $0x5a8] sm:$0xff]  ;;  %v8005_v35 = vcombine.high %v254_v26, %v262_v28  ;;  %v373_v17 = vld [vmem:[#allocation5 + $0x8e0] sm:$0xff] }
 0x165   :  { %v366_v18 = vld [vmem:[#allocation5 + $0x8a8] sm:$0xff] }
 0x166   :  { %v374_v20 = vld [vmem:[#allocation5 + $0x8e8] sm:$0xff] }
 0x167   :  { %3614 = vmatpush1.bf16.msra.mxu0 %v7874_v37  ;;  %3700 = vmatpush1.bf16.msra.mxu1 %v7876_v38  ;;  %v8002_v37 = vcombine.low %v253_v24, %v261_v25  ;;  %v8004_v38 = vcombine.low %v254_v26, %v262_v28  ;;  %v381_v24 = vld [vmem:[#allocation5 + $0x920] sm:$0xff]  ;;  %v382_v26 = vld [vmem:[#allocation5 + $0x928] sm:$0xff] }
 0x168   :  { %3615 = vmatprep.subr.bf16.mxu0 %v7891_v39  ;;  %3701 = vmatprep.subr.bf16.mxu1 %v7893_v43  ;;  %v8019_v39 = vcombine.high %v269_v32, %v277_v33  ;;  %v8021_v43 = vcombine.high %v270_v34, %v278_v36  ;;  %v389_v25 = vld [vmem:[#allocation5 + $0x960] sm:$0xff]  ;;  %v390_v28 = vld [vmem:[#allocation5 + $0x968] sm:$0xff] }
 0x16b   :  { %3616 = vmatpush1.bf16.msra.mxu0 %v7890_v56  ;;  %3702 = vmatpush1.bf16.msra.mxu1 %v7892_v45  ;;  %v8018_v56 = vcombine.low %v269_v32, %v277_v33  ;;  %v8020_v45 = vcombine.low %v270_v34, %v278_v36  ;;  %v8131_v32 = vcombine.high %v381_v24, %v389_v25  ;;  %v397_v34 = vld [vmem:[#allocation5 + $0x9a0] sm:$0xff]  ;;  %v10042_v36 = vld [vmem:[#allocation2 + $0xc] ss:$16 sps:$4 sm:$0xff]  }
 0x16c   :  { %3617 = vmatprep.subr.bf16.mxu0 %v7907_v46  ;;  %3703 = vmatprep.subr.bf16.mxu1 %v7909_v50  ;;  %v8035_v46 = vcombine.high %v285_v40, %v293_v41  ;;  %v8037_v50 = vcombine.high %v286_v42, %v294_v44  ;;  %v8133_v33 = vcombine.high %v382_v26, %v390_v28 }
 0x16f   :  { %3618 = vmatpush1.bf16.msra.mxu0 %v7906_v52  ;;  %3704 = vmatpush1.bf16.msra.mxu1 %v7908_v53  ;;  %v8034_v52 = vcombine.low %v285_v40, %v293_v41  ;;  %v8036_v53 = vcombine.low %v286_v42, %v294_v44  ;;  %v8130_v40 = vcombine.low %v381_v24, %v389_v25  ;;  %v413_v44 = vld [vmem:[#allocation5 + $0xa20] sm:$0xff] }
 0x170   :  { %3619 = vmatprep.subr.bf16.mxu0 %v7923_v54  ;;  %3705 = vmatprep.subr.bf16.mxu1 %v7925_v59  ;;  %v8051_v54 = vcombine.high %v301_v47, %v309_v48  ;;  %v8053_v59 = vcombine.high %v302_v49, %v310_v51  ;;  %v8132_v41 = vcombine.low %v382_v26, %v390_v28 }
 0x173   :  { %3620 = vmatpush1.bf16.msra.mxu0 %v7922_v61  ;;  %3706 = vmatpush1.bf16.msra.mxu1 %v7924_v62  ;;  %v8050_v61 = vcombine.low %v301_v47, %v309_v48  ;;  %v8052_v62 = vcombine.low %v302_v49, %v310_v51 }
 0x174   :  { %3621 = vmatprep.subr.bf16.mxu0 %v7939_v63  ;;  %3707 = vmatprep.subr.bf16.mxu1 %v7941_v3  ;;  %v8067_v63 = vcombine.high %v317_v55, %v325_v57  ;;  %v8069_v3 = vcombine.high %v318_v58, %v326_v60 }
 0x177   :  { %3622 = vmatpush1.bf16.msra.mxu0 %v7938_v5  ;;  %3708 = vmatpush1.bf16.msra.mxu1 %v7940_v6  ;;  %v8066_v5 = vcombine.low %v317_v55, %v325_v57  ;;  %v8068_v6 = vcombine.low %v318_v58, %v326_v60  ;;  %v430_v55 = vld [vmem:[#allocation5 + $0xaa8] sm:$0xff] }
 0x178   :  { %3623 = vmatprep.subr.bf16.mxu0 %v7955_v7  ;;  %3709 = vmatprep.subr.bf16.mxu1 %v7957_v11  ;;  %v8083_v7 = vcombine.high %v333_v0, %v341_v1  ;;  %v8085_v11 = vcombine.high %v334_v2, %v342_v4  ;;  %v438_v57 = vld [vmem:[#allocation5 + $0xae8] sm:$0xff] }
 0x17b   :  { %3624 = vmatpush1.bf16.msra.mxu0 %v7954_v13  ;;  %3710 = vmatpush1.bf16.msra.mxu1 %v7956_v14  ;;  %v8082_v13 = vcombine.low %v333_v0, %v341_v1  ;;  %v8084_v14 = vcombine.low %v334_v2, %v342_v4  ;;  %v8181_v1 = vcombine.high %v430_v55, %v438_v57  ;;  %v445_v2 = vld [vmem:[#allocation5 + $0xb20] sm:$0xff] }
 0x17c   :  { %3625 = vmatprep.subr.bf16.mxu0 %v7971_v15  ;;  %3711 = vmatprep.subr.bf16.mxu1 %v7973_v19  ;;  %v8099_v15 = vcombine.high %v349_v8, %v357_v9  ;;  %v8101_v19 = vcombine.high %v350_v10, %v358_v12 }
 0x17f   :  { %3626 = vmatpush1.bf16.msra.mxu0 %v7970_v21  ;;  %3712 = vmatpush1.bf16.msra.mxu1 %v7972_v22  ;;  %v8098_v21 = vcombine.low %v349_v8, %v357_v9  ;;  %v8100_v22 = vcombine.low %v350_v10, %v358_v12 }
 0x180   :  { %3627 = vmatprep.subr.bf16.mxu0 %v7987_v23  ;;  %3713 = vmatprep.subr.bf16.mxu1 %v7989_v27  ;;  %v8115_v23 = vcombine.high %v365_v16, %v373_v17  ;;  %v8117_v27 = vcombine.high %v366_v18, %v374_v20 }
 0x183   :  { %3628 = vmatpush1.bf16.msra.mxu0 %v7986_v29  ;;  %3714 = vmatpush1.bf16.msra.mxu1 %v7988_v30  ;;  %v10038_v29 = vld [vmem:[#allocation2] ss:$16 sps:$4 sm:$0xff]   ;;  %v8114_v30 = vcombine.low %v365_v16, %v373_v17 }
 0x184   :  { %3629 = vmatprep.subr.bf16.mxu0 %v8003_v31  ;;  %3715 = vmatprep.subr.bf16.mxu1 %v8005_v35  ;;  %v8116_v31 = vcombine.low %v366_v18, %v374_v20  ;;  %v405_v35 = vld [vmem:[#allocation5 + $0x9e0] sm:$0xff]  ;;  %v462_v20 = vld [vmem:[#allocation5 + $0xba8] sm:$0xff] }
 0x185   :  { %v8147_v42 = vcombine.high %v397_v34, %v405_v35  ;;  %v8146_v48 = vcombine.low %v397_v34, %v405_v35  ;;  %v469_v16 = vld [vmem:[#allocation5 + $0xbe0] sm:$0xff] }
 0x187   :  { %3630 = vmatpush1.bf16.msra.mxu0 %v8002_v37  ;;  %3716 = vmatpush1.bf16.msra.mxu1 %v8004_v38  ;;  %v398_v37 = vld [vmem:[#allocation5 + $0x9a8] sm:$0xff] }
 0x188   :  { %3631 = vmatprep.subr.bf16.mxu0 %v8019_v39  ;;  %3717 = vmatprep.subr.bf16.mxu1 %v8021_v43  ;;  %v406_v38 = vld [vmem:[#allocation5 + $0x9e8] sm:$0xff]  ;;  %v605_v39 = vlaneseq }
 0x189   :  { %v8149_v43 = vcombine.high %v398_v37, %v406_v38  ;;  %v8148_v49 = vcombine.low %v398_v37, %v406_v38 }
 0x18a   :  { %v10046_v47 = vshrl.u32 %v605_v39, 7 }
 0x18b   :  { %3632 = vmatpush1.bf16.msra.mxu0 %v8018_v56  ;;  %3718 = vmatpush1.bf16.msra.mxu1 %v8020_v45  ;;  %v421_v56 = vld [vmem:[#allocation5 + $0xa60] sm:$0xff]  ;;  %v414_v45 = vld [vmem:[#allocation5 + $0xa28] sm:$0xff] }
 0x18c   :  { %3633 = vmatprep.subr.bf16.mxu0 %v8035_v46  ;;  %3719 = vmatprep.subr.bf16.mxu1 %v8037_v50  ;;  %v422_v46 = vld [vmem:[#allocation5 + $0xa68] sm:$0xff]  ;;  %v8163_v50 = vcombine.high %v413_v44, %v421_v56  ;;  %v8162_v58 = vcombine.low %v413_v44, %v421_v56  ;;  %v10054_v60 = vsub.s32 2, %v10046_v47 }
 0x18d   :  { %v8165_v51 = vcombine.high %v414_v45, %v422_v46 }
 0x18f   :  { %3634 = vmatpush1.bf16.msra.mxu0 %v8034_v52  ;;  %3720 = vmatpush1.bf16.msra.mxu1 %v8036_v53  ;;  %v429_v52 = vld [vmem:[#allocation5 + $0xaa0] sm:$0xff] }
 0x190   :  { %3635 = vmatprep.subr.bf16.mxu0 %v8051_v54  ;;  %3721 = vmatprep.subr.bf16.mxu1 %v8053_v59  ;;  %v437_v53 = vld [vmem:[#allocation5 + $0xae0] sm:$0xff]  ;;  %v10049_v54 = vsub.s32 0, %v10046_v47 }
 0x191   :  { %v10051_v59 = vld [vmem:[#allocation7] sm:$0xff]  ;;  %v8179_v0 = vcombine.high %v429_v52, %v437_v53  ;;  %v8178_v9 = vcombine.low %v429_v52, %v437_v53 }
 0x192   :  { %v608_v4 = vrot.slane %v10051_v59, %v10049_v54 }
 0x193   :  { %3636 = vmatpush1.bf16.msra.mxu0 %v8050_v61  ;;  %3722 = vmatpush1.bf16.msra.mxu1 %v8052_v62  ;;  %v10057_v61 = vsub.s32 1, %v10046_v47  ;;  %v8164_v62 = vcombine.low %v414_v45, %v422_v46  ;;  %v478_v45 = vld [vmem:[#allocation5 + $0xc28] sm:$0xff] }
 0x194   :  { %3637 = vmatprep.subr.bf16.mxu0 %v8067_v63  ;;  %3723 = vmatprep.subr.bf16.mxu1 %v8069_v3  ;;  %v10060_v63 = vsub.s32 3, %v10046_v47  ;;  %v453_v3 = vld [vmem:[#allocation5 + $0xb60] sm:$0xff]  ;;  %v486_v46 = vld [vmem:[#allocation5 + $0xc68] sm:$0xff] }
 0x195   :  { %v612_v8 = vrot.slane %v10051_v59, %v10057_v61  ;;  %v8195_v12 = vcombine.high %v445_v2, %v453_v3  ;;  %v8194_v26 = vcombine.low %v445_v2, %v453_v3  ;;  %v501_v2 = vld [vmem:[#allocation5 + $0xce0] sm:$0xff] }
 0x196   :  { %v620_v10 = vrot.slane %v10051_v59, %v10060_v63 }
 0x197   :  { %3638 = vmatpush1.bf16.msra.mxu0 %v8066_v5  ;;  %3724 = vmatpush1.bf16.msra.mxu1 %v8068_v6  ;;  %v446_v5 = vld [vmem:[#allocation5 + $0xb28] sm:$0xff] }
 0x198   :  { %3639 = vmatprep.subr.bf16.mxu0 %v8083_v7  ;;  %3725 = vmatprep.subr.bf16.mxu1 %v8085_v11  ;;  %v454_v6 = vld [vmem:[#allocation5 + $0xb68] sm:$0xff]  ;;  %v616_v7 = vrot.slane %v10051_v59, %v10054_v60  ;;  %v8180_v11 = vcombine.low %v430_v55, %v438_v57 }
 0x19b   :  { %3640 = vmatpush1.bf16.msra.mxu0 %v8082_v13  ;;  %3726 = vmatpush1.bf16.msra.mxu1 %v8084_v14  ;;  %v8197_v14 = vcombine.high %v446_v5, %v454_v6 }
 0x19c   :  { %3652 = vmatprep.subr.bf16.mxu0 %v8099_v15  ;;  %3738 = vmatprep.subr.bf16.mxu1 %v8101_v19  ;;  %v461_v15 = vld [vmem:[#allocation5 + $0xba0] sm:$0xff] }
 0x19d   :  { %v8210_v38 = vcombine.low %v461_v15, %v469_v16 }
 0x19e   :  { %3642 = vmatmul.mubr.bf16.vlgmr.msra.gmra.mrb[8].mxu0 %v10038_v29  ;;  %3728 = vmatmul.mubr.bf16.vlgmr.msra.gmra.mrb[8].mxu1 %v10038_v29 }
 0x19f   :  { %3653 = vmatpush1.bf16.msra.mxu0 %v8098_v21  ;;  %3739 = vmatpush1.bf16.msra.mxu1 %v8100_v22  ;;  %v470_v21 = vld [vmem:[#allocation5 + $0xbe8] sm:$0xff] }
 0x1a0   :  { %3654 = vmatprep.subr.bf16.mxu0 %v8115_v23  ;;  %3740 = vmatprep.subr.bf16.mxu1 %v8117_v27  ;;  %v8196_v27 = vcombine.low %v446_v5, %v454_v6  ;;  %v8213_v39 = vcombine.high %v462_v20, %v470_v21  ;;  %v8212_v56 = vcombine.low %v462_v20, %v470_v21  ;;  %v502_v5 = vld [vmem:[#allocation5 + $0xce8] sm:$0xff] }
 0x1a1   :  { %3684 = vmatprep.mubr.bf16.mxu0 %v10042_v36  ;;  %3770 = vmatprep.mubr.bf16.mxu1 %v10042_v36  ;;  %v526_v20 = vld [vmem:[#allocation5 + $0xda8] sm:$0xff] }
 0x1a2   :  { %v534_v21 = vld [vmem:[#allocation5 + $0xde8] sm:$0xff] }
 0x1a3   :  { %3655 = vmatpush1.bf16.msra.mxu0 %v8114_v30  ;;  %3741 = vmatpush1.bf16.msra.mxu1 %v8116_v31 }
 0x1a4   :  { %3656 = vmatprep.subr.bf16.mxu0 %v8131_v32  ;;  %3742 = vmatprep.subr.bf16.mxu1 %v8133_v33  ;;  %v8211_v33 = vcombine.high %v461_v15, %v469_v16 }
 0x1a7   :  { %3657 = vmatpush1.bf16.msra.mxu0 %v8130_v40  ;;  %3743 = vmatpush1.bf16.msra.mxu1 %v8132_v41  ;;  %v477_v40 = vld [vmem:[#allocation5 + $0xc20] sm:$0xff] }
 0x1a8   :  { %3658 = vmatprep.subr.bf16.mxu0 %v8147_v42  ;;  %3744 = vmatprep.subr.bf16.mxu1 %v8149_v43  ;;  %v485_v41 = vld [vmem:[#allocation5 + $0xc60] sm:$0xff] }
 0x1a9   :  { %v8227_v57 = vcombine.high %v477_v40, %v485_v41  ;;  %v8226_v6 = vcombine.low %v477_v40, %v485_v41 }
 0x1ab   :  { %3659 = vmatpush1.bf16.msra.mxu0 %v8146_v48  ;;  %3745 = vmatpush1.bf16.msra.mxu1 %v8148_v49 }
 0x1ac   :  { %3660 = vmatprep.subr.bf16.mxu0 %v8163_v50  ;;  %3746 = vmatprep.subr.bf16.mxu1 %v8165_v51 }
 0x1af   :  { %3661 = vmatpush1.bf16.msra.mxu0 %v8162_v58  ;;  %3747 = vmatpush1.bf16.msra.mxu1 %v8164_v62 }
 0x1b0   :  { %3662 = vmatprep.subr.bf16.mxu0 %v8179_v0  ;;  %3748 = vmatprep.subr.bf16.mxu1 %v8181_v1  ;;  %v8229_v0 = vcombine.high %v478_v45, %v486_v46  ;;  %v493_v1 = vld [vmem:[#allocation5 + $0xca0] sm:$0xff] }
 0x1b1   :  { %v3342_v13 = vpop.f32.mrb[0].mxu0  ;;  %v3428_v18 = vpop.f32.mrb[0].mxu1 }
 0x1b2   :  { %v8866_v17 = vadd.f32 %v3342_v13, %v608_v4  ;;  %v3344_v19 = vpop.f32.mrb[1].mxu0  ;;  %v8870_v22 = vadd.f32 %v3428_v18, %v616_v7  ;;  %v3430_v24 = vpop.f32.mrb[1].mxu1  ;;  %v518_v13 = vld [vmem:[#allocation5 + $0xd68] sm:$0xff]  ;;  %v525_v18 = vld [vmem:[#allocation5 + $0xda0] sm:$0xff] }
 0x1b3   :  { %v8867_v23 = vadd.f32 %v3344_v19, %v612_v8  ;;  %v3346_v25 = vpop.f32.mrb[2].mxu0  ;;  %3663 = vmatpush1.bf16.msra.mxu0 %v8178_v9  ;;  %v8871_v28 = vadd.f32 %v3430_v24, %v620_v10  ;;  %v3432_v31 = vpop.f32.mrb[2].mxu1  ;;  %3749 = vmatpush1.bf16.msra.mxu1 %v8180_v11  ;;  %v517_v11 = vld [vmem:[#allocation5 + $0xd60] sm:$0xff] }
 0x1b4   :  { %v8868_v30 = vadd.f32 %v3346_v25, %v608_v4  ;;  %v3348_v32 = vpop.f32.mrb[3].mxu0  ;;  %3664 = vmatprep.subr.bf16.mxu0 %v8195_v12  ;;  %v8872_v34 = vadd.f32 %v3432_v31, %v616_v7  ;;  %v3434_v37 = vpop.f32.mrb[3].mxu1  ;;  %3750 = vmatprep.subr.bf16.mxu1 %v8197_v14  ;;  %v3953_v42 = vmax.f32 %v8866_v17, 0.0  ;;  %v3955_v48 = vmax.f32 %v8870_v22, 0.0  ;;  %v494_v4 = vld [vmem:[#allocation5 + $0xca8] sm:$0xff]  ;;  %v533_v19 = vld [vmem:[#allocation5 + $0xde0] sm:$0xff] }
 0x1b5   :  { %v8869_v35 = vadd.f32 %v3348_v32, %v612_v8  ;;  %v8873_v44 = vadd.f32 %v3434_v37, %v620_v10  ;;  %v3954_v49 = vmax.f32 %v8867_v23, 0.0  ;;  %v3956_v52 = vmax.f32 %v8871_v28, 0.0  ;;  %v509_v10 = vld [vmem:[#allocation5 + $0xd20] sm:$0xff]  ;;  %v510_v12 = vld [vmem:[#allocation5 + $0xd28] sm:$0xff] }
 0x1b6   :  { %v3969_v43 = vmax.f32 %v8868_v30, 0.0  ;;  %v3971_v50 = vmax.f32 %v8872_v34, 0.0  ;;  %v8228_v7 = vcombine.low %v478_v45, %v486_v46  ;;  %v8243_v8 = vcombine.high %v493_v1, %v501_v2  ;;  %v542_v28 = vld [vmem:[#allocation5 + $0xe28] sm:$0xff]  ;;  %v565_v37 = vld [vmem:[#allocation5 + $0xee0] sm:$0xff] }
 0x1b7   :  { %v3970_v51 = vmax.f32 %v8869_v35, 0.0  ;;  %3665 = vmatpush1.bf16.msra.mxu0 %v8194_v26  ;;  %v3972_v55 = vmax.f32 %v8873_v44, 0.0  ;;  %3751 = vmatpush1.bf16.msra.mxu1 %v8196_v27  ;;  %v8245_v9 = vcombine.high %v494_v4, %v502_v5  ;;  %v8242_v14 = vcombine.low %v493_v1, %v501_v2  ;;  %v541_v26 = vld [vmem:[#allocation5 + $0xe20] sm:$0xff]  ;;  %v550_v30 = vld [vmem:[#allocation5 + $0xe68] sm:$0xff] }
 0x1b8   :  { %v10070_v53 = vpack.c.bf16 %v3969_v43, %v3953_v42  ;;  %3666 = vmatprep.subr.bf16.mxu0 %v8211_v33  ;;  %v10072_v58 = vpack.c.bf16 %v3971_v50, %v3955_v48  ;;  %3752 = vmatprep.subr.bf16.mxu1 %v8213_v39  ;;  %v8244_v15 = vcombine.low %v494_v4, %v502_v5  ;;  %v549_v27 = vld [vmem:[#allocation5 + $0xe60] sm:$0xff]  ;;  %v566_v39 = vld [vmem:[#allocation5 + $0xee8] sm:$0xff] }
 0x1b9   :  { %v10074_v62 = vpack.c.bf16 %v3970_v51, %v3954_v49  ;;  %v10076_v3 = vpack.c.bf16 %v3972_v55, %v3956_v52  ;;  %v8259_v16 = vcombine.high %v509_v10, %v517_v11  ;;  %v8261_v17 = vcombine.high %v510_v12, %v518_v13  ;;  %v557_v35 = vld [vmem:[#allocation5 + $0xea0] sm:$0xff]  ;;  %v574_v45 = vld [vmem:[#allocation5 + $0xf28] sm:$0xff] }
 0x1ba   :  { %v8258_v22 = vcombine.low %v509_v10, %v517_v11  ;;  %v8260_v23 = vcombine.low %v510_v12, %v518_v13  ;;  %v8275_v24 = vcombine.high %v525_v18, %v533_v19  ;;  %v8277_v25 = vcombine.high %v526_v20, %v534_v21  ;;  %v573_v44 = vld [vmem:[#allocation5 + $0xf20] sm:$0xff]  ;;  %v582_v46 = vld [vmem:[#allocation5 + $0xf68] sm:$0xff] }
 0x1bb   :  { %3667 = vmatpush1.bf16.msra.mxu0 %v8210_v38  ;;  %3753 = vmatpush1.bf16.msra.mxu1 %v8212_v56  ;;  %v8274_v31 = vcombine.low %v525_v18, %v533_v19  ;;  %v8276_v32 = vcombine.low %v526_v20, %v534_v21  ;;  %v8291_v33 = vcombine.high %v541_v26, %v549_v27  ;;  %v558_v38 = vld [vmem:[#allocation5 + $0xea8] sm:$0xff]  ;;  %v581_v56 = vld [vmem:[#allocation5 + $0xf60] sm:$0xff] }
 0x1bc   :  { %3668 = vmatprep.subr.bf16.mxu0 %v8227_v57  ;;  %3754 = vmatprep.subr.bf16.mxu1 %v8229_v0  ;;  %v8293_v34 = vcombine.high %v542_v28, %v550_v30  ;;  %v8290_v40 = vcombine.low %v541_v26, %v549_v27  ;;  %v8292_v41 = vcombine.low %v542_v28, %v550_v30  ;;  %v589_v52 = vld [vmem:[#allocation5 + $0xfa0] sm:$0xff]  ;;  %v590_v57 = vld [vmem:[#allocation5 + $0xfa8] sm:$0xff]  ;;  %v136_v26 = vld [vmem:[#allocation5 + $0x178] sm:$0xff] }
 0x1bd   :  { %v8307_v42 = vcombine.high %v557_v35, %v565_v37  ;;  %v8309_v43 = vcombine.high %v558_v38, %v566_v39  ;;  %v8306_v48 = vcombine.low %v557_v35, %v565_v37  ;;  %v8308_v49 = vcombine.low %v558_v38, %v566_v39  ;;  %v597_v55 = vld [vmem:[#allocation5 + $0xfe0] sm:$0xff]  ;;  %v598_v0 = vld [vmem:[#allocation5 + $0xfe8] sm:$0xff]  ;;  %v144_v35 = vld [vmem:[#allocation5 + $0x1b8] sm:$0xff] }
 0x1be   :  { %v8323_v50 = vcombine.high %v573_v44, %v581_v56  ;;  %v8325_v51 = vcombine.high %v574_v45, %v582_v46  ;;  %v8322_v1 = vcombine.low %v573_v44, %v581_v56  ;;  %v8324_v2 = vcombine.low %v574_v45, %v582_v46  ;;  %v152_v37 = vld [vmem:[#allocation5 + $0x1f8] sm:$0xff] }
 0x1bf   :  { %3669 = vmatpush1.bf16.msra.mxu0 %v8226_v6  ;;  %3755 = vmatpush1.bf16.msra.mxu1 %v8228_v7  ;;  %v8339_v4 = vcombine.high %v589_v52, %v597_v55  ;;  %v8341_v5 = vcombine.high %v590_v57, %v598_v0  ;;  %v95_v6 = vld [vmem:[#allocation5 + $0x30] sm:$0xff]  ;;  %v8338_v10 = vcombine.low %v589_v52, %v597_v55  ;;  %v160_v44 = vld [vmem:[#allocation5 + $0x238] sm:$0xff] }
 0x1c0   :  { %3670 = vmatprep.subr.bf16.mxu0 %v8243_v8  ;;  %3756 = vmatprep.subr.bf16.mxu1 %v8245_v9  ;;  %v103_v7 = vld [vmem:[#allocation5 + $0x70] sm:$0xff]  ;;  %v96_v8 = vld [vmem:[#allocation5 + $0x38] sm:$0xff]  ;;  %v8340_v11 = vcombine.low %v590_v57, %v598_v0  ;;  %v7896_v46 = vcombine.low %v144_v35, %v152_v37 }
 0x1c1   :  { %v104_v9 = vld [vmem:[#allocation5 + $0x78] sm:$0xff]  ;;  %v7847_v12 = vcombine.high %v95_v6, %v103_v7  ;;  %v7846_v18 = vcombine.low %v95_v6, %v103_v7 }
 0x1c2   :  { %v7849_v13 = vcombine.high %v96_v8, %v104_v9  ;;  %v7848_v19 = vcombine.low %v96_v8, %v104_v9  ;;  %v168_v56 = vld [vmem:[#allocation5 + $0x278] sm:$0xff] }
 0x1c3   :  { %3671 = vmatpush1.bf16.msra.mxu0 %v8242_v14  ;;  %3757 = vmatpush1.bf16.msra.mxu1 %v8244_v15  ;;  %v111_v14 = vld [vmem:[#allocation5 + $0xb0] sm:$0xff]  ;;  %v176_v52 = vld [vmem:[#allocation5 + $0x2b8] sm:$0xff]  ;;  %v7912_v0 = vcombine.low %v160_v44, %v168_v56 }
 0x1c4   :  { %3672 = vmatprep.subr.bf16.mxu0 %v8259_v16  ;;  %3758 = vmatprep.subr.bf16.mxu1 %v8261_v17  ;;  %v119_v15 = vld [vmem:[#allocation5 + $0xf0] sm:$0xff]  ;;  %v112_v16 = vld [vmem:[#allocation5 + $0xb8] sm:$0xff] }
 0x1c5   :  { %v120_v17 = vld [vmem:[#allocation5 + $0xf8] sm:$0xff]  ;;  %v7863_v20 = vcombine.high %v111_v14, %v119_v15  ;;  %v7862_v27 = vcombine.low %v111_v14, %v119_v15 }
 0x1c6   :  { %v7865_v21 = vcombine.high %v112_v16, %v120_v17  ;;  %v7864_v28 = vcombine.low %v112_v16, %v120_v17  ;;  %v184_v55 = vld [vmem:[#allocation5 + $0x2f8] sm:$0xff] }
 0x1c7   :  { %3673 = vmatpush1.bf16.msra.mxu0 %v8258_v22  ;;  %3759 = vmatpush1.bf16.msra.mxu1 %v8260_v23  ;;  %v127_v22 = vld [vmem:[#allocation5 + $0x130] sm:$0xff]  ;;  %v192_v6 = vld [vmem:[#allocation5 + $0x338] sm:$0xff]  ;;  %v7928_v9 = vcombine.low %v176_v52, %v184_v55 }
 0x1c8   :  { %3674 = vmatprep.subr.bf16.mxu0 %v8275_v24  ;;  %3760 = vmatprep.subr.bf16.mxu1 %v8277_v25  ;;  %v135_v23 = vld [vmem:[#allocation5 + $0x170] sm:$0xff]  ;;  %v10078_v24 = vld [vmem:[#allocation2 + $0x8] ss:$16 sps:$4 sm:$0xff]  }
 0x1c9   :  { %v128_v25 = vld [vmem:[#allocation5 + $0x138] sm:$0xff]  ;;  %v7879_v30 = vcombine.high %v127_v22, %v135_v23  ;;  %v7878_v38 = vcombine.low %v127_v22, %v135_v23 }
 0x1ca   :  { %v7880_v39 = vcombine.low %v128_v25, %v136_v26  ;;  %v200_v7 = vld [vmem:[#allocation5 + $0x378] sm:$0xff] }
 0x1cb   :  { %3675 = vmatpush1.bf16.msra.mxu0 %v8274_v31  ;;  %3761 = vmatpush1.bf16.msra.mxu1 %v8276_v32  ;;  %v7881_v31 = vcombine.high %v128_v25, %v136_v26  ;;  %v143_v32 = vld [vmem:[#allocation5 + $0x1b0] sm:$0xff]  ;;  %v208_v14 = vld [vmem:[#allocation5 + $0x3b8] sm:$0xff]  ;;  %v7944_v17 = vcombine.low %v192_v6, %v200_v7 }
 0x1cc   :  { %3676 = vmatprep.subr.bf16.mxu0 %v8291_v33  ;;  %3762 = vmatprep.subr.bf16.mxu1 %v8293_v34  ;;  %v151_v33 = vld [vmem:[#allocation5 + $0x1f0] sm:$0xff]  ;;  %v216_v15 = vld [vmem:[#allocation5 + $0x3f8] sm:$0xff] }
 0x1cd   :  { %v9785_v34 = vld [vmem:[#allocation2 + $0x4] ss:$16 sps:$4 sm:$0xff]   ;;  %v7894_v45 = vcombine.low %v143_v32, %v151_v33  ;;  %v224_v22 = vld [vmem:[#allocation5 + $0x438] sm:$0xff]  ;;  %v7960_v26 = vcombine.low %v208_v14, %v216_v15 }
 0x1ce   :  { %v232_v23 = vld [vmem:[#allocation5 + $0x478] sm:$0xff] }
 0x1cf   :  { %3677 = vmatpush1.bf16.msra.mxu0 %v8290_v40  ;;  %3763 = vmatpush1.bf16.msra.mxu1 %v8292_v41  ;;  %v7895_v40 = vcombine.high %v143_v32, %v151_v33  ;;  %v7897_v41 = vcombine.high %v144_v35, %v152_v37  ;;  %v240_v32 = vld [vmem:[#allocation5 + $0x4b8] sm:$0xff]  ;;  %v7976_v35 = vcombine.low %v224_v22, %v232_v23 }
 0x1d0   :  { %3678 = vmatprep.subr.bf16.mxu0 %v8307_v42  ;;  %3764 = vmatprep.subr.bf16.mxu1 %v8309_v43  ;;  %v159_v42 = vld [vmem:[#allocation5 + $0x230] sm:$0xff]  ;;  %v248_v33 = vld [vmem:[#allocation5 + $0x4f8] sm:$0xff] }
 0x1d1   :  { %v167_v43 = vld [vmem:[#allocation5 + $0x270] sm:$0xff] }
 0x1d2   :  { %v7910_v57 = vcombine.low %v159_v42, %v167_v43 }
 0x1d3   :  { %3679 = vmatpush1.bf16.msra.mxu0 %v8306_v48  ;;  %3765 = vmatpush1.bf16.msra.mxu1 %v8308_v49  ;;  %v7911_v48 = vcombine.high %v159_v42, %v167_v43  ;;  %v7913_v49 = vcombine.high %v160_v44, %v168_v56  ;;  %v264_v42 = vld [vmem:[#allocation5 + $0x578] sm:$0xff]  ;;  %v7992_v44 = vcombine.low %v240_v32, %v248_v33 }
 0x1d4   :  { %3680 = vmatprep.subr.bf16.mxu0 %v8323_v50  ;;  %3766 = vmatprep.subr.bf16.mxu1 %v8325_v51  ;;  %v175_v50 = vld [vmem:[#allocation5 + $0x2b0] sm:$0xff] }
 0x1d5   :  { %v183_v51 = vld [vmem:[#allocation5 + $0x2f0] sm:$0xff] }
 0x1d6   :  { %v7926_v8 = vcombine.low %v175_v50, %v183_v51 }
 0x1d7   :  { %3681 = vmatpush1.bf16.msra.mxu0 %v8322_v1  ;;  %3767 = vmatpush1.bf16.msra.mxu1 %v8324_v2  ;;  %v7927_v1 = vcombine.high %v175_v50, %v183_v51  ;;  %v7929_v2 = vcombine.high %v176_v52, %v184_v55  ;;  %v280_v50 = vld [vmem:[#allocation5 + $0x5f8] sm:$0xff] }
 0x1d8   :  { %3682 = vmatprep.subr.bf16.mxu0 %v8339_v4  ;;  %3768 = vmatprep.subr.bf16.mxu1 %v8341_v5  ;;  %v191_v4 = vld [vmem:[#allocation5 + $0x330] sm:$0xff] }
 0x1d9   :  { %v199_v5 = vld [vmem:[#allocation5 + $0x370] sm:$0xff] }
 0x1da   :  { %v7942_v16 = vcombine.low %v191_v4, %v199_v5 }
 0x1db   :  { %3683 = vmatpush1.bf16.msra.mxu0 %v8338_v10  ;;  %3769 = vmatpush1.bf16.msra.mxu1 %v8340_v11  ;;  %v7943_v10 = vcombine.high %v191_v4, %v199_v5  ;;  %v7945_v11 = vcombine.high %v192_v6, %v200_v7  ;;  %v296_v4 = vld [vmem:[#allocation5 + $0x678] sm:$0xff] }
 0x1dc   :  { %3781 = vmatprep.subr.bf16.mxu0 %v7847_v12  ;;  %3867 = vmatprep.subr.bf16.mxu1 %v7849_v13  ;;  %v207_v12 = vld [vmem:[#allocation5 + $0x3b0] sm:$0xff] }
 0x1dd   :  { %v215_v13 = vld [vmem:[#allocation5 + $0x3f0] sm:$0xff] }
 0x1de   :  { %3685 = vmatmul.mubr.bf16.vlgmr.msra.gmra.mrb[8].mxu0 %v10078_v24  ;;  %3771 = vmatmul.mubr.bf16.vlgmr.msra.gmra.mrb[8].mxu1 %v10078_v24  ;;  %v7958_v25 = vcombine.low %v207_v12, %v215_v13 }
 0x1df   :  { %3782 = vmatpush1.bf16.msra.mxu0 %v7846_v18  ;;  %3868 = vmatpush1.bf16.msra.mxu1 %v7848_v19  ;;  %v7959_v18 = vcombine.high %v207_v12, %v215_v13  ;;  %v7961_v19 = vcombine.high %v208_v14, %v216_v15  ;;  %v312_v12 = vld [vmem:[#allocation5 + $0x6f8] sm:$0xff] }
 0x1e0   :  { %3783 = vmatprep.subr.bf16.mxu0 %v7863_v20  ;;  %3869 = vmatprep.subr.bf16.mxu1 %v7865_v21  ;;  %v223_v20 = vld [vmem:[#allocation5 + $0x430] sm:$0xff] }
 0x1e1   :  { %3813 = vmatprep.mubr.bf16.mxu0 %v9785_v34  ;;  %3899 = vmatprep.mubr.bf16.mxu1 %v9785_v34  ;;  %v231_v21 = vld [vmem:[#allocation5 + $0x470] sm:$0xff] }
 0x1e2   :  { %v7974_v34 = vcombine.low %v223_v20, %v231_v21 }
 0x1e3   :  { %3784 = vmatpush1.bf16.msra.mxu0 %v7862_v27  ;;  %3870 = vmatpush1.bf16.msra.mxu1 %v7864_v28  ;;  %v7975_v27 = vcombine.high %v223_v20, %v231_v21  ;;  %v7977_v28 = vcombine.high %v224_v22, %v232_v23  ;;  %v328_v20 = vld [vmem:[#allocation5 + $0x778] sm:$0xff] }
 0x1e4   :  { %3785 = vmatprep.subr.bf16.mxu0 %v7879_v30  ;;  %3871 = vmatprep.subr.bf16.mxu1 %v7881_v31  ;;  %v239_v30 = vld [vmem:[#allocation5 + $0x4b0] sm:$0xff] }
 0x1e5   :  { %v247_v31 = vld [vmem:[#allocation5 + $0x4f0] sm:$0xff] }
 0x1e6   :  { %v7991_v37 = vcombine.high %v239_v30, %v247_v31  ;;  %v7990_v43 = vcombine.low %v239_v30, %v247_v31  ;;  %v344_v30 = vld [vmem:[#allocation5 + $0x7f8] sm:$0xff] }
 0x1e7   :  { %3786 = vmatpush1.bf16.msra.mxu0 %v7878_v38  ;;  %3872 = vmatpush1.bf16.msra.mxu1 %v7880_v39  ;;  %v7993_v38 = vcombine.high %v240_v32, %v248_v33  ;;  %v255_v39 = vld [vmem:[#allocation5 + $0x530] sm:$0xff] }
 0x1e8   :  { %3787 = vmatprep.subr.bf16.mxu0 %v7895_v40  ;;  %3873 = vmatprep.subr.bf16.mxu1 %v7897_v41  ;;  %v263_v40 = vld [vmem:[#allocation5 + $0x570] sm:$0xff]  ;;  %v256_v41 = vld [vmem:[#allocation5 + $0x538] sm:$0xff] }
 0x1e9   :  { %v8007_v56 = vcombine.high %v255_v39, %v263_v40  ;;  %v8006_v51 = vcombine.low %v255_v39, %v263_v40  ;;  %v8008_v52 = vcombine.low %v256_v41, %v264_v42  ;;  %v360_v39 = vld [vmem:[#allocation5 + $0x878] sm:$0xff] }
 0x1eb   :  { %3788 = vmatpush1.bf16.msra.mxu0 %v7894_v45  ;;  %3874 = vmatpush1.bf16.msra.mxu1 %v7896_v46  ;;  %v8009_v45 = vcombine.high %v256_v41, %v264_v42  ;;  %v271_v46 = vld [vmem:[#allocation5 + $0x5b0] sm:$0xff] }
 0x1ec   :  { %3789 = vmatprep.subr.bf16.mxu0 %v7911_v48  ;;  %3875 = vmatprep.subr.bf16.mxu1 %v7913_v49  ;;  %v279_v48 = vld [vmem:[#allocation5 + $0x5f0] sm:$0xff]  ;;  %v272_v49 = vld [vmem:[#allocation5 + $0x5b8] sm:$0xff] }
 0x1ed   :  { %v8023_v55 = vcombine.high %v271_v46, %v279_v48  ;;  %v8022_v5 = vcombine.low %v271_v46, %v279_v48  ;;  %v8024_v6 = vcombine.low %v272_v49, %v280_v50  ;;  %v376_v46 = vld [vmem:[#allocation5 + $0x8f8] sm:$0xff] }
 0x1ef   :  { %3790 = vmatpush1.bf16.msra.mxu0 %v7910_v57  ;;  %3876 = vmatpush1.bf16.msra.mxu1 %v7912_v0  ;;  %v8025_v57 = vcombine.high %v272_v49, %v280_v50  ;;  %v287_v0 = vld [vmem:[#allocation5 + $0x630] sm:$0xff] }
 0x1f0   :  { %3791 = vmatprep.subr.bf16.mxu0 %v7927_v1  ;;  %3877 = vmatprep.subr.bf16.mxu1 %v7929_v2  ;;  %v295_v1 = vld [vmem:[#allocation5 + $0x670] sm:$0xff]  ;;  %v288_v2 = vld [vmem:[#allocation5 + $0x638] sm:$0xff] }
 0x1f1   :  { %v8039_v7 = vcombine.high %v287_v0, %v295_v1  ;;  %v8038_v13 = vcombine.low %v287_v0, %v295_v1  ;;  %v8040_v14 = vcombine.low %v288_v2, %v296_v4  ;;  %v392_v0 = vld [vmem:[#allocation5 + $0x978] sm:$0xff] }
 0x1f3   :  { %3792 = vmatpush1.bf16.msra.mxu0 %v7926_v8  ;;  %3878 = vmatpush1.bf16.msra.mxu1 %v7928_v9  ;;  %v8041_v8 = vcombine.high %v288_v2, %v296_v4  ;;  %v303_v9 = vld [vmem:[#allocation5 + $0x6b0] sm:$0xff] }
 0x1f4   :  { %3793 = vmatprep.subr.bf16.mxu0 %v7943_v10  ;;  %3879 = vmatprep.subr.bf16.mxu1 %v7945_v11  ;;  %v311_v10 = vld [vmem:[#allocation5 + $0x6f0] sm:$0xff]  ;;  %v304_v11 = vld [vmem:[#allocation5 + $0x6b8] sm:$0xff] }
 0x1f5   :  { %v8055_v15 = vcombine.high %v303_v9, %v311_v10  ;;  %v8054_v21 = vcombine.low %v303_v9, %v311_v10  ;;  %v8056_v22 = vcombine.low %v304_v11, %v312_v12  ;;  %v408_v9 = vld [vmem:[#allocation5 + $0x9f8] sm:$0xff] }
 0x1f7   :  { %3794 = vmatpush1.bf16.msra.mxu0 %v7942_v16  ;;  %3880 = vmatpush1.bf16.msra.mxu1 %v7944_v17  ;;  %v8057_v16 = vcombine.high %v304_v11, %v312_v12  ;;  %v319_v17 = vld [vmem:[#allocation5 + $0x730] sm:$0xff] }
 0x1f8   :  { %3795 = vmatprep.subr.bf16.mxu0 %v7959_v18  ;;  %3881 = vmatprep.subr.bf16.mxu1 %v7961_v19  ;;  %v327_v18 = vld [vmem:[#allocation5 + $0x770] sm:$0xff]  ;;  %v320_v19 = vld [vmem:[#allocation5 + $0x738] sm:$0xff] }
 0x1f9   :  { %v8071_v23 = vcombine.high %v319_v17, %v327_v18  ;;  %v8070_v31 = vcombine.low %v319_v17, %v327_v18  ;;  %v8072_v32 = vcombine.low %v320_v19, %v328_v20 }
 0x1fb   :  { %3796 = vmatpush1.bf16.msra.mxu0 %v7958_v25  ;;  %3882 = vmatpush1.bf16.msra.mxu1 %v7960_v26  ;;  %v8073_v25 = vcombine.high %v320_v19, %v328_v20  ;;  %v335_v26 = vld [vmem:[#allocation5 + $0x7b0] sm:$0xff] }
 0x1fc   :  { %3797 = vmatprep.subr.bf16.mxu0 %v7975_v27  ;;  %3883 = vmatprep.subr.bf16.mxu1 %v7977_v28  ;;  %v343_v27 = vld [vmem:[#allocation5 + $0x7f0] sm:$0xff]  ;;  %v336_v28 = vld [vmem:[#allocation5 + $0x7b8] sm:$0xff] }
 0x1fd   :  { %v8087_v33 = vcombine.high %v335_v26, %v343_v27  ;;  %v8086_v40 = vcombine.low %v335_v26, %v343_v27  ;;  %v8088_v41 = vcombine.low %v336_v28, %v344_v30  ;;  %v431_v20 = vld [vmem:[#allocation5 + $0xab0] sm:$0xff]  ;;  %v631_v27 = vsub.s32 6, %v10046_v47 }
 0x1ff   :  { %3798 = vmatpush1.bf16.msra.mxu0 %v7974_v34  ;;  %3884 = vmatpush1.bf16.msra.mxu1 %v7976_v35  ;;  %v8089_v34 = vcombine.high %v336_v28, %v344_v30  ;;  %v351_v35 = vld [vmem:[#allocation5 + $0x830] sm:$0xff]  ;;  %v627_v28 = vsub.s32 5, %v10046_v47 }
 0x200   :  { %3799 = vmatprep.subr.bf16.mxu0 %v7991_v37  ;;  %3885 = vmatprep.subr.bf16.mxu1 %v7993_v38  ;;  %v359_v37 = vld [vmem:[#allocation5 + $0x870] sm:$0xff]  ;;  %v352_v38 = vld [vmem:[#allocation5 + $0x838] sm:$0xff] }
 0x201   :  { %v8103_v42 = vcombine.high %v351_v35, %v359_v37  ;;  %v8102_v48 = vcombine.low %v351_v35, %v359_v37  ;;  %v8104_v49 = vcombine.low %v352_v38, %v360_v39  ;;  %v455_v35 = vld [vmem:[#allocation5 + $0xb70] sm:$0xff] }
 0x203   :  { %3800 = vmatpush1.bf16.msra.mxu0 %v7990_v43  ;;  %3886 = vmatpush1.bf16.msra.mxu1 %v7992_v44  ;;  %v8105_v43 = vcombine.high %v352_v38, %v360_v39  ;;  %v367_v44 = vld [vmem:[#allocation5 + $0x8b0] sm:$0xff]  ;;  %v448_v38 = vld [vmem:[#allocation5 + $0xb38] sm:$0xff] }
 0x204   :  { %3801 = vmatprep.subr.bf16.mxu0 %v8007_v56  ;;  %3887 = vmatprep.subr.bf16.mxu1 %v8009_v45  ;;  %v375_v56 = vld [vmem:[#allocation5 + $0x8f0] sm:$0xff]  ;;  %v368_v45 = vld [vmem:[#allocation5 + $0x8b8] sm:$0xff] }
 0x205   :  { %v8119_v50 = vcombine.high %v367_v44, %v375_v56  ;;  %v8118_v1 = vcombine.low %v367_v44, %v375_v56  ;;  %v8120_v2 = vcombine.low %v368_v45, %v376_v46  ;;  %v456_v39 = vld [vmem:[#allocation5 + $0xb78] sm:$0xff] }
 0x207   :  { %3802 = vmatpush1.bf16.msra.mxu0 %v8006_v51  ;;  %3888 = vmatpush1.bf16.msra.mxu1 %v8008_v52  ;;  %v8121_v51 = vcombine.high %v368_v45, %v376_v46  ;;  %v383_v52 = vld [vmem:[#allocation5 + $0x930] sm:$0xff]  ;;  %v8201_v46 = vcombine.high %v448_v38, %v456_v39 }
 0x208   :  { %3803 = vmatprep.subr.bf16.mxu0 %v8023_v55  ;;  %3889 = vmatprep.subr.bf16.mxu1 %v8025_v57  ;;  %v391_v55 = vld [vmem:[#allocation5 + $0x970] sm:$0xff]  ;;  %v384_v57 = vld [vmem:[#allocation5 + $0x938] sm:$0xff] }
 0x209   :  { %v8135_v4 = vcombine.high %v383_v52, %v391_v55  ;;  %v8134_v10 = vcombine.low %v383_v52, %v391_v55  ;;  %v464_v55 = vld [vmem:[#allocation5 + $0xbb8] sm:$0xff] }
 0x20b   :  { %3804 = vmatpush1.bf16.msra.mxu0 %v8022_v5  ;;  %3890 = vmatpush1.bf16.msra.mxu1 %v8024_v6  ;;  %v8137_v5 = vcombine.high %v384_v57, %v392_v0  ;;  %v399_v6 = vld [vmem:[#allocation5 + $0x9b0] sm:$0xff] }
 0x20c   :  { %3805 = vmatprep.subr.bf16.mxu0 %v8039_v7  ;;  %3891 = vmatprep.subr.bf16.mxu1 %v8041_v8  ;;  %v407_v7 = vld [vmem:[#allocation5 + $0x9f0] sm:$0xff]  ;;  %v400_v8 = vld [vmem:[#allocation5 + $0x9b8] sm:$0xff] }
 0x20d   :  { %v8151_v11 = vcombine.high %v399_v6, %v407_v7  ;;  %v8153_v12 = vcombine.high %v400_v8, %v408_v9  ;;  %v8150_v17 = vcombine.low %v399_v6, %v407_v7  ;;  %v8152_v18 = vcombine.low %v400_v8, %v408_v9 }
 0x20f   :  { %3806 = vmatpush1.bf16.msra.mxu0 %v8038_v13  ;;  %3892 = vmatpush1.bf16.msra.mxu1 %v8040_v14  ;;  %v415_v13 = vld [vmem:[#allocation5 + $0xa30] sm:$0xff] }
 0x210   :  { %3807 = vmatprep.subr.bf16.mxu0 %v8055_v15  ;;  %3893 = vmatprep.subr.bf16.mxu1 %v8057_v16  ;;  %v423_v14 = vld [vmem:[#allocation5 + $0xa70] sm:$0xff]  ;;  %v416_v15 = vld [vmem:[#allocation5 + $0xa38] sm:$0xff] }
 0x211   :  { %v424_v16 = vld [vmem:[#allocation5 + $0xa78] sm:$0xff]  ;;  %v8167_v19 = vcombine.high %v415_v13, %v423_v14  ;;  %v8166_v26 = vcombine.low %v415_v13, %v423_v14 }
 0x212   :  { %v8168_v30 = vcombine.low %v416_v15, %v424_v16 }
 0x213   :  { %3808 = vmatpush1.bf16.msra.mxu0 %v8054_v21  ;;  %3894 = vmatpush1.bf16.msra.mxu1 %v8056_v22  ;;  %v439_v21 = vld [vmem:[#allocation5 + $0xaf0] sm:$0xff]  ;;  %v623_v22 = vsub.s32 4, %v10046_v47 }
 0x214   :  { %3809 = vmatprep.subr.bf16.mxu0 %v8071_v23  ;;  %3895 = vmatprep.subr.bf16.mxu1 %v8073_v25  ;;  %v432_v23 = vld [vmem:[#allocation5 + $0xab8] sm:$0xff] }
 0x215   :  { %v440_v25 = vld [vmem:[#allocation5 + $0xaf8] sm:$0xff]  ;;  %v624_v37 = vrot.slane %v10051_v59, %v623_v22 }
 0x216   :  { %v8184_v44 = vcombine.low %v432_v23, %v440_v25 }
 0x217   :  { %3810 = vmatpush1.bf16.msra.mxu0 %v8070_v31  ;;  %3896 = vmatpush1.bf16.msra.mxu1 %v8072_v32  ;;  %v635_v31 = vsub.s32 7, %v10046_v47  ;;  %v8183_v32 = vcombine.high %v431_v20, %v439_v21 }
 0x218   :  { %3811 = vmatprep.subr.bf16.mxu0 %v8087_v33  ;;  %3897 = vmatprep.subr.bf16.mxu1 %v8089_v34  ;;  %v8185_v33 = vcombine.high %v432_v23, %v440_v25  ;;  %v447_v34 = vld [vmem:[#allocation5 + $0xb30] sm:$0xff] }
 0x219   :  { %v8199_v56 = vcombine.high %v447_v34, %v455_v35 }
 0x21b   :  { %3812 = vmatpush1.bf16.msra.mxu0 %v8086_v40  ;;  %3898 = vmatpush1.bf16.msra.mxu1 %v8088_v41  ;;  %v632_v40 = vrot.slane %v10051_v59, %v631_v27  ;;  %v628_v41 = vrot.slane %v10051_v59, %v627_v28 }
 0x21c   :  { %3824 = vmatprep.subr.bf16.mxu0 %v8103_v42  ;;  %3910 = vmatprep.subr.bf16.mxu1 %v8105_v43  ;;  %v8182_v42 = vcombine.low %v431_v20, %v439_v21  ;;  %v636_v43 = vrot.slane %v10051_v59, %v635_v31  ;;  %v8200_v59 = vcombine.low %v448_v38, %v456_v39  ;;  %v480_v20 = vld [vmem:[#allocation5 + $0xc38] sm:$0xff] }
 0x21d   :  { %v488_v21 = vld [vmem:[#allocation5 + $0xc78] sm:$0xff] }
 0x21e   :  { %3814 = vmatmul.mubr.bf16.vlgmr.msra.gmra.mrb[12].mxu0 %v10038_v29  ;;  %3900 = vmatmul.mubr.bf16.vlgmr.msra.gmra.mrb[12].mxu1 %v10038_v29  ;;  %v8136_v29 = vcombine.low %v384_v57, %v392_v0  ;;  %v472_v57 = vld [vmem:[#allocation5 + $0xbf8] sm:$0xff]  ;;  %v8233_v39 = vcombine.high %v480_v20, %v488_v21 }
 0x21f   :  { %3825 = vmatpush1.bf16.msra.mxu0 %v8102_v48  ;;  %3911 = vmatpush1.bf16.msra.mxu1 %v8104_v49  ;;  %v463_v48 = vld [vmem:[#allocation5 + $0xbb0] sm:$0xff]  ;;  %v8217_v14 = vcombine.high %v464_v55, %v472_v57 }
 0x220   :  { %3826 = vmatprep.subr.bf16.mxu0 %v8119_v50  ;;  %3912 = vmatprep.subr.bf16.mxu1 %v8121_v51  ;;  %v471_v49 = vld [vmem:[#allocation5 + $0xbf0] sm:$0xff] }
 0x221   :  { %3856 = vmatprep.mubr.bf16.mxu0 %v10042_v36  ;;  %3942 = vmatprep.mubr.bf16.mxu1 %v10042_v36  ;;  %v8169_v36 = vcombine.high %v416_v15, %v424_v16  ;;  %v8214_v13 = vcombine.low %v463_v48, %v471_v49  ;;  %v479_v15 = vld [vmem:[#allocation5 + $0xc30] sm:$0xff] }
 0x222   :  { %v487_v16 = vld [vmem:[#allocation5 + $0xc70] sm:$0xff] }
 0x223   :  { %3827 = vmatpush1.bf16.msra.mxu0 %v8118_v1  ;;  %3913 = vmatpush1.bf16.msra.mxu1 %v8120_v2 }
 0x224   :  { %3828 = vmatprep.subr.bf16.mxu0 %v8135_v4  ;;  %3914 = vmatprep.subr.bf16.mxu1 %v8137_v5  ;;  %v8198_v5 = vcombine.low %v447_v34, %v455_v35  ;;  %v8231_v35 = vcombine.high %v479_v15, %v487_v16 }
 0x227   :  { %3829 = vmatpush1.bf16.msra.mxu0 %v8134_v10  ;;  %3915 = vmatpush1.bf16.msra.mxu1 %v8136_v29  ;;  %v8215_v10 = vcombine.high %v463_v48, %v471_v49  ;;  %v511_v49 = vld [vmem:[#allocation5 + $0xd30] sm:$0xff] }
 0x228   :  { %3830 = vmatprep.subr.bf16.mxu0 %v8151_v11  ;;  %3916 = vmatprep.subr.bf16.mxu1 %v8153_v12 }
 0x22b   :  { %3831 = vmatpush1.bf16.msra.mxu0 %v8150_v17  ;;  %3917 = vmatpush1.bf16.msra.mxu1 %v8152_v18 }
 0x22c   :  { %3832 = vmatprep.subr.bf16.mxu0 %v8167_v19  ;;  %3918 = vmatprep.subr.bf16.mxu1 %v8169_v36  ;;  %v8216_v36 = vcombine.low %v464_v55, %v472_v57 }
 0x22f   :  { %3833 = vmatpush1.bf16.msra.mxu0 %v8166_v26  ;;  %3919 = vmatpush1.bf16.msra.mxu1 %v8168_v30 }
 0x230   :  { %3834 = vmatprep.subr.bf16.mxu0 %v8183_v32  ;;  %3920 = vmatprep.subr.bf16.mxu1 %v8185_v33 }
 0x231   :  { %v3514_v45 = vpop.f32.mrb[4].mxu0  ;;  %v3600_v51 = vpop.f32.mrb[4].mxu1 }
 0x232   :  { %v8874_v50 = vadd.f32 %v3514_v45, %v624_v37  ;;  %v3516_v52 = vpop.f32.mrb[5].mxu0  ;;  %v8878_v0 = vadd.f32 %v3600_v51, %v632_v40  ;;  %v3602_v2 = vpop.f32.mrb[5].mxu1  ;;  %v8232_v45 = vcombine.low %v480_v20, %v488_v21  ;;  %v512_v51 = vld [vmem:[#allocation5 + $0xd38] sm:$0xff] }
 0x233   :  { %v8875_v1 = vadd.f32 %v3516_v52, %v628_v41  ;;  %v3518_v4 = vpop.f32.mrb[6].mxu0  ;;  %3835 = vmatpush1.bf16.msra.mxu0 %v8182_v42  ;;  %v8879_v6 = vadd.f32 %v3602_v2, %v636_v43  ;;  %v3604_v8 = vpop.f32.mrb[6].mxu1  ;;  %3921 = vmatpush1.bf16.msra.mxu1 %v8184_v44  ;;  %v504_v44 = vld [vmem:[#allocation5 + $0xcf8] sm:$0xff]  ;;  %v527_v2 = vld [vmem:[#allocation5 + $0xdb0] sm:$0xff] }
 0x234   :  { %v8876_v7 = vadd.f32 %v3518_v4, %v624_v37  ;;  %v3520_v9 = vpop.f32.mrb[7].mxu0  ;;  %3836 = vmatprep.subr.bf16.mxu0 %v8199_v56  ;;  %v8880_v29 = vadd.f32 %v3604_v8, %v632_v40  ;;  %v3606_v12 = vpop.f32.mrb[7].mxu1  ;;  %3922 = vmatprep.subr.bf16.mxu1 %v8201_v46  ;;  %v3957_v17 = vmax.f32 %v8874_v50, 0.0  ;;  %v3959_v23 = vmax.f32 %v8878_v0, 0.0  ;;  %v495_v40 = vld [vmem:[#allocation5 + $0xcb0] sm:$0xff]  ;;  %v520_v52 = vld [vmem:[#allocation5 + $0xd78] sm:$0xff] }
 0x235   :  { %v8877_v11 = vadd.f32 %v3520_v9, %v628_v41  ;;  %v8881_v19 = vadd.f32 %v3606_v12, %v636_v43  ;;  %v3958_v25 = vmax.f32 %v8875_v1, 0.0  ;;  %v3960_v32 = vmax.f32 %v8879_v6, 0.0  ;;  %v503_v41 = vld [vmem:[#allocation5 + $0xcf0] sm:$0xff]  ;;  %v496_v43 = vld [vmem:[#allocation5 + $0xcb8] sm:$0xff] }
 0x236   :  { %v3973_v18 = vmax.f32 %v8876_v7, 0.0  ;;  %v3975_v26 = vmax.f32 %v8880_v29, 0.0  ;;  %v8230_v56 = vcombine.low %v479_v15, %v487_v16  ;;  %v8247_v46 = vcombine.high %v495_v40, %v503_v41  ;;  %v519_v50 = vld [vmem:[#allocation5 + $0xd70] sm:$0xff]  ;;  %v552_v12 = vld [vmem:[#allocation5 + $0xe78] sm:$0xff] }
 0x237   :  { %v3974_v30 = vmax.f32 %v8877_v11, 0.0  ;;  %3837 = vmatpush1.bf16.msra.mxu0 %v8198_v5  ;;  %v3976_v34 = vmax.f32 %v8881_v19, 0.0  ;;  %3923 = vmatpush1.bf16.msra.mxu1 %v8200_v59  ;;  %v8249_v48 = vcombine.high %v496_v43, %v504_v44  ;;  %v8246_v55 = vcombine.low %v495_v40, %v503_v41  ;;  %v535_v4 = vld [vmem:[#allocation5 + $0xdf0] sm:$0xff]  ;;  %v528_v5 = vld [vmem:[#allocation5 + $0xdb8] sm:$0xff] }
 0x238   :  { %v10102_v33 = vpack.c.bf16 %v3973_v18, %v3957_v17  ;;  %3838 = vmatprep.subr.bf16.mxu0 %v8215_v10  ;;  %v10104_v37 = vpack.c.bf16 %v3975_v26, %v3959_v23  ;;  %3924 = vmatprep.subr.bf16.mxu1 %v8217_v14  ;;  %v8248_v57 = vcombine.low %v496_v43, %v504_v44  ;;  %v536_v59 = vld [vmem:[#allocation5 + $0xdf8] sm:$0xff]  ;;  %v543_v10 = vld [vmem:[#allocation5 + $0xe30] sm:$0xff] }
 0x239   :  { %v10106_v38 = vpack.c.bf16 %v3974_v30, %v3958_v25  ;;  %v10108_v42 = vpack.c.bf16 %v3976_v34, %v3960_v32  ;;  %v8263_v0 = vcombine.high %v511_v49, %v519_v50  ;;  %v8265_v1 = vcombine.high %v512_v51, %v520_v52  ;;  %v551_v29 = vld [vmem:[#allocation5 + $0xe70] sm:$0xff]  ;;  %v544_v11 = vld [vmem:[#allocation5 + $0xe38] sm:$0xff] }
 0x23a   :  { %v8262_v6 = vcombine.low %v511_v49, %v519_v50  ;;  %v8264_v7 = vcombine.low %v512_v51, %v520_v52  ;;  %v8279_v8 = vcombine.high %v527_v2, %v535_v4  ;;  %v8281_v9 = vcombine.high %v528_v5, %v536_v59  ;;  %v559_v17 = vld [vmem:[#allocation5 + $0xeb0] sm:$0xff]  ;;  %v560_v19 = vld [vmem:[#allocation5 + $0xeb8] sm:$0xff] }
 0x23b   :  { %3839 = vmatpush1.bf16.msra.mxu0 %v8214_v13  ;;  %3925 = vmatpush1.bf16.msra.mxu1 %v8216_v36  ;;  %v8278_v13 = vcombine.low %v527_v2, %v535_v4  ;;  %v8280_v14 = vcombine.low %v528_v5, %v536_v59  ;;  %v8295_v15 = vcombine.high %v543_v10, %v551_v29  ;;  %v567_v18 = vld [vmem:[#allocation5 + $0xef0] sm:$0xff]  ;;  %v568_v36 = vld [vmem:[#allocation5 + $0xef8] sm:$0xff] }
 0x23c   :  { %3840 = vmatprep.subr.bf16.mxu0 %v8231_v35  ;;  %3926 = vmatprep.subr.bf16.mxu1 %v8233_v39  ;;  %v8297_v16 = vcombine.high %v544_v11, %v552_v12  ;;  %v8294_v20 = vcombine.low %v543_v10, %v551_v29  ;;  %v8296_v21 = vcombine.low %v544_v11, %v552_v12  ;;  %v575_v26 = vld [vmem:[#allocation5 + $0xf30] sm:$0xff]  ;;  %v576_v32 = vld [vmem:[#allocation5 + $0xf38] sm:$0xff] }
 0x23d   :  { %v8311_v23 = vcombine.high %v559_v17, %v567_v18  ;;  %v8313_v25 = vcombine.high %v560_v19, %v568_v36  ;;  %v583_v30 = vld [vmem:[#allocation5 + $0xf70] sm:$0xff]  ;;  %v584_v34 = vld [vmem:[#allocation5 + $0xf78] sm:$0xff]  ;;  %v8310_v35 = vcombine.low %v559_v17, %v567_v18  ;;  %v8312_v39 = vcombine.low %v560_v19, %v568_v36 }
 0x23e   :  { %v8327_v40 = vcombine.high %v575_v26, %v583_v30  ;;  %v8329_v41 = vcombine.high %v576_v32, %v584_v34  ;;  %v591_v43 = vld [vmem:[#allocation5 + $0xfb0] sm:$0xff]  ;;  %v9021_v4 = vld [vmem:[#allocation8 + $0x2c] ss:$16 sps:$4 sm:$0xff]   ;;  %v9019_v59 = vld [vmem:[#allocation8 + $0x28] ss:$16 sps:$4 sm:$0xff]  }
 0x23f   :  { %3841 = vmatpush1.bf16.msra.mxu0 %v8230_v56  ;;  %3927 = vmatpush1.bf16.msra.mxu1 %v8232_v45  ;;  %v599_v44 = vld [vmem:[#allocation5 + $0xff0] sm:$0xff]  ;;  %v592_v56 = vld [vmem:[#allocation5 + $0xfb8] sm:$0xff] }
 0x240   :  { %3842 = vmatprep.subr.bf16.mxu0 %v8247_v46  ;;  %3928 = vmatprep.subr.bf16.mxu1 %v8249_v48  ;;  %v600_v45 = vld [vmem:[#allocation5 + $0xff8] sm:$0xff]  ;;  %v8326_v46 = vcombine.low %v575_v26, %v583_v30  ;;  %v8328_v48 = vcombine.low %v576_v32, %v584_v34  ;;  %v8343_v49 = vcombine.high %v591_v43, %v599_v44  ;;  %v9018_v2 = vld [vmem:[#allocation8 + $0x24] ss:$16 sps:$4 sm:$0xff]   ;;  %v9016_v5 = vld [vmem:[#allocation8 + $0x20] ss:$16 sps:$4 sm:$0xff]  }
 0x241   :  { %v8345_v50 = vcombine.high %v592_v56, %v600_v45  ;;  %v8342_v51 = vcombine.low %v591_v43, %v599_v44  ;;  %v8344_v52 = vcombine.low %v592_v56, %v600_v45  ;;  %v9030_v10 = vld [vmem:[#allocation8 + $0x64] ss:$16 sps:$4 sm:$0xff]   ;;  %v9028_v29 = vld [vmem:[#allocation8 + $0x60] ss:$16 sps:$4 sm:$0xff]   ;;  %v9031_v11 = vld [vmem:[#allocation8 + $0x68] ss:$16 sps:$4 sm:$0xff]  }
 0x242   :  { %v9036_v12 = vld [vmem:[#allocation8 + $0x84] ss:$16 sps:$4 sm:$0xff]   ;;  %v9040_v17 = vld [vmem:[#allocation8 + $0xa0] ss:$16 sps:$4 sm:$0xff]   ;;  %v9043_v18 = vld [vmem:[#allocation8 + $0xa8] ss:$16 sps:$4 sm:$0xff]  }
 0x243   :  { %3843 = vmatpush1.bf16.msra.mxu0 %v8246_v55  ;;  %3929 = vmatpush1.bf16.msra.mxu1 %v8248_v57  ;;  %v9012_v55 = vld [vmem:[#allocation8 + $0x4] ss:$16 sps:$4 sm:$0xff]   ;;  %v9015_v57 = vld [vmem:[#allocation8 + $0xc] ss:$16 sps:$4 sm:$0xff]   ;;  %v9052_v26 = vld [vmem:[#allocation8 + $0xe0] ss:$16 sps:$4 sm:$0xff]  }
 0x244   :  { %3844 = vmatprep.subr.bf16.mxu0 %v8263_v0  ;;  %3930 = vmatprep.subr.bf16.mxu1 %v8265_v1  ;;  %v9010_v0 = vld [vmem:[#allocation8] ss:$16 sps:$4 sm:$0xff]   ;;  %v9013_v1 = vld [vmem:[#allocation8 + $0x8] ss:$16 sps:$4 sm:$0xff]   ;;  %v9048_v19 = vld [vmem:[#allocation8 + $0xc4] ss:$16 sps:$4 sm:$0xff]  }
 0x245   :  { %v9051_v36 = vld [vmem:[#allocation8 + $0xcc] ss:$16 sps:$4 sm:$0xff]   ;;  %v9055_v30 = vld [vmem:[#allocation8 + $0xe8] ss:$16 sps:$4 sm:$0xff]   ;;  %v9060_v32 = vld [vmem:[#allocation8 + $0x104] ss:$16 sps:$4 sm:$0xff]  }
 0x246   :  { %v9063_v34 = vld [vmem:[#allocation8 + $0x10c] ss:$16 sps:$4 sm:$0xff]   ;;  %v9064_v43 = vld [vmem:[#allocation8 + $0x120] ss:$16 sps:$4 sm:$0xff]   ;;  %v9067_v44 = vld [vmem:[#allocation8 + $0x128] ss:$16 sps:$4 sm:$0xff]  }
 0x247   :  { %3845 = vmatpush1.bf16.msra.mxu0 %v8262_v6  ;;  %3931 = vmatpush1.bf16.msra.mxu1 %v8264_v7  ;;  %v9024_v6 = vld [vmem:[#allocation8 + $0x44] ss:$16 sps:$4 sm:$0xff]   ;;  %v9027_v7 = vld [vmem:[#allocation8 + $0x4c] ss:$16 sps:$4 sm:$0xff]  }
 0x248   :  { %3846 = vmatprep.subr.bf16.mxu0 %v8279_v8  ;;  %3932 = vmatprep.subr.bf16.mxu1 %v8281_v9  ;;  %v9022_v8 = vld [vmem:[#allocation8 + $0x40] ss:$16 sps:$4 sm:$0xff]   ;;  %v9025_v9 = vld [vmem:[#allocation8 + $0x48] ss:$16 sps:$4 sm:$0xff]   ;;  %v9072_v56 = vld [vmem:[#allocation8 + $0x144] ss:$16 sps:$4 sm:$0xff]  }
 0x249   :  { %v9075_v45 = vld [vmem:[#allocation8 + $0x14c] ss:$16 sps:$4 sm:$0xff]  }
 0x24b   :  { %3847 = vmatpush1.bf16.msra.mxu0 %v8278_v13  ;;  %3933 = vmatpush1.bf16.msra.mxu1 %v8280_v14  ;;  %v9039_v13 = vld [vmem:[#allocation8 + $0x8c] ss:$16 sps:$4 sm:$0xff]   ;;  %v9037_v14 = vld [vmem:[#allocation8 + $0x88] ss:$16 sps:$4 sm:$0xff]  }
 0x24c   :  { %3848 = vmatprep.subr.bf16.mxu0 %v8295_v15  ;;  %3934 = vmatprep.subr.bf16.mxu1 %v8297_v16  ;;  %v9042_v15 = vld [vmem:[#allocation8 + $0xa4] ss:$16 sps:$4 sm:$0xff]   ;;  %v9045_v16 = vld [vmem:[#allocation8 + $0xac] ss:$16 sps:$4 sm:$0xff]  }
 0x24f   :  { %3849 = vmatpush1.bf16.msra.mxu0 %v8294_v20  ;;  %3935 = vmatpush1.bf16.msra.mxu1 %v8296_v21  ;;  %v9046_v20 = vld [vmem:[#allocation8 + $0xc0] ss:$16 sps:$4 sm:$0xff]   ;;  %v9049_v21 = vld [vmem:[#allocation8 + $0xc8] ss:$16 sps:$4 sm:$0xff]  }
 0x250   :  { %3850 = vmatprep.subr.bf16.mxu0 %v8311_v23  ;;  %3936 = vmatprep.subr.bf16.mxu1 %v8313_v25  ;;  %v9054_v23 = vld [vmem:[#allocation8 + $0xe4] ss:$16 sps:$4 sm:$0xff]   ;;  %v9057_v25 = vld [vmem:[#allocation8 + $0xec] ss:$16 sps:$4 sm:$0xff]  }
 0x253   :  { %3851 = vmatpush1.bf16.msra.mxu0 %v8310_v35  ;;  %3937 = vmatpush1.bf16.msra.mxu1 %v8312_v39  ;;  %v9058_v35 = vld [vmem:[#allocation8 + $0x100] ss:$16 sps:$4 sm:$0xff]   ;;  %v9061_v39 = vld [vmem:[#allocation8 + $0x108] ss:$16 sps:$4 sm:$0xff]  }
 0x254   :  { %3852 = vmatprep.subr.bf16.mxu0 %v8327_v40  ;;  %3938 = vmatprep.subr.bf16.mxu1 %v8329_v41  ;;  %v9066_v40 = vld [vmem:[#allocation8 + $0x124] ss:$16 sps:$4 sm:$0xff]   ;;  %v9069_v41 = vld [vmem:[#allocation8 + $0x12c] ss:$16 sps:$4 sm:$0xff]  }
 0x257   :  { %3853 = vmatpush1.bf16.msra.mxu0 %v8326_v46  ;;  %3939 = vmatpush1.bf16.msra.mxu1 %v8328_v48  ;;  %v9070_v46 = vld [vmem:[#allocation8 + $0x140] ss:$16 sps:$4 sm:$0xff]   ;;  %v9073_v48 = vld [vmem:[#allocation8 + $0x148] ss:$16 sps:$4 sm:$0xff]  }
 0x258   :  { %3854 = vmatprep.subr.bf16.mxu0 %v8343_v49  ;;  %3940 = vmatprep.subr.bf16.mxu1 %v8345_v50  ;;  %v9078_v49 = vld [vmem:[#allocation8 + $0x164] ss:$16 sps:$4 sm:$0xff]   ;;  %v9081_v50 = vld [vmem:[#allocation8 + $0x16c] ss:$16 sps:$4 sm:$0xff]  }
 0x25b   :  { %3855 = vmatpush1.bf16.msra.mxu0 %v8342_v51  ;;  %3941 = vmatpush1.bf16.msra.mxu1 %v8344_v52  ;;  %v9076_v51 = vld [vmem:[#allocation8 + $0x160] ss:$16 sps:$4 sm:$0xff]   ;;  %v9079_v52 = vld [vmem:[#allocation8 + $0x168] ss:$16 sps:$4 sm:$0xff]  }
 0x25c   :  { %7095 = vmatprep.subr.bf16.mxu0 %v9012_v55  ;;  %7439 = vmatprep.subr.bf16.mxu1 %v9015_v57  ;;  %v9084_v55 = vld [vmem:[#allocation8 + $0x184] ss:$16 sps:$4 sm:$0xff]   ;;  %v9087_v57 = vld [vmem:[#allocation8 + $0x18c] ss:$16 sps:$4 sm:$0xff]  }
 0x25e   :  { %3857 = vmatmul.mubr.bf16.vlgmr.msra.gmra.mrb[12].mxu0 %v10078_v24  ;;  %3943 = vmatmul.mubr.bf16.vlgmr.msra.gmra.mrb[12].mxu1 %v10078_v24  ;;  %v9033_v24 = vld [vmem:[#allocation8 + $0x6c] ss:$16 sps:$4 sm:$0xff]  }
 0x25f   :  { %7096 = vmatpush1.bf16.msra.mxu0 %v9010_v0  ;;  %7127 = vmatprep.mubr.bf16.mxu0 %v10074_v62  ;;  %v9082_v0 = vld [vmem:[#allocation8 + $0x180] ss:$16 sps:$4 sm:$0xff]  }
 0x260   :  { %7440 = vmatpush1.bf16.msra.mxu1 %v9013_v1  ;;  %7471 = vmatprep.mubr.bf16.mxu1 %v10074_v62  ;;  %v9034_v62 = vld [vmem:[#allocation8 + $0x80] ss:$16 sps:$4 sm:$0xff]   ;;  %v9085_v1 = vld [vmem:[#allocation8 + $0x188] ss:$16 sps:$4 sm:$0xff]  }
 0x261   :  { %7097 = vmatprep.subr.bf16.mxu0 %v9018_v2  ;;  %7441 = vmatprep.subr.bf16.mxu1 %v9021_v4  ;;  %v9090_v2 = vld [vmem:[#allocation8 + $0x1a4] ss:$16 sps:$4 sm:$0xff]   ;;  %v9093_v4 = vld [vmem:[#allocation8 + $0x1ac] ss:$16 sps:$4 sm:$0xff]  }
 0x263   :  { %7098 = vmatpush1.bf16.msra.mxu0 %v9016_v5  ;;  %v9088_v5 = vld [vmem:[#allocation8 + $0x1a0] ss:$16 sps:$4 sm:$0xff]  }
 0x264   :  { %7442 = vmatpush1.bf16.msra.mxu1 %v9019_v59  ;;  %7099 = vmatprep.subr.bf16.mxu0 %v9024_v6  ;;  %v9091_v59 = vld [vmem:[#allocation8 + $0x1a8] ss:$16 sps:$4 sm:$0xff]   ;;  %v9096_v6 = vld [vmem:[#allocation8 + $0x1c4] ss:$16 sps:$4 sm:$0xff]  }
 0x265   :  { %7443 = vmatprep.subr.bf16.mxu1 %v9027_v7  ;;  %v9099_v7 = vld [vmem:[#allocation8 + $0x1cc] ss:$16 sps:$4 sm:$0xff]  }
 0x267   :  { %7100 = vmatpush1.bf16.msra.mxu0 %v9022_v8  ;;  %v9094_v8 = vld [vmem:[#allocation8 + $0x1c0] ss:$16 sps:$4 sm:$0xff]  }
 0x268   :  { %7444 = vmatpush1.bf16.msra.mxu1 %v9025_v9  ;;  %7101 = vmatprep.subr.bf16.mxu0 %v9030_v10  ;;  %v9097_v9 = vld [vmem:[#allocation8 + $0x1c8] ss:$16 sps:$4 sm:$0xff]   ;;  %v9102_v10 = vld [vmem:[#allocation8 + $0x1e4] ss:$16 sps:$4 sm:$0xff]  }
 0x269   :  { %7445 = vmatprep.subr.bf16.mxu1 %v9033_v24  ;;  %v9105_v24 = vld [vmem:[#allocation8 + $0x1ec] ss:$16 sps:$4 sm:$0xff]  }
 0x26b   :  { %7102 = vmatpush1.bf16.msra.mxu0 %v9028_v29  ;;  %v9100_v29 = vld [vmem:[#allocation8 + $0x1e0] ss:$16 sps:$4 sm:$0xff]  }
 0x26c   :  { %7446 = vmatpush1.bf16.msra.mxu1 %v9031_v11  ;;  %7103 = vmatprep.subr.bf16.mxu0 %v9036_v12  ;;  %v9103_v11 = vld [vmem:[#allocation8 + $0x1e8] ss:$16 sps:$4 sm:$0xff]   ;;  %v9108_v12 = vld [vmem:[#allocation8 + $0x204] ss:$16 sps:$4 sm:$0xff]  }
 0x26d   :  { %7447 = vmatprep.subr.bf16.mxu1 %v9039_v13  ;;  %v9111_v13 = vld [vmem:[#allocation8 + $0x20c] ss:$16 sps:$4 sm:$0xff]  }
 0x26f   :  { %7104 = vmatpush1.bf16.msra.mxu0 %v9034_v62  ;;  %v9106_v62 = vld [vmem:[#allocation8 + $0x200] ss:$16 sps:$4 sm:$0xff]  }
 0x270   :  { %7448 = vmatpush1.bf16.msra.mxu1 %v9037_v14  ;;  %7105 = vmatprep.subr.bf16.mxu0 %v9042_v15  ;;  %v9109_v14 = vld [vmem:[#allocation8 + $0x208] ss:$16 sps:$4 sm:$0xff]   ;;  %v9114_v15 = vld [vmem:[#allocation8 + $0x224] ss:$16 sps:$4 sm:$0xff]  }
 0x271   :  { %7449 = vmatprep.subr.bf16.mxu1 %v9045_v16  ;;  %v9117_v16 = vld [vmem:[#allocation8 + $0x22c] ss:$16 sps:$4 sm:$0xff]  }
 0x273   :  { %7106 = vmatpush1.bf16.msra.mxu0 %v9040_v17  ;;  %v9112_v17 = vld [vmem:[#allocation8 + $0x220] ss:$16 sps:$4 sm:$0xff]  }
 0x274   :  { %7450 = vmatpush1.bf16.msra.mxu1 %v9043_v18  ;;  %7107 = vmatprep.subr.bf16.mxu0 %v9048_v19  ;;  %v9115_v18 = vld [vmem:[#allocation8 + $0x228] ss:$16 sps:$4 sm:$0xff]   ;;  %v9120_v19 = vld [vmem:[#allocation8 + $0x244] ss:$16 sps:$4 sm:$0xff]  }
 0x275   :  { %7451 = vmatprep.subr.bf16.mxu1 %v9051_v36  ;;  %v9123_v36 = vld [vmem:[#allocation8 + $0x24c] ss:$16 sps:$4 sm:$0xff]  }
 0x277   :  { %7108 = vmatpush1.bf16.msra.mxu0 %v9046_v20  ;;  %v9118_v20 = vld [vmem:[#allocation8 + $0x240] ss:$16 sps:$4 sm:$0xff]  }
 0x278   :  { %7452 = vmatpush1.bf16.msra.mxu1 %v9049_v21  ;;  %7109 = vmatprep.subr.bf16.mxu0 %v9054_v23  ;;  %v9121_v21 = vld [vmem:[#allocation8 + $0x248] ss:$16 sps:$4 sm:$0xff]   ;;  %v9126_v23 = vld [vmem:[#allocation8 + $0x264] ss:$16 sps:$4 sm:$0xff]  }
 0x279   :  { %7453 = vmatprep.subr.bf16.mxu1 %v9057_v25  ;;  %v9124_v25 = vld [vmem:[#allocation8 + $0x260] ss:$16 sps:$4 sm:$0xff]  }
 0x27b   :  { %7110 = vmatpush1.bf16.msra.mxu0 %v9052_v26  ;;  %v9127_v26 = vld [vmem:[#allocation8 + $0x268] ss:$16 sps:$4 sm:$0xff]  }
 0x27c   :  { %7454 = vmatpush1.bf16.msra.mxu1 %v9055_v30  ;;  %7111 = vmatprep.subr.bf16.mxu0 %v9060_v32  ;;  %v9132_v30 = vld [vmem:[#allocation8 + $0x284] ss:$16 sps:$4 sm:$0xff]   ;;  %v9135_v32 = vld [vmem:[#allocation8 + $0x28c] ss:$16 sps:$4 sm:$0xff]  }
 0x27d   :  { %7455 = vmatprep.subr.bf16.mxu1 %v9063_v34  ;;  %v10118_v34 = vld [vmem:[#allocation7 + $0x8] sm:$0xff] }
 0x27f   :  { %7112 = vmatpush1.bf16.msra.mxu0 %v9058_v35  ;;  %v9133_v35 = vld [vmem:[#allocation8 + $0x288] ss:$16 sps:$4 sm:$0xff]  }
 0x280   :  { %7456 = vmatpush1.bf16.msra.mxu1 %v9061_v39  ;;  %7113 = vmatprep.subr.bf16.mxu0 %v9066_v40  ;;  %v9138_v39 = vld [vmem:[#allocation8 + $0x2a4] ss:$16 sps:$4 sm:$0xff]   ;;  %v9141_v40 = vld [vmem:[#allocation8 + $0x2ac] ss:$16 sps:$4 sm:$0xff]  }
 0x281   :  { %7457 = vmatprep.subr.bf16.mxu1 %v9069_v41  ;;  %v640_v41 = vrot.slane %v10118_v34, %v10049_v54 }
 0x283   :  { %7114 = vmatpush1.bf16.msra.mxu0 %v9064_v43  ;;  %v648_v43 = vrot.slane %v10118_v34, %v10054_v60 }
 0x284   :  { %7458 = vmatpush1.bf16.msra.mxu1 %v9067_v44  ;;  %7115 = vmatprep.subr.bf16.mxu0 %v9072_v56  ;;  %v644_v44 = vrot.slane %v10118_v34, %v10057_v61  ;;  %v9136_v56 = vld [vmem:[#allocation8 + $0x2a0] ss:$16 sps:$4 sm:$0xff]  }
 0x285   :  { %7459 = vmatprep.subr.bf16.mxu1 %v9075_v45  ;;  %v652_v45 = vrot.slane %v10118_v34, %v10060_v63 }
 0x287   :  { %7116 = vmatpush1.bf16.msra.mxu0 %v9070_v46  ;;  %v9139_v46 = vld [vmem:[#allocation8 + $0x2a8] ss:$16 sps:$4 sm:$0xff]  }
 0x288   :  { %7460 = vmatpush1.bf16.msra.mxu1 %v9073_v48  ;;  %7117 = vmatprep.subr.bf16.mxu0 %v9078_v49  ;;  %v9144_v48 = vld [vmem:[#allocation8 + $0x2c4] ss:$16 sps:$4 sm:$0xff]  }
 0x289   :  { %7461 = vmatprep.subr.bf16.mxu1 %v9081_v50  ;;  %v9147_v50 = vld [vmem:[#allocation8 + $0x2cc] ss:$16 sps:$4 sm:$0xff]  }
 0x28b   :  { %7118 = vmatpush1.bf16.msra.mxu0 %v9076_v51 }
 0x28c   :  { %7462 = vmatpush1.bf16.msra.mxu1 %v9079_v52  ;;  %7119 = vmatprep.subr.bf16.mxu0 %v9084_v55 }
 0x28d   :  { %7463 = vmatprep.subr.bf16.mxu1 %v9087_v57 }
 0x28f   :  { %7120 = vmatpush1.bf16.msra.mxu0 %v9082_v0 }
 0x290   :  { %7464 = vmatpush1.bf16.msra.mxu1 %v9085_v1  ;;  %7121 = vmatprep.subr.bf16.mxu0 %v9090_v2 }
 0x291   :  { %7465 = vmatprep.subr.bf16.mxu1 %v9093_v4  ;;  %v9142_v4 = vld [vmem:[#allocation8 + $0x2c0] ss:$16 sps:$4 sm:$0xff]  }
 0x293   :  { %7122 = vmatpush1.bf16.msra.mxu0 %v9088_v5 }
 0x294   :  { %7466 = vmatpush1.bf16.msra.mxu1 %v9091_v59  ;;  %7123 = vmatprep.subr.bf16.mxu0 %v9096_v6 }
 0x295   :  { %7467 = vmatprep.subr.bf16.mxu1 %v9099_v7 }
 0x297   :  { %7124 = vmatpush1.bf16.msra.mxu0 %v9094_v8  ;;  %v9145_v8 = vld [vmem:[#allocation8 + $0x2c8] ss:$16 sps:$4 sm:$0xff]  }
 0x298   :  { %7468 = vmatpush1.bf16.msra.mxu1 %v9097_v9  ;;  %7125 = vmatprep.subr.bf16.mxu0 %v9102_v10  ;;  %v9150_v9 = vld [vmem:[#allocation8 + $0x2e4] ss:$16 sps:$4 sm:$0xff]  }
 0x299   :  { %7469 = vmatprep.subr.bf16.mxu1 %v9105_v24 }
 0x29b   :  { %7126 = vmatpush1.bf16.msra.mxu0 %v9100_v29 }
 0x29c   :  { %7470 = vmatpush1.bf16.msra.mxu1 %v9103_v11  ;;  %7138 = vmatprep.subr.bf16.mxu0 %v9108_v12  ;;  %v9153_v11 = vld [vmem:[#allocation8 + $0x2ec] ss:$16 sps:$4 sm:$0xff]  }
 0x29d   :  { %7482 = vmatprep.subr.bf16.mxu1 %v9111_v13 }
 0x29e   :  { %7128 = vmatmul.mubr.bf16.vlgmr.msra.gmra.mrb[16].mxu0 %v10070_v53 }
 0x29f   :  { %7472 = vmatmul.mubr.bf16.vlgmr.msra.gmra.mrb[16].mxu1 %v10070_v53  ;;  %7139 = vmatpush1.bf16.msra.mxu0 %v9106_v62  ;;  %v9129_v53 = vld [vmem:[#allocation8 + $0x26c] ss:$16 sps:$4 sm:$0xff]  }
 0x2a0   :  { %7170 = vmatprep.mubr.bf16.mxu0 %v10076_v3  ;;  %7483 = vmatpush1.bf16.msra.mxu1 %v9109_v14 }
 0x2a1   :  { %7514 = vmatprep.mubr.bf16.mxu1 %v10076_v3  ;;  %7140 = vmatprep.subr.bf16.mxu0 %v9114_v15  ;;  %v9130_v3 = vld [vmem:[#allocation8 + $0x280] ss:$16 sps:$4 sm:$0xff]  }
 0x2a2   :  { %7484 = vmatprep.subr.bf16.mxu1 %v9117_v16 }
 0x2a3   :  { %7141 = vmatpush1.bf16.msra.mxu0 %v9112_v17 }
 0x2a4   :  { %7485 = vmatpush1.bf16.msra.mxu1 %v9115_v18  ;;  %7142 = vmatprep.subr.bf16.mxu0 %v9120_v19  ;;  %v9148_v18 = vld [vmem:[#allocation8 + $0x2e0] ss:$16 sps:$4 sm:$0xff]  }
 0x2a5   :  { %7486 = vmatprep.subr.bf16.mxu1 %v9123_v36 }
 0x2a7   :  { %7143 = vmatpush1.bf16.msra.mxu0 %v9118_v20 }
 0x2a8   :  { %7487 = vmatpush1.bf16.msra.mxu1 %v9121_v21  ;;  %7144 = vmatprep.subr.bf16.mxu0 %v9126_v23  ;;  %v9151_v21 = vld [vmem:[#allocation8 + $0x2e8] ss:$16 sps:$4 sm:$0xff]   ;;  %v9156_v23 = vld [vmem:[#allocation8 + $0x304] ss:$16 sps:$4 sm:$0xff]  }
 0x2a9   :  { %7488 = vmatprep.subr.bf16.mxu1 %v9129_v53 }
 0x2ab   :  { %7145 = vmatpush1.bf16.msra.mxu0 %v9124_v25 }
 0x2ac   :  { %7489 = vmatpush1.bf16.msra.mxu1 %v9127_v26  ;;  %7146 = vmatprep.subr.bf16.mxu0 %v9132_v30  ;;  %v9159_v26 = vld [vmem:[#allocation8 + $0x30c] ss:$16 sps:$4 sm:$0xff]  }
 0x2ad   :  { %7490 = vmatprep.subr.bf16.mxu1 %v9135_v32  ;;  %v9154_v32 = vld [vmem:[#allocation8 + $0x300] ss:$16 sps:$4 sm:$0xff]  }
 0x2af   :  { %7147 = vmatpush1.bf16.msra.mxu0 %v9130_v3  ;;  %v9157_v3 = vld [vmem:[#allocation8 + $0x308] ss:$16 sps:$4 sm:$0xff]  }
 0x2b0   :  { %7491 = vmatpush1.bf16.msra.mxu1 %v9133_v35  ;;  %7148 = vmatprep.subr.bf16.mxu0 %v9138_v39  ;;  %v9162_v35 = vld [vmem:[#allocation8 + $0x324] ss:$16 sps:$4 sm:$0xff]   ;;  %v9165_v39 = vld [vmem:[#allocation8 + $0x32c] ss:$16 sps:$4 sm:$0xff]  }
 0x2b1   :  { %v3686_v49 = vpop.f32.mrb[8].mxu0  ;;  %7492 = vmatprep.subr.bf16.mxu1 %v9141_v40  ;;  %v3772_v52 = vpop.f32.mrb[8].mxu1  ;;  %v9160_v40 = vld [vmem:[#allocation8 + $0x320] ss:$16 sps:$4 sm:$0xff]  }
 0x2b2   :  { %v8882_v51 = vadd.f32 %v3686_v49, %v640_v41  ;;  %v3688_v55 = vpop.f32.mrb[9].mxu0  ;;  %v8886_v57 = vadd.f32 %v3772_v52, %v648_v43  ;;  %v3774_v1 = vpop.f32.mrb[9].mxu1  ;;  %v9172_v49 = vld [vmem:[#allocation8 + $0x360] ss:$16 sps:$4 sm:$0xff]   ;;  %v9183_v52 = vld [vmem:[#allocation8 + $0x38c] ss:$16 sps:$4 sm:$0xff]  }
 0x2b3   :  { %v8883_v0 = vadd.f32 %v3688_v55, %v644_v44  ;;  %v3690_v2 = vpop.f32.mrb[10].mxu0  ;;  %7149 = vmatpush1.bf16.msra.mxu0 %v9136_v56  ;;  %v8887_v5 = vadd.f32 %v3774_v1, %v652_v45  ;;  %v3776_v6 = vpop.f32.mrb[10].mxu1  ;;  %v9166_v56 = vld [vmem:[#allocation8 + $0x340] ss:$16 sps:$4 sm:$0xff]   ;;  %v9189_v1 = vld [vmem:[#allocation8 + $0x3ac] ss:$16 sps:$4 sm:$0xff]  }
 0x2b4   :  { %v8884_v59 = vadd.f32 %v3690_v2, %v640_v41  ;;  %7493 = vmatpush1.bf16.msra.mxu1 %v9139_v46  ;;  %v3692_v7 = vpop.f32.mrb[11].mxu0  ;;  %7150 = vmatprep.subr.bf16.mxu0 %v9144_v48  ;;  %v8888_v10 = vadd.f32 %v3776_v6, %v648_v43  ;;  %v3778_v29 = vpop.f32.mrb[11].mxu1  ;;  %v3961_v12 = vmax.f32 %v8882_v51, 0.0  ;;  %v3963_v14 = vmax.f32 %v8886_v57, 0.0  ;;  %v9163_v41 = vld [vmem:[#allocation8 + $0x328] ss:$16 sps:$4 sm:$0xff]  }
 0x2b5   :  { %v8885_v24 = vadd.f32 %v3692_v7, %v644_v44  ;;  %7494 = vmatprep.subr.bf16.mxu1 %v9147_v50  ;;  %v8889_v62 = vadd.f32 %v3778_v29, %v652_v45  ;;  %v3962_v15 = vmax.f32 %v8883_v0, 0.0  ;;  %v3964_v19 = vmax.f32 %v8887_v5, 0.0  ;;  %v9168_v43 = vld [vmem:[#allocation8 + $0x344] ss:$16 sps:$4 sm:$0xff]   ;;  %v9171_v44 = vld [vmem:[#allocation8 + $0x34c] ss:$16 sps:$4 sm:$0xff]  }
 0x2b6   :  { %v3977_v13 = vmax.f32 %v8884_v59, 0.0  ;;  %v3979_v16 = vmax.f32 %v8888_v10, 0.0  ;;  %v9169_v45 = vld [vmem:[#allocation8 + $0x348] ss:$16 sps:$4 sm:$0xff]   ;;  %v9174_v46 = vld [vmem:[#allocation8 + $0x364] ss:$16 sps:$4 sm:$0xff]  }
 0x2b7   :  { %v3978_v17 = vmax.f32 %v8885_v24, 0.0  ;;  %7151 = vmatpush1.bf16.msra.mxu0 %v9142_v4  ;;  %v3980_v20 = vmax.f32 %v8889_v62, 0.0  ;;  %v9177_v48 = vld [vmem:[#allocation8 + $0x36c] ss:$16 sps:$4 sm:$0xff]   ;;  %v9175_v50 = vld [vmem:[#allocation8 + $0x368] ss:$16 sps:$4 sm:$0xff]  }
 0x2b8   :  { %v10128_v36 = vpack.c.bf16 %v3977_v13, %v3961_v12  ;;  %7495 = vmatpush1.bf16.msra.mxu1 %v9145_v8  ;;  %7152 = vmatprep.subr.bf16.mxu0 %v9150_v9  ;;  %v10130_v53 = vpack.c.bf16 %v3979_v16, %v3963_v14  ;;  %v9180_v51 = vld [vmem:[#allocation8 + $0x384] ss:$16 sps:$4 sm:$0xff]   ;;  %v9178_v55 = vld [vmem:[#allocation8 + $0x380] ss:$16 sps:$4 sm:$0xff]   ;;  %v9181_v57 = vld [vmem:[#allocation8 + $0x388] ss:$16 sps:$4 sm:$0xff]  }
 0x2b9   :  { %v10132_v25 = vpack.c.bf16 %v3978_v17, %v3962_v15  ;;  %7496 = vmatprep.subr.bf16.mxu1 %v9153_v11  ;;  %v10134_v30 = vpack.c.bf16 %v3980_v20, %v3964_v19  ;;  %v9186_v0 = vld [vmem:[#allocation8 + $0x3a4] ss:$16 sps:$4 sm:$0xff]   ;;  %v9184_v2 = vld [vmem:[#allocation8 + $0x3a0] ss:$16 sps:$4 sm:$0xff]   ;;  %v9187_v4 = vld [vmem:[#allocation8 + $0x3a8] ss:$16 sps:$4 sm:$0xff]  }
 0x2ba   :  { %v9192_v5 = vld [vmem:[#allocation8 + $0x3c4] ss:$16 sps:$4 sm:$0xff]   ;;  %v9195_v59 = vld [vmem:[#allocation8 + $0x3cc] ss:$16 sps:$4 sm:$0xff]   ;;  %v9190_v6 = vld [vmem:[#allocation8 + $0x3c0] ss:$16 sps:$4 sm:$0xff]  }
 0x2bb   :  { %7153 = vmatpush1.bf16.msra.mxu0 %v9148_v18  ;;  %v9193_v7 = vld [vmem:[#allocation8 + $0x3c8] ss:$16 sps:$4 sm:$0xff]   ;;  %v9198_v8 = vld [vmem:[#allocation8 + $0x3e4] ss:$16 sps:$4 sm:$0xff]   ;;  %v9201_v9 = vld [vmem:[#allocation8 + $0x3ec] ss:$16 sps:$4 sm:$0xff]  }
 0x2bc   :  { %7497 = vmatpush1.bf16.msra.mxu1 %v9151_v21  ;;  %7154 = vmatprep.subr.bf16.mxu0 %v9156_v23  ;;  %v9196_v10 = vld [vmem:[#allocation8 + $0x3e0] ss:$16 sps:$4 sm:$0xff]   ;;  %v9199_v24 = vld [vmem:[#allocation8 + $0x3e8] ss:$16 sps:$4 sm:$0xff]   ;;  %v9204_v29 = vld [vmem:[#allocation8 + $0x404] ss:$16 sps:$4 sm:$0xff]  }
 0x2bd   :  { %7498 = vmatprep.subr.bf16.mxu1 %v9159_v26  ;;  %v9207_v11 = vld [vmem:[#allocation8 + $0x40c] ss:$16 sps:$4 sm:$0xff]   ;;  %v9202_v12 = vld [vmem:[#allocation8 + $0x400] ss:$16 sps:$4 sm:$0xff]   ;;  %v9205_v13 = vld [vmem:[#allocation8 + $0x408] ss:$16 sps:$4 sm:$0xff]  }
 0x2be   :  { %v9210_v62 = vld [vmem:[#allocation8 + $0x424] ss:$16 sps:$4 sm:$0xff]   ;;  %v9213_v14 = vld [vmem:[#allocation8 + $0x42c] ss:$16 sps:$4 sm:$0xff]   ;;  %v9208_v15 = vld [vmem:[#allocation8 + $0x420] ss:$16 sps:$4 sm:$0xff]  }
 0x2bf   :  { %7155 = vmatpush1.bf16.msra.mxu0 %v9154_v32  ;;  %v9211_v16 = vld [vmem:[#allocation8 + $0x428] ss:$16 sps:$4 sm:$0xff]   ;;  %v9216_v17 = vld [vmem:[#allocation8 + $0x444] ss:$16 sps:$4 sm:$0xff]   ;;  %v9219_v18 = vld [vmem:[#allocation8 + $0x44c] ss:$16 sps:$4 sm:$0xff]  }
 0x2c0   :  { %7499 = vmatpush1.bf16.msra.mxu1 %v9157_v3  ;;  %7156 = vmatprep.subr.bf16.mxu0 %v9162_v35  ;;  %v9214_v19 = vld [vmem:[#allocation8 + $0x440] ss:$16 sps:$4 sm:$0xff]   ;;  %v9217_v20 = vld [vmem:[#allocation8 + $0x448] ss:$16 sps:$4 sm:$0xff]   ;;  %v9222_v21 = vld [vmem:[#allocation8 + $0x464] ss:$16 sps:$4 sm:$0xff]  }
 0x2c1   :  { %7500 = vmatprep.subr.bf16.mxu1 %v9165_v39  ;;  %v9220_v23 = vld [vmem:[#allocation8 + $0x460] ss:$16 sps:$4 sm:$0xff]   ;;  %v9223_v26 = vld [vmem:[#allocation8 + $0x468] ss:$16 sps:$4 sm:$0xff]   ;;  %v9228_v32 = vld [vmem:[#allocation8 + $0x484] ss:$16 sps:$4 sm:$0xff]  }
 0x2c2   :  { %v9231_v3 = vld [vmem:[#allocation8 + $0x48c] ss:$16 sps:$4 sm:$0xff]   ;;  %v9229_v35 = vld [vmem:[#allocation8 + $0x488] ss:$16 sps:$4 sm:$0xff]   ;;  %v9234_v39 = vld [vmem:[#allocation8 + $0x4a4] ss:$16 sps:$4 sm:$0xff]  }
 0x2c3   :  { %7157 = vmatpush1.bf16.msra.mxu0 %v9160_v40  ;;  %v9237_v40 = vld [vmem:[#allocation8 + $0x4ac] ss:$16 sps:$4 sm:$0xff]  }
 0x2c4   :  { %7501 = vmatpush1.bf16.msra.mxu1 %v9163_v41  ;;  %7158 = vmatprep.subr.bf16.mxu0 %v9168_v43  ;;  %v9232_v41 = vld [vmem:[#allocation8 + $0x4a0] ss:$16 sps:$4 sm:$0xff]   ;;  %v9235_v43 = vld [vmem:[#allocation8 + $0x4a8] ss:$16 sps:$4 sm:$0xff]  }
 0x2c5   :  { %7502 = vmatprep.subr.bf16.mxu1 %v9171_v44  ;;  %v9240_v44 = vld [vmem:[#allocation8 + $0x4c4] ss:$16 sps:$4 sm:$0xff]  }
 0x2c7   :  { %7159 = vmatpush1.bf16.msra.mxu0 %v9166_v56  ;;  %v9243_v56 = vld [vmem:[#allocation8 + $0x4cc] ss:$16 sps:$4 sm:$0xff]  }
 0x2c8   :  { %7503 = vmatpush1.bf16.msra.mxu1 %v9169_v45  ;;  %7160 = vmatprep.subr.bf16.mxu0 %v9174_v46  ;;  %v9238_v45 = vld [vmem:[#allocation8 + $0x4c0] ss:$16 sps:$4 sm:$0xff]   ;;  %v9241_v46 = vld [vmem:[#allocation8 + $0x4c8] ss:$16 sps:$4 sm:$0xff]  }
 0x2c9   :  { %7504 = vmatprep.subr.bf16.mxu1 %v9177_v48  ;;  %v9246_v48 = vld [vmem:[#allocation8 + $0x4e4] ss:$16 sps:$4 sm:$0xff]  }
 0x2cb   :  { %7161 = vmatpush1.bf16.msra.mxu0 %v9172_v49  ;;  %v9249_v49 = vld [vmem:[#allocation8 + $0x4ec] ss:$16 sps:$4 sm:$0xff]  }
 0x2cc   :  { %7505 = vmatpush1.bf16.msra.mxu1 %v9175_v50  ;;  %7162 = vmatprep.subr.bf16.mxu0 %v9180_v51  ;;  %v9244_v50 = vld [vmem:[#allocation8 + $0x4e0] ss:$16 sps:$4 sm:$0xff]   ;;  %v9247_v51 = vld [vmem:[#allocation8 + $0x4e8] ss:$16 sps:$4 sm:$0xff]  }
 0x2cd   :  { %7506 = vmatprep.subr.bf16.mxu1 %v9183_v52  ;;  %v9252_v52 = vld [vmem:[#allocation8 + $0x504] ss:$16 sps:$4 sm:$0xff]  }
 0x2cf   :  { %7163 = vmatpush1.bf16.msra.mxu0 %v9178_v55  ;;  %v9255_v55 = vld [vmem:[#allocation8 + $0x50c] ss:$16 sps:$4 sm:$0xff]  }
 0x2d0   :  { %7507 = vmatpush1.bf16.msra.mxu1 %v9181_v57  ;;  %7164 = vmatprep.subr.bf16.mxu0 %v9186_v0  ;;  %v9250_v57 = vld [vmem:[#allocation8 + $0x500] ss:$16 sps:$4 sm:$0xff]   ;;  %v9253_v0 = vld [vmem:[#allocation8 + $0x508] ss:$16 sps:$4 sm:$0xff]  }
 0x2d1   :  { %7508 = vmatprep.subr.bf16.mxu1 %v9189_v1  ;;  %v9258_v1 = vld [vmem:[#allocation8 + $0x524] ss:$16 sps:$4 sm:$0xff]  }
 0x2d3   :  { %7165 = vmatpush1.bf16.msra.mxu0 %v9184_v2  ;;  %v9261_v2 = vld [vmem:[#allocation8 + $0x52c] ss:$16 sps:$4 sm:$0xff]  }
 0x2d4   :  { %7509 = vmatpush1.bf16.msra.mxu1 %v9187_v4  ;;  %7166 = vmatprep.subr.bf16.mxu0 %v9192_v5  ;;  %v9256_v4 = vld [vmem:[#allocation8 + $0x520] ss:$16 sps:$4 sm:$0xff]   ;;  %v9259_v5 = vld [vmem:[#allocation8 + $0x528] ss:$16 sps:$4 sm:$0xff]  }
 0x2d5   :  { %7510 = vmatprep.subr.bf16.mxu1 %v9195_v59  ;;  %v9264_v59 = vld [vmem:[#allocation8 + $0x544] ss:$16 sps:$4 sm:$0xff]  }
 0x2d7   :  { %7167 = vmatpush1.bf16.msra.mxu0 %v9190_v6  ;;  %v9267_v6 = vld [vmem:[#allocation8 + $0x54c] ss:$16 sps:$4 sm:$0xff]  }
 0x2d8   :  { %7511 = vmatpush1.bf16.msra.mxu1 %v9193_v7  ;;  %7168 = vmatprep.subr.bf16.mxu0 %v9198_v8  ;;  %v9262_v7 = vld [vmem:[#allocation8 + $0x540] ss:$16 sps:$4 sm:$0xff]   ;;  %v9265_v8 = vld [vmem:[#allocation8 + $0x548] ss:$16 sps:$4 sm:$0xff]  }
 0x2d9   :  { %7512 = vmatprep.subr.bf16.mxu1 %v9201_v9  ;;  %v9270_v9 = vld [vmem:[#allocation8 + $0x564] ss:$16 sps:$4 sm:$0xff]  }
 0x2db   :  { %7169 = vmatpush1.bf16.msra.mxu0 %v9196_v10  ;;  %v9273_v10 = vld [vmem:[#allocation8 + $0x56c] ss:$16 sps:$4 sm:$0xff]  }
 0x2dc   :  { %7513 = vmatpush1.bf16.msra.mxu1 %v9199_v24  ;;  %7181 = vmatprep.subr.bf16.mxu0 %v9204_v29  ;;  %v9268_v24 = vld [vmem:[#allocation8 + $0x560] ss:$16 sps:$4 sm:$0xff]   ;;  %v9271_v29 = vld [vmem:[#allocation8 + $0x568] ss:$16 sps:$4 sm:$0xff]  }
 0x2dd   :  { %7525 = vmatprep.subr.bf16.mxu1 %v9207_v11  ;;  %v9276_v11 = vld [vmem:[#allocation8 + $0x584] ss:$16 sps:$4 sm:$0xff]  }
 0x2de   :  { %7171 = vmatmul.mubr.bf16.vlgmr.msra.gmra.mrb[16].mxu0 %v10072_v58 }
 0x2df   :  { %7515 = vmatmul.mubr.bf16.vlgmr.msra.gmra.mrb[16].mxu1 %v10072_v58  ;;  %7182 = vmatpush1.bf16.msra.mxu0 %v9202_v12  ;;  %v9225_v58 = vld [vmem:[#allocation8 + $0x46c] ss:$16 sps:$4 sm:$0xff]  }
 0x2e0   :  { %7213 = vmatprep.mubr.bf16.mxu0 %v10106_v38  ;;  %7526 = vmatpush1.bf16.msra.mxu1 %v9205_v13  ;;  %v9279_v12 = vld [vmem:[#allocation8 + $0x58c] ss:$16 sps:$4 sm:$0xff]   ;;  %v9274_v13 = vld [vmem:[#allocation8 + $0x580] ss:$16 sps:$4 sm:$0xff]  }
 0x2e1   :  { %7557 = vmatprep.mubr.bf16.mxu1 %v10106_v38  ;;  %7183 = vmatprep.subr.bf16.mxu0 %v9210_v62  ;;  %v9226_v38 = vld [vmem:[#allocation8 + $0x480] ss:$16 sps:$4 sm:$0xff]   ;;  %v9277_v62 = vld [vmem:[#allocation8 + $0x588] ss:$16 sps:$4 sm:$0xff]  }
 0x2e2   :  { %7527 = vmatprep.subr.bf16.mxu1 %v9213_v14  ;;  %v9282_v14 = vld [vmem:[#allocation8 + $0x5a4] ss:$16 sps:$4 sm:$0xff]  }
 0x2e3   :  { %7184 = vmatpush1.bf16.msra.mxu0 %v9208_v15  ;;  %v9285_v15 = vld [vmem:[#allocation8 + $0x5ac] ss:$16 sps:$4 sm:$0xff]  }
 0x2e4   :  { %7528 = vmatpush1.bf16.msra.mxu1 %v9211_v16  ;;  %7185 = vmatprep.subr.bf16.mxu0 %v9216_v17  ;;  %v9280_v16 = vld [vmem:[#allocation8 + $0x5a0] ss:$16 sps:$4 sm:$0xff]   ;;  %v9283_v17 = vld [vmem:[#allocation8 + $0x5a8] ss:$16 sps:$4 sm:$0xff]  }
 0x2e5   :  { %7529 = vmatprep.subr.bf16.mxu1 %v9219_v18  ;;  %v9288_v18 = vld [vmem:[#allocation8 + $0x5c4] ss:$16 sps:$4 sm:$0xff]  }
 0x2e7   :  { %7186 = vmatpush1.bf16.msra.mxu0 %v9214_v19  ;;  %v9291_v19 = vld [vmem:[#allocation8 + $0x5cc] ss:$16 sps:$4 sm:$0xff]  }
 0x2e8   :  { %7530 = vmatpush1.bf16.msra.mxu1 %v9217_v20  ;;  %7187 = vmatprep.subr.bf16.mxu0 %v9222_v21  ;;  %v9286_v20 = vld [vmem:[#allocation8 + $0x5c0] ss:$16 sps:$4 sm:$0xff]   ;;  %v9289_v21 = vld [vmem:[#allocation8 + $0x5c8] ss:$16 sps:$4 sm:$0xff]  }
 0x2e9   :  { %7531 = vmatprep.subr.bf16.mxu1 %v9225_v58  ;;  %v9294_v58 = vld [vmem:[#allocation8 + $0x5e4] ss:$16 sps:$4 sm:$0xff]  }
 0x2eb   :  { %7188 = vmatpush1.bf16.msra.mxu0 %v9220_v23  ;;  %v9297_v23 = vld [vmem:[#allocation8 + $0x5ec] ss:$16 sps:$4 sm:$0xff]  }
 0x2ec   :  { %7532 = vmatpush1.bf16.msra.mxu1 %v9223_v26  ;;  %7189 = vmatprep.subr.bf16.mxu0 %v9228_v32  ;;  %v9292_v26 = vld [vmem:[#allocation8 + $0x5e0] ss:$16 sps:$4 sm:$0xff]   ;;  %v9295_v32 = vld [vmem:[#allocation8 + $0x5e8] ss:$16 sps:$4 sm:$0xff]  }
 0x2ed   :  { %7533 = vmatprep.subr.bf16.mxu1 %v9231_v3  ;;  %v9300_v3 = vld [vmem:[#allocation8 + $0x604] ss:$16 sps:$4 sm:$0xff]  }
 0x2ef   :  { %7190 = vmatpush1.bf16.msra.mxu0 %v9226_v38  ;;  %v9303_v38 = vld [vmem:[#allocation8 + $0x60c] ss:$16 sps:$4 sm:$0xff]  }
 0x2f0   :  { %7534 = vmatpush1.bf16.msra.mxu1 %v9229_v35  ;;  %7191 = vmatprep.subr.bf16.mxu0 %v9234_v39  ;;  %v9298_v35 = vld [vmem:[#allocation8 + $0x600] ss:$16 sps:$4 sm:$0xff]   ;;  %v9301_v39 = vld [vmem:[#allocation8 + $0x608] ss:$16 sps:$4 sm:$0xff]  }
 0x2f1   :  { %7535 = vmatprep.subr.bf16.mxu1 %v9237_v40  ;;  %v9306_v40 = vld [vmem:[#allocation8 + $0x624] ss:$16 sps:$4 sm:$0xff]  }
 0x2f3   :  { %7192 = vmatpush1.bf16.msra.mxu0 %v9232_v41  ;;  %v9309_v41 = vld [vmem:[#allocation8 + $0x62c] ss:$16 sps:$4 sm:$0xff]  }
 0x2f4   :  { %7536 = vmatpush1.bf16.msra.mxu1 %v9235_v43  ;;  %7193 = vmatprep.subr.bf16.mxu0 %v9240_v44  ;;  %v9304_v43 = vld [vmem:[#allocation8 + $0x620] ss:$16 sps:$4 sm:$0xff]   ;;  %v9307_v44 = vld [vmem:[#allocation8 + $0x628] ss:$16 sps:$4 sm:$0xff]  }
 0x2f5   :  { %7537 = vmatprep.subr.bf16.mxu1 %v9243_v56  ;;  %v9312_v56 = vld [vmem:[#allocation8 + $0x644] ss:$16 sps:$4 sm:$0xff]  }
 0x2f7   :  { %7194 = vmatpush1.bf16.msra.mxu0 %v9238_v45  ;;  %v9315_v45 = vld [vmem:[#allocation8 + $0x64c] ss:$16 sps:$4 sm:$0xff]  }
 0x2f8   :  { %7538 = vmatpush1.bf16.msra.mxu1 %v9241_v46  ;;  %7195 = vmatprep.subr.bf16.mxu0 %v9246_v48  ;;  %v9310_v46 = vld [vmem:[#allocation8 + $0x640] ss:$16 sps:$4 sm:$0xff]   ;;  %v9313_v48 = vld [vmem:[#allocation8 + $0x648] ss:$16 sps:$4 sm:$0xff]  }
 0x2f9   :  { %7539 = vmatprep.subr.bf16.mxu1 %v9249_v49  ;;  %v9318_v49 = vld [vmem:[#allocation8 + $0x664] ss:$16 sps:$4 sm:$0xff]  }
 0x2fb   :  { %7196 = vmatpush1.bf16.msra.mxu0 %v9244_v50  ;;  %v9316_v50 = vld [vmem:[#allocation8 + $0x660] ss:$16 sps:$4 sm:$0xff]  }
 0x2fc   :  { %7540 = vmatpush1.bf16.msra.mxu1 %v9247_v51  ;;  %7197 = vmatprep.subr.bf16.mxu0 %v9252_v52  ;;  %v9319_v51 = vld [vmem:[#allocation8 + $0x668] ss:$16 sps:$4 sm:$0xff]   ;;  %v9324_v52 = vld [vmem:[#allocation8 + $0x684] ss:$16 sps:$4 sm:$0xff]  }
 0x2fd   :  { %7541 = vmatprep.subr.bf16.mxu1 %v9255_v55  ;;  %v9327_v55 = vld [vmem:[#allocation8 + $0x68c] ss:$16 sps:$4 sm:$0xff]  }
 0x2ff   :  { %7198 = vmatpush1.bf16.msra.mxu0 %v9250_v57  ;;  %v9325_v57 = vld [vmem:[#allocation8 + $0x688] ss:$16 sps:$4 sm:$0xff]  }
 0x300   :  { %7542 = vmatpush1.bf16.msra.mxu1 %v9253_v0  ;;  %7199 = vmatprep.subr.bf16.mxu0 %v9258_v1  ;;  %v9330_v0 = vld [vmem:[#allocation8 + $0x6a4] ss:$16 sps:$4 sm:$0xff]   ;;  %v9333_v1 = vld [vmem:[#allocation8 + $0x6ac] ss:$16 sps:$4 sm:$0xff]  }
 0x301   :  { %7543 = vmatprep.subr.bf16.mxu1 %v9261_v2  ;;  %v656_v2 = vrot.slane %v10118_v34, %v623_v22  ;;  %v9339_v22 = vld [vmem:[#allocation8 + $0x6cc] ss:$16 sps:$4 sm:$0xff]  }
 0x303   :  { %7200 = vmatpush1.bf16.msra.mxu0 %v9256_v4  ;;  %v664_v4 = vrot.slane %v10118_v34, %v631_v27 }
 0x304   :  { %7544 = vmatpush1.bf16.msra.mxu1 %v9259_v5  ;;  %7201 = vmatprep.subr.bf16.mxu0 %v9264_v59  ;;  %v660_v5 = vrot.slane %v10118_v34, %v627_v28  ;;  %v9328_v59 = vld [vmem:[#allocation8 + $0x6a0] ss:$16 sps:$4 sm:$0xff]  }
 0x305   :  { %7545 = vmatprep.subr.bf16.mxu1 %v9267_v6  ;;  %v668_v6 = vrot.slane %v10118_v34, %v635_v31  ;;  %v9334_v28 = vld [vmem:[#allocation8 + $0x6c0] ss:$16 sps:$4 sm:$0xff]   ;;  %v9337_v34 = vld [vmem:[#allocation8 + $0x6c8] ss:$16 sps:$4 sm:$0xff]  }
 0x307   :  { %7202 = vmatpush1.bf16.msra.mxu0 %v9262_v7  ;;  %v9331_v7 = vld [vmem:[#allocation8 + $0x6a8] ss:$16 sps:$4 sm:$0xff]  }
 0x308   :  { %7546 = vmatpush1.bf16.msra.mxu1 %v9265_v8  ;;  %7203 = vmatprep.subr.bf16.mxu0 %v9270_v9  ;;  %v9336_v8 = vld [vmem:[#allocation8 + $0x6c4] ss:$16 sps:$4 sm:$0xff]  }
 0x309   :  { %7547 = vmatprep.subr.bf16.mxu1 %v9273_v10 }
 0x30b   :  { %7204 = vmatpush1.bf16.msra.mxu0 %v9268_v24 }
 0x30c   :  { %7548 = vmatpush1.bf16.msra.mxu1 %v9271_v29  ;;  %7205 = vmatprep.subr.bf16.mxu0 %v9276_v11 }
 0x30d   :  { %7549 = vmatprep.subr.bf16.mxu1 %v9279_v12 }
 0x30f   :  { %7206 = vmatpush1.bf16.msra.mxu0 %v9274_v13 }
 0x310   :  { %7550 = vmatpush1.bf16.msra.mxu1 %v9277_v62  ;;  %7207 = vmatprep.subr.bf16.mxu0 %v9282_v14 }
 0x311   :  { %7551 = vmatprep.subr.bf16.mxu1 %v9285_v15  ;;  %v9342_v15 = vld [vmem:[#allocation8 + $0x6e4] ss:$16 sps:$4 sm:$0xff]  }
 0x313   :  { %7208 = vmatpush1.bf16.msra.mxu0 %v9280_v16 }
 0x314   :  { %7552 = vmatpush1.bf16.msra.mxu1 %v9283_v17  ;;  %7209 = vmatprep.subr.bf16.mxu0 %v9288_v18 }
 0x315   :  { %7553 = vmatprep.subr.bf16.mxu1 %v9291_v19  ;;  %v9345_v19 = vld [vmem:[#allocation8 + $0x6ec] ss:$16 sps:$4 sm:$0xff]  }
 0x317   :  { %7210 = vmatpush1.bf16.msra.mxu0 %v9286_v20 }
 0x318   :  { %7554 = vmatpush1.bf16.msra.mxu1 %v9289_v21  ;;  %7211 = vmatprep.subr.bf16.mxu0 %v9294_v58 }
 0x319   :  { %7555 = vmatprep.subr.bf16.mxu1 %v9297_v23 }
 0x31b   :  { %7212 = vmatpush1.bf16.msra.mxu0 %v9292_v26 }
 0x31c   :  { %7556 = vmatpush1.bf16.msra.mxu1 %v9295_v32  ;;  %7224 = vmatprep.subr.bf16.mxu0 %v9300_v3 }
 0x31d   :  { %7568 = vmatprep.subr.bf16.mxu1 %v9303_v38  ;;  %v9340_v38 = vld [vmem:[#allocation8 + $0x6e0] ss:$16 sps:$4 sm:$0xff]  }
 0x31e   :  { %7214 = vmatmul.mubr.bf16.vlgmr.msra.gmra.mrb[16].mxu0 %v10102_v33 }
 0x31f   :  { %7558 = vmatmul.mubr.bf16.vlgmr.msra.gmra.mrb[16].mxu1 %v10102_v33  ;;  %7225 = vmatpush1.bf16.msra.mxu0 %v9298_v35  ;;  %v9321_v33 = vld [vmem:[#allocation8 + $0x66c] ss:$16 sps:$4 sm:$0xff]  }
 0x320   :  { %7256 = vmatprep.mubr.bf16.mxu0 %v10108_v42  ;;  %7569 = vmatpush1.bf16.msra.mxu1 %v9301_v39 }
 0x321   :  { %7600 = vmatprep.mubr.bf16.mxu1 %v10108_v42  ;;  %7226 = vmatprep.subr.bf16.mxu0 %v9306_v40  ;;  %v9322_v42 = vld [vmem:[#allocation8 + $0x680] ss:$16 sps:$4 sm:$0xff]  }
 0x322   :  { %7570 = vmatprep.subr.bf16.mxu1 %v9309_v41  ;;  %v9343_v41 = vld [vmem:[#allocation8 + $0x6e8] ss:$16 sps:$4 sm:$0xff]  }
 0x323   :  { %7227 = vmatpush1.bf16.msra.mxu0 %v9304_v43  ;;  %v9348_v43 = vld [vmem:[#allocation8 + $0x704] ss:$16 sps:$4 sm:$0xff]  }
 0x324   :  { %7571 = vmatpush1.bf16.msra.mxu1 %v9307_v44  ;;  %7228 = vmatprep.subr.bf16.mxu0 %v9312_v56 }
 0x325   :  { %7572 = vmatprep.subr.bf16.mxu1 %v9315_v45  ;;  %v9351_v45 = vld [vmem:[#allocation8 + $0x70c] ss:$16 sps:$4 sm:$0xff]  }
 0x327   :  { %7229 = vmatpush1.bf16.msra.mxu0 %v9310_v46 }
 0x328   :  { %7573 = vmatpush1.bf16.msra.mxu1 %v9313_v48  ;;  %7230 = vmatprep.subr.bf16.mxu0 %v9318_v49  ;;  %v9346_v48 = vld [vmem:[#allocation8 + $0x700] ss:$16 sps:$4 sm:$0xff]   ;;  %v9349_v49 = vld [vmem:[#allocation8 + $0x708] ss:$16 sps:$4 sm:$0xff]  }
 0x329   :  { %7574 = vmatprep.subr.bf16.mxu1 %v9321_v33  ;;  %v9354_v33 = vld [vmem:[#allocation8 + $0x724] ss:$16 sps:$4 sm:$0xff]  }
 0x32b   :  { %7231 = vmatpush1.bf16.msra.mxu0 %v9316_v50  ;;  %v9357_v50 = vld [vmem:[#allocation8 + $0x72c] ss:$16 sps:$4 sm:$0xff]  }
 0x32c   :  { %7575 = vmatpush1.bf16.msra.mxu1 %v9319_v51  ;;  %7232 = vmatprep.subr.bf16.mxu0 %v9324_v52  ;;  %v9352_v51 = vld [vmem:[#allocation8 + $0x720] ss:$16 sps:$4 sm:$0xff]   ;;  %v9355_v52 = vld [vmem:[#allocation8 + $0x728] ss:$16 sps:$4 sm:$0xff]  }
 0x32d   :  { %7576 = vmatprep.subr.bf16.mxu1 %v9327_v55  ;;  %v9360_v55 = vld [vmem:[#allocation8 + $0x744] ss:$16 sps:$4 sm:$0xff]  }
 0x32f   :  { %7233 = vmatpush1.bf16.msra.mxu0 %v9322_v42  ;;  %v9363_v42 = vld [vmem:[#allocation8 + $0x74c] ss:$16 sps:$4 sm:$0xff]  }
 0x330   :  { %7577 = vmatpush1.bf16.msra.mxu1 %v9325_v57  ;;  %7234 = vmatprep.subr.bf16.mxu0 %v9330_v0  ;;  %v9358_v57 = vld [vmem:[#allocation8 + $0x740] ss:$16 sps:$4 sm:$0xff]   ;;  %v9361_v0 = vld [vmem:[#allocation8 + $0x748] ss:$16 sps:$4 sm:$0xff]  }
 0x331   :  { %v3858_v9 = vpop.f32.mrb[12].mxu0  ;;  %7578 = vmatprep.subr.bf16.mxu1 %v9333_v1  ;;  %v3944_v24 = vpop.f32.mrb[12].mxu1  ;;  %v9366_v1 = vld [vmem:[#allocation8 + $0x764] ss:$16 sps:$4 sm:$0xff]  }
 0x332   :  { %v8890_v10 = vadd.f32 %v3858_v9, %v656_v2  ;;  %v3860_v29 = vpop.f32.mrb[13].mxu0  ;;  %v8894_v27 = vadd.f32 %v3944_v24, %v664_v4  ;;  %v3946_v12 = vpop.f32.mrb[13].mxu1  ;;  %v9378_v9 = vld [vmem:[#allocation8 + $0x7a4] ss:$16 sps:$4 sm:$0xff]   ;;  %v9379_v24 = vld [vmem:[#allocation8 + $0x7a8] ss:$16 sps:$4 sm:$0xff]  }
 0x333   :  { %v8891_v11 = vadd.f32 %v3860_v29, %v660_v5  ;;  %v3862_v13 = vpop.f32.mrb[14].mxu0  ;;  %7235 = vmatpush1.bf16.msra.mxu0 %v9328_v59  ;;  %v8895_v62 = vadd.f32 %v3946_v12, %v668_v6  ;;  %v3948_v47 = vpop.f32.mrb[14].mxu1  ;;  %v9372_v59 = vld [vmem:[#allocation8 + $0x784] ss:$16 sps:$4 sm:$0xff]   ;;  %v9385_v12 = vld [vmem:[#allocation8 + $0x7c8] ss:$16 sps:$4 sm:$0xff]  }
 0x334   :  { %v8892_v14 = vadd.f32 %v3862_v13, %v656_v2  ;;  %7579 = vmatpush1.bf16.msra.mxu1 %v9331_v7  ;;  %v3864_v31 = vpop.f32.mrb[15].mxu0  ;;  %7236 = vmatprep.subr.bf16.mxu0 %v9336_v8  ;;  %v8896_v16 = vadd.f32 %v3948_v47, %v664_v4  ;;  %v3950_v18 = vpop.f32.mrb[15].mxu1  ;;  %v3965_v20 = vmax.f32 %v8890_v10, 0.0  ;;  %v3967_v23 = vmax.f32 %v8894_v27, 0.0  ;;  %v9369_v2 = vld [vmem:[#allocation8 + $0x76c] ss:$16 sps:$4 sm:$0xff]  }
 0x335   :  { %v8893_v17 = vadd.f32 %v3864_v31, %v660_v5  ;;  %7580 = vmatprep.subr.bf16.mxu1 %v9339_v22  ;;  %v8897_v58 = vadd.f32 %v3950_v18, %v668_v6  ;;  %v3966_v26 = vmax.f32 %v8891_v11, 0.0  ;;  %v3968_v35 = vmax.f32 %v8895_v62, 0.0  ;;  %v9364_v4 = vld [vmem:[#allocation8 + $0x760] ss:$16 sps:$4 sm:$0xff]   ;;  %v9367_v5 = vld [vmem:[#allocation8 + $0x768] ss:$16 sps:$4 sm:$0xff]  }
 0x336   :  { %v3981_v21 = vmax.f32 %v8892_v14, 0.0  ;;  %v3983_v32 = vmax.f32 %v8896_v16, 0.0  ;;  %v9375_v6 = vld [vmem:[#allocation8 + $0x78c] ss:$16 sps:$4 sm:$0xff]   ;;  %v9370_v7 = vld [vmem:[#allocation8 + $0x780] ss:$16 sps:$4 sm:$0xff]  }
 0x337   :  { %v3982_v3 = vmax.f32 %v8893_v17, 0.0  ;;  %7237 = vmatpush1.bf16.msra.mxu0 %v9334_v28  ;;  %v3984_v40 = vmax.f32 %v8897_v58, 0.0  ;;  %v9373_v8 = vld [vmem:[#allocation8 + $0x788] ss:$16 sps:$4 sm:$0xff]   ;;  %v9381_v22 = vld [vmem:[#allocation8 + $0x7ac] ss:$16 sps:$4 sm:$0xff]  }
 0x338   :  { %v10156_v39 = vpack.c.bf16 %v3981_v21, %v3965_v20  ;;  %7581 = vmatpush1.bf16.msra.mxu1 %v9337_v34  ;;  %7238 = vmatprep.subr.bf16.mxu0 %v9342_v15  ;;  %v10158_v44 = vpack.c.bf16 %v3983_v32, %v3967_v23  ;;  %v9376_v10 = vld [vmem:[#allocation8 + $0x7a0] ss:$16 sps:$4 sm:$0xff]   ;;  %v9384_v29 = vld [vmem:[#allocation8 + $0x7c4] ss:$16 sps:$4 sm:$0xff]   ;;  %v9387_v27 = vld [vmem:[#allocation8 + $0x7cc] ss:$16 sps:$4 sm:$0xff]  }
 0x339   :  { %v10160_v56 = vpack.c.bf16 %v3982_v3, %v3966_v26  ;;  %7582 = vmatprep.subr.bf16.mxu1 %v9345_v19  ;;  %v10162_v46 = vpack.c.bf16 %v3984_v40, %v3968_v35  ;;  %v9382_v11 = vld [vmem:[#allocation8 + $0x7c0] ss:$16 sps:$4 sm:$0xff]   ;;  %v9390_v13 = vld [vmem:[#allocation8 + $0x7e4] ss:$16 sps:$4 sm:$0xff]   ;;  %v9393_v28 = vld [vmem:[#allocation8 + $0x7ec] ss:$16 sps:$4 sm:$0xff]  }
 0x33a   :  { %v9388_v62 = vld [vmem:[#allocation8 + $0x7e0] ss:$16 sps:$4 sm:$0xff]   ;;  %v9391_v14 = vld [vmem:[#allocation8 + $0x7e8] ss:$16 sps:$4 sm:$0xff]   ;;  %v9396_v47 = vld [vmem:[#allocation8 + $0x804] ss:$16 sps:$4 sm:$0xff]  }
 0x33b   :  { %7239 = vmatpush1.bf16.msra.mxu0 %v9340_v38  ;;  %v9399_v31 = vld [vmem:[#allocation8 + $0x80c] ss:$16 sps:$4 sm:$0xff]   ;;  %v9394_v34 = vld [vmem:[#allocation8 + $0x800] ss:$16 sps:$4 sm:$0xff]   ;;  %v9397_v15 = vld [vmem:[#allocation8 + $0x808] ss:$16 sps:$4 sm:$0xff]  }
 0x33c   :  { %7583 = vmatpush1.bf16.msra.mxu1 %v9343_v41  ;;  %7240 = vmatprep.subr.bf16.mxu0 %v9348_v43  ;;  %v9402_v16 = vld [vmem:[#allocation8 + $0x824] ss:$16 sps:$4 sm:$0xff]   ;;  %v9405_v17 = vld [vmem:[#allocation8 + $0x82c] ss:$16 sps:$4 sm:$0xff]   ;;  %v9400_v18 = vld [vmem:[#allocation8 + $0x820] ss:$16 sps:$4 sm:$0xff]  }
 0x33d   :  { %7584 = vmatprep.subr.bf16.mxu1 %v9351_v45  ;;  %v9403_v19 = vld [vmem:[#allocation8 + $0x828] ss:$16 sps:$4 sm:$0xff]   ;;  %v9408_v20 = vld [vmem:[#allocation8 + $0x844] ss:$16 sps:$4 sm:$0xff]   ;;  %v9411_v21 = vld [vmem:[#allocation8 + $0x84c] ss:$16 sps:$4 sm:$0xff]  }
 0x33e   :  { %v9406_v58 = vld [vmem:[#allocation8 + $0x840] ss:$16 sps:$4 sm:$0xff]   ;;  %v9409_v23 = vld [vmem:[#allocation8 + $0x848] ss:$16 sps:$4 sm:$0xff]   ;;  %v9414_v26 = vld [vmem:[#allocation8 + $0x864] ss:$16 sps:$4 sm:$0xff]  }
 0x33f   :  { %7241 = vmatpush1.bf16.msra.mxu0 %v9346_v48  ;;  %v9412_v32 = vld [vmem:[#allocation8 + $0x860] ss:$16 sps:$4 sm:$0xff]   ;;  %v9415_v3 = vld [vmem:[#allocation8 + $0x868] ss:$16 sps:$4 sm:$0xff]   ;;  %v9420_v38 = vld [vmem:[#allocation8 + $0x884] ss:$16 sps:$4 sm:$0xff]  }
 0x340   :  { %7585 = vmatpush1.bf16.msra.mxu1 %v9349_v49  ;;  %7242 = vmatprep.subr.bf16.mxu0 %v9354_v33  ;;  %v9423_v35 = vld [vmem:[#allocation8 + $0x88c] ss:$16 sps:$4 sm:$0xff]   ;;  %v9421_v40 = vld [vmem:[#allocation8 + $0x888] ss:$16 sps:$4 sm:$0xff]   ;;  %v9426_v41 = vld [vmem:[#allocation8 + $0x8a4] ss:$16 sps:$4 sm:$0xff]  }
 0x341   :  { %7586 = vmatprep.subr.bf16.mxu1 %v9357_v50  ;;  %v9429_v43 = vld [vmem:[#allocation8 + $0x8ac] ss:$16 sps:$4 sm:$0xff]   ;;  %v9424_v45 = vld [vmem:[#allocation8 + $0x8a0] ss:$16 sps:$4 sm:$0xff]   ;;  %v9427_v48 = vld [vmem:[#allocation8 + $0x8a8] ss:$16 sps:$4 sm:$0xff]  }
 0x342   :  { %v9432_v49 = vld [vmem:[#allocation8 + $0x8c4] ss:$16 sps:$4 sm:$0xff]   ;;  %v9435_v33 = vld [vmem:[#allocation8 + $0x8cc] ss:$16 sps:$4 sm:$0xff]   ;;  %v9430_v50 = vld [vmem:[#allocation8 + $0x8c0] ss:$16 sps:$4 sm:$0xff]  }
 0x343   :  { %7243 = vmatpush1.bf16.msra.mxu0 %v9352_v51  ;;  %v9433_v51 = vld [vmem:[#allocation8 + $0x8c8] ss:$16 sps:$4 sm:$0xff]  }
 0x344   :  { %7587 = vmatpush1.bf16.msra.mxu1 %v9355_v52  ;;  %7244 = vmatprep.subr.bf16.mxu0 %v9360_v55  ;;  %v9438_v52 = vld [vmem:[#allocation8 + $0x8e4] ss:$16 sps:$4 sm:$0xff]   ;;  %v9441_v55 = vld [vmem:[#allocation8 + $0x8ec] ss:$16 sps:$4 sm:$0xff]  }
 0x345   :  { %7588 = vmatprep.subr.bf16.mxu1 %v9363_v42  ;;  %v9436_v42 = vld [vmem:[#allocation8 + $0x8e0] ss:$16 sps:$4 sm:$0xff]  }
 0x347   :  { %7245 = vmatpush1.bf16.msra.mxu0 %v9358_v57  ;;  %v9439_v57 = vld [vmem:[#allocation8 + $0x8e8] ss:$16 sps:$4 sm:$0xff]  }
 0x348   :  { %7589 = vmatpush1.bf16.msra.mxu1 %v9361_v0  ;;  %7246 = vmatprep.subr.bf16.mxu0 %v9366_v1  ;;  %v9444_v0 = vld [vmem:[#allocation8 + $0x904] ss:$16 sps:$4 sm:$0xff]   ;;  %v9447_v1 = vld [vmem:[#allocation8 + $0x90c] ss:$16 sps:$4 sm:$0xff]  }
 0x349   :  { %7590 = vmatprep.subr.bf16.mxu1 %v9369_v2  ;;  %v9442_v2 = vld [vmem:[#allocation8 + $0x900] ss:$16 sps:$4 sm:$0xff]  }
 0x34b   :  { %7247 = vmatpush1.bf16.msra.mxu0 %v9364_v4  ;;  %v9445_v4 = vld [vmem:[#allocation8 + $0x908] ss:$16 sps:$4 sm:$0xff]  }
 0x34c   :  { %7591 = vmatpush1.bf16.msra.mxu1 %v9367_v5  ;;  %7248 = vmatprep.subr.bf16.mxu0 %v9372_v59  ;;  %v9450_v5 = vld [vmem:[#allocation8 + $0x924] ss:$16 sps:$4 sm:$0xff]   ;;  %v9453_v59 = vld [vmem:[#allocation8 + $0x92c] ss:$16 sps:$4 sm:$0xff]  }
 0x34d   :  { %7592 = vmatprep.subr.bf16.mxu1 %v9375_v6  ;;  %v9448_v6 = vld [vmem:[#allocation8 + $0x920] ss:$16 sps:$4 sm:$0xff]  }
 0x34f   :  { %7249 = vmatpush1.bf16.msra.mxu0 %v9370_v7  ;;  %v9451_v7 = vld [vmem:[#allocation8 + $0x928] ss:$16 sps:$4 sm:$0xff]  }
 0x350   :  { %7593 = vmatpush1.bf16.msra.mxu1 %v9373_v8  ;;  %7250 = vmatprep.subr.bf16.mxu0 %v9378_v9  ;;  %v9456_v8 = vld [vmem:[#allocation8 + $0x944] ss:$16 sps:$4 sm:$0xff]   ;;  %v9459_v9 = vld [vmem:[#allocation8 + $0x94c] ss:$16 sps:$4 sm:$0xff]  }
 0x351   :  { %7594 = vmatprep.subr.bf16.mxu1 %v9381_v22  ;;  %v9454_v22 = vld [vmem:[#allocation8 + $0x940] ss:$16 sps:$4 sm:$0xff]  }
 0x353   :  { %7251 = vmatpush1.bf16.msra.mxu0 %v9376_v10  ;;  %v9457_v10 = vld [vmem:[#allocation8 + $0x948] ss:$16 sps:$4 sm:$0xff]  }
 0x354   :  { %7595 = vmatpush1.bf16.msra.mxu1 %v9379_v24  ;;  %7252 = vmatprep.subr.bf16.mxu0 %v9384_v29  ;;  %v9462_v24 = vld [vmem:[#allocation8 + $0x964] ss:$16 sps:$4 sm:$0xff]   ;;  %v9465_v29 = vld [vmem:[#allocation8 + $0x96c] ss:$16 sps:$4 sm:$0xff]  }
 0x355   :  { %7596 = vmatprep.subr.bf16.mxu1 %v9387_v27  ;;  %v9460_v27 = vld [vmem:[#allocation8 + $0x960] ss:$16 sps:$4 sm:$0xff]  }
 0x357   :  { %7253 = vmatpush1.bf16.msra.mxu0 %v9382_v11  ;;  %v9463_v11 = vld [vmem:[#allocation8 + $0x968] ss:$16 sps:$4 sm:$0xff]  }
 0x358   :  { %7597 = vmatpush1.bf16.msra.mxu1 %v9385_v12  ;;  %7254 = vmatprep.subr.bf16.mxu0 %v9390_v13  ;;  %v9468_v12 = vld [vmem:[#allocation8 + $0x984] ss:$16 sps:$4 sm:$0xff]   ;;  %v9471_v13 = vld [vmem:[#allocation8 + $0x98c] ss:$16 sps:$4 sm:$0xff]  }
 0x359   :  { %7598 = vmatprep.subr.bf16.mxu1 %v9393_v28  ;;  %v9466_v28 = vld [vmem:[#allocation8 + $0x980] ss:$16 sps:$4 sm:$0xff]  }
 0x35b   :  { %7255 = vmatpush1.bf16.msra.mxu0 %v9388_v62  ;;  %v9469_v62 = vld [vmem:[#allocation8 + $0x988] ss:$16 sps:$4 sm:$0xff]  }
 0x35c   :  { %7599 = vmatpush1.bf16.msra.mxu1 %v9391_v14  ;;  %7267 = vmatprep.subr.bf16.mxu0 %v9396_v47  ;;  %v9474_v14 = vld [vmem:[#allocation8 + $0x9a4] ss:$16 sps:$4 sm:$0xff]   ;;  %v9477_v47 = vld [vmem:[#allocation8 + $0x9ac] ss:$16 sps:$4 sm:$0xff]  }
 0x35d   :  { %7611 = vmatprep.subr.bf16.mxu1 %v9399_v31  ;;  %v9472_v31 = vld [vmem:[#allocation8 + $0x9a0] ss:$16 sps:$4 sm:$0xff]  }
 0x35e   :  { %7257 = vmatmul.mubr.bf16.vlgmr.msra.gmra.mrb[16].mxu0 %v10104_v37 }
 0x35f   :  { %7601 = vmatmul.mubr.bf16.vlgmr.msra.gmra.mrb[16].mxu1 %v10104_v37  ;;  %7268 = vmatpush1.bf16.msra.mxu0 %v9394_v34  ;;  %v9417_v37 = vld [vmem:[#allocation8 + $0x86c] ss:$16 sps:$4 sm:$0xff]   ;;  %v9475_v34 = vld [vmem:[#allocation8 + $0x9a8] ss:$16 sps:$4 sm:$0xff]  }
 0x360   :  { %7299 = vmatprep.mubr.bf16.mxu0 %v10132_v25  ;;  %7612 = vmatpush1.bf16.msra.mxu1 %v9397_v15  ;;  %v9480_v15 = vld [vmem:[#allocation8 + $0x9c4] ss:$16 sps:$4 sm:$0xff]  }
 0x361   :  { %7643 = vmatprep.mubr.bf16.mxu1 %v10132_v25  ;;  %7269 = vmatprep.subr.bf16.mxu0 %v9402_v16  ;;  %v9418_v25 = vld [vmem:[#allocation8 + $0x880] ss:$16 sps:$4 sm:$0xff]   ;;  %v9483_v16 = vld [vmem:[#allocation8 + $0x9cc] ss:$16 sps:$4 sm:$0xff]  }
 0x362   :  { %7613 = vmatprep.subr.bf16.mxu1 %v9405_v17  ;;  %v9478_v17 = vld [vmem:[#allocation8 + $0x9c0] ss:$16 sps:$4 sm:$0xff]  }
 0x363   :  { %7270 = vmatpush1.bf16.msra.mxu0 %v9400_v18  ;;  %v9481_v18 = vld [vmem:[#allocation8 + $0x9c8] ss:$16 sps:$4 sm:$0xff]  }
 0x364   :  { %7614 = vmatpush1.bf16.msra.mxu1 %v9403_v19  ;;  %7271 = vmatprep.subr.bf16.mxu0 %v9408_v20  ;;  %v9486_v19 = vld [vmem:[#allocation8 + $0x9e4] ss:$16 sps:$4 sm:$0xff]   ;;  %v9489_v20 = vld [vmem:[#allocation8 + $0x9ec] ss:$16 sps:$4 sm:$0xff]  }
 0x365   :  { %7615 = vmatprep.subr.bf16.mxu1 %v9411_v21  ;;  %v9484_v21 = vld [vmem:[#allocation8 + $0x9e0] ss:$16 sps:$4 sm:$0xff]  }
 0x367   :  { %7272 = vmatpush1.bf16.msra.mxu0 %v9406_v58  ;;  %v9487_v58 = vld [vmem:[#allocation8 + $0x9e8] ss:$16 sps:$4 sm:$0xff]  }
 0x368   :  { %7616 = vmatpush1.bf16.msra.mxu1 %v9409_v23  ;;  %7273 = vmatprep.subr.bf16.mxu0 %v9414_v26  ;;  %v9492_v23 = vld [vmem:[#allocation8 + $0xa04] ss:$16 sps:$4 sm:$0xff]   ;;  %v9495_v26 = vld [vmem:[#allocation8 + $0xa0c] ss:$16 sps:$4 sm:$0xff]  }
 0x369   :  { %7617 = vmatprep.subr.bf16.mxu1 %v9417_v37  ;;  %v9490_v37 = vld [vmem:[#allocation8 + $0xa00] ss:$16 sps:$4 sm:$0xff]  }
 0x36b   :  { %7274 = vmatpush1.bf16.msra.mxu0 %v9412_v32  ;;  %v9493_v32 = vld [vmem:[#allocation8 + $0xa08] ss:$16 sps:$4 sm:$0xff]  }
 0x36c   :  { %7618 = vmatpush1.bf16.msra.mxu1 %v9415_v3  ;;  %7275 = vmatprep.subr.bf16.mxu0 %v9420_v38  ;;  %v9498_v3 = vld [vmem:[#allocation8 + $0xa24] ss:$16 sps:$4 sm:$0xff]   ;;  %v9501_v38 = vld [vmem:[#allocation8 + $0xa2c] ss:$16 sps:$4 sm:$0xff]  }
 0x36d   :  { %7619 = vmatprep.subr.bf16.mxu1 %v9423_v35  ;;  %v9496_v35 = vld [vmem:[#allocation8 + $0xa20] ss:$16 sps:$4 sm:$0xff]  }
 0x36f   :  { %7276 = vmatpush1.bf16.msra.mxu0 %v9418_v25  ;;  %v9499_v25 = vld [vmem:[#allocation8 + $0xa28] ss:$16 sps:$4 sm:$0xff]  }
 0x370   :  { %7620 = vmatpush1.bf16.msra.mxu1 %v9421_v40  ;;  %7277 = vmatprep.subr.bf16.mxu0 %v9426_v41  ;;  %v9504_v40 = vld [vmem:[#allocation8 + $0xa44] ss:$16 sps:$4 sm:$0xff]   ;;  %v9507_v41 = vld [vmem:[#allocation8 + $0xa4c] ss:$16 sps:$4 sm:$0xff]  }
 0x371   :  { %7621 = vmatprep.subr.bf16.mxu1 %v9429_v43  ;;  %v9502_v43 = vld [vmem:[#allocation8 + $0xa40] ss:$16 sps:$4 sm:$0xff]  }
 0x373   :  { %7278 = vmatpush1.bf16.msra.mxu0 %v9424_v45  ;;  %v9505_v45 = vld [vmem:[#allocation8 + $0xa48] ss:$16 sps:$4 sm:$0xff]  }
 0x374   :  { %7622 = vmatpush1.bf16.msra.mxu1 %v9427_v48  ;;  %7279 = vmatprep.subr.bf16.mxu0 %v9432_v49  ;;  %v9510_v48 = vld [vmem:[#allocation8 + $0xa64] ss:$16 sps:$4 sm:$0xff]   ;;  %v9508_v49 = vld [vmem:[#allocation8 + $0xa60] ss:$16 sps:$4 sm:$0xff]  }
 0x375   :  { %7623 = vmatprep.subr.bf16.mxu1 %v9435_v33  ;;  %v9511_v33 = vld [vmem:[#allocation8 + $0xa68] ss:$16 sps:$4 sm:$0xff]  }
 0x377   :  { %7280 = vmatpush1.bf16.msra.mxu0 %v9430_v50  ;;  %v9516_v50 = vld [vmem:[#allocation8 + $0xa84] ss:$16 sps:$4 sm:$0xff]  }
 0x378   :  { %7624 = vmatpush1.bf16.msra.mxu1 %v9433_v51  ;;  %7281 = vmatprep.subr.bf16.mxu0 %v9438_v52  ;;  %v9519_v51 = vld [vmem:[#allocation8 + $0xa8c] ss:$16 sps:$4 sm:$0xff]   ;;  %v9517_v52 = vld [vmem:[#allocation8 + $0xa88] ss:$16 sps:$4 sm:$0xff]  }
 0x379   :  { %7625 = vmatprep.subr.bf16.mxu1 %v9441_v55  ;;  %v9522_v55 = vld [vmem:[#allocation8 + $0xaa4] ss:$16 sps:$4 sm:$0xff]  }
 0x37b   :  { %7282 = vmatpush1.bf16.msra.mxu0 %v9436_v42  ;;  %v9525_v42 = vld [vmem:[#allocation8 + $0xaac] ss:$16 sps:$4 sm:$0xff]  }
 0x37c   :  { %7626 = vmatpush1.bf16.msra.mxu1 %v9439_v57  ;;  %7283 = vmatprep.subr.bf16.mxu0 %v9444_v0  ;;  %v9520_v57 = vld [vmem:[#allocation8 + $0xaa0] ss:$16 sps:$4 sm:$0xff]   ;;  %v9523_v0 = vld [vmem:[#allocation8 + $0xaa8] ss:$16 sps:$4 sm:$0xff]  }
 0x37d   :  { %7627 = vmatprep.subr.bf16.mxu1 %v9447_v1  ;;  %v9528_v1 = vld [vmem:[#allocation8 + $0xac4] ss:$16 sps:$4 sm:$0xff]  }
 0x37f   :  { %7284 = vmatpush1.bf16.msra.mxu0 %v9442_v2  ;;  %v9531_v2 = vld [vmem:[#allocation8 + $0xacc] ss:$16 sps:$4 sm:$0xff]  }
 0x380   :  { %7628 = vmatpush1.bf16.msra.mxu1 %v9445_v4  ;;  %7285 = vmatprep.subr.bf16.mxu0 %v9450_v5  ;;  %v9526_v4 = vld [vmem:[#allocation8 + $0xac0] ss:$16 sps:$4 sm:$0xff]   ;;  %v9529_v5 = vld [vmem:[#allocation8 + $0xac8] ss:$16 sps:$4 sm:$0xff]  }
 0x381   :  { %7629 = vmatprep.subr.bf16.mxu1 %v9453_v59  ;;  %v9534_v59 = vld [vmem:[#allocation8 + $0xae4] ss:$16 sps:$4 sm:$0xff]  }
 0x383   :  { %7286 = vmatpush1.bf16.msra.mxu0 %v9448_v6  ;;  %v9537_v6 = vld [vmem:[#allocation8 + $0xaec] ss:$16 sps:$4 sm:$0xff]  }
 0x384   :  { %7630 = vmatpush1.bf16.msra.mxu1 %v9451_v7  ;;  %7287 = vmatprep.subr.bf16.mxu0 %v9456_v8  ;;  %v9532_v7 = vld [vmem:[#allocation8 + $0xae0] ss:$16 sps:$4 sm:$0xff]   ;;  %v9535_v8 = vld [vmem:[#allocation8 + $0xae8] ss:$16 sps:$4 sm:$0xff]  }
 0x385   :  { %7631 = vmatprep.subr.bf16.mxu1 %v9459_v9  ;;  %v9540_v9 = vld [vmem:[#allocation8 + $0xb04] ss:$16 sps:$4 sm:$0xff]  }
 0x387   :  { %7288 = vmatpush1.bf16.msra.mxu0 %v9454_v22  ;;  %v9543_v22 = vld [vmem:[#allocation8 + $0xb0c] ss:$16 sps:$4 sm:$0xff]  }
 0x388   :  { %7632 = vmatpush1.bf16.msra.mxu1 %v9457_v10  ;;  %7289 = vmatprep.subr.bf16.mxu0 %v9462_v24  ;;  %v9538_v10 = vld [vmem:[#allocation8 + $0xb00] ss:$16 sps:$4 sm:$0xff]   ;;  %v9541_v24 = vld [vmem:[#allocation8 + $0xb08] ss:$16 sps:$4 sm:$0xff]  }
 0x389   :  { %7633 = vmatprep.subr.bf16.mxu1 %v9465_v29  ;;  %v9546_v29 = vld [vmem:[#allocation8 + $0xb24] ss:$16 sps:$4 sm:$0xff]  }
 0x38b   :  { %7290 = vmatpush1.bf16.msra.mxu0 %v9460_v27  ;;  %v9549_v27 = vld [vmem:[#allocation8 + $0xb2c] ss:$16 sps:$4 sm:$0xff]  }
 0x38c   :  { %7634 = vmatpush1.bf16.msra.mxu1 %v9463_v11  ;;  %7291 = vmatprep.subr.bf16.mxu0 %v9468_v12  ;;  %v9544_v11 = vld [vmem:[#allocation8 + $0xb20] ss:$16 sps:$4 sm:$0xff]   ;;  %v9547_v12 = vld [vmem:[#allocation8 + $0xb28] ss:$16 sps:$4 sm:$0xff]  }
 0x38d   :  { %7635 = vmatprep.subr.bf16.mxu1 %v9471_v13  ;;  %v9552_v13 = vld [vmem:[#allocation8 + $0xb44] ss:$16 sps:$4 sm:$0xff]  }
 0x38f   :  { %7292 = vmatpush1.bf16.msra.mxu0 %v9466_v28  ;;  %v9555_v28 = vld [vmem:[#allocation8 + $0xb4c] ss:$16 sps:$4 sm:$0xff]  }
 0x390   :  { %7636 = vmatpush1.bf16.msra.mxu1 %v9469_v62  ;;  %7293 = vmatprep.subr.bf16.mxu0 %v9474_v14  ;;  %v9550_v62 = vld [vmem:[#allocation8 + $0xb40] ss:$16 sps:$4 sm:$0xff]   ;;  %v9553_v14 = vld [vmem:[#allocation8 + $0xb48] ss:$16 sps:$4 sm:$0xff]  }
 0x391   :  { %7637 = vmatprep.subr.bf16.mxu1 %v9477_v47  ;;  %v9558_v47 = vld [vmem:[#allocation8 + $0xb64] ss:$16 sps:$4 sm:$0xff]  }
 0x393   :  { %7294 = vmatpush1.bf16.msra.mxu0 %v9472_v31  ;;  %v9561_v31 = vld [vmem:[#allocation8 + $0xb6c] ss:$16 sps:$4 sm:$0xff]  }
 0x394   :  { %7638 = vmatpush1.bf16.msra.mxu1 %v9475_v34  ;;  %7295 = vmatprep.subr.bf16.mxu0 %v9480_v15  ;;  %v9556_v34 = vld [vmem:[#allocation8 + $0xb60] ss:$16 sps:$4 sm:$0xff]   ;;  %v9559_v15 = vld [vmem:[#allocation8 + $0xb68] ss:$16 sps:$4 sm:$0xff]  }
 0x395   :  { %7639 = vmatprep.subr.bf16.mxu1 %v9483_v16  ;;  %v9564_v16 = vld [vmem:[#allocation8 + $0xb84] ss:$16 sps:$4 sm:$0xff]  }
 0x397   :  { %7296 = vmatpush1.bf16.msra.mxu0 %v9478_v17  ;;  %v9567_v17 = vld [vmem:[#allocation8 + $0xb8c] ss:$16 sps:$4 sm:$0xff]  }
 0x398   :  { %7640 = vmatpush1.bf16.msra.mxu1 %v9481_v18  ;;  %7297 = vmatprep.subr.bf16.mxu0 %v9486_v19  ;;  %v9562_v18 = vld [vmem:[#allocation8 + $0xb80] ss:$16 sps:$4 sm:$0xff]   ;;  %v9565_v19 = vld [vmem:[#allocation8 + $0xb88] ss:$16 sps:$4 sm:$0xff]  }
 0x399   :  { %7641 = vmatprep.subr.bf16.mxu1 %v9489_v20  ;;  %v9570_v20 = vld [vmem:[#allocation8 + $0xba4] ss:$16 sps:$4 sm:$0xff]  }
 0x39b   :  { %7298 = vmatpush1.bf16.msra.mxu0 %v9484_v21  ;;  %v9573_v21 = vld [vmem:[#allocation8 + $0xbac] ss:$16 sps:$4 sm:$0xff]  }
 0x39c   :  { %7642 = vmatpush1.bf16.msra.mxu1 %v9487_v58  ;;  %7310 = vmatprep.subr.bf16.mxu0 %v9492_v23  ;;  %v9568_v58 = vld [vmem:[#allocation8 + $0xba0] ss:$16 sps:$4 sm:$0xff]   ;;  %v9571_v23 = vld [vmem:[#allocation8 + $0xba8] ss:$16 sps:$4 sm:$0xff]  }
 0x39d   :  { %7654 = vmatprep.subr.bf16.mxu1 %v9495_v26  ;;  %v9576_v26 = vld [vmem:[#allocation8 + $0xbc4] ss:$16 sps:$4 sm:$0xff]  }
 0x39e   :  { %7300 = vmatmul.mubr.bf16.vlgmr.msra.gmra.mrb[16].mxu0 %v10128_v36 }
 0x39f   :  { %7644 = vmatmul.mubr.bf16.vlgmr.msra.gmra.mrb[16].mxu1 %v10128_v36  ;;  %7311 = vmatpush1.bf16.msra.mxu0 %v9490_v37  ;;  %v9513_v36 = vld [vmem:[#allocation8 + $0xa6c] ss:$16 sps:$4 sm:$0xff]  }
 0x3a0   :  { %7342 = vmatprep.mubr.bf16.mxu0 %v10134_v30  ;;  %7655 = vmatpush1.bf16.msra.mxu1 %v9493_v32  ;;  %v9579_v37 = vld [vmem:[#allocation8 + $0xbcc] ss:$16 sps:$4 sm:$0xff]   ;;  %v9574_v32 = vld [vmem:[#allocation8 + $0xbc0] ss:$16 sps:$4 sm:$0xff]  }
 0x3a1   :  { %7686 = vmatprep.mubr.bf16.mxu1 %v10134_v30  ;;  %7312 = vmatprep.subr.bf16.mxu0 %v9498_v3  ;;  %v9514_v30 = vld [vmem:[#allocation8 + $0xa80] ss:$16 sps:$4 sm:$0xff]   ;;  %v9577_v3 = vld [vmem:[#allocation8 + $0xbc8] ss:$16 sps:$4 sm:$0xff]  }
 0x3a2   :  { %7656 = vmatprep.subr.bf16.mxu1 %v9501_v38  ;;  %v9582_v38 = vld [vmem:[#allocation8 + $0xbe4] ss:$16 sps:$4 sm:$0xff]  }
 0x3a3   :  { %7313 = vmatpush1.bf16.msra.mxu0 %v9496_v35  ;;  %v9585_v35 = vld [vmem:[#allocation8 + $0xbec] ss:$16 sps:$4 sm:$0xff]  }
 0x3a4   :  { %7657 = vmatpush1.bf16.msra.mxu1 %v9499_v25  ;;  %7314 = vmatprep.subr.bf16.mxu0 %v9504_v40  ;;  %v9580_v25 = vld [vmem:[#allocation8 + $0xbe0] ss:$16 sps:$4 sm:$0xff]   ;;  %v9583_v40 = vld [vmem:[#allocation8 + $0xbe8] ss:$16 sps:$4 sm:$0xff]  }
 0x3a5   :  { %7658 = vmatprep.subr.bf16.mxu1 %v9507_v41  ;;  %v9588_v41 = vld [vmem:[#allocation8 + $0xc04] ss:$16 sps:$4 sm:$0xff]  }
 0x3a7   :  { %7315 = vmatpush1.bf16.msra.mxu0 %v9502_v43  ;;  %v9591_v43 = vld [vmem:[#allocation8 + $0xc0c] ss:$16 sps:$4 sm:$0xff]  }
 0x3a8   :  { %7659 = vmatpush1.bf16.msra.mxu1 %v9505_v45  ;;  %7316 = vmatprep.subr.bf16.mxu0 %v9510_v48  ;;  %v9586_v45 = vld [vmem:[#allocation8 + $0xc00] ss:$16 sps:$4 sm:$0xff]   ;;  %v9589_v48 = vld [vmem:[#allocation8 + $0xc08] ss:$16 sps:$4 sm:$0xff]  }
 0x3a9   :  { %7660 = vmatprep.subr.bf16.mxu1 %v9513_v36  ;;  %v9594_v36 = vld [vmem:[#allocation8 + $0xc24] ss:$16 sps:$4 sm:$0xff]  }
 0x3ab   :  { %7317 = vmatpush1.bf16.msra.mxu0 %v9508_v49  ;;  %v9597_v49 = vld [vmem:[#allocation8 + $0xc2c] ss:$16 sps:$4 sm:$0xff]  }
 0x3ac   :  { %7661 = vmatpush1.bf16.msra.mxu1 %v9511_v33  ;;  %7318 = vmatprep.subr.bf16.mxu0 %v9516_v50  ;;  %v9592_v33 = vld [vmem:[#allocation8 + $0xc20] ss:$16 sps:$4 sm:$0xff]   ;;  %v9595_v50 = vld [vmem:[#allocation8 + $0xc28] ss:$16 sps:$4 sm:$0xff]  }
 0x3ad   :  { %7662 = vmatprep.subr.bf16.mxu1 %v9519_v51  ;;  %v9600_v51 = vld [vmem:[#allocation8 + $0xc44] ss:$16 sps:$4 sm:$0xff]  }
 0x3af   :  { %7319 = vmatpush1.bf16.msra.mxu0 %v9514_v30  ;;  %v9603_v30 = vld [vmem:[#allocation8 + $0xc4c] ss:$16 sps:$4 sm:$0xff]  }
 0x3b0   :  { %7663 = vmatpush1.bf16.msra.mxu1 %v9517_v52  ;;  %7320 = vmatprep.subr.bf16.mxu0 %v9522_v55  ;;  %v9598_v52 = vld [vmem:[#allocation8 + $0xc40] ss:$16 sps:$4 sm:$0xff]   ;;  %v9601_v55 = vld [vmem:[#allocation8 + $0xc48] ss:$16 sps:$4 sm:$0xff]  }
 0x3b1   :  { %7664 = vmatprep.subr.bf16.mxu1 %v9525_v42  ;;  %v9606_v42 = vld [vmem:[#allocation8 + $0xc64] ss:$16 sps:$4 sm:$0xff]  }
 0x3b3   :  { %7321 = vmatpush1.bf16.msra.mxu0 %v9520_v57  ;;  %v9604_v57 = vld [vmem:[#allocation8 + $0xc60] ss:$16 sps:$4 sm:$0xff]  }
 0x3b4   :  { %7665 = vmatpush1.bf16.msra.mxu1 %v9523_v0  ;;  %7322 = vmatprep.subr.bf16.mxu0 %v9528_v1  ;;  %v9607_v0 = vld [vmem:[#allocation8 + $0xc68] ss:$16 sps:$4 sm:$0xff]   ;;  %v9612_v1 = vld [vmem:[#allocation8 + $0xc84] ss:$16 sps:$4 sm:$0xff]  }
 0x3b5   :  { %7666 = vmatprep.subr.bf16.mxu1 %v9531_v2  ;;  %v9615_v2 = vld [vmem:[#allocation8 + $0xc8c] ss:$16 sps:$4 sm:$0xff]  }
 0x3b7   :  { %7323 = vmatpush1.bf16.msra.mxu0 %v9526_v4  ;;  %v9613_v4 = vld [vmem:[#allocation8 + $0xc88] ss:$16 sps:$4 sm:$0xff]  }
 0x3b8   :  { %7667 = vmatpush1.bf16.msra.mxu1 %v9529_v5  ;;  %7324 = vmatprep.subr.bf16.mxu0 %v9534_v59  ;;  %v9618_v5 = vld [vmem:[#allocation8 + $0xca4] ss:$16 sps:$4 sm:$0xff]   ;;  %v9621_v59 = vld [vmem:[#allocation8 + $0xcac] ss:$16 sps:$4 sm:$0xff]  }
 0x3b9   :  { %7668 = vmatprep.subr.bf16.mxu1 %v9537_v6  ;;  %v9616_v6 = vld [vmem:[#allocation8 + $0xca0] ss:$16 sps:$4 sm:$0xff]  }
 0x3bb   :  { %7325 = vmatpush1.bf16.msra.mxu0 %v9532_v7  ;;  %v9619_v7 = vld [vmem:[#allocation8 + $0xca8] ss:$16 sps:$4 sm:$0xff]  }
 0x3bc   :  { %7669 = vmatpush1.bf16.msra.mxu1 %v9535_v8  ;;  %7326 = vmatprep.subr.bf16.mxu0 %v9540_v9  ;;  %v9624_v8 = vld [vmem:[#allocation8 + $0xcc4] ss:$16 sps:$4 sm:$0xff]   ;;  %v9627_v9 = vld [vmem:[#allocation8 + $0xccc] ss:$16 sps:$4 sm:$0xff]  }
 0x3bd   :  { %7670 = vmatprep.subr.bf16.mxu1 %v9543_v22  ;;  %v9622_v22 = vld [vmem:[#allocation8 + $0xcc0] ss:$16 sps:$4 sm:$0xff]  }
 0x3bf   :  { %7327 = vmatpush1.bf16.msra.mxu0 %v9538_v10  ;;  %v9625_v10 = vld [vmem:[#allocation8 + $0xcc8] ss:$16 sps:$4 sm:$0xff]  }
 0x3c0   :  { %7671 = vmatpush1.bf16.msra.mxu1 %v9541_v24  ;;  %7328 = vmatprep.subr.bf16.mxu0 %v9546_v29  ;;  %v9630_v24 = vld [vmem:[#allocation8 + $0xce4] ss:$16 sps:$4 sm:$0xff]   ;;  %v9633_v29 = vld [vmem:[#allocation8 + $0xcec] ss:$16 sps:$4 sm:$0xff]  }
 0x3c1   :  { %7672 = vmatprep.subr.bf16.mxu1 %v9549_v27  ;;  %v9628_v27 = vld [vmem:[#allocation8 + $0xce0] ss:$16 sps:$4 sm:$0xff]  }
 0x3c3   :  { %7329 = vmatpush1.bf16.msra.mxu0 %v9544_v11  ;;  %v9631_v11 = vld [vmem:[#allocation8 + $0xce8] ss:$16 sps:$4 sm:$0xff]  }
 0x3c4   :  { %7673 = vmatpush1.bf16.msra.mxu1 %v9547_v12  ;;  %7330 = vmatprep.subr.bf16.mxu0 %v9552_v13  ;;  %v9636_v12 = vld [vmem:[#allocation8 + $0xd04] ss:$16 sps:$4 sm:$0xff]   ;;  %v9639_v13 = vld [vmem:[#allocation8 + $0xd0c] ss:$16 sps:$4 sm:$0xff]  }
 0x3c5   :  { %7674 = vmatprep.subr.bf16.mxu1 %v9555_v28  ;;  %v9634_v28 = vld [vmem:[#allocation8 + $0xd00] ss:$16 sps:$4 sm:$0xff]  }
 0x3c7   :  { %7331 = vmatpush1.bf16.msra.mxu0 %v9550_v62  ;;  %v9637_v62 = vld [vmem:[#allocation8 + $0xd08] ss:$16 sps:$4 sm:$0xff]  }
 0x3c8   :  { %7675 = vmatpush1.bf16.msra.mxu1 %v9553_v14  ;;  %7332 = vmatprep.subr.bf16.mxu0 %v9558_v47  ;;  %v9642_v14 = vld [vmem:[#allocation8 + $0xd24] ss:$16 sps:$4 sm:$0xff]   ;;  %v9645_v47 = vld [vmem:[#allocation8 + $0xd2c] ss:$16 sps:$4 sm:$0xff]  }
 0x3c9   :  { %7676 = vmatprep.subr.bf16.mxu1 %v9561_v31  ;;  %v9640_v31 = vld [vmem:[#allocation8 + $0xd20] ss:$16 sps:$4 sm:$0xff]  }
 0x3cb   :  { %7333 = vmatpush1.bf16.msra.mxu0 %v9556_v34  ;;  %v9643_v34 = vld [vmem:[#allocation8 + $0xd28] ss:$16 sps:$4 sm:$0xff]  }
 0x3cc   :  { %7677 = vmatpush1.bf16.msra.mxu1 %v9559_v15  ;;  %7334 = vmatprep.subr.bf16.mxu0 %v9564_v16  ;;  %v9648_v15 = vld [vmem:[#allocation8 + $0xd44] ss:$16 sps:$4 sm:$0xff]   ;;  %v9651_v16 = vld [vmem:[#allocation8 + $0xd4c] ss:$16 sps:$4 sm:$0xff]  }
 0x3cd   :  { %7678 = vmatprep.subr.bf16.mxu1 %v9567_v17  ;;  %v9646_v17 = vld [vmem:[#allocation8 + $0xd40] ss:$16 sps:$4 sm:$0xff]  }
 0x3cf   :  { %7335 = vmatpush1.bf16.msra.mxu0 %v9562_v18  ;;  %v9649_v18 = vld [vmem:[#allocation8 + $0xd48] ss:$16 sps:$4 sm:$0xff]  }
 0x3d0   :  { %7679 = vmatpush1.bf16.msra.mxu1 %v9565_v19  ;;  %7336 = vmatprep.subr.bf16.mxu0 %v9570_v20  ;;  %v9654_v19 = vld [vmem:[#allocation8 + $0xd64] ss:$16 sps:$4 sm:$0xff]   ;;  %v9657_v20 = vld [vmem:[#allocation8 + $0xd6c] ss:$16 sps:$4 sm:$0xff]  }
 0x3d1   :  { %7680 = vmatprep.subr.bf16.mxu1 %v9573_v21  ;;  %v9652_v21 = vld [vmem:[#allocation8 + $0xd60] ss:$16 sps:$4 sm:$0xff]  }
 0x3d3   :  { %7337 = vmatpush1.bf16.msra.mxu0 %v9568_v58  ;;  %v9655_v58 = vld [vmem:[#allocation8 + $0xd68] ss:$16 sps:$4 sm:$0xff]  }
 0x3d4   :  { %7681 = vmatpush1.bf16.msra.mxu1 %v9571_v23  ;;  %7338 = vmatprep.subr.bf16.mxu0 %v9576_v26  ;;  %v9660_v23 = vld [vmem:[#allocation8 + $0xd84] ss:$16 sps:$4 sm:$0xff]   ;;  %v9663_v26 = vld [vmem:[#allocation8 + $0xd8c] ss:$16 sps:$4 sm:$0xff]  }
 0x3d5   :  { %7682 = vmatprep.subr.bf16.mxu1 %v9579_v37  ;;  %v9658_v37 = vld [vmem:[#allocation8 + $0xd80] ss:$16 sps:$4 sm:$0xff]  }
 0x3d7   :  { %7339 = vmatpush1.bf16.msra.mxu0 %v9574_v32  ;;  %v9661_v32 = vld [vmem:[#allocation8 + $0xd88] ss:$16 sps:$4 sm:$0xff]  }
 0x3d8   :  { %7683 = vmatpush1.bf16.msra.mxu1 %v9577_v3  ;;  %7340 = vmatprep.subr.bf16.mxu0 %v9582_v38  ;;  %v9666_v3 = vld [vmem:[#allocation8 + $0xda4] ss:$16 sps:$4 sm:$0xff]   ;;  %v9669_v38 = vld [vmem:[#allocation8 + $0xdac] ss:$16 sps:$4 sm:$0xff]  }
 0x3d9   :  { %7684 = vmatprep.subr.bf16.mxu1 %v9585_v35  ;;  %v9664_v35 = vld [vmem:[#allocation8 + $0xda0] ss:$16 sps:$4 sm:$0xff]  }
 0x3db   :  { %7341 = vmatpush1.bf16.msra.mxu0 %v9580_v25  ;;  %v9667_v25 = vld [vmem:[#allocation8 + $0xda8] ss:$16 sps:$4 sm:$0xff]  }
 0x3dc   :  { %7685 = vmatpush1.bf16.msra.mxu1 %v9583_v40  ;;  %7353 = vmatprep.subr.bf16.mxu0 %v9588_v41  ;;  %v9672_v40 = vld [vmem:[#allocation8 + $0xdc4] ss:$16 sps:$4 sm:$0xff]   ;;  %v9675_v41 = vld [vmem:[#allocation8 + $0xdcc] ss:$16 sps:$4 sm:$0xff]  }
 0x3dd   :  { %7697 = vmatprep.subr.bf16.mxu1 %v9591_v43  ;;  %v9670_v43 = vld [vmem:[#allocation8 + $0xdc0] ss:$16 sps:$4 sm:$0xff]  }
 0x3de   :  { %7343 = vmatmul.mubr.bf16.vlgmr.msra.gmra.mrb[16].mxu0 %v10130_v53 }
 0x3df   :  { %7687 = vmatmul.mubr.bf16.vlgmr.msra.gmra.mrb[16].mxu1 %v10130_v53  ;;  %7354 = vmatpush1.bf16.msra.mxu0 %v9586_v45  ;;  %v9609_v53 = vld [vmem:[#allocation8 + $0xc6c] ss:$16 sps:$4 sm:$0xff]   ;;  %v9673_v45 = vld [vmem:[#allocation8 + $0xdc8] ss:$16 sps:$4 sm:$0xff]  }
 0x3e0   :  { %7385 = vmatprep.mubr.bf16.mxu0 %v10160_v56  ;;  %7698 = vmatpush1.bf16.msra.mxu1 %v9589_v48  ;;  %v9678_v48 = vld [vmem:[#allocation8 + $0xde4] ss:$16 sps:$4 sm:$0xff]  }
 0x3e1   :  { %7729 = vmatprep.mubr.bf16.mxu1 %v10160_v56  ;;  %7355 = vmatprep.subr.bf16.mxu0 %v9594_v36  ;;  %v9610_v56 = vld [vmem:[#allocation8 + $0xc80] ss:$16 sps:$4 sm:$0xff]   ;;  %v9681_v36 = vld [vmem:[#allocation8 + $0xdec] ss:$16 sps:$4 sm:$0xff]  }
 0x3e2   :  { %7699 = vmatprep.subr.bf16.mxu1 %v9597_v49  ;;  %v9676_v49 = vld [vmem:[#allocation8 + $0xde0] ss:$16 sps:$4 sm:$0xff]  }
 0x3e3   :  { %7356 = vmatpush1.bf16.msra.mxu0 %v9592_v33  ;;  %v9679_v33 = vld [vmem:[#allocation8 + $0xde8] ss:$16 sps:$4 sm:$0xff]  }
 0x3e4   :  { %7700 = vmatpush1.bf16.msra.mxu1 %v9595_v50  ;;  %7357 = vmatprep.subr.bf16.mxu0 %v9600_v51  ;;  %v9684_v50 = vld [vmem:[#allocation8 + $0xe04] ss:$16 sps:$4 sm:$0xff]   ;;  %v9687_v51 = vld [vmem:[#allocation8 + $0xe0c] ss:$16 sps:$4 sm:$0xff]  }
 0x3e5   :  { %7701 = vmatprep.subr.bf16.mxu1 %v9603_v30  ;;  %v9682_v30 = vld [vmem:[#allocation8 + $0xe00] ss:$16 sps:$4 sm:$0xff]  }
 0x3e7   :  { %7358 = vmatpush1.bf16.msra.mxu0 %v9598_v52  ;;  %v9685_v52 = vld [vmem:[#allocation8 + $0xe08] ss:$16 sps:$4 sm:$0xff]  }
 0x3e8   :  { %7702 = vmatpush1.bf16.msra.mxu1 %v9601_v55  ;;  %7359 = vmatprep.subr.bf16.mxu0 %v9606_v42  ;;  %v9690_v55 = vld [vmem:[#allocation8 + $0xe24] ss:$16 sps:$4 sm:$0xff]   ;;  %v9693_v42 = vld [vmem:[#allocation8 + $0xe2c] ss:$16 sps:$4 sm:$0xff]  }
 0x3e9   :  { %7703 = vmatprep.subr.bf16.mxu1 %v9609_v53  ;;  %v9688_v53 = vld [vmem:[#allocation8 + $0xe20] ss:$16 sps:$4 sm:$0xff]  }
 0x3eb   :  { %7360 = vmatpush1.bf16.msra.mxu0 %v9604_v57  ;;  %v9691_v57 = vld [vmem:[#allocation8 + $0xe28] ss:$16 sps:$4 sm:$0xff]  }
 0x3ec   :  { %7704 = vmatpush1.bf16.msra.mxu1 %v9607_v0  ;;  %7361 = vmatprep.subr.bf16.mxu0 %v9612_v1  ;;  %v9696_v0 = vld [vmem:[#allocation8 + $0xe44] ss:$16 sps:$4 sm:$0xff]   ;;  %v9699_v1 = vld [vmem:[#allocation8 + $0xe4c] ss:$16 sps:$4 sm:$0xff]  }
 0x3ed   :  { %7705 = vmatprep.subr.bf16.mxu1 %v9615_v2  ;;  %v9694_v2 = vld [vmem:[#allocation8 + $0xe40] ss:$16 sps:$4 sm:$0xff]  }
 0x3ef   :  { %7362 = vmatpush1.bf16.msra.mxu0 %v9610_v56  ;;  %v9697_v56 = vld [vmem:[#allocation8 + $0xe48] ss:$16 sps:$4 sm:$0xff]  }
 0x3f0   :  { %7706 = vmatpush1.bf16.msra.mxu1 %v9613_v4  ;;  %7363 = vmatprep.subr.bf16.mxu0 %v9618_v5  ;;  %v9702_v4 = vld [vmem:[#allocation8 + $0xe64] ss:$16 sps:$4 sm:$0xff]   ;;  %v9700_v5 = vld [vmem:[#allocation8 + $0xe60] ss:$16 sps:$4 sm:$0xff]  }
 0x3f1   :  { %7707 = vmatprep.subr.bf16.mxu1 %v9621_v59  ;;  %v9703_v59 = vld [vmem:[#allocation8 + $0xe68] ss:$16 sps:$4 sm:$0xff]  }
 0x3f3   :  { %7364 = vmatpush1.bf16.msra.mxu0 %v9616_v6  ;;  %v9708_v6 = vld [vmem:[#allocation8 + $0xe84] ss:$16 sps:$4 sm:$0xff]  }
 0x3f4   :  { %7708 = vmatpush1.bf16.msra.mxu1 %v9619_v7  ;;  %7365 = vmatprep.subr.bf16.mxu0 %v9624_v8  ;;  %v9711_v7 = vld [vmem:[#allocation8 + $0xe8c] ss:$16 sps:$4 sm:$0xff]   ;;  %v9709_v8 = vld [vmem:[#allocation8 + $0xe88] ss:$16 sps:$4 sm:$0xff]  }
 0x3f5   :  { %7709 = vmatprep.subr.bf16.mxu1 %v9627_v9  ;;  %v9714_v9 = vld [vmem:[#allocation8 + $0xea4] ss:$16 sps:$4 sm:$0xff]  }
 0x3f7   :  { %7366 = vmatpush1.bf16.msra.mxu0 %v9622_v22  ;;  %v9717_v22 = vld [vmem:[#allocation8 + $0xeac] ss:$16 sps:$4 sm:$0xff]  }
 0x3f8   :  { %7710 = vmatpush1.bf16.msra.mxu1 %v9625_v10  ;;  %7367 = vmatprep.subr.bf16.mxu0 %v9630_v24  ;;  %v9712_v10 = vld [vmem:[#allocation8 + $0xea0] ss:$16 sps:$4 sm:$0xff]   ;;  %v9715_v24 = vld [vmem:[#allocation8 + $0xea8] ss:$16 sps:$4 sm:$0xff]  }
 0x3f9   :  { %7711 = vmatprep.subr.bf16.mxu1 %v9633_v29  ;;  %v9720_v29 = vld [vmem:[#allocation8 + $0xec4] ss:$16 sps:$4 sm:$0xff]  }
 0x3fb   :  { %7368 = vmatpush1.bf16.msra.mxu0 %v9628_v27  ;;  %v9723_v27 = vld [vmem:[#allocation8 + $0xecc] ss:$16 sps:$4 sm:$0xff]  }
 0x3fc   :  { %7712 = vmatpush1.bf16.msra.mxu1 %v9631_v11  ;;  %7369 = vmatprep.subr.bf16.mxu0 %v9636_v12  ;;  %v9718_v11 = vld [vmem:[#allocation8 + $0xec0] ss:$16 sps:$4 sm:$0xff]   ;;  %v9721_v12 = vld [vmem:[#allocation8 + $0xec8] ss:$16 sps:$4 sm:$0xff]  }
 0x3fd   :  { %7713 = vmatprep.subr.bf16.mxu1 %v9639_v13  ;;  %v9726_v13 = vld [vmem:[#allocation8 + $0xee4] ss:$16 sps:$4 sm:$0xff]  }
 0x3ff   :  { %7370 = vmatpush1.bf16.msra.mxu0 %v9634_v28  ;;  %v9729_v28 = vld [vmem:[#allocation8 + $0xeec] ss:$16 sps:$4 sm:$0xff]  }
 0x400   :  { %7714 = vmatpush1.bf16.msra.mxu1 %v9637_v62  ;;  %7371 = vmatprep.subr.bf16.mxu0 %v9642_v14  ;;  %v9724_v62 = vld [vmem:[#allocation8 + $0xee0] ss:$16 sps:$4 sm:$0xff]   ;;  %v9727_v14 = vld [vmem:[#allocation8 + $0xee8] ss:$16 sps:$4 sm:$0xff]  }
 0x401   :  { %7715 = vmatprep.subr.bf16.mxu1 %v9645_v47  ;;  %v9732_v47 = vld [vmem:[#allocation8 + $0xf04] ss:$16 sps:$4 sm:$0xff]  }
 0x403   :  { %7372 = vmatpush1.bf16.msra.mxu0 %v9640_v31  ;;  %v9735_v31 = vld [vmem:[#allocation8 + $0xf0c] ss:$16 sps:$4 sm:$0xff]  }
 0x404   :  { %7716 = vmatpush1.bf16.msra.mxu1 %v9643_v34  ;;  %7373 = vmatprep.subr.bf16.mxu0 %v9648_v15  ;;  %v9730_v34 = vld [vmem:[#allocation8 + $0xf00] ss:$16 sps:$4 sm:$0xff]   ;;  %v9733_v15 = vld [vmem:[#allocation8 + $0xf08] ss:$16 sps:$4 sm:$0xff]  }
 0x405   :  { %7717 = vmatprep.subr.bf16.mxu1 %v9651_v16  ;;  %v9738_v16 = vld [vmem:[#allocation8 + $0xf24] ss:$16 sps:$4 sm:$0xff]  }
 0x407   :  { %7374 = vmatpush1.bf16.msra.mxu0 %v9646_v17  ;;  %v9741_v17 = vld [vmem:[#allocation8 + $0xf2c] ss:$16 sps:$4 sm:$0xff]  }
 0x408   :  { %7718 = vmatpush1.bf16.msra.mxu1 %v9649_v18  ;;  %7375 = vmatprep.subr.bf16.mxu0 %v9654_v19  ;;  %v9736_v18 = vld [vmem:[#allocation8 + $0xf20] ss:$16 sps:$4 sm:$0xff]   ;;  %v9739_v19 = vld [vmem:[#allocation8 + $0xf28] ss:$16 sps:$4 sm:$0xff]  }
 0x409   :  { %7719 = vmatprep.subr.bf16.mxu1 %v9657_v20  ;;  %v9744_v20 = vld [vmem:[#allocation8 + $0xf44] ss:$16 sps:$4 sm:$0xff]  }
 0x40b   :  { %7376 = vmatpush1.bf16.msra.mxu0 %v9652_v21  ;;  %v9747_v21 = vld [vmem:[#allocation8 + $0xf4c] ss:$16 sps:$4 sm:$0xff]  }
 0x40c   :  { %7720 = vmatpush1.bf16.msra.mxu1 %v9655_v58  ;;  %7377 = vmatprep.subr.bf16.mxu0 %v9660_v23  ;;  %v9742_v58 = vld [vmem:[#allocation8 + $0xf40] ss:$16 sps:$4 sm:$0xff]   ;;  %v9745_v23 = vld [vmem:[#allocation8 + $0xf48] ss:$16 sps:$4 sm:$0xff]  }
 0x40d   :  { %7721 = vmatprep.subr.bf16.mxu1 %v9663_v26  ;;  %v9750_v26 = vld [vmem:[#allocation8 + $0xf64] ss:$16 sps:$4 sm:$0xff]  }
 0x40f   :  { %7378 = vmatpush1.bf16.msra.mxu0 %v9658_v37  ;;  %v9753_v37 = vld [vmem:[#allocation8 + $0xf6c] ss:$16 sps:$4 sm:$0xff]  }
 0x410   :  { %7722 = vmatpush1.bf16.msra.mxu1 %v9661_v32  ;;  %7379 = vmatprep.subr.bf16.mxu0 %v9666_v3  ;;  %v9748_v32 = vld [vmem:[#allocation8 + $0xf60] ss:$16 sps:$4 sm:$0xff]   ;;  %v9751_v3 = vld [vmem:[#allocation8 + $0xf68] ss:$16 sps:$4 sm:$0xff]  }
 0x411   :  { %7723 = vmatprep.subr.bf16.mxu1 %v9669_v38  ;;  %v9756_v38 = vld [vmem:[#allocation8 + $0xf84] ss:$16 sps:$4 sm:$0xff]  }
 0x413   :  { %7380 = vmatpush1.bf16.msra.mxu0 %v9664_v35  ;;  %v9759_v35 = vld [vmem:[#allocation8 + $0xf8c] ss:$16 sps:$4 sm:$0xff]  }
 0x414   :  { %7724 = vmatpush1.bf16.msra.mxu1 %v9667_v25  ;;  %7381 = vmatprep.subr.bf16.mxu0 %v9672_v40  ;;  %v9754_v25 = vld [vmem:[#allocation8 + $0xf80] ss:$16 sps:$4 sm:$0xff]   ;;  %v9757_v40 = vld [vmem:[#allocation8 + $0xf88] ss:$16 sps:$4 sm:$0xff]  }
 0x415   :  { %7725 = vmatprep.subr.bf16.mxu1 %v9675_v41  ;;  %v9762_v41 = vld [vmem:[#allocation8 + $0xfa4] ss:$16 sps:$4 sm:$0xff]  }
 0x417   :  { %7382 = vmatpush1.bf16.msra.mxu0 %v9670_v43  ;;  %v9765_v43 = vld [vmem:[#allocation8 + $0xfac] ss:$16 sps:$4 sm:$0xff]  }
 0x418   :  { %7726 = vmatpush1.bf16.msra.mxu1 %v9673_v45  ;;  %7383 = vmatprep.subr.bf16.mxu0 %v9678_v48  ;;  %v9760_v45 = vld [vmem:[#allocation8 + $0xfa0] ss:$16 sps:$4 sm:$0xff]   ;;  %v9763_v48 = vld [vmem:[#allocation8 + $0xfa8] ss:$16 sps:$4 sm:$0xff]  }
 0x419   :  { %7727 = vmatprep.subr.bf16.mxu1 %v9681_v36  ;;  %v9768_v36 = vld [vmem:[#allocation8 + $0xfc4] ss:$16 sps:$4 sm:$0xff]  }
 0x41b   :  { %7384 = vmatpush1.bf16.msra.mxu0 %v9676_v49  ;;  %v9771_v49 = vld [vmem:[#allocation8 + $0xfcc] ss:$16 sps:$4 sm:$0xff]  }
 0x41c   :  { %7728 = vmatpush1.bf16.msra.mxu1 %v9679_v33  ;;  %7396 = vmatprep.subr.bf16.mxu0 %v9684_v50  ;;  %v9766_v33 = vld [vmem:[#allocation8 + $0xfc0] ss:$16 sps:$4 sm:$0xff]   ;;  %v9769_v50 = vld [vmem:[#allocation8 + $0xfc8] ss:$16 sps:$4 sm:$0xff]  }
 0x41d   :  { %7740 = vmatprep.subr.bf16.mxu1 %v9687_v51  ;;  %v9774_v51 = vld [vmem:[#allocation8 + $0xfe4] ss:$16 sps:$4 sm:$0xff]  }
 0x41e   :  { %7386 = vmatmul.mubr.bf16.vlgmr.msra.gmra.mrb[16].mxu0 %v10156_v39 }
 0x41f   :  { %7730 = vmatmul.mubr.bf16.vlgmr.msra.gmra.mrb[16].mxu1 %v10156_v39  ;;  %7397 = vmatpush1.bf16.msra.mxu0 %v9682_v30  ;;  %v9705_v39 = vld [vmem:[#allocation8 + $0xe6c] ss:$16 sps:$4 sm:$0xff]  }
 0x420   :  { %7428 = vmatprep.mubr.bf16.mxu0 %v10162_v46  ;;  %7741 = vmatpush1.bf16.msra.mxu1 %v9685_v52  ;;  %v9777_v30 = vld [vmem:[#allocation8 + $0xfec] ss:$16 sps:$4 sm:$0xff]   ;;  %v9772_v52 = vld [vmem:[#allocation8 + $0xfe0] ss:$16 sps:$4 sm:$0xff]  }
 0x421   :  { %7772 = vmatprep.mubr.bf16.mxu1 %v10162_v46  ;;  %7398 = vmatprep.subr.bf16.mxu0 %v9690_v55  ;;  %v9706_v46 = vld [vmem:[#allocation8 + $0xe80] ss:$16 sps:$4 sm:$0xff]   ;;  %v9775_v55 = vld [vmem:[#allocation8 + $0xfe8] ss:$16 sps:$4 sm:$0xff]  }
 0x422   :  { %7742 = vmatprep.subr.bf16.mxu1 %v9693_v42  ;;  %v4513_v42 = vld [vmem:[#allocation10] sm:$0xf] }
 0x423   :  { %7399 = vmatpush1.bf16.msra.mxu0 %v9688_v53  ;;  %v4518_v53 = vrot.slane %v4513_v42, %v10049_v54 }
 0x424   :  { %7743 = vmatpush1.bf16.msra.mxu1 %v9691_v57  ;;  %7400 = vmatprep.subr.bf16.mxu0 %v9696_v0  ;;  %v4526_v57 = vrot.slane %v4513_v42, %v10054_v60  ;;  %v4522_v0 = vrot.slane %v4513_v42, %v10057_v61 }
 0x425   :  { %7744 = vmatprep.subr.bf16.mxu1 %v9699_v1  ;;  %v4530_v1 = vrot.slane %v4513_v42, %v10060_v63 }
 0x427   :  { %7401 = vmatpush1.bf16.msra.mxu0 %v9694_v2 }
 0x428   :  { %7745 = vmatpush1.bf16.msra.mxu1 %v9697_v56  ;;  %7402 = vmatprep.subr.bf16.mxu0 %v9702_v4 }
 0x429   :  { %7746 = vmatprep.subr.bf16.mxu1 %v9705_v39 }
 0x42b   :  { %7403 = vmatpush1.bf16.msra.mxu0 %v9700_v5 }
 0x42c   :  { %7747 = vmatpush1.bf16.msra.mxu1 %v9703_v59  ;;  %7404 = vmatprep.subr.bf16.mxu0 %v9708_v6 }
 0x42d   :  { %7748 = vmatprep.subr.bf16.mxu1 %v9711_v7 }
 0x42f   :  { %7405 = vmatpush1.bf16.msra.mxu0 %v9706_v46 }
 0x430   :  { %7749 = vmatpush1.bf16.msra.mxu1 %v9709_v8  ;;  %7406 = vmatprep.subr.bf16.mxu0 %v9714_v9 }
 0x431   :  { %7750 = vmatprep.subr.bf16.mxu1 %v9717_v22 }
 0x433   :  { %7407 = vmatpush1.bf16.msra.mxu0 %v9712_v10 }
 0x434   :  { %7751 = vmatpush1.bf16.msra.mxu1 %v9715_v24  ;;  %7408 = vmatprep.subr.bf16.mxu0 %v9720_v29 }
 0x435   :  { %7752 = vmatprep.subr.bf16.mxu1 %v9723_v27 }
 0x437   :  { %7409 = vmatpush1.bf16.msra.mxu0 %v9718_v11 }
 0x438   :  { %7753 = vmatpush1.bf16.msra.mxu1 %v9721_v12  ;;  %7410 = vmatprep.subr.bf16.mxu0 %v9726_v13 }
 0x439   :  { %7754 = vmatprep.subr.bf16.mxu1 %v9729_v28 }
 0x43b   :  { %7411 = vmatpush1.bf16.msra.mxu0 %v9724_v62 }
 0x43c   :  { %7755 = vmatpush1.bf16.msra.mxu1 %v9727_v14  ;;  %7412 = vmatprep.subr.bf16.mxu0 %v9732_v47 }
 0x43d   :  { %7756 = vmatprep.subr.bf16.mxu1 %v9735_v31 }
 0x43f   :  { %7413 = vmatpush1.bf16.msra.mxu0 %v9730_v34 }
 0x440   :  { %7757 = vmatpush1.bf16.msra.mxu1 %v9733_v15  ;;  %7414 = vmatprep.subr.bf16.mxu0 %v9738_v16 }
 0x441   :  { %7758 = vmatprep.subr.bf16.mxu1 %v9741_v17 }
 0x443   :  { %7415 = vmatpush1.bf16.msra.mxu0 %v9736_v18 }
 0x444   :  { %7759 = vmatpush1.bf16.msra.mxu1 %v9739_v19  ;;  %7416 = vmatprep.subr.bf16.mxu0 %v9744_v20 }
 0x445   :  { %7760 = vmatprep.subr.bf16.mxu1 %v9747_v21 }
 0x447   :  { %7417 = vmatpush1.bf16.msra.mxu0 %v9742_v58 }
 0x448   :  { %7761 = vmatpush1.bf16.msra.mxu1 %v9745_v23  ;;  %7418 = vmatprep.subr.bf16.mxu0 %v9750_v26 }
 0x449   :  { %7762 = vmatprep.subr.bf16.mxu1 %v9753_v37 }
 0x44b   :  { %7419 = vmatpush1.bf16.msra.mxu0 %v9748_v32 }
 0x44c   :  { %7763 = vmatpush1.bf16.msra.mxu1 %v9751_v3  ;;  %7420 = vmatprep.subr.bf16.mxu0 %v9756_v38 }
 0x44d   :  { %7764 = vmatprep.subr.bf16.mxu1 %v9759_v35 }
 0x44f   :  { %7421 = vmatpush1.bf16.msra.mxu0 %v9754_v25 }
 0x450   :  { %7765 = vmatpush1.bf16.msra.mxu1 %v9757_v40  ;;  %7422 = vmatprep.subr.bf16.mxu0 %v9762_v41 }
 0x451   :  { %7766 = vmatprep.subr.bf16.mxu1 %v9765_v43 }
 0x453   :  { %7423 = vmatpush1.bf16.msra.mxu0 %v9760_v45 }
 0x454   :  { %7767 = vmatpush1.bf16.msra.mxu1 %v9763_v48  ;;  %7424 = vmatprep.subr.bf16.mxu0 %v9768_v36 }
 0x455   :  { %7768 = vmatprep.subr.bf16.mxu1 %v9771_v49 }
 0x457   :  { %7425 = vmatpush1.bf16.msra.mxu0 %v9766_v33 }
 0x458   :  { %7769 = vmatpush1.bf16.msra.mxu1 %v9769_v50  ;;  %7426 = vmatprep.subr.bf16.mxu0 %v9774_v51 }
 0x459   :  { %7770 = vmatprep.subr.bf16.mxu1 %v9777_v30 }
 0x45b   :  { %7427 = vmatpush1.bf16.msra.mxu0 %v9772_v52 }
 0x45c   :  { %7771 = vmatpush1.bf16.msra.mxu1 %v9775_v55 }
 0x45e   :  { %7429 = vmatmul.mubr.bf16.vlgmr.msra.gmra.mrb[16].mxu0 %v10158_v44 }
 0x45f   :  { %7773 = vmatmul.mubr.bf16.vlgmr.msra.gmra.mrb[16].mxu1 %v10158_v44 }
 0x531   :  { %v7430_v2 = vpop.f32.mrb[16].mxu0 }
 0x532   :  { %v8898_v56 = vadd.f32 %v7430_v2, %v4518_v53  ;;  %v7774_v4 = vpop.f32.mrb[16].mxu1  ;;  %v7432_v39 = vpop.f32.mrb[17].mxu0 }
 0x533   :  { %v8902_v5 = vadd.f32 %v7774_v4, %v4526_v57  ;;  %v8899_v59 = vadd.f32 %v7432_v39, %v4522_v0  ;;  %v7776_v6 = vpop.f32.mrb[17].mxu1  ;;  %v7434_v7 = vpop.f32.mrb[18].mxu0 }
 0x534   :  { %v8903_v46 = vadd.f32 %v7776_v6, %v4530_v1  ;;  %v8900_v8 = vadd.f32 %v7434_v7, %v4518_v53  ;;  %v7778_v44 = vpop.f32.mrb[18].mxu1  ;;  %v7436_v9 = vpop.f32.mrb[19].mxu0 }
 0x535   :  { %v8862_v22 = vpack.c.bf16 %v8899_v59, %v8898_v56  ;;  %v8904_v54 = vadd.f32 %v7778_v44, %v4526_v57  ;;  %v8901_v10 = vadd.f32 %v7436_v9, %v4522_v0  ;;  %v7780_v60 = vpop.f32.mrb[19].mxu1 }
 0x536   :  { %v8863_v61 = vpack.c.bf16 %v8903_v46, %v8902_v5  ;;  %v8905_v63 = vadd.f32 %v7780_v60, %v4530_v1 }
 0x537   :  { %7807 = vst [vmem:[#allocation11] sm:$0xff] %v8862_v22  ;;  %v8864_v24 = vpack.c.bf16 %v8901_v10, %v8900_v8 }
 0x538   :  { %7808 = vst [vmem:[#allocation11 + $0x8] sm:$0xff] %v8863_v61  ;;  %v8865_v29 = vpack.c.bf16 %v8905_v63, %v8904_v54 }
 0x539   :  { %7809 = vst [vmem:[#allocation11 + $0x10] sm:$0xff] %v8864_v24 }
 0x53a   :  { %7810 = vst [vmem:[#allocation11 + $0x18] sm:$0xff] %v8865_v29 }
 0x53b   :  { %9907 = shalt.err (!%p9904_p2)
}
 0x53c   :  { %s9908_s7 = scalar_lea.hbm %s10206_s5, 512 }
 0x53d   :  { %p9909_p3 = scmp.ne.s32.totalorder %s10206_s5, %s9908_s7  ;;  %p9912_p4 = scmp.lt.u32.totalorder %s9908_s7, %s10206_s5 }
 0x53f   :  { %p9914_p5 = pnand %p9912_p4, %p9909_p3 }
 0x541   :  { %9917 = shalt.err (!%p9914_p5)
}
 0x542   :  { %7822 = dma.vmem_to_hbm [thread:$0]  %s7817_s29, 512, %s10206_s5, [#allocation4], %s9931_s18, %s9931_s18, %s9932_s19  }
 0x543   :  { %9924 = dma.done.wait [#allocation4], 512  }
 0x544   :  { %9925 = vsyncadd [#allocation4], 4294966784 }
 0x545   :  { %7826 = vsyncpa [#allocation3], 1 }
 0x546   :  { %7827 = vsyncpa [#allocation6], 1 }
 0x547   :  { %7828 = vsyncpa [#allocation9], 1 }
 0x548   :  { %7829 = vsyncpa [#allocation4], 1 }

// kernel: tpu_custom_call.1
= control target key start
LH: loop header
LB: loop body
LE: loop exit
PB: predicated region body
PF: predicated region fallthrough
CT: control target
= control target key end

     0   :  { %10 = vsyncpa [#allocation3], 0  ;;  %s10201_s0 = inlined_call_operand.hbm [shape: bf16[16,512], index: 0, kind: input, shape index: {}]   ;;  %s10202_s1 = inlined_call_operand.hbm [shape: bf16[512,2048], index: 1, kind: input, shape index: {}]   ;;  %s10203_s2 = inlined_call_operand.hbm [shape: f32[1,2048], index: 2, kind: input, shape index: {}]   ;;  %s10204_s3 = inlined_call_operand.hbm [shape: bf16[2048,512], index: 3, kind: input, shape index: {}]   ;;  %s10205_s4 = inlined_call_operand.hbm [shape: f32[1,512], index: 4, kind: input, shape index: {}]   ;;  %s10206_s5 = inlined_call_operand.hbm [shape: bf16[16,512], index: 5, kind: output, shape index: {}]  }
   0x1   :  { %11 = vsyncpa [#allocation6], 0 }
   0x2   :  { %12 = vsyncpa [#allocation9], 0 }
   0x3   :  { %13 = vsyncpa [#allocation4], 0  ;;  %s9926_s18 = smov [#allocation5]   ;;  %s9786_s22 = scalar_lea.hbm %s10202_s1, 65536 }
   0x4   :  { %s31_s19 = sshll.u32 %s9926_s18, 4  ;;  %p9787_p0 = scmp.ne.s32.totalorder %s10202_s1, %s9786_s22  ;;  %s32_s19 = int_to_ptr.vmem [resolvable:$true] %s31_s19 }
   0x5   :  { %p9790_p1 = scmp.lt.u32.totalorder %s9786_s22, %s10202_s1 }
   0x7   :  { %p9792_p2 = pnand %p9790_p1, %p9787_p0 }
   0x9   :  { %9795 = shalt.err (!%p9792_p2)
}
   0xa   :  { %s9796_s27 = scalar_lea.vmem %s32_s19, 65536  ;;  %p9801_p4 = scmp.lt.s32.totalorder %s32_s19, %s32_s19 }
   0xb   :  { %p9797_p3 = scmp.ne.s32.totalorder %s32_s19, %s9796_s27  ;;  %p9802_p5 = scmp.lt.s32.totalorder %s9796_s27, %s9796_s27 }
   0xd   :  { %p9803_p6 = por %p9802_p5, %p9801_p4 }
   0xf   :  { %p9804_p7 = pnand %p9803_p6, %p9797_p3 }
  0x11   :  { %9807 = shalt.err (!%p9804_p7)
}
  0x12   :  { %s9927_s28 = smov 1024   ;;  %s9928_s29 = smov 64  }
  0x13   :  { %37 = dma.hbm_to_vmem [thread:$0]  %s10202_s1, 65536, %s32_s19, [#allocation6], %s9927_s28, %s9927_s28, %s9928_s29  }
  0x14   :  { %s9929_s7 = smov [#allocation8]   ;;  %s9930_s9 = smov [#allocation2]  }
  0x15   :  { %s53_s8 = sshll.u32 %s9929_s7, 4  ;;  %s19_s10 = sshll.u32 %s9930_s9, 4  ;;  %s54_s8 = int_to_ptr.vmem [resolvable:$true] %s53_s8  ;;  %s20_s10 = int_to_ptr.vmem [resolvable:$true] %s19_s10 }
  0x16   :  { %s9808_s13 = scalar_lea.hbm %s10204_s3, 65536 }
  0x17   :  { %p9809_p8 = scmp.ne.s32.totalorder %s10204_s3, %s9808_s13  ;;  %p9812_p9 = scmp.lt.u32.totalorder %s9808_s13, %s10204_s3 }
  0x19   :  { %p9814_p10 = pnand %p9812_p9, %p9809_p8 }
  0x1b   :  { %9817 = shalt.err (!%p9814_p10)
}
  0x1c   :  { %s9818_s1 = scalar_lea.vmem %s54_s8, 65536  ;;  %p9823_p12 = scmp.lt.s32.totalorder %s54_s8, %s54_s8 }
  0x1d   :  { %p9819_p11 = scmp.ne.s32.totalorder %s54_s8, %s9818_s1  ;;  %p9824_p13 = scmp.lt.s32.totalorder %s9818_s1, %s9818_s1 }
  0x1f   :  { %p9825_p0 = por %p9824_p13, %p9823_p12 }
  0x21   :  { %p9826_p1 = pnand %p9825_p0, %p9819_p11 }
  0x23   :  { %9829 = shalt.err (!%p9826_p1)
}
  0x24   :  { %s9931_s18 = smov 256   ;;  %s9932_s19 = smov 16  }
  0x25   :  { %59 = dma.hbm_to_vmem [thread:$0]  %s10204_s3, 65536, %s54_s8, [#allocation9], %s9931_s18, %s9931_s18, %s9932_s19  }
  0x26   :  { %s9830_s24 = scalar_lea.hbm %s10201_s0, 512 }
  0x27   :  { %p9831_p2 = scmp.ne.s32.totalorder %s10201_s0, %s9830_s24  ;;  %p9834_p3 = scmp.lt.u32.totalorder %s9830_s24, %s10201_s0 }
  0x29   :  { %p9836_p4 = pnand %p9834_p3, %p9831_p2 }
  0x2b   :  { %9839 = shalt.err (!%p9836_p4)
}
  0x2c   :  { %s9840_s29 = scalar_lea.vmem %s20_s10, 512  ;;  %p9845_p6 = scmp.lt.s32.totalorder %s20_s10, %s20_s10 }
  0x2d   :  { %p9841_p5 = scmp.ne.s32.totalorder %s20_s10, %s9840_s29  ;;  %p9846_p7 = scmp.lt.s32.totalorder %s9840_s29, %s9840_s29 }
  0x2f   :  { %p9847_p8 = por %p9846_p7, %p9845_p6 }
  0x31   :  { %p9848_p9 = pnand %p9847_p8, %p9841_p5 }
  0x33   :  { %9851 = shalt.err (!%p9848_p9)
}
  0x34   :  { %25 = dma.hbm_to_vmem [thread:$0]  %s10201_s0, 512, %s20_s10, [#allocation3], %s9931_s18, %s9931_s18, %s9932_s19  }
  0x35   :  { %s9933_s6 = smov [#allocation7]   ;;  %s9934_s8 = smov [#allocation10]  }
  0x36   :  { %s44_s7 = sshll.u32 %s9933_s6, 4  ;;  %s66_s9 = sshll.u32 %s9934_s8, 4  ;;  %s45_s7 = int_to_ptr.vmem [resolvable:$true] %s44_s7  ;;  %s67_s9 = int_to_ptr.vmem [resolvable:$true] %s66_s9 }
  0x37   :  { %s9852_s13 = scalar_lea.hbm %s10203_s2, 256 }
  0x38   :  { %p9853_p10 = scmp.ne.s32.totalorder %s10203_s2, %s9852_s13  ;;  %p9856_p11 = scmp.lt.u32.totalorder %s9852_s13, %s10203_s2 }
  0x3a   :  { %p9858_p12 = pnand %p9856_p11, %p9853_p10 }
  0x3c   :  { %9861 = shalt.err (!%p9858_p12)
}
  0x3d   :  { %s9862_s0 = scalar_lea.vmem %s45_s7, 256  ;;  %p9867_p0 = scmp.lt.s32.totalorder %s45_s7, %s45_s7 }
  0x3e   :  { %p9863_p13 = scmp.ne.s32.totalorder %s45_s7, %s9862_s0  ;;  %p9868_p1 = scmp.lt.s32.totalorder %s9862_s0, %s9862_s0 }
  0x40   :  { %p9869_p2 = por %p9868_p1, %p9867_p0 }
  0x42   :  { %p9870_p3 = pnand %p9869_p2, %p9863_p13 }
  0x44   :  { %9873 = shalt.err (!%p9870_p3)
}
  0x45   :  { %47 = dma.hbm_to_vmem [thread:$0]  %s10203_s2, 256, %s45_s7, [#allocation6]  }
  0x46   :  { %s9874_s22 = scalar_lea.hbm %s10205_s4, 64 }
  0x47   :  { %p9875_p4 = scmp.ne.s32.totalorder %s10205_s4, %s9874_s22  ;;  %p9878_p5 = scmp.lt.u32.totalorder %s9874_s22, %s10205_s4 }
  0x49   :  { %p9880_p6 = pnand %p9878_p5, %p9875_p4 }
  0x4b   :  { %9883 = shalt.err (!%p9880_p6)
}
  0x4c   :  { %s9884_s27 = scalar_lea.vmem %s67_s9, 64  ;;  %p9889_p8 = scmp.lt.s32.totalorder %s67_s9, %s67_s9 }
  0x4d   :  { %p9885_p7 = scmp.ne.s32.totalorder %s67_s9, %s9884_s27  ;;  %p9890_p9 = scmp.lt.s32.totalorder %s9884_s27, %s9884_s27 }
  0x4f   :  { %p9891_p10 = por %p9890_p9, %p9889_p8 }
  0x51   :  { %p9892_p11 = pnand %p9891_p10, %p9885_p7 }
  0x53   :  { %9895 = shalt.err (!%p9892_p11)
}
  0x54   :  { %69 = dma.hbm_to_vmem [thread:$0]  %s10205_s4, 64, %s67_s9, [#allocation9]  }
  0x55   :  { %9918 = dma.done.wait [#allocation3], 512  }
  0x56   :  { %9919 = vsyncadd [#allocation3], 4294966784 }
  0x57   :  { %9920 = dma.done.wait [#allocation6], 65792  }
  0x58   :  { %9921 = vsyncadd [#allocation6], 4294901504 }
  0x59   :  { %9922 = dma.done.wait [#allocation9], 65600  }
  0x5a   :  { %9923 = vsyncadd [#allocation9], 4294901696  ;;  %v89_v0 = vld [vmem:[#allocation5] sm:$0xff]  ;;  %v90_v2 = vld [vmem:[#allocation5 + $0x8] sm:$0xff]  ;;  %s9935_s4 = smov [#allocation11]  }
  0x5b   :  { %v97_v1 = vld [vmem:[#allocation5 + $0x40] sm:$0xff]  ;;  %v98_v4 = vld [vmem:[#allocation5 + $0x48] sm:$0xff]  ;;  %s7816_s29 = sshll.u32 %s9935_s4, 4  ;;  %s7817_s29 = int_to_ptr.vmem [resolvable:$true] %s7816_s29 }
  0x5c   :  { %v7835_v3 = vcombine.high %v89_v0, %v97_v1  ;;  %v7834_v5 = vcombine.low %v89_v0, %v97_v1  ;;  %v105_v6 = vld [vmem:[#allocation5 + $0x80] sm:$0xff]  ;;  %v7837_v8 = vcombine.high %v90_v2, %v98_v4  ;;  %v7836_v9 = vcombine.low %v90_v2, %v98_v4  ;;  %v106_v11 = vld [vmem:[#allocation5 + $0x88] sm:$0xff]  ;;  %s9896_s3 = scalar_lea.vmem %s7817_s29, 512  ;;  %p9901_p13 = scmp.lt.s32.totalorder %s7817_s29, %s7817_s29 }
  0x5d   :  { %v113_v7 = vld [vmem:[#allocation5 + $0xc0] sm:$0xff]  ;;  %v114_v12 = vld [vmem:[#allocation5 + $0xc8] sm:$0xff]  ;;  %p9897_p12 = scmp.ne.s32.totalorder %s7817_s29, %s9896_s3  ;;  %p9902_p0 = scmp.lt.s32.totalorder %s9896_s3, %s9896_s3 }
  0x5e   :  { %v7851_v10 = vcombine.high %v105_v6, %v113_v7  ;;  %v121_v13 = vld [vmem:[#allocation5 + $0x100] sm:$0xff]  ;;  %3265 = vmatprep.subr.bf16.mxu0 %v7835_v3  ;;  %v7853_v14 = vcombine.high %v106_v11, %v114_v12  ;;  %v122_v16 = vld [vmem:[#allocation5 + $0x108] sm:$0xff]  ;;  %3351 = vmatprep.subr.bf16.mxu1 %v7837_v8  ;;  %v7850_v18 = vcombine.low %v105_v6, %v113_v7 }
  0x5f   :  { %v129_v15 = vld [vmem:[#allocation5 + $0x140] sm:$0xff]  ;;  %v130_v17 = vld [vmem:[#allocation5 + $0x148] sm:$0xff]  ;;  %3266 = vmatpush1.bf16.msra.mxu0 %v7834_v5  ;;  %3352 = vmatpush1.bf16.msra.mxu1 %v7836_v9  ;;  %v7852_v19 = vcombine.low %v106_v11, %v114_v12  ;;  %p9903_p1 = por %p9902_p0, %p9901_p13 }
  0x60   :  { %3267 = vmatprep.subr.bf16.mxu0 %v7851_v10  ;;  %v7867_v20 = vcombine.high %v121_v13, %v129_v15  ;;  %3353 = vmatprep.subr.bf16.mxu1 %v7853_v14  ;;  %v7869_v21 = vcombine.high %v122_v16, %v130_v17  ;;  %v137_v22 = vld [vmem:[#allocation5 + $0x180] sm:$0xff]  ;;  %v138_v24 = vld [vmem:[#allocation5 + $0x188] sm:$0xff]  ;;  %v7866_v26 = vcombine.low %v121_v13, %v129_v15 }
  0x61   :  { %v145_v23 = vld [vmem:[#allocation5 + $0x1c0] sm:$0xff]  ;;  %v146_v25 = vld [vmem:[#allocation5 + $0x1c8] sm:$0xff]  ;;  %v7868_v27 = vcombine.low %v122_v16, %v130_v17  ;;  %p9904_p2 = pnand %p9903_p1, %p9897_p12 }
  0x62   :  { %v7883_v28 = vcombine.high %v137_v22, %v145_v23  ;;  %v7885_v29 = vcombine.high %v138_v24, %v146_v25  ;;  %v153_v30 = vld [vmem:[#allocation5 + $0x200] sm:$0xff]  ;;  %v154_v32 = vld [vmem:[#allocation5 + $0x208] sm:$0xff]  ;;  %v7882_v34 = vcombine.low %v137_v22, %v145_v23  ;;  %v7884_v35 = vcombine.low %v138_v24, %v146_v25 }
  0x63   :  { %3268 = vmatpush1.bf16.msra.mxu0 %v7850_v18  ;;  %3354 = vmatpush1.bf16.msra.mxu1 %v7852_v19  ;;  %v161_v31 = vld [vmem:[#allocation5 + $0x240] sm:$0xff]  ;;  %v162_v33 = vld [vmem:[#allocation5 + $0x248] sm:$0xff] }
  0x64   :  { %3269 = vmatprep.subr.bf16.mxu0 %v7867_v20  ;;  %3355 = vmatprep.subr.bf16.mxu1 %v7869_v21  ;;  %v7899_v36 = vcombine.high %v153_v30, %v161_v31  ;;  %v7901_v37 = vcombine.high %v154_v32, %v162_v33  ;;  %v169_v38 = vld [vmem:[#allocation5 + $0x280] sm:$0xff]  ;;  %v170_v40 = vld [vmem:[#allocation5 + $0x288] sm:$0xff]  ;;  %v7898_v42 = vcombine.low %v153_v30, %v161_v31 }
  0x65   :  { %v177_v39 = vld [vmem:[#allocation5 + $0x2c0] sm:$0xff]  ;;  %v178_v41 = vld [vmem:[#allocation5 + $0x2c8] sm:$0xff]  ;;  %v7900_v43 = vcombine.low %v154_v32, %v162_v33 }
  0x66   :  { %v7915_v44 = vcombine.high %v169_v38, %v177_v39  ;;  %v7917_v45 = vcombine.high %v170_v40, %v178_v41  ;;  %v185_v46 = vld [vmem:[#allocation5 + $0x300] sm:$0xff]  ;;  %v186_v48 = vld [vmem:[#allocation5 + $0x308] sm:$0xff]  ;;  %v7914_v50 = vcombine.low %v169_v38, %v177_v39  ;;  %v7916_v51 = vcombine.low %v170_v40, %v178_v41 }
  0x67   :  { %3270 = vmatpush1.bf16.msra.mxu0 %v7866_v26  ;;  %3356 = vmatpush1.bf16.msra.mxu1 %v7868_v27  ;;  %v193_v47 = vld [vmem:[#allocation5 + $0x340] sm:$0xff]  ;;  %v194_v49 = vld [vmem:[#allocation5 + $0x348] sm:$0xff] }
  0x68   :  { %3271 = vmatprep.subr.bf16.mxu0 %v7883_v28  ;;  %3357 = vmatprep.subr.bf16.mxu1 %v7885_v29  ;;  %v7931_v52 = vcombine.high %v185_v46, %v193_v47  ;;  %v7933_v53 = vcombine.high %v186_v48, %v194_v49  ;;  %v201_v54 = vld [vmem:[#allocation5 + $0x380] sm:$0xff]  ;;  %v202_v57 = vld [vmem:[#allocation5 + $0x388] sm:$0xff]  ;;  %v7930_v59 = vcombine.low %v185_v46, %v193_v47 }
  0x69   :  { %v209_v55 = vld [vmem:[#allocation5 + $0x3c0] sm:$0xff]  ;;  %v210_v58 = vld [vmem:[#allocation5 + $0x3c8] sm:$0xff]  ;;  %v7932_v60 = vcombine.low %v186_v48, %v194_v49 }
  0x6a   :  { %v10032_v56 = vld [vmem:[#allocation2 + $0x4] ss:$16 sps:$4 sm:$0xff]   ;;  %v7947_v61 = vcombine.high %v201_v54, %v209_v55  ;;  %v7949_v62 = vcombine.high %v202_v57, %v210_v58  ;;  %v218_v1 = vld [vmem:[#allocation5 + $0x408] sm:$0xff]  ;;  %v7946_v3 = vcombine.low %v201_v54, %v209_v55  ;;  %v7948_v4 = vcombine.low %v202_v57, %v210_v58 }
  0x6b   :  { %3272 = vmatpush1.bf16.msra.mxu0 %v7882_v34  ;;  %3358 = vmatpush1.bf16.msra.mxu1 %v7884_v35  ;;  %v217_v63 = vld [vmem:[#allocation5 + $0x400] sm:$0xff]  ;;  %v226_v2 = vld [vmem:[#allocation5 + $0x448] sm:$0xff] }
  0x6c   :  { %3273 = vmatprep.subr.bf16.mxu0 %v7899_v36  ;;  %3359 = vmatprep.subr.bf16.mxu1 %v7901_v37  ;;  %v225_v0 = vld [vmem:[#allocation5 + $0x440] sm:$0xff]  ;;  %v7965_v6 = vcombine.high %v218_v1, %v226_v2  ;;  %v234_v9 = vld [vmem:[#allocation5 + $0x488] sm:$0xff]  ;;  %v7964_v12 = vcombine.low %v218_v1, %v226_v2 }
  0x6d   :  { %3297 = vmatprep.mubr.bf16.mxu0 %v10032_v56  ;;  %3383 = vmatprep.mubr.bf16.mxu1 %v10032_v56  ;;  %v7963_v5 = vcombine.high %v217_v63, %v225_v0  ;;  %v233_v7 = vld [vmem:[#allocation5 + $0x480] sm:$0xff]  ;;  %v242_v10 = vld [vmem:[#allocation5 + $0x4c8] sm:$0xff]  ;;  %v7962_v11 = vcombine.low %v217_v63, %v225_v0 }
  0x6e   :  { %v241_v8 = vld [vmem:[#allocation5 + $0x4c0] sm:$0xff]  ;;  %v7981_v14 = vcombine.high %v234_v9, %v242_v10  ;;  %v250_v17 = vld [vmem:[#allocation5 + $0x508] sm:$0xff]  ;;  %v7980_v20 = vcombine.low %v234_v9, %v242_v10 }
  0x6f   :  { %3274 = vmatpush1.bf16.msra.mxu0 %v7898_v42  ;;  %3360 = vmatpush1.bf16.msra.mxu1 %v7900_v43  ;;  %v7979_v13 = vcombine.high %v233_v7, %v241_v8  ;;  %v249_v15 = vld [vmem:[#allocation5 + $0x500] sm:$0xff]  ;;  %v258_v18 = vld [vmem:[#allocation5 + $0x548] sm:$0xff]  ;;  %v7978_v19 = vcombine.low %v233_v7, %v241_v8 }
  0x70   :  { %3275 = vmatprep.subr.bf16.mxu0 %v7915_v44  ;;  %3361 = vmatprep.subr.bf16.mxu1 %v7917_v45  ;;  %v257_v16 = vld [vmem:[#allocation5 + $0x540] sm:$0xff]  ;;  %v7997_v22 = vcombine.high %v250_v17, %v258_v18  ;;  %v266_v25 = vld [vmem:[#allocation5 + $0x588] sm:$0xff]  ;;  %v7996_v28 = vcombine.low %v250_v17, %v258_v18 }
  0x71   :  { %v7995_v21 = vcombine.high %v249_v15, %v257_v16  ;;  %v265_v23 = vld [vmem:[#allocation5 + $0x580] sm:$0xff]  ;;  %v274_v26 = vld [vmem:[#allocation5 + $0x5c8] sm:$0xff]  ;;  %v7994_v27 = vcombine.low %v249_v15, %v257_v16 }
  0x72   :  { %v273_v24 = vld [vmem:[#allocation5 + $0x5c0] sm:$0xff]  ;;  %v8013_v30 = vcombine.high %v266_v25, %v274_v26  ;;  %v282_v33 = vld [vmem:[#allocation5 + $0x608] sm:$0xff]  ;;  %v8012_v36 = vcombine.low %v266_v25, %v274_v26 }
  0x73   :  { %3276 = vmatpush1.bf16.msra.mxu0 %v7914_v50  ;;  %3362 = vmatpush1.bf16.msra.mxu1 %v7916_v51  ;;  %v8011_v29 = vcombine.high %v265_v23, %v273_v24  ;;  %v281_v31 = vld [vmem:[#allocation5 + $0x600] sm:$0xff]  ;;  %v290_v34 = vld [vmem:[#allocation5 + $0x648] sm:$0xff]  ;;  %v8010_v35 = vcombine.low %v265_v23, %v273_v24 }
  0x74   :  { %3277 = vmatprep.subr.bf16.mxu0 %v7931_v52  ;;  %3363 = vmatprep.subr.bf16.mxu1 %v7933_v53  ;;  %v289_v32 = vld [vmem:[#allocation5 + $0x640] sm:$0xff]  ;;  %v8029_v38 = vcombine.high %v282_v33, %v290_v34  ;;  %v298_v41 = vld [vmem:[#allocation5 + $0x688] sm:$0xff]  ;;  %v8028_v44 = vcombine.low %v282_v33, %v290_v34 }
  0x75   :  { %v8027_v37 = vcombine.high %v281_v31, %v289_v32  ;;  %v297_v39 = vld [vmem:[#allocation5 + $0x680] sm:$0xff]  ;;  %v306_v42 = vld [vmem:[#allocation5 + $0x6c8] sm:$0xff]  ;;  %v8026_v43 = vcombine.low %v281_v31, %v289_v32 }
  0x76   :  { %v305_v40 = vld [vmem:[#allocation5 + $0x6c0] sm:$0xff]  ;;  %v8045_v46 = vcombine.high %v298_v41, %v306_v42  ;;  %v314_v49 = vld [vmem:[#allocation5 + $0x708] sm:$0xff]  ;;  %v8044_v52 = vcombine.low %v298_v41, %v306_v42 }
  0x77   :  { %3278 = vmatpush1.bf16.msra.mxu0 %v7930_v59  ;;  %3364 = vmatpush1.bf16.msra.mxu1 %v7932_v60  ;;  %v8043_v45 = vcombine.high %v297_v39, %v305_v40  ;;  %v313_v47 = vld [vmem:[#allocation5 + $0x700] sm:$0xff]  ;;  %v322_v50 = vld [vmem:[#allocation5 + $0x748] sm:$0xff]  ;;  %v8042_v51 = vcombine.low %v297_v39, %v305_v40 }
  0x78   :  { %3279 = vmatprep.subr.bf16.mxu0 %v7947_v61  ;;  %3365 = vmatprep.subr.bf16.mxu1 %v7949_v62  ;;  %v321_v48 = vld [vmem:[#allocation5 + $0x740] sm:$0xff]  ;;  %v8061_v54 = vcombine.high %v314_v49, %v322_v50  ;;  %v330_v58 = vld [vmem:[#allocation5 + $0x788] sm:$0xff]  ;;  %v8060_v61 = vcombine.low %v314_v49, %v322_v50 }
  0x79   :  { %v8059_v53 = vcombine.high %v313_v47, %v321_v48  ;;  %v329_v55 = vld [vmem:[#allocation5 + $0x780] sm:$0xff]  ;;  %v338_v59 = vld [vmem:[#allocation5 + $0x7c8] sm:$0xff]  ;;  %v8058_v60 = vcombine.low %v313_v47, %v321_v48 }
  0x7a   :  { %v337_v57 = vld [vmem:[#allocation5 + $0x7c0] sm:$0xff]  ;;  %v8077_v63 = vcombine.high %v330_v58, %v338_v59  ;;  %v346_v2 = vld [vmem:[#allocation5 + $0x808] sm:$0xff] }
  0x7b   :  { %3280 = vmatpush1.bf16.msra.mxu0 %v7946_v3  ;;  %3366 = vmatpush1.bf16.msra.mxu1 %v7948_v4  ;;  %v8075_v62 = vcombine.high %v329_v55, %v337_v57  ;;  %v345_v0 = vld [vmem:[#allocation5 + $0x800] sm:$0xff]  ;;  %v354_v3 = vld [vmem:[#allocation5 + $0x848] sm:$0xff]  ;;  %v8074_v4 = vcombine.low %v329_v55, %v337_v57 }
  0x7c   :  { %3281 = vmatprep.subr.bf16.mxu0 %v7963_v5  ;;  %3367 = vmatprep.subr.bf16.mxu1 %v7965_v6  ;;  %v353_v1 = vld [vmem:[#allocation5 + $0x840] sm:$0xff]  ;;  %v8076_v5 = vcombine.low %v330_v58, %v338_v59  ;;  %v8093_v7 = vcombine.high %v346_v2, %v354_v3 }
  0x7d   :  { %v8091_v6 = vcombine.high %v345_v0, %v353_v1  ;;  %v361_v8 = vld [vmem:[#allocation5 + $0x880] sm:$0xff] }
  0x7e   :  { %v369_v9 = vld [vmem:[#allocation5 + $0x8c0] sm:$0xff] }
  0x7f   :  { %3282 = vmatpush1.bf16.msra.mxu0 %v7962_v11  ;;  %3368 = vmatpush1.bf16.msra.mxu1 %v7964_v12  ;;  %v9006_v10 = vld [vmem:[#allocation2] ss:$16 sps:$4 sm:$0xff]   ;;  %v362_v11 = vld [vmem:[#allocation5 + $0x888] sm:$0xff]  ;;  %v8107_v15 = vcombine.high %v361_v8, %v369_v9 }
  0x80   :  { %3283 = vmatprep.subr.bf16.mxu0 %v7979_v13  ;;  %3369 = vmatprep.subr.bf16.mxu1 %v7981_v14  ;;  %v370_v12 = vld [vmem:[#allocation5 + $0x8c8] sm:$0xff]  ;;  %v8090_v13 = vcombine.low %v345_v0, %v353_v1  ;;  %v8092_v14 = vcombine.low %v346_v2, %v354_v3  ;;  %v377_v17 = vld [vmem:[#allocation5 + $0x900] sm:$0xff] }
  0x81   :  { %v8109_v16 = vcombine.high %v362_v11, %v370_v12  ;;  %v385_v18 = vld [vmem:[#allocation5 + $0x940] sm:$0xff]  ;;  %v8108_v23 = vcombine.low %v362_v11, %v370_v12  ;;  %v490_v12 = vld [vmem:[#allocation5 + $0xc88] sm:$0xff] }
  0x82   :  { %v8123_v24 = vcombine.high %v377_v17, %v385_v18  ;;  %v393_v25 = vld [vmem:[#allocation5 + $0x980] sm:$0xff] }
  0x83   :  { %3284 = vmatpush1.bf16.msra.mxu0 %v7978_v19  ;;  %3370 = vmatpush1.bf16.msra.mxu1 %v7980_v20  ;;  %v9007_v19 = vld [vmem:[#allocation2 + $0xc] ss:$16 sps:$4 sm:$0xff]   ;;  %v401_v26 = vld [vmem:[#allocation5 + $0x9c0] sm:$0xff] }
  0x84   :  { %3285 = vmatprep.subr.bf16.mxu0 %v7995_v21  ;;  %3371 = vmatprep.subr.bf16.mxu1 %v7997_v22  ;;  %v378_v20 = vld [vmem:[#allocation5 + $0x908] sm:$0xff]  ;;  %v8106_v22 = vcombine.low %v361_v8, %v369_v9  ;;  %v8139_v32 = vcombine.high %v393_v25, %v401_v26  ;;  %v409_v33 = vld [vmem:[#allocation5 + $0xa00] sm:$0xff] }
  0x85   :  { %v386_v21 = vld [vmem:[#allocation5 + $0x948] sm:$0xff]  ;;  %v417_v34 = vld [vmem:[#allocation5 + $0xa40] sm:$0xff] }
  0x86   :  { %v8124_v31 = vcombine.low %v378_v20, %v386_v21  ;;  %v8155_v40 = vcombine.high %v409_v33, %v417_v34  ;;  %v425_v41 = vld [vmem:[#allocation5 + $0xa80] sm:$0xff] }
  0x87   :  { %3286 = vmatpush1.bf16.msra.mxu0 %v7994_v27  ;;  %3372 = vmatpush1.bf16.msra.mxu1 %v7996_v28  ;;  %v394_v27 = vld [vmem:[#allocation5 + $0x988] sm:$0xff]  ;;  %v8125_v28 = vcombine.high %v378_v20, %v386_v21  ;;  %v433_v42 = vld [vmem:[#allocation5 + $0xac0] sm:$0xff] }
  0x88   :  { %3287 = vmatprep.subr.bf16.mxu0 %v8011_v29  ;;  %3373 = vmatprep.subr.bf16.mxu1 %v8013_v30  ;;  %v402_v29 = vld [vmem:[#allocation5 + $0x9c8] sm:$0xff]  ;;  %v8122_v30 = vcombine.low %v377_v17, %v385_v18  ;;  %v8171_v48 = vcombine.high %v425_v41, %v433_v42  ;;  %v441_v49 = vld [vmem:[#allocation5 + $0xb00] sm:$0xff] }
  0x89   :  { %v8140_v39 = vcombine.low %v394_v27, %v402_v29  ;;  %v449_v50 = vld [vmem:[#allocation5 + $0xb40] sm:$0xff]  ;;  %v506_v20 = vld [vmem:[#allocation5 + $0xd08] sm:$0xff] }
  0x8a   :  { %v8187_v57 = vcombine.high %v441_v49, %v449_v50  ;;  %v457_v58 = vld [vmem:[#allocation5 + $0xb80] sm:$0xff] }
  0x8b   :  { %3288 = vmatpush1.bf16.msra.mxu0 %v8010_v35  ;;  %3374 = vmatpush1.bf16.msra.mxu1 %v8012_v36  ;;  %v410_v35 = vld [vmem:[#allocation5 + $0xa08] sm:$0xff]  ;;  %v8141_v36 = vcombine.high %v394_v27, %v402_v29  ;;  %v465_v59 = vld [vmem:[#allocation5 + $0xbc0] sm:$0xff] }
  0x8c   :  { %3289 = vmatprep.subr.bf16.mxu0 %v8027_v37  ;;  %3375 = vmatprep.subr.bf16.mxu1 %v8029_v38  ;;  %v418_v37 = vld [vmem:[#allocation5 + $0xa48] sm:$0xff]  ;;  %v8138_v38 = vcombine.low %v393_v25, %v401_v26  ;;  %v8203_v1 = vcombine.high %v457_v58, %v465_v59  ;;  %v473_v2 = vld [vmem:[#allocation5 + $0xc00] sm:$0xff] }
  0x8d   :  { %v8156_v47 = vcombine.low %v410_v35, %v418_v37  ;;  %v481_v3 = vld [vmem:[#allocation5 + $0xc40] sm:$0xff] }
  0x8e   :  { %v8219_v9 = vcombine.high %v473_v2, %v481_v3  ;;  %v497_v11 = vld [vmem:[#allocation5 + $0xcc0] sm:$0xff] }
  0x8f   :  { %3290 = vmatpush1.bf16.msra.mxu0 %v8026_v43  ;;  %3376 = vmatpush1.bf16.msra.mxu1 %v8028_v44  ;;  %v426_v43 = vld [vmem:[#allocation5 + $0xa88] sm:$0xff]  ;;  %v8157_v44 = vcombine.high %v410_v35, %v418_v37  ;;  %v505_v18 = vld [vmem:[#allocation5 + $0xd00] sm:$0xff] }
  0x90   :  { %3291 = vmatprep.subr.bf16.mxu0 %v8043_v45  ;;  %3377 = vmatprep.subr.bf16.mxu1 %v8045_v46  ;;  %v434_v45 = vld [vmem:[#allocation5 + $0xac8] sm:$0xff]  ;;  %v8154_v46 = vcombine.low %v409_v33, %v417_v34  ;;  %v521_v26 = vld [vmem:[#allocation5 + $0xd80] sm:$0xff] }
  0x91   :  { %v8172_v55 = vcombine.low %v426_v43, %v434_v45  ;;  %v529_v27 = vld [vmem:[#allocation5 + $0xdc0] sm:$0xff] }
  0x92   :  { %v8267_v33 = vcombine.high %v521_v26, %v529_v27  ;;  %v537_v34 = vld [vmem:[#allocation5 + $0xe00] sm:$0xff] }
  0x93   :  { %3292 = vmatpush1.bf16.msra.mxu0 %v8042_v51  ;;  %3378 = vmatpush1.bf16.msra.mxu1 %v8044_v52  ;;  %v442_v51 = vld [vmem:[#allocation5 + $0xb08] sm:$0xff]  ;;  %v8173_v52 = vcombine.high %v426_v43, %v434_v45  ;;  %v545_v35 = vld [vmem:[#allocation5 + $0xe40] sm:$0xff] }
  0x94   :  { %3293 = vmatprep.subr.bf16.mxu0 %v8059_v53  ;;  %3379 = vmatprep.subr.bf16.mxu1 %v8061_v54  ;;  %v450_v53 = vld [vmem:[#allocation5 + $0xb48] sm:$0xff]  ;;  %v8170_v54 = vcombine.low %v425_v41, %v433_v42  ;;  %v8283_v41 = vcombine.high %v537_v34, %v545_v35  ;;  %v553_v42 = vld [vmem:[#allocation5 + $0xe80] sm:$0xff] }
  0x95   :  { %v8188_v0 = vcombine.low %v442_v51, %v450_v53  ;;  %v561_v43 = vld [vmem:[#allocation5 + $0xec0] sm:$0xff] }
  0x97   :  { %3294 = vmatpush1.bf16.msra.mxu0 %v8058_v60  ;;  %3380 = vmatpush1.bf16.msra.mxu1 %v8060_v61  ;;  %v458_v60 = vld [vmem:[#allocation5 + $0xb88] sm:$0xff]  ;;  %v8189_v61 = vcombine.high %v442_v51, %v450_v53  ;;  %v577_v51 = vld [vmem:[#allocation5 + $0xf40] sm:$0xff] }
  0x98   :  { %3295 = vmatprep.subr.bf16.mxu0 %v8075_v62  ;;  %3381 = vmatprep.subr.bf16.mxu1 %v8077_v63  ;;  %v466_v62 = vld [vmem:[#allocation5 + $0xbc8] sm:$0xff]  ;;  %v8186_v63 = vcombine.low %v441_v49, %v449_v50  ;;  %v8299_v49 = vcombine.high %v553_v42, %v561_v43  ;;  %v569_v50 = vld [vmem:[#allocation5 + $0xf00] sm:$0xff] }
  0x99   :  { %v8204_v8 = vcombine.low %v458_v60, %v466_v62 }
  0x9b   :  { %3296 = vmatpush1.bf16.msra.mxu0 %v8074_v4  ;;  %3382 = vmatpush1.bf16.msra.mxu1 %v8076_v5  ;;  %v474_v4 = vld [vmem:[#allocation5 + $0xc08] sm:$0xff]  ;;  %v8205_v5 = vcombine.high %v458_v60, %v466_v62  ;;  %v593_v60 = vld [vmem:[#allocation5 + $0xfc0] sm:$0xff] }
  0x9c   :  { %3308 = vmatprep.subr.bf16.mxu0 %v8091_v6  ;;  %3394 = vmatprep.subr.bf16.mxu1 %v8093_v7  ;;  %v482_v6 = vld [vmem:[#allocation5 + $0xc48] sm:$0xff]  ;;  %v8202_v7 = vcombine.low %v457_v58, %v465_v59  ;;  %v8315_v58 = vcombine.high %v569_v50, %v577_v51  ;;  %v585_v59 = vld [vmem:[#allocation5 + $0xf80] sm:$0xff] }
  0x9e   :  { %3298 = vmatmul.mubr.bf16.vlgmr.msra.gmra.mrb[0].mxu0 %v9006_v10  ;;  %3384 = vmatmul.mubr.bf16.vlgmr.msra.gmra.mrb[0].mxu1 %v9006_v10  ;;  %v489_v10 = vld [vmem:[#allocation5 + $0xc80] sm:$0xff] }
  0x9f   :  { %3309 = vmatpush1.bf16.msra.mxu0 %v8090_v13  ;;  %3395 = vmatpush1.bf16.msra.mxu1 %v8092_v14  ;;  %v8221_v13 = vcombine.high %v474_v4, %v482_v6  ;;  %v498_v14 = vld [vmem:[#allocation5 + $0xcc8] sm:$0xff]  ;;  %v8235_v17 = vcombine.high %v489_v10, %v497_v11 }
  0xa0   :  { %3310 = vmatprep.subr.bf16.mxu0 %v8107_v15  ;;  %3396 = vmatprep.subr.bf16.mxu1 %v8109_v16  ;;  %v8218_v15 = vcombine.low %v473_v2, %v481_v3  ;;  %v8220_v16 = vcombine.low %v474_v4, %v482_v6  ;;  %v8237_v21 = vcombine.high %v490_v12, %v498_v14  ;;  %v91_v3 = vld [vmem:[#allocation5 + $0x10] sm:$0xff] }
  0xa1   :  { %3340 = vmatprep.mubr.bf16.mxu0 %v9007_v19  ;;  %3426 = vmatprep.mubr.bf16.mxu1 %v9007_v19  ;;  %v513_v19 = vld [vmem:[#allocation5 + $0xd40] sm:$0xff]  ;;  %v8331_v2 = vcombine.high %v585_v59, %v593_v60  ;;  %v99_v4 = vld [vmem:[#allocation5 + $0x50] sm:$0xff] }
  0xa2   :  { %v8251_v25 = vcombine.high %v505_v18, %v513_v19 }
  0xa3   :  { %3311 = vmatpush1.bf16.msra.mxu0 %v8106_v22  ;;  %3397 = vmatpush1.bf16.msra.mxu1 %v8108_v23  ;;  %v514_v22 = vld [vmem:[#allocation5 + $0xd48] sm:$0xff]  ;;  %v8234_v23 = vcombine.low %v489_v10, %v497_v11  ;;  %v7839_v11 = vcombine.high %v91_v3, %v99_v4 }
  0xa4   :  { %3312 = vmatprep.subr.bf16.mxu0 %v8123_v24  ;;  %3398 = vmatprep.subr.bf16.mxu1 %v8125_v28  ;;  %v8236_v24 = vcombine.low %v490_v12, %v498_v14  ;;  %v522_v28 = vld [vmem:[#allocation5 + $0xd88] sm:$0xff]  ;;  %v8253_v29 = vcombine.high %v506_v20, %v514_v22  ;;  %v107_v12 = vld [vmem:[#allocation5 + $0x90] sm:$0xff]  ;;  %v108_v14 = vld [vmem:[#allocation5 + $0x98] sm:$0xff] }
  0xa5   :  { %v9009_v10 = vld [vmem:[#allocation2 + $0x8] ss:$16 sps:$4 sm:$0xff]  }
  0xa7   :  { %3313 = vmatpush1.bf16.msra.mxu0 %v8122_v30  ;;  %3399 = vmatpush1.bf16.msra.mxu1 %v8124_v31  ;;  %v530_v30 = vld [vmem:[#allocation5 + $0xdc8] sm:$0xff]  ;;  %v8250_v31 = vcombine.low %v505_v18, %v513_v19 }
  0xa8   :  { %3314 = vmatprep.subr.bf16.mxu0 %v8139_v32  ;;  %3400 = vmatprep.subr.bf16.mxu1 %v8141_v36  ;;  %v8252_v32 = vcombine.low %v506_v20, %v514_v22  ;;  %v538_v36 = vld [vmem:[#allocation5 + $0xe08] sm:$0xff]  ;;  %v8269_v37 = vcombine.high %v522_v28, %v530_v30  ;;  %v123_v20 = vld [vmem:[#allocation5 + $0x110] sm:$0xff]  ;;  %v124_v22 = vld [vmem:[#allocation5 + $0x118] sm:$0xff] }
  0xab   :  { %3315 = vmatpush1.bf16.msra.mxu0 %v8138_v38  ;;  %3401 = vmatpush1.bf16.msra.mxu1 %v8140_v39  ;;  %v546_v38 = vld [vmem:[#allocation5 + $0xe48] sm:$0xff]  ;;  %v8266_v39 = vcombine.low %v521_v26, %v529_v27 }
  0xac   :  { %3316 = vmatprep.subr.bf16.mxu0 %v8155_v40  ;;  %3402 = vmatprep.subr.bf16.mxu1 %v8157_v44  ;;  %v8268_v40 = vcombine.low %v522_v28, %v530_v30  ;;  %v554_v44 = vld [vmem:[#allocation5 + $0xe88] sm:$0xff]  ;;  %v8285_v45 = vcombine.high %v538_v36, %v546_v38  ;;  %v139_v28 = vld [vmem:[#allocation5 + $0x190] sm:$0xff]  ;;  %v140_v30 = vld [vmem:[#allocation5 + $0x198] sm:$0xff] }
  0xaf   :  { %3317 = vmatpush1.bf16.msra.mxu0 %v8154_v46  ;;  %3403 = vmatpush1.bf16.msra.mxu1 %v8156_v47  ;;  %v562_v46 = vld [vmem:[#allocation5 + $0xec8] sm:$0xff]  ;;  %v8282_v47 = vcombine.low %v537_v34, %v545_v35 }
  0xb0   :  { %3318 = vmatprep.subr.bf16.mxu0 %v8171_v48  ;;  %3404 = vmatprep.subr.bf16.mxu1 %v8173_v52  ;;  %v8284_v48 = vcombine.low %v538_v36, %v546_v38  ;;  %v570_v52 = vld [vmem:[#allocation5 + $0xf08] sm:$0xff]  ;;  %v8301_v53 = vcombine.high %v554_v44, %v562_v46  ;;  %v155_v36 = vld [vmem:[#allocation5 + $0x210] sm:$0xff]  ;;  %v156_v38 = vld [vmem:[#allocation5 + $0x218] sm:$0xff] }
  0xb3   :  { %3319 = vmatpush1.bf16.msra.mxu0 %v8170_v54  ;;  %3405 = vmatpush1.bf16.msra.mxu1 %v8172_v55  ;;  %v578_v54 = vld [vmem:[#allocation5 + $0xf48] sm:$0xff]  ;;  %v8298_v55 = vcombine.low %v553_v42, %v561_v43 }
  0xb4   :  { %3320 = vmatprep.subr.bf16.mxu0 %v8187_v57  ;;  %3406 = vmatprep.subr.bf16.mxu1 %v8189_v61  ;;  %v8300_v57 = vcombine.low %v554_v44, %v562_v46  ;;  %v586_v61 = vld [vmem:[#allocation5 + $0xf88] sm:$0xff]  ;;  %v8317_v62 = vcombine.high %v570_v52, %v578_v54  ;;  %v171_v44 = vld [vmem:[#allocation5 + $0x290] sm:$0xff] }
  0xb7   :  { %3321 = vmatpush1.bf16.msra.mxu0 %v8186_v63  ;;  %3407 = vmatpush1.bf16.msra.mxu1 %v8188_v0  ;;  %v594_v63 = vld [vmem:[#allocation5 + $0xfc8] sm:$0xff]  ;;  %v8314_v0 = vcombine.low %v569_v50, %v577_v51  ;;  %v187_v51 = vld [vmem:[#allocation5 + $0x310] sm:$0xff] }
  0xb8   :  { %3322 = vmatprep.subr.bf16.mxu0 %v8203_v1  ;;  %3408 = vmatprep.subr.bf16.mxu1 %v8205_v5  ;;  %v8316_v1 = vcombine.low %v570_v52, %v578_v54  ;;  %v92_v5 = vld [vmem:[#allocation5 + $0x18] sm:$0xff]  ;;  %v8333_v6 = vcombine.high %v586_v61, %v594_v63  ;;  %v195_v52 = vld [vmem:[#allocation5 + $0x350] sm:$0xff] }
  0xbb   :  { %3323 = vmatpush1.bf16.msra.mxu0 %v8202_v7  ;;  %3409 = vmatpush1.bf16.msra.mxu1 %v8204_v8  ;;  %v100_v7 = vld [vmem:[#allocation5 + $0x58] sm:$0xff]  ;;  %v8330_v8 = vcombine.low %v585_v59, %v593_v60  ;;  %v7935_v59 = vcombine.high %v187_v51, %v195_v52  ;;  %v203_v60 = vld [vmem:[#allocation5 + $0x390] sm:$0xff] }
  0xbc   :  { %3324 = vmatprep.subr.bf16.mxu0 %v8219_v9  ;;  %3410 = vmatprep.subr.bf16.mxu1 %v8221_v13  ;;  %v8332_v9 = vcombine.low %v586_v61, %v594_v63  ;;  %v115_v13 = vld [vmem:[#allocation5 + $0xd0] sm:$0xff]  ;;  %v7840_v18 = vcombine.low %v92_v5, %v100_v7 }
  0xbd   :  { %v7855_v19 = vcombine.high %v107_v12, %v115_v13  ;;  %v211_v61 = vld [vmem:[#allocation5 + $0x3d0] sm:$0xff] }
  0xbf   :  { %3325 = vmatpush1.bf16.msra.mxu0 %v8218_v15  ;;  %3411 = vmatpush1.bf16.msra.mxu1 %v8220_v16  ;;  %v7841_v15 = vcombine.high %v92_v5, %v100_v7  ;;  %v116_v16 = vld [vmem:[#allocation5 + $0xd8] sm:$0xff]  ;;  %v227_v5 = vld [vmem:[#allocation5 + $0x450] sm:$0xff] }
  0xc0   :  { %3326 = vmatprep.subr.bf16.mxu0 %v8235_v17  ;;  %3412 = vmatprep.subr.bf16.mxu1 %v8237_v21  ;;  %v7838_v17 = vcombine.low %v91_v3, %v99_v4  ;;  %v131_v21 = vld [vmem:[#allocation5 + $0x150] sm:$0xff]  ;;  %v7856_v26 = vcombine.low %v108_v14, %v116_v16  ;;  %v7951_v3 = vcombine.high %v203_v60, %v211_v61 }
  0xc1   :  { %v7871_v27 = vcombine.high %v123_v20, %v131_v21  ;;  %v219_v4 = vld [vmem:[#allocation5 + $0x410] sm:$0xff] }
  0xc3   :  { %3327 = vmatpush1.bf16.msra.mxu0 %v8234_v23  ;;  %3413 = vmatpush1.bf16.msra.mxu1 %v8236_v24  ;;  %v7857_v23 = vcombine.high %v108_v14, %v116_v16  ;;  %v132_v24 = vld [vmem:[#allocation5 + $0x158] sm:$0xff] }
  0xc4   :  { %3328 = vmatprep.subr.bf16.mxu0 %v8251_v25  ;;  %3414 = vmatprep.subr.bf16.mxu1 %v8253_v29  ;;  %v7854_v25 = vcombine.low %v107_v12, %v115_v13  ;;  %v147_v29 = vld [vmem:[#allocation5 + $0x1d0] sm:$0xff]  ;;  %v7872_v34 = vcombine.low %v124_v22, %v132_v24  ;;  %v236_v14 = vld [vmem:[#allocation5 + $0x498] sm:$0xff] }
  0xc5   :  { %v7887_v35 = vcombine.high %v139_v28, %v147_v29  ;;  %v235_v12 = vld [vmem:[#allocation5 + $0x490] sm:$0xff]  ;;  %v244_v16 = vld [vmem:[#allocation5 + $0x4d8] sm:$0xff] }
  0xc6   :  { %v243_v13 = vld [vmem:[#allocation5 + $0x4d0] sm:$0xff] }
  0xc7   :  { %3329 = vmatpush1.bf16.msra.mxu0 %v8250_v31  ;;  %3415 = vmatpush1.bf16.msra.mxu1 %v8252_v32  ;;  %v7873_v31 = vcombine.high %v124_v22, %v132_v24  ;;  %v148_v32 = vld [vmem:[#allocation5 + $0x1d8] sm:$0xff] }
  0xc8   :  { %3330 = vmatprep.subr.bf16.mxu0 %v8267_v33  ;;  %3416 = vmatprep.subr.bf16.mxu1 %v8269_v37  ;;  %v7870_v33 = vcombine.low %v123_v20, %v131_v21  ;;  %v163_v37 = vld [vmem:[#allocation5 + $0x250] sm:$0xff]  ;;  %v7888_v42 = vcombine.low %v140_v30, %v148_v32  ;;  %v252_v22 = vld [vmem:[#allocation5 + $0x518] sm:$0xff] }
  0xc9   :  { %v7903_v43 = vcombine.high %v155_v36, %v163_v37  ;;  %v251_v20 = vld [vmem:[#allocation5 + $0x510] sm:$0xff]  ;;  %v260_v24 = vld [vmem:[#allocation5 + $0x558] sm:$0xff] }
  0xca   :  { %v259_v21 = vld [vmem:[#allocation5 + $0x550] sm:$0xff] }
  0xcb   :  { %3331 = vmatpush1.bf16.msra.mxu0 %v8266_v39  ;;  %3417 = vmatpush1.bf16.msra.mxu1 %v8268_v40  ;;  %v7889_v39 = vcombine.high %v140_v30, %v148_v32  ;;  %v164_v40 = vld [vmem:[#allocation5 + $0x258] sm:$0xff] }
  0xcc   :  { %3332 = vmatprep.subr.bf16.mxu0 %v8283_v41  ;;  %3418 = vmatprep.subr.bf16.mxu1 %v8285_v45  ;;  %v7886_v41 = vcombine.low %v139_v28, %v147_v29  ;;  %v172_v45 = vld [vmem:[#allocation5 + $0x298] sm:$0xff]  ;;  %v7905_v46 = vcombine.high %v156_v38, %v164_v40  ;;  %v267_v28 = vld [vmem:[#allocation5 + $0x590] sm:$0xff] }
  0xcd   :  { %v275_v29 = vld [vmem:[#allocation5 + $0x5d0] sm:$0xff]  ;;  %v268_v30 = vld [vmem:[#allocation5 + $0x598] sm:$0xff] }
  0xce   :  { %v276_v32 = vld [vmem:[#allocation5 + $0x5d8] sm:$0xff] }
  0xcf   :  { %3333 = vmatpush1.bf16.msra.mxu0 %v8282_v47  ;;  %3419 = vmatpush1.bf16.msra.mxu1 %v8284_v48  ;;  %v180_v47 = vld [vmem:[#allocation5 + $0x2d8] sm:$0xff]  ;;  %v7902_v48 = vcombine.low %v155_v36, %v163_v37  ;;  %v283_v36 = vld [vmem:[#allocation5 + $0x610] sm:$0xff] }
  0xd0   :  { %3334 = vmatprep.subr.bf16.mxu0 %v8299_v49  ;;  %3420 = vmatprep.subr.bf16.mxu1 %v8301_v53  ;;  %v7904_v49 = vcombine.low %v156_v38, %v164_v40  ;;  %v188_v53 = vld [vmem:[#allocation5 + $0x318] sm:$0xff]  ;;  %v7921_v54 = vcombine.high %v172_v45, %v180_v47  ;;  %v291_v37 = vld [vmem:[#allocation5 + $0x650] sm:$0xff] }
  0xd1   :  { %v284_v38 = vld [vmem:[#allocation5 + $0x618] sm:$0xff] }
  0xd2   :  { %v292_v40 = vld [vmem:[#allocation5 + $0x658] sm:$0xff] }
  0xd3   :  { %3335 = vmatpush1.bf16.msra.mxu0 %v8298_v55  ;;  %3421 = vmatpush1.bf16.msra.mxu1 %v8300_v57  ;;  %v196_v55 = vld [vmem:[#allocation5 + $0x358] sm:$0xff] }
  0xd4   :  { %3336 = vmatprep.subr.bf16.mxu0 %v8315_v58  ;;  %3422 = vmatprep.subr.bf16.mxu1 %v8317_v62  ;;  %v7920_v58 = vcombine.low %v172_v45, %v180_v47  ;;  %v204_v62 = vld [vmem:[#allocation5 + $0x398] sm:$0xff]  ;;  %v7937_v63 = vcombine.high %v188_v53, %v196_v55 }
  0xd5   :  { %v300_v45 = vld [vmem:[#allocation5 + $0x698] sm:$0xff] }
  0xd6   :  { %v308_v47 = vld [vmem:[#allocation5 + $0x6d8] sm:$0xff] }
  0xd7   :  { %3337 = vmatpush1.bf16.msra.mxu0 %v8314_v0  ;;  %3423 = vmatpush1.bf16.msra.mxu1 %v8316_v1  ;;  %v212_v0 = vld [vmem:[#allocation5 + $0x3d8] sm:$0xff]  ;;  %v7934_v1 = vcombine.low %v187_v51, %v195_v52  ;;  %v315_v51 = vld [vmem:[#allocation5 + $0x710] sm:$0xff] }
  0xd8   :  { %3338 = vmatprep.subr.bf16.mxu0 %v8331_v2  ;;  %3424 = vmatprep.subr.bf16.mxu1 %v8333_v6  ;;  %v7936_v2 = vcombine.low %v188_v53, %v196_v55  ;;  %v220_v6 = vld [vmem:[#allocation5 + $0x418] sm:$0xff]  ;;  %v7953_v7 = vcombine.high %v204_v62, %v212_v0  ;;  %v323_v52 = vld [vmem:[#allocation5 + $0x750] sm:$0xff] }
  0xd9   :  { %v316_v53 = vld [vmem:[#allocation5 + $0x718] sm:$0xff] }
  0xda   :  { %v324_v55 = vld [vmem:[#allocation5 + $0x758] sm:$0xff] }
  0xdb   :  { %3339 = vmatpush1.bf16.msra.mxu0 %v8330_v8  ;;  %3425 = vmatpush1.bf16.msra.mxu1 %v8332_v9  ;;  %v228_v8 = vld [vmem:[#allocation5 + $0x458] sm:$0xff]  ;;  %v7950_v9 = vcombine.low %v203_v60, %v211_v61  ;;  %v331_v60 = vld [vmem:[#allocation5 + $0x790] sm:$0xff] }
  0xdc   :  { %3437 = vmatprep.subr.bf16.mxu0 %v7839_v11  ;;  %3523 = vmatprep.subr.bf16.mxu1 %v7841_v15  ;;  %v7967_v11 = vcombine.high %v219_v4, %v227_v5  ;;  %v7969_v15 = vcombine.high %v220_v6, %v228_v8  ;;  %v339_v61 = vld [vmem:[#allocation5 + $0x7d0] sm:$0xff] }
  0xde   :  { %3341 = vmatmul.mubr.bf16.vlgmr.msra.gmra.mrb[0].mxu0 %v9009_v10  ;;  %3427 = vmatmul.mubr.bf16.vlgmr.msra.gmra.mrb[0].mxu1 %v9009_v10  ;;  %v7952_v10 = vcombine.low %v204_v62, %v212_v0  ;;  %v332_v62 = vld [vmem:[#allocation5 + $0x798] sm:$0xff] }
  0xdf   :  { %3438 = vmatpush1.bf16.msra.mxu0 %v7838_v17  ;;  %3524 = vmatpush1.bf16.msra.mxu1 %v7840_v18  ;;  %v7966_v17 = vcombine.low %v219_v4, %v227_v5  ;;  %v7968_v18 = vcombine.low %v220_v6, %v228_v8  ;;  %v340_v0 = vld [vmem:[#allocation5 + $0x7d8] sm:$0xff]  ;;  %v347_v4 = vld [vmem:[#allocation5 + $0x810] sm:$0xff] }
  0xe0   :  { %3439 = vmatprep.subr.bf16.mxu0 %v7855_v19  ;;  %3525 = vmatprep.subr.bf16.mxu1 %v7857_v23  ;;  %v7983_v19 = vcombine.high %v235_v12, %v243_v13  ;;  %v7985_v23 = vcombine.high %v236_v14, %v244_v16  ;;  %v355_v5 = vld [vmem:[#allocation5 + $0x850] sm:$0xff]  ;;  %v348_v6 = vld [vmem:[#allocation5 + $0x818] sm:$0xff] }
  0xe1   :  { %3469 = vmatprep.mubr.bf16.mxu0 %v10032_v56  ;;  %3555 = vmatprep.mubr.bf16.mxu1 %v10032_v56  ;;  %v179_v56 = vld [vmem:[#allocation5 + $0x2d0] sm:$0xff]  ;;  %v356_v8 = vld [vmem:[#allocation5 + $0x858] sm:$0xff] }
  0xe2   :  { %v7919_v50 = vcombine.high %v171_v44, %v179_v56  ;;  %v7918_v57 = vcombine.low %v171_v44, %v179_v56  ;;  %v299_v44 = vld [vmem:[#allocation5 + $0x690] sm:$0xff] }
  0xe3   :  { %3440 = vmatpush1.bf16.msra.mxu0 %v7854_v25  ;;  %3526 = vmatpush1.bf16.msra.mxu1 %v7856_v26  ;;  %v7982_v25 = vcombine.low %v235_v12, %v243_v13  ;;  %v7984_v26 = vcombine.low %v236_v14, %v244_v16  ;;  %v307_v56 = vld [vmem:[#allocation5 + $0x6d0] sm:$0xff]  ;;  %v364_v14 = vld [vmem:[#allocation5 + $0x898] sm:$0xff] }
  0xe4   :  { %3441 = vmatprep.subr.bf16.mxu0 %v7871_v27  ;;  %3527 = vmatprep.subr.bf16.mxu1 %v7873_v31  ;;  %v7999_v27 = vcombine.high %v251_v20, %v259_v21  ;;  %v8001_v31 = vcombine.high %v252_v22, %v260_v24  ;;  %v363_v12 = vld [vmem:[#allocation5 + $0x890] sm:$0xff]  ;;  %v372_v16 = vld [vmem:[#allocation5 + $0x8d8] sm:$0xff] }
  0xe5   :  { %v371_v13 = vld [vmem:[#allocation5 + $0x8d0] sm:$0xff] }
  0xe7   :  { %3442 = vmatpush1.bf16.msra.mxu0 %v7870_v33  ;;  %3528 = vmatpush1.bf16.msra.mxu1 %v7872_v34  ;;  %v7998_v33 = vcombine.low %v251_v20, %v259_v21  ;;  %v8000_v34 = vcombine.low %v252_v22, %v260_v24  ;;  %v379_v20 = vld [vmem:[#allocation5 + $0x910] sm:$0xff]  ;;  %v380_v22 = vld [vmem:[#allocation5 + $0x918] sm:$0xff] }
  0xe8   :  { %3443 = vmatprep.subr.bf16.mxu0 %v7887_v35  ;;  %3529 = vmatprep.subr.bf16.mxu1 %v7889_v39  ;;  %v8015_v35 = vcombine.high %v267_v28, %v275_v29  ;;  %v8017_v39 = vcombine.high %v268_v30, %v276_v32  ;;  %v387_v21 = vld [vmem:[#allocation5 + $0x950] sm:$0xff]  ;;  %v388_v24 = vld [vmem:[#allocation5 + $0x958] sm:$0xff] }
  0xeb   :  { %3444 = vmatpush1.bf16.msra.mxu0 %v7886_v41  ;;  %3530 = vmatpush1.bf16.msra.mxu1 %v7888_v42  ;;  %v8014_v41 = vcombine.low %v267_v28, %v275_v29  ;;  %v8016_v42 = vcombine.low %v268_v30, %v276_v32  ;;  %v8127_v28 = vcombine.high %v379_v20, %v387_v21  ;;  %v395_v29 = vld [vmem:[#allocation5 + $0x990] sm:$0xff] }
  0xec   :  { %3445 = vmatprep.subr.bf16.mxu0 %v7903_v43  ;;  %3531 = vmatprep.subr.bf16.mxu1 %v7905_v46  ;;  %v8031_v43 = vcombine.high %v283_v36, %v291_v37  ;;  %v8033_v46 = vcombine.high %v284_v38, %v292_v40  ;;  %v403_v30 = vld [vmem:[#allocation5 + $0x9d0] sm:$0xff]  ;;  %v8129_v32 = vcombine.high %v380_v22, %v388_v24 }
  0xef   :  { %3446 = vmatpush1.bf16.msra.mxu0 %v7902_v48  ;;  %3532 = vmatpush1.bf16.msra.mxu1 %v7904_v49  ;;  %v8030_v48 = vcombine.low %v283_v36, %v291_v37  ;;  %v8032_v49 = vcombine.low %v284_v38, %v292_v40  ;;  %v8128_v36 = vcombine.low %v380_v22, %v388_v24  ;;  %v411_v38 = vld [vmem:[#allocation5 + $0xa10] sm:$0xff]  ;;  %v412_v40 = vld [vmem:[#allocation5 + $0xa18] sm:$0xff] }
  0xf0   :  { %3447 = vmatprep.subr.bf16.mxu0 %v7919_v50  ;;  %3533 = vmatprep.subr.bf16.mxu1 %v7921_v54  ;;  %v8047_v50 = vcombine.high %v299_v44, %v307_v56  ;;  %v8049_v54 = vcombine.high %v300_v45, %v308_v47  ;;  %v8143_v37 = vcombine.high %v395_v29, %v403_v30  ;;  %v507_v22 = vld [vmem:[#allocation5 + $0xd10] sm:$0xff]  ;;  %v508_v24 = vld [vmem:[#allocation5 + $0xd18] sm:$0xff] }
  0xf3   :  { %3448 = vmatpush1.bf16.msra.mxu0 %v7918_v57  ;;  %3534 = vmatpush1.bf16.msra.mxu1 %v7920_v58  ;;  %v8046_v57 = vcombine.low %v299_v44, %v307_v56  ;;  %v8048_v58 = vcombine.low %v300_v45, %v308_v47  ;;  %v427_v45 = vld [vmem:[#allocation5 + $0xa90] sm:$0xff]  ;;  %v428_v47 = vld [vmem:[#allocation5 + $0xa98] sm:$0xff] }
  0xf4   :  { %3449 = vmatprep.subr.bf16.mxu0 %v7935_v59  ;;  %3535 = vmatprep.subr.bf16.mxu1 %v7937_v63  ;;  %v8063_v59 = vcombine.high %v315_v51, %v323_v52  ;;  %v8065_v63 = vcombine.high %v316_v53, %v324_v55 }
  0xf7   :  { %3450 = vmatpush1.bf16.msra.mxu0 %v7934_v1  ;;  %3536 = vmatpush1.bf16.msra.mxu1 %v7936_v2  ;;  %v8062_v1 = vcombine.low %v315_v51, %v323_v52  ;;  %v8064_v2 = vcombine.low %v316_v53, %v324_v55  ;;  %v443_v53 = vld [vmem:[#allocation5 + $0xb10] sm:$0xff]  ;;  %v444_v55 = vld [vmem:[#allocation5 + $0xb18] sm:$0xff] }
  0xf8   :  { %3451 = vmatprep.subr.bf16.mxu0 %v7951_v3  ;;  %3537 = vmatprep.subr.bf16.mxu1 %v7953_v7  ;;  %v8079_v3 = vcombine.high %v331_v60, %v339_v61  ;;  %v8081_v7 = vcombine.high %v332_v62, %v340_v0 }
  0xfb   :  { %3452 = vmatpush1.bf16.msra.mxu0 %v7950_v9  ;;  %3538 = vmatpush1.bf16.msra.mxu1 %v7952_v10  ;;  %v8078_v9 = vcombine.low %v331_v60, %v339_v61  ;;  %v8080_v10 = vcombine.low %v332_v62, %v340_v0  ;;  %v459_v62 = vld [vmem:[#allocation5 + $0xb90] sm:$0xff] }
  0xfc   :  { %3453 = vmatprep.subr.bf16.mxu0 %v7967_v11  ;;  %3539 = vmatprep.subr.bf16.mxu1 %v7969_v15  ;;  %v8095_v11 = vcombine.high %v347_v4, %v355_v5  ;;  %v8097_v15 = vcombine.high %v348_v6, %v356_v8 }
  0xff   :  { %3454 = vmatpush1.bf16.msra.mxu0 %v7966_v17  ;;  %3540 = vmatpush1.bf16.msra.mxu1 %v7968_v18  ;;  %v8094_v17 = vcombine.low %v347_v4, %v355_v5  ;;  %v8096_v18 = vcombine.low %v348_v6, %v356_v8  ;;  %v475_v6 = vld [vmem:[#allocation5 + $0xc10] sm:$0xff]  ;;  %v476_v8 = vld [vmem:[#allocation5 + $0xc18] sm:$0xff] }
 0x100   :  { %3455 = vmatprep.subr.bf16.mxu0 %v7983_v19  ;;  %3541 = vmatprep.subr.bf16.mxu1 %v7985_v23  ;;  %v8111_v19 = vcombine.high %v363_v12, %v371_v13  ;;  %v8113_v23 = vcombine.high %v364_v14, %v372_v16 }
 0x103   :  { %3456 = vmatpush1.bf16.msra.mxu0 %v7982_v25  ;;  %3542 = vmatpush1.bf16.msra.mxu1 %v7984_v26  ;;  %v9778_v25 = vld [vmem:[#allocation2] ss:$16 sps:$4 sm:$0xff]   ;;  %v8110_v26 = vcombine.low %v363_v12, %v371_v13 }
 0x104   :  { %3457 = vmatprep.subr.bf16.mxu0 %v7999_v27  ;;  %3543 = vmatprep.subr.bf16.mxu1 %v8001_v31  ;;  %v8112_v27 = vcombine.low %v364_v14, %v372_v16  ;;  %v396_v31 = vld [vmem:[#allocation5 + $0x998] sm:$0xff]  ;;  %v491_v14 = vld [vmem:[#allocation5 + $0xc90] sm:$0xff] }
 0x105   :  { %v492_v16 = vld [vmem:[#allocation5 + $0xc98] sm:$0xff] }
 0x107   :  { %3458 = vmatpush1.bf16.msra.mxu0 %v7998_v33  ;;  %3544 = vmatpush1.bf16.msra.mxu1 %v8000_v34  ;;  %v404_v33 = vld [vmem:[#allocation5 + $0x9d8] sm:$0xff] }
 0x108   :  { %3459 = vmatprep.subr.bf16.mxu0 %v8015_v35  ;;  %3545 = vmatprep.subr.bf16.mxu1 %v8017_v39  ;;  %v9779_v34 = vld [vmem:[#allocation2 + $0xc] ss:$16 sps:$4 sm:$0xff]   ;;  %v8126_v35 = vcombine.low %v379_v20, %v387_v21  ;;  %v419_v39 = vld [vmem:[#allocation5 + $0xa50] sm:$0xff]  ;;  %v8144_v44 = vcombine.low %v396_v31, %v404_v33 }
 0x109   :  { %v8159_v56 = vcombine.high %v411_v38, %v419_v39 }
 0x10b   :  { %3460 = vmatpush1.bf16.msra.mxu0 %v8014_v41  ;;  %3546 = vmatpush1.bf16.msra.mxu1 %v8016_v42  ;;  %v8145_v41 = vcombine.high %v396_v31, %v404_v33  ;;  %v420_v42 = vld [vmem:[#allocation5 + $0xa58] sm:$0xff]  ;;  %v531_v31 = vld [vmem:[#allocation5 + $0xdd0] sm:$0xff] }
 0x10c   :  { %3461 = vmatprep.subr.bf16.mxu0 %v8031_v43  ;;  %3547 = vmatprep.subr.bf16.mxu1 %v8033_v46  ;;  %v8142_v43 = vcombine.low %v395_v29, %v403_v30  ;;  %v435_v46 = vld [vmem:[#allocation5 + $0xad0] sm:$0xff]  ;;  %v8160_v51 = vcombine.low %v412_v40, %v420_v42 }
 0x10d   :  { %v8175_v52 = vcombine.high %v427_v45, %v435_v46  ;;  %v523_v30 = vld [vmem:[#allocation5 + $0xd90] sm:$0xff] }
 0x10f   :  { %3462 = vmatpush1.bf16.msra.mxu0 %v8030_v48  ;;  %3548 = vmatpush1.bf16.msra.mxu1 %v8032_v49  ;;  %v8161_v48 = vcombine.high %v412_v40, %v420_v42  ;;  %v436_v49 = vld [vmem:[#allocation5 + $0xad8] sm:$0xff] }
 0x110   :  { %3463 = vmatprep.subr.bf16.mxu0 %v8047_v50  ;;  %3549 = vmatprep.subr.bf16.mxu1 %v8049_v54  ;;  %v8158_v50 = vcombine.low %v411_v38, %v419_v39  ;;  %v451_v54 = vld [vmem:[#allocation5 + $0xb50] sm:$0xff]  ;;  %v8176_v60 = vcombine.low %v428_v47, %v436_v49  ;;  %v540_v40 = vld [vmem:[#allocation5 + $0xe18] sm:$0xff] }
 0x111   :  { %v8191_v61 = vcombine.high %v443_v53, %v451_v54  ;;  %v539_v38 = vld [vmem:[#allocation5 + $0xe10] sm:$0xff]  ;;  %v548_v42 = vld [vmem:[#allocation5 + $0xe58] sm:$0xff] }
 0x112   :  { %v547_v39 = vld [vmem:[#allocation5 + $0xe50] sm:$0xff] }
 0x113   :  { %3464 = vmatpush1.bf16.msra.mxu0 %v8046_v57  ;;  %3550 = vmatpush1.bf16.msra.mxu1 %v8048_v58  ;;  %v8177_v57 = vcombine.high %v428_v47, %v436_v49  ;;  %v452_v58 = vld [vmem:[#allocation5 + $0xb58] sm:$0xff] }
 0x114   :  { %3465 = vmatprep.subr.bf16.mxu0 %v8063_v59  ;;  %3551 = vmatprep.subr.bf16.mxu1 %v8065_v63  ;;  %v8174_v59 = vcombine.low %v427_v45, %v435_v46  ;;  %v467_v63 = vld [vmem:[#allocation5 + $0xbd0] sm:$0xff]  ;;  %v8193_v0 = vcombine.high %v444_v55, %v452_v58  ;;  %v8192_v4 = vcombine.low %v444_v55, %v452_v58  ;;  %v556_v47 = vld [vmem:[#allocation5 + $0xe98] sm:$0xff] }
 0x115   :  { %v8207_v5 = vcombine.high %v459_v62, %v467_v63  ;;  %v555_v45 = vld [vmem:[#allocation5 + $0xe90] sm:$0xff]  ;;  %v564_v49 = vld [vmem:[#allocation5 + $0xed8] sm:$0xff] }
 0x116   :  { %v563_v46 = vld [vmem:[#allocation5 + $0xed0] sm:$0xff]  ;;  %v572_v55 = vld [vmem:[#allocation5 + $0xf18] sm:$0xff] }
 0x117   :  { %3466 = vmatpush1.bf16.msra.mxu0 %v8062_v1  ;;  %3552 = vmatpush1.bf16.msra.mxu1 %v8064_v2  ;;  %v460_v1 = vld [vmem:[#allocation5 + $0xb98] sm:$0xff] }
 0x118   :  { %3467 = vmatprep.subr.bf16.mxu0 %v8079_v3  ;;  %3553 = vmatprep.subr.bf16.mxu1 %v8081_v7  ;;  %v468_v2 = vld [vmem:[#allocation5 + $0xbd8] sm:$0xff]  ;;  %v8190_v3 = vcombine.low %v443_v53, %v451_v54  ;;  %v483_v7 = vld [vmem:[#allocation5 + $0xc50] sm:$0xff] }
 0x119   :  { %v8208_v12 = vcombine.low %v460_v1, %v468_v2  ;;  %v8223_v13 = vcombine.high %v475_v6, %v483_v7  ;;  %v571_v53 = vld [vmem:[#allocation5 + $0xf10] sm:$0xff]  ;;  %v580_v58 = vld [vmem:[#allocation5 + $0xf58] sm:$0xff] }
 0x11a   :  { %v579_v54 = vld [vmem:[#allocation5 + $0xf50] sm:$0xff] }
 0x11b   :  { %3468 = vmatpush1.bf16.msra.mxu0 %v8078_v9  ;;  %3554 = vmatpush1.bf16.msra.mxu1 %v8080_v10  ;;  %v8209_v9 = vcombine.high %v460_v1, %v468_v2  ;;  %v484_v10 = vld [vmem:[#allocation5 + $0xc58] sm:$0xff]  ;;  %v8321_v1 = vcombine.high %v572_v55, %v580_v58 }
 0x11c   :  { %3480 = vmatprep.subr.bf16.mxu0 %v8095_v11  ;;  %3566 = vmatprep.subr.bf16.mxu1 %v8097_v15  ;;  %v8206_v11 = vcombine.low %v459_v62, %v467_v63  ;;  %v499_v15 = vld [vmem:[#allocation5 + $0xcd0] sm:$0xff]  ;;  %v8224_v20 = vcombine.low %v476_v8, %v484_v10  ;;  %v596_v2 = vld [vmem:[#allocation5 + $0xfd8] sm:$0xff] }
 0x11d   :  { %v8239_v21 = vcombine.high %v491_v14, %v499_v15  ;;  %v587_v62 = vld [vmem:[#allocation5 + $0xf90] sm:$0xff] }
 0x11e   :  { %3470 = vmatmul.mubr.bf16.vlgmr.msra.gmra.mrb[4].mxu0 %v9778_v25  ;;  %3556 = vmatmul.mubr.bf16.vlgmr.msra.gmra.mrb[4].mxu1 %v9778_v25  ;;  %v595_v63 = vld [vmem:[#allocation5 + $0xfd0] sm:$0xff] }
 0x11f   :  { %3481 = vmatpush1.bf16.msra.mxu0 %v8094_v17  ;;  %3567 = vmatpush1.bf16.msra.mxu1 %v8096_v18  ;;  %v8225_v17 = vcombine.high %v476_v8, %v484_v10  ;;  %v500_v18 = vld [vmem:[#allocation5 + $0xcd8] sm:$0xff]  ;;  %v94_v8 = vld [vmem:[#allocation5 + $0x28] sm:$0xff] }
 0x120   :  { %3482 = vmatprep.subr.bf16.mxu0 %v8111_v19  ;;  %3568 = vmatprep.subr.bf16.mxu1 %v8113_v23  ;;  %v8222_v19 = vcombine.low %v475_v6, %v483_v7  ;;  %v515_v23 = vld [vmem:[#allocation5 + $0xd50] sm:$0xff]  ;;  %v8241_v25 = vcombine.high %v492_v16, %v500_v18  ;;  %v93_v6 = vld [vmem:[#allocation5 + $0x20] sm:$0xff]  ;;  %v102_v10 = vld [vmem:[#allocation5 + $0x68] sm:$0xff] }
 0x121   :  { %3512 = vmatprep.mubr.bf16.mxu0 %v9779_v34  ;;  %3598 = vmatprep.mubr.bf16.mxu1 %v9779_v34  ;;  %v8255_v29 = vcombine.high %v507_v22, %v515_v23  ;;  %v532_v34 = vld [vmem:[#allocation5 + $0xdd8] sm:$0xff]  ;;  %v101_v7 = vld [vmem:[#allocation5 + $0x60] sm:$0xff] }
 0x123   :  { %3483 = vmatpush1.bf16.msra.mxu0 %v8110_v26  ;;  %3569 = vmatpush1.bf16.msra.mxu1 %v8112_v27  ;;  %v516_v26 = vld [vmem:[#allocation5 + $0xd58] sm:$0xff]  ;;  %v8238_v27 = vcombine.low %v491_v14, %v499_v15  ;;  %v109_v14 = vld [vmem:[#allocation5 + $0xa0] sm:$0xff] }
 0x124   :  { %3484 = vmatprep.subr.bf16.mxu0 %v8127_v28  ;;  %3570 = vmatprep.subr.bf16.mxu1 %v8129_v32  ;;  %v8240_v28 = vcombine.low %v492_v16, %v500_v18  ;;  %v524_v32 = vld [vmem:[#allocation5 + $0xd98] sm:$0xff]  ;;  %v8257_v33 = vcombine.high %v508_v24, %v516_v26  ;;  %v117_v15 = vld [vmem:[#allocation5 + $0xe0] sm:$0xff]  ;;  %v110_v16 = vld [vmem:[#allocation5 + $0xa8] sm:$0xff] }
 0x125   :  { %v118_v18 = vld [vmem:[#allocation5 + $0xe8] sm:$0xff] }
 0x127   :  { %3485 = vmatpush1.bf16.msra.mxu0 %v8126_v35  ;;  %3571 = vmatpush1.bf16.msra.mxu1 %v8128_v36  ;;  %v8254_v35 = vcombine.low %v507_v22, %v515_v23  ;;  %v8256_v36 = vcombine.low %v508_v24, %v516_v26  ;;  %v125_v22 = vld [vmem:[#allocation5 + $0x120] sm:$0xff]  ;;  %v126_v24 = vld [vmem:[#allocation5 + $0x128] sm:$0xff] }
 0x128   :  { %3486 = vmatprep.subr.bf16.mxu0 %v8143_v37  ;;  %3572 = vmatprep.subr.bf16.mxu1 %v8145_v41  ;;  %v8271_v37 = vcombine.high %v523_v30, %v531_v31  ;;  %v8273_v41 = vcombine.high %v524_v32, %v532_v34  ;;  %v133_v23 = vld [vmem:[#allocation5 + $0x160] sm:$0xff]  ;;  %v134_v26 = vld [vmem:[#allocation5 + $0x168] sm:$0xff] }
 0x12b   :  { %3487 = vmatpush1.bf16.msra.mxu0 %v8142_v43  ;;  %3573 = vmatpush1.bf16.msra.mxu1 %v8144_v44  ;;  %v8270_v43 = vcombine.low %v523_v30, %v531_v31  ;;  %v8272_v44 = vcombine.low %v524_v32, %v532_v34  ;;  %v7875_v30 = vcombine.high %v125_v22, %v133_v23  ;;  %v141_v31 = vld [vmem:[#allocation5 + $0x1a0] sm:$0xff] }
 0x12c   :  { %3488 = vmatprep.subr.bf16.mxu0 %v8159_v56  ;;  %3574 = vmatprep.subr.bf16.mxu1 %v8161_v48  ;;  %v8287_v56 = vcombine.high %v539_v38, %v547_v39  ;;  %v8289_v48 = vcombine.high %v540_v40, %v548_v42  ;;  %v149_v32 = vld [vmem:[#allocation5 + $0x1e0] sm:$0xff]  ;;  %v7877_v34 = vcombine.high %v126_v24, %v134_v26 }
 0x12f   :  { %3489 = vmatpush1.bf16.msra.mxu0 %v8158_v50  ;;  %3575 = vmatpush1.bf16.msra.mxu1 %v8160_v51  ;;  %v8286_v50 = vcombine.low %v539_v38, %v547_v39  ;;  %v8288_v51 = vcombine.low %v540_v40, %v548_v42  ;;  %v7876_v38 = vcombine.low %v126_v24, %v134_v26  ;;  %v157_v40 = vld [vmem:[#allocation5 + $0x220] sm:$0xff]  ;;  %v158_v42 = vld [vmem:[#allocation5 + $0x228] sm:$0xff] }
 0x130   :  { %3490 = vmatprep.subr.bf16.mxu0 %v8175_v52  ;;  %3576 = vmatprep.subr.bf16.mxu1 %v8177_v57  ;;  %v8303_v52 = vcombine.high %v555_v45, %v563_v46  ;;  %v8305_v57 = vcombine.high %v556_v47, %v564_v49  ;;  %v7891_v39 = vcombine.high %v141_v31, %v149_v32  ;;  %v253_v24 = vld [vmem:[#allocation5 + $0x520] sm:$0xff]  ;;  %v254_v26 = vld [vmem:[#allocation5 + $0x528] sm:$0xff] }
 0x133   :  { %3491 = vmatpush1.bf16.msra.mxu0 %v8174_v59  ;;  %3577 = vmatpush1.bf16.msra.mxu1 %v8176_v60  ;;  %v8302_v59 = vcombine.low %v555_v45, %v563_v46  ;;  %v8304_v60 = vcombine.low %v556_v47, %v564_v49  ;;  %v173_v47 = vld [vmem:[#allocation5 + $0x2a0] sm:$0xff]  ;;  %v174_v49 = vld [vmem:[#allocation5 + $0x2a8] sm:$0xff] }
 0x134   :  { %3492 = vmatprep.subr.bf16.mxu0 %v8191_v61  ;;  %3578 = vmatprep.subr.bf16.mxu1 %v8193_v0  ;;  %v8319_v61 = vcombine.high %v571_v53, %v579_v54  ;;  %v588_v0 = vld [vmem:[#allocation5 + $0xf98] sm:$0xff] }
 0x137   :  { %3493 = vmatpush1.bf16.msra.mxu0 %v8190_v3  ;;  %3579 = vmatpush1.bf16.msra.mxu1 %v8192_v4  ;;  %v8318_v3 = vcombine.low %v571_v53, %v579_v54  ;;  %v8320_v4 = vcombine.low %v572_v55, %v580_v58  ;;  %v189_v55 = vld [vmem:[#allocation5 + $0x320] sm:$0xff]  ;;  %v190_v58 = vld [vmem:[#allocation5 + $0x328] sm:$0xff] }
 0x138   :  { %3494 = vmatprep.subr.bf16.mxu0 %v8207_v5  ;;  %3580 = vmatprep.subr.bf16.mxu1 %v8209_v9  ;;  %v8335_v5 = vcombine.high %v587_v62, %v595_v63  ;;  %v8337_v9 = vcombine.high %v588_v0, %v596_v2 }
 0x13b   :  { %3495 = vmatpush1.bf16.msra.mxu0 %v8206_v11  ;;  %3581 = vmatpush1.bf16.msra.mxu1 %v8208_v12  ;;  %v8334_v11 = vcombine.low %v587_v62, %v595_v63  ;;  %v8336_v12 = vcombine.low %v588_v0, %v596_v2  ;;  %v205_v0 = vld [vmem:[#allocation5 + $0x3a0] sm:$0xff]  ;;  %v206_v2 = vld [vmem:[#allocation5 + $0x3a8] sm:$0xff] }
 0x13c   :  { %3496 = vmatprep.subr.bf16.mxu0 %v8223_v13  ;;  %3582 = vmatprep.subr.bf16.mxu1 %v8225_v17  ;;  %v7843_v13 = vcombine.high %v93_v6, %v101_v7  ;;  %v7845_v17 = vcombine.high %v94_v8, %v102_v10 }
 0x13f   :  { %3497 = vmatpush1.bf16.msra.mxu0 %v8222_v19  ;;  %3583 = vmatpush1.bf16.msra.mxu1 %v8224_v20  ;;  %v7842_v19 = vcombine.low %v93_v6, %v101_v7  ;;  %v7844_v20 = vcombine.low %v94_v8, %v102_v10  ;;  %v221_v8 = vld [vmem:[#allocation5 + $0x420] sm:$0xff]  ;;  %v222_v10 = vld [vmem:[#allocation5 + $0x428] sm:$0xff] }
 0x140   :  { %3498 = vmatprep.subr.bf16.mxu0 %v8239_v21  ;;  %3584 = vmatprep.subr.bf16.mxu1 %v8241_v25  ;;  %v7859_v21 = vcombine.high %v109_v14, %v117_v15  ;;  %v7861_v25 = vcombine.high %v110_v16, %v118_v18 }
 0x143   :  { %3499 = vmatpush1.bf16.msra.mxu0 %v8238_v27  ;;  %3585 = vmatpush1.bf16.msra.mxu1 %v8240_v28  ;;  %v9780_v27 = vld [vmem:[#allocation2 + $0x8] ss:$16 sps:$4 sm:$0xff]   ;;  %v7858_v28 = vcombine.low %v109_v14, %v117_v15 }
 0x144   :  { %3500 = vmatprep.subr.bf16.mxu0 %v8255_v29  ;;  %3586 = vmatprep.subr.bf16.mxu1 %v8257_v33  ;;  %v7860_v29 = vcombine.low %v110_v16, %v118_v18  ;;  %v142_v33 = vld [vmem:[#allocation5 + $0x1a8] sm:$0xff]  ;;  %v237_v16 = vld [vmem:[#allocation5 + $0x4a0] sm:$0xff] }
 0x145   :  { %v238_v18 = vld [vmem:[#allocation5 + $0x4a8] sm:$0xff] }
 0x147   :  { %3501 = vmatpush1.bf16.msra.mxu0 %v8254_v35  ;;  %3587 = vmatpush1.bf16.msra.mxu1 %v8256_v36  ;;  %v150_v35 = vld [vmem:[#allocation5 + $0x1e8] sm:$0xff]  ;;  %v9781_v36 = vld [vmem:[#allocation2 + $0x4] ss:$16 sps:$4 sm:$0xff]  }
 0x148   :  { %3502 = vmatprep.subr.bf16.mxu0 %v8271_v37  ;;  %3588 = vmatprep.subr.bf16.mxu1 %v8273_v41  ;;  %v7874_v37 = vcombine.low %v125_v22, %v133_v23  ;;  %v165_v41 = vld [vmem:[#allocation5 + $0x260] sm:$0xff]  ;;  %v7892_v45 = vcombine.low %v142_v33, %v150_v35 }
 0x149   :  { %v7907_v46 = vcombine.high %v157_v40, %v165_v41 }
 0x14b   :  { %3503 = vmatpush1.bf16.msra.mxu0 %v8270_v43  ;;  %3589 = vmatpush1.bf16.msra.mxu1 %v8272_v44  ;;  %v7893_v43 = vcombine.high %v142_v33, %v150_v35  ;;  %v166_v44 = vld [vmem:[#allocation5 + $0x268] sm:$0xff]  ;;  %v277_v33 = vld [vmem:[#allocation5 + $0x5e0] sm:$0xff] }
 0x14c   :  { %3504 = vmatprep.subr.bf16.mxu0 %v8287_v56  ;;  %3590 = vmatprep.subr.bf16.mxu1 %v8289_v48  ;;  %v7890_v56 = vcombine.low %v141_v31, %v149_v32  ;;  %v181_v48 = vld [vmem:[#allocation5 + $0x2e0] sm:$0xff]  ;;  %v7908_v53 = vcombine.low %v158_v42, %v166_v44 }
 0x14d   :  { %v7923_v54 = vcombine.high %v173_v47, %v181_v48  ;;  %v269_v32 = vld [vmem:[#allocation5 + $0x5a0] sm:$0xff] }
 0x14f   :  { %3505 = vmatpush1.bf16.msra.mxu0 %v8286_v50  ;;  %3591 = vmatpush1.bf16.msra.mxu1 %v8288_v51  ;;  %v7909_v50 = vcombine.high %v158_v42, %v166_v44  ;;  %v182_v51 = vld [vmem:[#allocation5 + $0x2e8] sm:$0xff] }
 0x150   :  { %3506 = vmatprep.subr.bf16.mxu0 %v8303_v52  ;;  %3592 = vmatprep.subr.bf16.mxu1 %v8305_v57  ;;  %v7906_v52 = vcombine.low %v157_v40, %v165_v41  ;;  %v197_v57 = vld [vmem:[#allocation5 + $0x360] sm:$0xff]  ;;  %v7924_v62 = vcombine.low %v174_v49, %v182_v51  ;;  %v286_v42 = vld [vmem:[#allocation5 + $0x628] sm:$0xff] }
 0x151   :  { %v7939_v63 = vcombine.high %v189_v55, %v197_v57  ;;  %v285_v40 = vld [vmem:[#allocation5 + $0x620] sm:$0xff]  ;;  %v294_v44 = vld [vmem:[#allocation5 + $0x668] sm:$0xff] }
 0x152   :  { %v293_v41 = vld [vmem:[#allocation5 + $0x660] sm:$0xff] }
 0x153   :  { %3507 = vmatpush1.bf16.msra.mxu0 %v8302_v59  ;;  %3593 = vmatpush1.bf16.msra.mxu1 %v8304_v60  ;;  %v7925_v59 = vcombine.high %v174_v49, %v182_v51  ;;  %v198_v60 = vld [vmem:[#allocation5 + $0x368] sm:$0xff] }
 0x154   :  { %3508 = vmatprep.subr.bf16.mxu0 %v8319_v61  ;;  %3594 = vmatprep.subr.bf16.mxu1 %v8321_v1  ;;  %v7922_v61 = vcombine.low %v173_v47, %v181_v48  ;;  %v213_v1 = vld [vmem:[#allocation5 + $0x3e0] sm:$0xff]  ;;  %v7940_v6 = vcombine.low %v190_v58, %v198_v60  ;;  %v302_v49 = vld [vmem:[#allocation5 + $0x6a8] sm:$0xff] }
 0x155   :  { %v7955_v7 = vcombine.high %v205_v0, %v213_v1  ;;  %v301_v47 = vld [vmem:[#allocation5 + $0x6a0] sm:$0xff]  ;;  %v310_v51 = vld [vmem:[#allocation5 + $0x6e8] sm:$0xff] }
 0x156   :  { %v309_v48 = vld [vmem:[#allocation5 + $0x6e0] sm:$0xff] }
 0x157   :  { %3509 = vmatpush1.bf16.msra.mxu0 %v8318_v3  ;;  %3595 = vmatpush1.bf16.msra.mxu1 %v8320_v4  ;;  %v7941_v3 = vcombine.high %v190_v58, %v198_v60  ;;  %v214_v4 = vld [vmem:[#allocation5 + $0x3e8] sm:$0xff] }
 0x158   :  { %3510 = vmatprep.subr.bf16.mxu0 %v8335_v5  ;;  %3596 = vmatprep.subr.bf16.mxu1 %v8337_v9  ;;  %v7938_v5 = vcombine.low %v189_v55, %v197_v57  ;;  %v229_v9 = vld [vmem:[#allocation5 + $0x460] sm:$0xff]  ;;  %v7956_v14 = vcombine.low %v206_v2, %v214_v4  ;;  %v318_v58 = vld [vmem:[#allocation5 + $0x728] sm:$0xff] }
 0x159   :  { %v7971_v15 = vcombine.high %v221_v8, %v229_v9  ;;  %v317_v55 = vld [vmem:[#allocation5 + $0x720] sm:$0xff]  ;;  %v326_v60 = vld [vmem:[#allocation5 + $0x768] sm:$0xff] }
 0x15a   :  { %v325_v57 = vld [vmem:[#allocation5 + $0x760] sm:$0xff] }
 0x15b   :  { %3511 = vmatpush1.bf16.msra.mxu0 %v8334_v11  ;;  %3597 = vmatpush1.bf16.msra.mxu1 %v8336_v12  ;;  %v7957_v11 = vcombine.high %v206_v2, %v214_v4  ;;  %v230_v12 = vld [vmem:[#allocation5 + $0x468] sm:$0xff] }
 0x15c   :  { %3609 = vmatprep.subr.bf16.mxu0 %v7843_v13  ;;  %3695 = vmatprep.subr.bf16.mxu1 %v7845_v17  ;;  %v7954_v13 = vcombine.low %v205_v0, %v213_v1  ;;  %v245_v17 = vld [vmem:[#allocation5 + $0x4e0] sm:$0xff]  ;;  %v7972_v22 = vcombine.low %v222_v10, %v230_v12  ;;  %v334_v2 = vld [vmem:[#allocation5 + $0x7a8] sm:$0xff] }
 0x15d   :  { %v7987_v23 = vcombine.high %v237_v16, %v245_v17  ;;  %v333_v0 = vld [vmem:[#allocation5 + $0x7a0] sm:$0xff]  ;;  %v342_v4 = vld [vmem:[#allocation5 + $0x7e8] sm:$0xff] }
 0x15e   :  { %3513 = vmatmul.mubr.bf16.vlgmr.msra.gmra.mrb[4].mxu0 %v9780_v27  ;;  %3599 = vmatmul.mubr.bf16.vlgmr.msra.gmra.mrb[4].mxu1 %v9780_v27  ;;  %v341_v1 = vld [vmem:[#allocation5 + $0x7e0] sm:$0xff] }
 0x15f   :  { %3610 = vmatpush1.bf16.msra.mxu0 %v7842_v19  ;;  %3696 = vmatpush1.bf16.msra.mxu1 %v7844_v20  ;;  %v7973_v19 = vcombine.high %v222_v10, %v230_v12  ;;  %v246_v20 = vld [vmem:[#allocation5 + $0x4e8] sm:$0xff] }
 0x160   :  { %3611 = vmatprep.subr.bf16.mxu0 %v7859_v21  ;;  %3697 = vmatprep.subr.bf16.mxu1 %v7861_v25  ;;  %v7970_v21 = vcombine.low %v221_v8, %v229_v9  ;;  %v261_v25 = vld [vmem:[#allocation5 + $0x560] sm:$0xff]  ;;  %v7989_v27 = vcombine.high %v238_v18, %v246_v20  ;;  %v350_v10 = vld [vmem:[#allocation5 + $0x828] sm:$0xff] }
 0x161   :  { %3641 = vmatprep.mubr.bf16.mxu0 %v9781_v36  ;;  %3727 = vmatprep.mubr.bf16.mxu1 %v9781_v36  ;;  %v8003_v31 = vcombine.high %v253_v24, %v261_v25  ;;  %v278_v36 = vld [vmem:[#allocation5 + $0x5e8] sm:$0xff]  ;;  %v349_v8 = vld [vmem:[#allocation5 + $0x820] sm:$0xff] }
 0x162   :  { %v357_v9 = vld [vmem:[#allocation5 + $0x860] sm:$0xff]  ;;  %v358_v12 = vld [vmem:[#allocation5 + $0x868] sm:$0xff] }
 0x163   :  { %3612 = vmatpush1.bf16.msra.mxu0 %v7858_v28  ;;  %3698 = vmatpush1.bf16.msra.mxu1 %v7860_v29  ;;  %v262_v28 = vld [vmem:[#allocation5 + $0x568] sm:$0xff]  ;;  %v7986_v29 = vcombine.low %v237_v16, %v245_v17  ;;  %v365_v16 = vld [vmem:[#allocation5 + $0x8a0] sm:$0xff] }
 0x164   :  { %3613 = vmatprep.subr.bf16.mxu0 %v7875_v30  ;;  %3699 = vmatprep.subr.bf16.mxu1 %v7877_v34  ;;  %v7988_v30 = vcombine.low %v238_v18, %v246_v20  ;;  %v270_v34 = vld [vmem:[#allocation5 + $0x5a8] sm:$0xff]  ;;  %v8005_v35 = vcombine.high %v254_v26, %v262_v28  ;;  %v373_v17 = vld [vmem:[#allocation5 + $0x8e0] sm:$0xff] }
 0x165   :  { %v366_v18 = vld [vmem:[#allocation5 + $0x8a8] sm:$0xff] }
 0x166   :  { %v374_v20 = vld [vmem:[#allocation5 + $0x8e8] sm:$0xff] }
 0x167   :  { %3614 = vmatpush1.bf16.msra.mxu0 %v7874_v37  ;;  %3700 = vmatpush1.bf16.msra.mxu1 %v7876_v38  ;;  %v8002_v37 = vcombine.low %v253_v24, %v261_v25  ;;  %v8004_v38 = vcombine.low %v254_v26, %v262_v28  ;;  %v381_v24 = vld [vmem:[#allocation5 + $0x920] sm:$0xff]  ;;  %v382_v26 = vld [vmem:[#allocation5 + $0x928] sm:$0xff] }
 0x168   :  { %3615 = vmatprep.subr.bf16.mxu0 %v7891_v39  ;;  %3701 = vmatprep.subr.bf16.mxu1 %v7893_v43  ;;  %v8019_v39 = vcombine.high %v269_v32, %v277_v33  ;;  %v8021_v43 = vcombine.high %v270_v34, %v278_v36  ;;  %v389_v25 = vld [vmem:[#allocation5 + $0x960] sm:$0xff]  ;;  %v390_v28 = vld [vmem:[#allocation5 + $0x968] sm:$0xff] }
 0x16b   :  { %3616 = vmatpush1.bf16.msra.mxu0 %v7890_v56  ;;  %3702 = vmatpush1.bf16.msra.mxu1 %v7892_v45  ;;  %v8018_v56 = vcombine.low %v269_v32, %v277_v33  ;;  %v8020_v45 = vcombine.low %v270_v34, %v278_v36  ;;  %v8131_v32 = vcombine.high %v381_v24, %v389_v25  ;;  %v397_v34 = vld [vmem:[#allocation5 + $0x9a0] sm:$0xff]  ;;  %v10042_v36 = vld [vmem:[#allocation2 + $0xc] ss:$16 sps:$4 sm:$0xff]  }
 0x16c   :  { %3617 = vmatprep.subr.bf16.mxu0 %v7907_v46  ;;  %3703 = vmatprep.subr.bf16.mxu1 %v7909_v50  ;;  %v8035_v46 = vcombine.high %v285_v40, %v293_v41  ;;  %v8037_v50 = vcombine.high %v286_v42, %v294_v44  ;;  %v8133_v33 = vcombine.high %v382_v26, %v390_v28 }
 0x16f   :  { %3618 = vmatpush1.bf16.msra.mxu0 %v7906_v52  ;;  %3704 = vmatpush1.bf16.msra.mxu1 %v7908_v53  ;;  %v8034_v52 = vcombine.low %v285_v40, %v293_v41  ;;  %v8036_v53 = vcombine.low %v286_v42, %v294_v44  ;;  %v8130_v40 = vcombine.low %v381_v24, %v389_v25  ;;  %v413_v44 = vld [vmem:[#allocation5 + $0xa20] sm:$0xff] }
 0x170   :  { %3619 = vmatprep.subr.bf16.mxu0 %v7923_v54  ;;  %3705 = vmatprep.subr.bf16.mxu1 %v7925_v59  ;;  %v8051_v54 = vcombine.high %v301_v47, %v309_v48  ;;  %v8053_v59 = vcombine.high %v302_v49, %v310_v51  ;;  %v8132_v41 = vcombine.low %v382_v26, %v390_v28 }
 0x173   :  { %3620 = vmatpush1.bf16.msra.mxu0 %v7922_v61  ;;  %3706 = vmatpush1.bf16.msra.mxu1 %v7924_v62  ;;  %v8050_v61 = vcombine.low %v301_v47, %v309_v48  ;;  %v8052_v62 = vcombine.low %v302_v49, %v310_v51 }
 0x174   :  { %3621 = vmatprep.subr.bf16.mxu0 %v7939_v63  ;;  %3707 = vmatprep.subr.bf16.mxu1 %v7941_v3  ;;  %v8067_v63 = vcombine.high %v317_v55, %v325_v57  ;;  %v8069_v3 = vcombine.high %v318_v58, %v326_v60 }
 0x177   :  { %3622 = vmatpush1.bf16.msra.mxu0 %v7938_v5  ;;  %3708 = vmatpush1.bf16.msra.mxu1 %v7940_v6  ;;  %v8066_v5 = vcombine.low %v317_v55, %v325_v57  ;;  %v8068_v6 = vcombine.low %v318_v58, %v326_v60  ;;  %v430_v55 = vld [vmem:[#allocation5 + $0xaa8] sm:$0xff] }
 0x178   :  { %3623 = vmatprep.subr.bf16.mxu0 %v7955_v7  ;;  %3709 = vmatprep.subr.bf16.mxu1 %v7957_v11  ;;  %v8083_v7 = vcombine.high %v333_v0, %v341_v1  ;;  %v8085_v11 = vcombine.high %v334_v2, %v342_v4  ;;  %v438_v57 = vld [vmem:[#allocation5 + $0xae8] sm:$0xff] }
 0x17b   :  { %3624 = vmatpush1.bf16.msra.mxu0 %v7954_v13  ;;  %3710 = vmatpush1.bf16.msra.mxu1 %v7956_v14  ;;  %v8082_v13 = vcombine.low %v333_v0, %v341_v1  ;;  %v8084_v14 = vcombine.low %v334_v2, %v342_v4  ;;  %v8181_v1 = vcombine.high %v430_v55, %v438_v57  ;;  %v445_v2 = vld [vmem:[#allocation5 + $0xb20] sm:$0xff] }
 0x17c   :  { %3625 = vmatprep.subr.bf16.mxu0 %v7971_v15  ;;  %3711 = vmatprep.subr.bf16.mxu1 %v7973_v19  ;;  %v8099_v15 = vcombine.high %v349_v8, %v357_v9  ;;  %v8101_v19 = vcombine.high %v350_v10, %v358_v12 }
 0x17f   :  { %3626 = vmatpush1.bf16.msra.mxu0 %v7970_v21  ;;  %3712 = vmatpush1.bf16.msra.mxu1 %v7972_v22  ;;  %v8098_v21 = vcombine.low %v349_v8, %v357_v9  ;;  %v8100_v22 = vcombine.low %v350_v10, %v358_v12 }
 0x180   :  { %3627 = vmatprep.subr.bf16.mxu0 %v7987_v23  ;;  %3713 = vmatprep.subr.bf16.mxu1 %v7989_v27  ;;  %v8115_v23 = vcombine.high %v365_v16, %v373_v17  ;;  %v8117_v27 = vcombine.high %v366_v18, %v374_v20 }
 0x183   :  { %3628 = vmatpush1.bf16.msra.mxu0 %v7986_v29  ;;  %3714 = vmatpush1.bf16.msra.mxu1 %v7988_v30  ;;  %v10038_v29 = vld [vmem:[#allocation2] ss:$16 sps:$4 sm:$0xff]   ;;  %v8114_v30 = vcombine.low %v365_v16, %v373_v17 }
 0x184   :  { %3629 = vmatprep.subr.bf16.mxu0 %v8003_v31  ;;  %3715 = vmatprep.subr.bf16.mxu1 %v8005_v35  ;;  %v8116_v31 = vcombine.low %v366_v18, %v374_v20  ;;  %v405_v35 = vld [vmem:[#allocation5 + $0x9e0] sm:$0xff]  ;;  %v462_v20 = vld [vmem:[#allocation5 + $0xba8] sm:$0xff] }
 0x185   :  { %v8147_v42 = vcombine.high %v397_v34, %v405_v35  ;;  %v8146_v48 = vcombine.low %v397_v34, %v405_v35  ;;  %v469_v16 = vld [vmem:[#allocation5 + $0xbe0] sm:$0xff] }
 0x187   :  { %3630 = vmatpush1.bf16.msra.mxu0 %v8002_v37  ;;  %3716 = vmatpush1.bf16.msra.mxu1 %v8004_v38  ;;  %v398_v37 = vld [vmem:[#allocation5 + $0x9a8] sm:$0xff] }
 0x188   :  { %3631 = vmatprep.subr.bf16.mxu0 %v8019_v39  ;;  %3717 = vmatprep.subr.bf16.mxu1 %v8021_v43  ;;  %v406_v38 = vld [vmem:[#allocation5 + $0x9e8] sm:$0xff]  ;;  %v605_v39 = vlaneseq }
 0x189   :  { %v8149_v43 = vcombine.high %v398_v37, %v406_v38  ;;  %v8148_v49 = vcombine.low %v398_v37, %v406_v38 }
 0x18a   :  { %v10046_v47 = vshrl.u32 %v605_v39, 7 }
 0x18b   :  { %3632 = vmatpush1.bf16.msra.mxu0 %v8018_v56  ;;  %3718 = vmatpush1.bf16.msra.mxu1 %v8020_v45  ;;  %v421_v56 = vld [vmem:[#allocation5 + $0xa60] sm:$0xff]  ;;  %v414_v45 = vld [vmem:[#allocation5 + $0xa28] sm:$0xff] }
 0x18c   :  { %3633 = vmatprep.subr.bf16.mxu0 %v8035_v46  ;;  %3719 = vmatprep.subr.bf16.mxu1 %v8037_v50  ;;  %v422_v46 = vld [vmem:[#allocation5 + $0xa68] sm:$0xff]  ;;  %v8163_v50 = vcombine.high %v413_v44, %v421_v56  ;;  %v8162_v58 = vcombine.low %v413_v44, %v421_v56  ;;  %v10054_v60 = vsub.s32 2, %v10046_v47 }
 0x18d   :  { %v8165_v51 = vcombine.high %v414_v45, %v422_v46 }
 0x18f   :  { %3634 = vmatpush1.bf16.msra.mxu0 %v8034_v52  ;;  %3720 = vmatpush1.bf16.msra.mxu1 %v8036_v53  ;;  %v429_v52 = vld [vmem:[#allocation5 + $0xaa0] sm:$0xff] }
 0x190   :  { %3635 = vmatprep.subr.bf16.mxu0 %v8051_v54  ;;  %3721 = vmatprep.subr.bf16.mxu1 %v8053_v59  ;;  %v437_v53 = vld [vmem:[#allocation5 + $0xae0] sm:$0xff]  ;;  %v10049_v54 = vsub.s32 0, %v10046_v47 }
 0x191   :  { %v10051_v59 = vld [vmem:[#allocation7] sm:$0xff]  ;;  %v8179_v0 = vcombine.high %v429_v52, %v437_v53  ;;  %v8178_v9 = vcombine.low %v429_v52, %v437_v53 }
 0x192   :  { %v608_v4 = vrot.slane %v10051_v59, %v10049_v54 }
 0x193   :  { %3636 = vmatpush1.bf16.msra.mxu0 %v8050_v61  ;;  %3722 = vmatpush1.bf16.msra.mxu1 %v8052_v62  ;;  %v10057_v61 = vsub.s32 1, %v10046_v47  ;;  %v8164_v62 = vcombine.low %v414_v45, %v422_v46  ;;  %v478_v45 = vld [vmem:[#allocation5 + $0xc28] sm:$0xff] }
 0x194   :  { %3637 = vmatprep.subr.bf16.mxu0 %v8067_v63  ;;  %3723 = vmatprep.subr.bf16.mxu1 %v8069_v3  ;;  %v10060_v63 = vsub.s32 3, %v10046_v47  ;;  %v453_v3 = vld [vmem:[#allocation5 + $0xb60] sm:$0xff]  ;;  %v486_v46 = vld [vmem:[#allocation5 + $0xc68] sm:$0xff] }
 0x195   :  { %v612_v8 = vrot.slane %v10051_v59, %v10057_v61  ;;  %v8195_v12 = vcombine.high %v445_v2, %v453_v3  ;;  %v8194_v26 = vcombine.low %v445_v2, %v453_v3  ;;  %v501_v2 = vld [vmem:[#allocation5 + $0xce0] sm:$0xff] }
 0x196   :  { %v620_v10 = vrot.slane %v10051_v59, %v10060_v63 }
 0x197   :  { %3638 = vmatpush1.bf16.msra.mxu0 %v8066_v5  ;;  %3724 = vmatpush1.bf16.msra.mxu1 %v8068_v6  ;;  %v446_v5 = vld [vmem:[#allocation5 + $0xb28] sm:$0xff] }
 0x198   :  { %3639 = vmatprep.subr.bf16.mxu0 %v8083_v7  ;;  %3725 = vmatprep.subr.bf16.mxu1 %v8085_v11  ;;  %v454_v6 = vld [vmem:[#allocation5 + $0xb68] sm:$0xff]  ;;  %v616_v7 = vrot.slane %v10051_v59, %v10054_v60  ;;  %v8180_v11 = vcombine.low %v430_v55, %v438_v57 }
 0x19b   :  { %3640 = vmatpush1.bf16.msra.mxu0 %v8082_v13  ;;  %3726 = vmatpush1.bf16.msra.mxu1 %v8084_v14  ;;  %v8197_v14 = vcombine.high %v446_v5, %v454_v6 }
 0x19c   :  { %3652 = vmatprep.subr.bf16.mxu0 %v8099_v15  ;;  %3738 = vmatprep.subr.bf16.mxu1 %v8101_v19  ;;  %v461_v15 = vld [vmem:[#allocation5 + $0xba0] sm:$0xff] }
 0x19d   :  { %v8210_v38 = vcombine.low %v461_v15, %v469_v16 }
 0x19e   :  { %3642 = vmatmul.mubr.bf16.vlgmr.msra.gmra.mrb[8].mxu0 %v10038_v29  ;;  %3728 = vmatmul.mubr.bf16.vlgmr.msra.gmra.mrb[8].mxu1 %v10038_v29 }
 0x19f   :  { %3653 = vmatpush1.bf16.msra.mxu0 %v8098_v21  ;;  %3739 = vmatpush1.bf16.msra.mxu1 %v8100_v22  ;;  %v470_v21 = vld [vmem:[#allocation5 + $0xbe8] sm:$0xff] }
 0x1a0   :  { %3654 = vmatprep.subr.bf16.mxu0 %v8115_v23  ;;  %3740 = vmatprep.subr.bf16.mxu1 %v8117_v27  ;;  %v8196_v27 = vcombine.low %v446_v5, %v454_v6  ;;  %v8213_v39 = vcombine.high %v462_v20, %v470_v21  ;;  %v8212_v56 = vcombine.low %v462_v20, %v470_v21  ;;  %v502_v5 = vld [vmem:[#allocation5 + $0xce8] sm:$0xff] }
 0x1a1   :  { %3684 = vmatprep.mubr.bf16.mxu0 %v10042_v36  ;;  %3770 = vmatprep.mubr.bf16.mxu1 %v10042_v36  ;;  %v526_v20 = vld [vmem:[#allocation5 + $0xda8] sm:$0xff] }
 0x1a2   :  { %v534_v21 = vld [vmem:[#allocation5 + $0xde8] sm:$0xff] }
 0x1a3   :  { %3655 = vmatpush1.bf16.msra.mxu0 %v8114_v30  ;;  %3741 = vmatpush1.bf16.msra.mxu1 %v8116_v31 }
 0x1a4   :  { %3656 = vmatprep.subr.bf16.mxu0 %v8131_v32  ;;  %3742 = vmatprep.subr.bf16.mxu1 %v8133_v33  ;;  %v8211_v33 = vcombine.high %v461_v15, %v469_v16 }
 0x1a7   :  { %3657 = vmatpush1.bf16.msra.mxu0 %v8130_v40  ;;  %3743 = vmatpush1.bf16.msra.mxu1 %v8132_v41  ;;  %v477_v40 = vld [vmem:[#allocation5 + $0xc20] sm:$0xff] }
 0x1a8   :  { %3658 = vmatprep.subr.bf16.mxu0 %v8147_v42  ;;  %3744 = vmatprep.subr.bf16.mxu1 %v8149_v43  ;;  %v485_v41 = vld [vmem:[#allocation5 + $0xc60] sm:$0xff] }
 0x1a9   :  { %v8227_v57 = vcombine.high %v477_v40, %v485_v41  ;;  %v8226_v6 = vcombine.low %v477_v40, %v485_v41 }
 0x1ab   :  { %3659 = vmatpush1.bf16.msra.mxu0 %v8146_v48  ;;  %3745 = vmatpush1.bf16.msra.mxu1 %v8148_v49 }
 0x1ac   :  { %3660 = vmatprep.subr.bf16.mxu0 %v8163_v50  ;;  %3746 = vmatprep.subr.bf16.mxu1 %v8165_v51 }
 0x1af   :  { %3661 = vmatpush1.bf16.msra.mxu0 %v8162_v58  ;;  %3747 = vmatpush1.bf16.msra.mxu1 %v8164_v62 }
 0x1b0   :  { %3662 = vmatprep.subr.bf16.mxu0 %v8179_v0  ;;  %3748 = vmatprep.subr.bf16.mxu1 %v8181_v1  ;;  %v8229_v0 = vcombine.high %v478_v45, %v486_v46  ;;  %v493_v1 = vld [vmem:[#allocation5 + $0xca0] sm:$0xff] }
 0x1b1   :  { %v3342_v13 = vpop.f32.mrb[0].mxu0  ;;  %v3428_v18 = vpop.f32.mrb[0].mxu1 }
 0x1b2   :  { %v8866_v17 = vadd.f32 %v3342_v13, %v608_v4  ;;  %v3344_v19 = vpop.f32.mrb[1].mxu0  ;;  %v8870_v22 = vadd.f32 %v3428_v18, %v616_v7  ;;  %v3430_v24 = vpop.f32.mrb[1].mxu1  ;;  %v518_v13 = vld [vmem:[#allocation5 + $0xd68] sm:$0xff]  ;;  %v525_v18 = vld [vmem:[#allocation5 + $0xda0] sm:$0xff] }
 0x1b3   :  { %v8867_v23 = vadd.f32 %v3344_v19, %v612_v8  ;;  %v3346_v25 = vpop.f32.mrb[2].mxu0  ;;  %3663 = vmatpush1.bf16.msra.mxu0 %v8178_v9  ;;  %v8871_v28 = vadd.f32 %v3430_v24, %v620_v10  ;;  %v3432_v31 = vpop.f32.mrb[2].mxu1  ;;  %3749 = vmatpush1.bf16.msra.mxu1 %v8180_v11  ;;  %v517_v11 = vld [vmem:[#allocation5 + $0xd60] sm:$0xff] }
 0x1b4   :  { %v8868_v30 = vadd.f32 %v3346_v25, %v608_v4  ;;  %v3348_v32 = vpop.f32.mrb[3].mxu0  ;;  %3664 = vmatprep.subr.bf16.mxu0 %v8195_v12  ;;  %v8872_v34 = vadd.f32 %v3432_v31, %v616_v7  ;;  %v3434_v37 = vpop.f32.mrb[3].mxu1  ;;  %3750 = vmatprep.subr.bf16.mxu1 %v8197_v14  ;;  %v3953_v42 = vmax.f32 %v8866_v17, 0.0  ;;  %v3955_v48 = vmax.f32 %v8870_v22, 0.0  ;;  %v494_v4 = vld [vmem:[#allocation5 + $0xca8] sm:$0xff]  ;;  %v533_v19 = vld [vmem:[#allocation5 + $0xde0] sm:$0xff] }
 0x1b5   :  { %v8869_v35 = vadd.f32 %v3348_v32, %v612_v8  ;;  %v8873_v44 = vadd.f32 %v3434_v37, %v620_v10  ;;  %v3954_v49 = vmax.f32 %v8867_v23, 0.0  ;;  %v3956_v52 = vmax.f32 %v8871_v28, 0.0  ;;  %v509_v10 = vld [vmem:[#allocation5 + $0xd20] sm:$0xff]  ;;  %v510_v12 = vld [vmem:[#allocation5 + $0xd28] sm:$0xff] }
 0x1b6   :  { %v3969_v43 = vmax.f32 %v8868_v30, 0.0  ;;  %v3971_v50 = vmax.f32 %v8872_v34, 0.0  ;;  %v8228_v7 = vcombine.low %v478_v45, %v486_v46  ;;  %v8243_v8 = vcombine.high %v493_v1, %v501_v2  ;;  %v542_v28 = vld [vmem:[#allocation5 + $0xe28] sm:$0xff]  ;;  %v565_v37 = vld [vmem:[#allocation5 + $0xee0] sm:$0xff] }
 0x1b7   :  { %v3970_v51 = vmax.f32 %v8869_v35, 0.0  ;;  %3665 = vmatpush1.bf16.msra.mxu0 %v8194_v26  ;;  %v3972_v55 = vmax.f32 %v8873_v44, 0.0  ;;  %3751 = vmatpush1.bf16.msra.mxu1 %v8196_v27  ;;  %v8245_v9 = vcombine.high %v494_v4, %v502_v5  ;;  %v8242_v14 = vcombine.low %v493_v1, %v501_v2  ;;  %v541_v26 = vld [vmem:[#allocation5 + $0xe20] sm:$0xff]  ;;  %v550_v30 = vld [vmem:[#allocation5 + $0xe68] sm:$0xff] }
 0x1b8   :  { %v10070_v53 = vpack.c.bf16 %v3969_v43, %v3953_v42  ;;  %3666 = vmatprep.subr.bf16.mxu0 %v8211_v33  ;;  %v10072_v58 = vpack.c.bf16 %v3971_v50, %v3955_v48  ;;  %3752 = vmatprep.subr.bf16.mxu1 %v8213_v39  ;;  %v8244_v15 = vcombine.low %v494_v4, %v502_v5  ;;  %v549_v27 = vld [vmem:[#allocation5 + $0xe60] sm:$0xff]  ;;  %v566_v39 = vld [vmem:[#allocation5 + $0xee8] sm:$0xff] }
 0x1b9   :  { %v10074_v62 = vpack.c.bf16 %v3970_v51, %v3954_v49  ;;  %v10076_v3 = vpack.c.bf16 %v3972_v55, %v3956_v52  ;;  %v8259_v16 = vcombine.high %v509_v10, %v517_v11  ;;  %v8261_v17 = vcombine.high %v510_v12, %v518_v13  ;;  %v557_v35 = vld [vmem:[#allocation5 + $0xea0] sm:$0xff]  ;;  %v574_v45 = vld [vmem:[#allocation5 + $0xf28] sm:$0xff] }
 0x1ba   :  { %v8258_v22 = vcombine.low %v509_v10, %v517_v11  ;;  %v8260_v23 = vcombine.low %v510_v12, %v518_v13  ;;  %v8275_v24 = vcombine.high %v525_v18, %v533_v19  ;;  %v8277_v25 = vcombine.high %v526_v20, %v534_v21  ;;  %v573_v44 = vld [vmem:[#allocation5 + $0xf20] sm:$0xff]  ;;  %v582_v46 = vld [vmem:[#allocation5 + $0xf68] sm:$0xff] }
 0x1bb   :  { %3667 = vmatpush1.bf16.msra.mxu0 %v8210_v38  ;;  %3753 = vmatpush1.bf16.msra.mxu1 %v8212_v56  ;;  %v8274_v31 = vcombine.low %v525_v18, %v533_v19  ;;  %v8276_v32 = vcombine.low %v526_v20, %v534_v21  ;;  %v8291_v33 = vcombine.high %v541_v26, %v549_v27  ;;  %v558_v38 = vld [vmem:[#allocation5 + $0xea8] sm:$0xff]  ;;  %v581_v56 = vld [vmem:[#allocation5 + $0xf60] sm:$0xff] }
 0x1bc   :  { %3668 = vmatprep.subr.bf16.mxu0 %v8227_v57  ;;  %3754 = vmatprep.subr.bf16.mxu1 %v8229_v0  ;;  %v8293_v34 = vcombine.high %v542_v28, %v550_v30  ;;  %v8290_v40 = vcombine.low %v541_v26, %v549_v27  ;;  %v8292_v41 = vcombine.low %v542_v28, %v550_v30  ;;  %v589_v52 = vld [vmem:[#allocation5 + $0xfa0] sm:$0xff]  ;;  %v590_v57 = vld [vmem:[#allocation5 + $0xfa8] sm:$0xff]  ;;  %v136_v26 = vld [vmem:[#allocation5 + $0x178] sm:$0xff] }
 0x1bd   :  { %v8307_v42 = vcombine.high %v557_v35, %v565_v37  ;;  %v8309_v43 = vcombine.high %v558_v38, %v566_v39  ;;  %v8306_v48 = vcombine.low %v557_v35, %v565_v37  ;;  %v8308_v49 = vcombine.low %v558_v38, %v566_v39  ;;  %v597_v55 = vld [vmem:[#allocation5 + $0xfe0] sm:$0xff]  ;;  %v598_v0 = vld [vmem:[#allocation5 + $0xfe8] sm:$0xff]  ;;  %v144_v35 = vld [vmem:[#allocation5 + $0x1b8] sm:$0xff] }
 0x1be   :  { %v8323_v50 = vcombine.high %v573_v44, %v581_v56  ;;  %v8325_v51 = vcombine.high %v574_v45, %v582_v46  ;;  %v8322_v1 = vcombine.low %v573_v44, %v581_v56  ;;  %v8324_v2 = vcombine.low %v574_v45, %v582_v46  ;;  %v152_v37 = vld [vmem:[#allocation5 + $0x1f8] sm:$0xff] }
 0x1bf   :  { %3669 = vmatpush1.bf16.msra.mxu0 %v8226_v6  ;;  %3755 = vmatpush1.bf16.msra.mxu1 %v8228_v7  ;;  %v8339_v4 = vcombine.high %v589_v52, %v597_v55  ;;  %v8341_v5 = vcombine.high %v590_v57, %v598_v0  ;;  %v95_v6 = vld [vmem:[#allocation5 + $0x30] sm:$0xff]  ;;  %v8338_v10 = vcombine.low %v589_v52, %v597_v55  ;;  %v160_v44 = vld [vmem:[#allocation5 + $0x238] sm:$0xff] }
 0x1c0   :  { %3670 = vmatprep.subr.bf16.mxu0 %v8243_v8  ;;  %3756 = vmatprep.subr.bf16.mxu1 %v8245_v9  ;;  %v103_v7 = vld [vmem:[#allocation5 + $0x70] sm:$0xff]  ;;  %v96_v8 = vld [vmem:[#allocation5 + $0x38] sm:$0xff]  ;;  %v8340_v11 = vcombine.low %v590_v57, %v598_v0  ;;  %v7896_v46 = vcombine.low %v144_v35, %v152_v37 }
 0x1c1   :  { %v104_v9 = vld [vmem:[#allocation5 + $0x78] sm:$0xff]  ;;  %v7847_v12 = vcombine.high %v95_v6, %v103_v7  ;;  %v7846_v18 = vcombine.low %v95_v6, %v103_v7 }
 0x1c2   :  { %v7849_v13 = vcombine.high %v96_v8, %v104_v9  ;;  %v7848_v19 = vcombine.low %v96_v8, %v104_v9  ;;  %v168_v56 = vld [vmem:[#allocation5 + $0x278] sm:$0xff] }
 0x1c3   :  { %3671 = vmatpush1.bf16.msra.mxu0 %v8242_v14  ;;  %3757 = vmatpush1.bf16.msra.mxu1 %v8244_v15  ;;  %v111_v14 = vld [vmem:[#allocation5 + $0xb0] sm:$0xff]  ;;  %v176_v52 = vld [vmem:[#allocation5 + $0x2b8] sm:$0xff]  ;;  %v7912_v0 = vcombine.low %v160_v44, %v168_v56 }
 0x1c4   :  { %3672 = vmatprep.subr.bf16.mxu0 %v8259_v16  ;;  %3758 = vmatprep.subr.bf16.mxu1 %v8261_v17  ;;  %v119_v15 = vld [vmem:[#allocation5 + $0xf0] sm:$0xff]  ;;  %v112_v16 = vld [vmem:[#allocation5 + $0xb8] sm:$0xff] }
 0x1c5   :  { %v120_v17 = vld [vmem:[#allocation5 + $0xf8] sm:$0xff]  ;;  %v7863_v20 = vcombine.high %v111_v14, %v119_v15  ;;  %v7862_v27 = vcombine.low %v111_v14, %v119_v15 }
 0x1c6   :  { %v7865_v21 = vcombine.high %v112_v16, %v120_v17  ;;  %v7864_v28 = vcombine.low %v112_v16, %v120_v17  ;;  %v184_v55 = vld [vmem:[#allocation5 + $0x2f8] sm:$0xff] }
 0x1c7   :  { %3673 = vmatpush1.bf16.msra.mxu0 %v8258_v22  ;;  %3759 = vmatpush1.bf16.msra.mxu1 %v8260_v23  ;;  %v127_v22 = vld [vmem:[#allocation5 + $0x130] sm:$0xff]  ;;  %v192_v6 = vld [vmem:[#allocation5 + $0x338] sm:$0xff]  ;;  %v7928_v9 = vcombine.low %v176_v52, %v184_v55 }
 0x1c8   :  { %3674 = vmatprep.subr.bf16.mxu0 %v8275_v24  ;;  %3760 = vmatprep.subr.bf16.mxu1 %v8277_v25  ;;  %v135_v23 = vld [vmem:[#allocation5 + $0x170] sm:$0xff]  ;;  %v10078_v24 = vld [vmem:[#allocation2 + $0x8] ss:$16 sps:$4 sm:$0xff]  }
 0x1c9   :  { %v128_v25 = vld [vmem:[#allocation5 + $0x138] sm:$0xff]  ;;  %v7879_v30 = vcombine.high %v127_v22, %v135_v23  ;;  %v7878_v38 = vcombine.low %v127_v22, %v135_v23 }
 0x1ca   :  { %v7880_v39 = vcombine.low %v128_v25, %v136_v26  ;;  %v200_v7 = vld [vmem:[#allocation5 + $0x378] sm:$0xff] }
 0x1cb   :  { %3675 = vmatpush1.bf16.msra.mxu0 %v8274_v31  ;;  %3761 = vmatpush1.bf16.msra.mxu1 %v8276_v32  ;;  %v7881_v31 = vcombine.high %v128_v25, %v136_v26  ;;  %v143_v32 = vld [vmem:[#allocation5 + $0x1b0] sm:$0xff]  ;;  %v208_v14 = vld [vmem:[#allocation5 + $0x3b8] sm:$0xff]  ;;  %v7944_v17 = vcombine.low %v192_v6, %v200_v7 }
 0x1cc   :  { %3676 = vmatprep.subr.bf16.mxu0 %v8291_v33  ;;  %3762 = vmatprep.subr.bf16.mxu1 %v8293_v34  ;;  %v151_v33 = vld [vmem:[#allocation5 + $0x1f0] sm:$0xff]  ;;  %v216_v15 = vld [vmem:[#allocation5 + $0x3f8] sm:$0xff] }
 0x1cd   :  { %v9785_v34 = vld [vmem:[#allocation2 + $0x4] ss:$16 sps:$4 sm:$0xff]   ;;  %v7894_v45 = vcombine.low %v143_v32, %v151_v33  ;;  %v224_v22 = vld [vmem:[#allocation5 + $0x438] sm:$0xff]  ;;  %v7960_v26 = vcombine.low %v208_v14, %v216_v15 }
 0x1ce   :  { %v232_v23 = vld [vmem:[#allocation5 + $0x478] sm:$0xff] }
 0x1cf   :  { %3677 = vmatpush1.bf16.msra.mxu0 %v8290_v40  ;;  %3763 = vmatpush1.bf16.msra.mxu1 %v8292_v41  ;;  %v7895_v40 = vcombine.high %v143_v32, %v151_v33  ;;  %v7897_v41 = vcombine.high %v144_v35, %v152_v37  ;;  %v240_v32 = vld [vmem:[#allocation5 + $0x4b8] sm:$0xff]  ;;  %v7976_v35 = vcombine.low %v224_v22, %v232_v23 }
 0x1d0   :  { %3678 = vmatprep.subr.bf16.mxu0 %v8307_v42  ;;  %3764 = vmatprep.subr.bf16.mxu1 %v8309_v43  ;;  %v159_v42 = vld [vmem:[#allocation5 + $0x230] sm:$0xff]  ;;  %v248_v33 = vld [vmem:[#allocation5 + $0x4f8] sm:$0xff] }
 0x1d1   :  { %v167_v43 = vld [vmem:[#allocation5 + $0x270] sm:$0xff] }
 0x1d2   :  { %v7910_v57 = vcombine.low %v159_v42, %v167_v43 }
 0x1d3   :  { %3679 = vmatpush1.bf16.msra.mxu0 %v8306_v48  ;;  %3765 = vmatpush1.bf16.msra.mxu1 %v8308_v49  ;;  %v7911_v48 = vcombine.high %v159_v42, %v167_v43  ;;  %v7913_v49 = vcombine.high %v160_v44, %v168_v56  ;;  %v264_v42 = vld [vmem:[#allocation5 + $0x578] sm:$0xff]  ;;  %v7992_v44 = vcombine.low %v240_v32, %v248_v33 }
 0x1d4   :  { %3680 = vmatprep.subr.bf16.mxu0 %v8323_v50  ;;  %3766 = vmatprep.subr.bf16.mxu1 %v8325_v51  ;;  %v175_v50 = vld [vmem:[#allocation5 + $0x2b0] sm:$0xff] }
 0x1d5   :  { %v183_v51 = vld [vmem:[#allocation5 + $0x2f0] sm:$0xff] }
 0x1d6   :  { %v7926_v8 = vcombine.low %v175_v50, %v183_v51 }
 0x1d7   :  { %3681 = vmatpush1.bf16.msra.mxu0 %v8322_v1  ;;  %3767 = vmatpush1.bf16.msra.mxu1 %v8324_v2  ;;  %v7927_v1 = vcombine.high %v175_v50, %v183_v51  ;;  %v7929_v2 = vcombine.high %v176_v52, %v184_v55  ;;  %v280_v50 = vld [vmem:[#allocation5 + $0x5f8] sm:$0xff] }
 0x1d8   :  { %3682 = vmatprep.subr.bf16.mxu0 %v8339_v4  ;;  %3768 = vmatprep.subr.bf16.mxu1 %v8341_v5  ;;  %v191_v4 = vld [vmem:[#allocation5 + $0x330] sm:$0xff] }
 0x1d9   :  { %v199_v5 = vld [vmem:[#allocation5 + $0x370] sm:$0xff] }
 0x1da   :  { %v7942_v16 = vcombine.low %v191_v4, %v199_v5 }
 0x1db   :  { %3683 = vmatpush1.bf16.msra.mxu0 %v8338_v10  ;;  %3769 = vmatpush1.bf16.msra.mxu1 %v8340_v11  ;;  %v7943_v10 = vcombine.high %v191_v4, %v199_v5  ;;  %v7945_v11 = vcombine.high %v192_v6, %v200_v7  ;;  %v296_v4 = vld [vmem:[#allocation5 + $0x678] sm:$0xff] }
 0x1dc   :  { %3781 = vmatprep.subr.bf16.mxu0 %v7847_v12  ;;  %3867 = vmatprep.subr.bf16.mxu1 %v7849_v13  ;;  %v207_v12 = vld [vmem:[#allocation5 + $0x3b0] sm:$0xff] }
 0x1dd   :  { %v215_v13 = vld [vmem:[#allocation5 + $0x3f0] sm:$0xff] }
 0x1de   :  { %3685 = vmatmul.mubr.bf16.vlgmr.msra.gmra.mrb[8].mxu0 %v10078_v24  ;;  %3771 = vmatmul.mubr.bf16.vlgmr.msra.gmra.mrb[8].mxu1 %v10078_v24  ;;  %v7958_v25 = vcombine.low %v207_v12, %v215_v13 }
 0x1df   :  { %3782 = vmatpush1.bf16.msra.mxu0 %v7846_v18  ;;  %3868 = vmatpush1.bf16.msra.mxu1 %v7848_v19  ;;  %v7959_v18 = vcombine.high %v207_v12, %v215_v13  ;;  %v7961_v19 = vcombine.high %v208_v14, %v216_v15  ;;  %v312_v12 = vld [vmem:[#allocation5 + $0x6f8] sm:$0xff] }
 0x1e0   :  { %3783 = vmatprep.subr.bf16.mxu0 %v7863_v20  ;;  %3869 = vmatprep.subr.bf16.mxu1 %v7865_v21  ;;  %v223_v20 = vld [vmem:[#allocation5 + $0x430] sm:$0xff] }
 0x1e1   :  { %3813 = vmatprep.mubr.bf16.mxu0 %v9785_v34  ;;  %3899 = vmatprep.mubr.bf16.mxu1 %v9785_v34  ;;  %v231_v21 = vld [vmem:[#allocation5 + $0x470] sm:$0xff] }
 0x1e2   :  { %v7974_v34 = vcombine.low %v223_v20, %v231_v21 }
 0x1e3   :  { %3784 = vmatpush1.bf16.msra.mxu0 %v7862_v27  ;;  %3870 = vmatpush1.bf16.msra.mxu1 %v7864_v28  ;;  %v7975_v27 = vcombine.high %v223_v20, %v231_v21  ;;  %v7977_v28 = vcombine.high %v224_v22, %v232_v23  ;;  %v328_v20 = vld [vmem:[#allocation5 + $0x778] sm:$0xff] }
 0x1e4   :  { %3785 = vmatprep.subr.bf16.mxu0 %v7879_v30  ;;  %3871 = vmatprep.subr.bf16.mxu1 %v7881_v31  ;;  %v239_v30 = vld [vmem:[#allocation5 + $0x4b0] sm:$0xff] }
 0x1e5   :  { %v247_v31 = vld [vmem:[#allocation5 + $0x4f0] sm:$0xff] }
 0x1e6   :  { %v7991_v37 = vcombine.high %v239_v30, %v247_v31  ;;  %v7990_v43 = vcombine.low %v239_v30, %v247_v31  ;;  %v344_v30 = vld [vmem:[#allocation5 + $0x7f8] sm:$0xff] }
 0x1e7   :  { %3786 = vmatpush1.bf16.msra.mxu0 %v7878_v38  ;;  %3872 = vmatpush1.bf16.msra.mxu1 %v7880_v39  ;;  %v7993_v38 = vcombine.high %v240_v32, %v248_v33  ;;  %v255_v39 = vld [vmem:[#allocation5 + $0x530] sm:$0xff] }
 0x1e8   :  { %3787 = vmatprep.subr.bf16.mxu0 %v7895_v40  ;;  %3873 = vmatprep.subr.bf16.mxu1 %v7897_v41  ;;  %v263_v40 = vld [vmem:[#allocation5 + $0x570] sm:$0xff]  ;;  %v256_v41 = vld [vmem:[#allocation5 + $0x538] sm:$0xff] }
 0x1e9   :  { %v8007_v56 = vcombine.high %v255_v39, %v263_v40  ;;  %v8006_v51 = vcombine.low %v255_v39, %v263_v40  ;;  %v8008_v52 = vcombine.low %v256_v41, %v264_v42  ;;  %v360_v39 = vld [vmem:[#allocation5 + $0x878] sm:$0xff] }
 0x1eb   :  { %3788 = vmatpush1.bf16.msra.mxu0 %v7894_v45  ;;  %3874 = vmatpush1.bf16.msra.mxu1 %v7896_v46  ;;  %v8009_v45 = vcombine.high %v256_v41, %v264_v42  ;;  %v271_v46 = vld [vmem:[#allocation5 + $0x5b0] sm:$0xff] }
 0x1ec   :  { %3789 = vmatprep.subr.bf16.mxu0 %v7911_v48  ;;  %3875 = vmatprep.subr.bf16.mxu1 %v7913_v49  ;;  %v279_v48 = vld [vmem:[#allocation5 + $0x5f0] sm:$0xff]  ;;  %v272_v49 = vld [vmem:[#allocation5 + $0x5b8] sm:$0xff] }
 0x1ed   :  { %v8023_v55 = vcombine.high %v271_v46, %v279_v48  ;;  %v8022_v5 = vcombine.low %v271_v46, %v279_v48  ;;  %v8024_v6 = vcombine.low %v272_v49, %v280_v50  ;;  %v376_v46 = vld [vmem:[#allocation5 + $0x8f8] sm:$0xff] }
 0x1ef   :  { %3790 = vmatpush1.bf16.msra.mxu0 %v7910_v57  ;;  %3876 = vmatpush1.bf16.msra.mxu1 %v7912_v0  ;;  %v8025_v57 = vcombine.high %v272_v49, %v280_v50  ;;  %v287_v0 = vld [vmem:[#allocation5 + $0x630] sm:$0xff] }
 0x1f0   :  { %3791 = vmatprep.subr.bf16.mxu0 %v7927_v1  ;;  %3877 = vmatprep.subr.bf16.mxu1 %v7929_v2  ;;  %v295_v1 = vld [vmem:[#allocation5 + $0x670] sm:$0xff]  ;;  %v288_v2 = vld [vmem:[#allocation5 + $0x638] sm:$0xff] }
 0x1f1   :  { %v8039_v7 = vcombine.high %v287_v0, %v295_v1  ;;  %v8038_v13 = vcombine.low %v287_v0, %v295_v1  ;;  %v8040_v14 = vcombine.low %v288_v2, %v296_v4  ;;  %v392_v0 = vld [vmem:[#allocation5 + $0x978] sm:$0xff] }
 0x1f3   :  { %3792 = vmatpush1.bf16.msra.mxu0 %v7926_v8  ;;  %3878 = vmatpush1.bf16.msra.mxu1 %v7928_v9  ;;  %v8041_v8 = vcombine.high %v288_v2, %v296_v4  ;;  %v303_v9 = vld [vmem:[#allocation5 + $0x6b0] sm:$0xff] }
 0x1f4   :  { %3793 = vmatprep.subr.bf16.mxu0 %v7943_v10  ;;  %3879 = vmatprep.subr.bf16.mxu1 %v7945_v11  ;;  %v311_v10 = vld [vmem:[#allocation5 + $0x6f0] sm:$0xff]  ;;  %v304_v11 = vld [vmem:[#allocation5 + $0x6b8] sm:$0xff] }
 0x1f5   :  { %v8055_v15 = vcombine.high %v303_v9, %v311_v10  ;;  %v8054_v21 = vcombine.low %v303_v9, %v311_v10  ;;  %v8056_v22 = vcombine.low %v304_v11, %v312_v12  ;;  %v408_v9 = vld [vmem:[#allocation5 + $0x9f8] sm:$0xff] }
 0x1f7   :  { %3794 = vmatpush1.bf16.msra.mxu0 %v7942_v16  ;;  %3880 = vmatpush1.bf16.msra.mxu1 %v7944_v17  ;;  %v8057_v16 = vcombine.high %v304_v11, %v312_v12  ;;  %v319_v17 = vld [vmem:[#allocation5 + $0x730] sm:$0xff] }
 0x1f8   :  { %3795 = vmatprep.subr.bf16.mxu0 %v7959_v18  ;;  %3881 = vmatprep.subr.bf16.mxu1 %v7961_v19  ;;  %v327_v18 = vld [vmem:[#allocation5 + $0x770] sm:$0xff]  ;;  %v320_v19 = vld [vmem:[#allocation5 + $0x738] sm:$0xff] }
 0x1f9   :  { %v8071_v23 = vcombine.high %v319_v17, %v327_v18  ;;  %v8070_v31 = vcombine.low %v319_v17, %v327_v18  ;;  %v8072_v32 = vcombine.low %v320_v19, %v328_v20 }
 0x1fb   :  { %3796 = vmatpush1.bf16.msra.mxu0 %v7958_v25  ;;  %3882 = vmatpush1.bf16.msra.mxu1 %v7960_v26  ;;  %v8073_v25 = vcombine.high %v320_v19, %v328_v20  ;;  %v335_v26 = vld [vmem:[#allocation5 + $0x7b0] sm:$0xff] }
 0x1fc   :  { %3797 = vmatprep.subr.bf16.mxu0 %v7975_v27  ;;  %3883 = vmatprep.subr.bf16.mxu1 %v7977_v28  ;;  %v343_v27 = vld [vmem:[#allocation5 + $0x7f0] sm:$0xff]  ;;  %v336_v28 = vld [vmem:[#allocation5 + $0x7b8] sm:$0xff] }
 0x1fd   :  { %v8087_v33 = vcombine.high %v335_v26, %v343_v27  ;;  %v8086_v40 = vcombine.low %v335_v26, %v343_v27  ;;  %v8088_v41 = vcombine.low %v336_v28, %v344_v30  ;;  %v431_v20 = vld [vmem:[#allocation5 + $0xab0] sm:$0xff]  ;;  %v631_v27 = vsub.s32 6, %v10046_v47 }
 0x1ff   :  { %3798 = vmatpush1.bf16.msra.mxu0 %v7974_v34  ;;  %3884 = vmatpush1.bf16.msra.mxu1 %v7976_v35  ;;  %v8089_v34 = vcombine.high %v336_v28, %v344_v30  ;;  %v351_v35 = vld [vmem:[#allocation5 + $0x830] sm:$0xff]  ;;  %v627_v28 = vsub.s32 5, %v10046_v47 }
 0x200   :  { %3799 = vmatprep.subr.bf16.mxu0 %v7991_v37  ;;  %3885 = vmatprep.subr.bf16.mxu1 %v7993_v38  ;;  %v359_v37 = vld [vmem:[#allocation5 + $0x870] sm:$0xff]  ;;  %v352_v38 = vld [vmem:[#allocation5 + $0x838] sm:$0xff] }
 0x201   :  { %v8103_v42 = vcombine.high %v351_v35, %v359_v37  ;;  %v8102_v48 = vcombine.low %v351_v35, %v359_v37  ;;  %v8104_v49 = vcombine.low %v352_v38, %v360_v39  ;;  %v455_v35 = vld [vmem:[#allocation5 + $0xb70] sm:$0xff] }
 0x203   :  { %3800 = vmatpush1.bf16.msra.mxu0 %v7990_v43  ;;  %3886 = vmatpush1.bf16.msra.mxu1 %v7992_v44  ;;  %v8105_v43 = vcombine.high %v352_v38, %v360_v39  ;;  %v367_v44 = vld [vmem:[#allocation5 + $0x8b0] sm:$0xff]  ;;  %v448_v38 = vld [vmem:[#allocation5 + $0xb38] sm:$0xff] }
 0x204   :  { %3801 = vmatprep.subr.bf16.mxu0 %v8007_v56  ;;  %3887 = vmatprep.subr.bf16.mxu1 %v8009_v45  ;;  %v375_v56 = vld [vmem:[#allocation5 + $0x8f0] sm:$0xff]  ;;  %v368_v45 = vld [vmem:[#allocation5 + $0x8b8] sm:$0xff] }
 0x205   :  { %v8119_v50 = vcombine.high %v367_v44, %v375_v56  ;;  %v8118_v1 = vcombine.low %v367_v44, %v375_v56  ;;  %v8120_v2 = vcombine.low %v368_v45, %v376_v46  ;;  %v456_v39 = vld [vmem:[#allocation5 + $0xb78] sm:$0xff] }
 0x207   :  { %3802 = vmatpush1.bf16.msra.mxu0 %v8006_v51  ;;  %3888 = vmatpush1.bf16.msra.mxu1 %v8008_v52  ;;  %v8121_v51 = vcombine.high %v368_v45, %v376_v46  ;;  %v383_v52 = vld [vmem:[#allocation5 + $0x930] sm:$0xff]  ;;  %v8201_v46 = vcombine.high %v448_v38, %v456_v39 }
 0x208   :  { %3803 = vmatprep.subr.bf16.mxu0 %v8023_v55  ;;  %3889 = vmatprep.subr.bf16.mxu1 %v8025_v57  ;;  %v391_v55 = vld [vmem:[#allocation5 + $0x970] sm:$0xff]  ;;  %v384_v57 = vld [vmem:[#allocation5 + $0x938] sm:$0xff] }
 0x209   :  { %v8135_v4 = vcombine.high %v383_v52, %v391_v55  ;;  %v8134_v10 = vcombine.low %v383_v52, %v391_v55  ;;  %v464_v55 = vld [vmem:[#allocation5 + $0xbb8] sm:$0xff] }
 0x20b   :  { %3804 = vmatpush1.bf16.msra.mxu0 %v8022_v5  ;;  %3890 = vmatpush1.bf16.msra.mxu1 %v8024_v6  ;;  %v8137_v5 = vcombine.high %v384_v57, %v392_v0  ;;  %v399_v6 = vld [vmem:[#allocation5 + $0x9b0] sm:$0xff] }
 0x20c   :  { %3805 = vmatprep.subr.bf16.mxu0 %v8039_v7  ;;  %3891 = vmatprep.subr.bf16.mxu1 %v8041_v8  ;;  %v407_v7 = vld [vmem:[#allocation5 + $0x9f0] sm:$0xff]  ;;  %v400_v8 = vld [vmem:[#allocation5 + $0x9b8] sm:$0xff] }
 0x20d   :  { %v8151_v11 = vcombine.high %v399_v6, %v407_v7  ;;  %v8153_v12 = vcombine.high %v400_v8, %v408_v9  ;;  %v8150_v17 = vcombine.low %v399_v6, %v407_v7  ;;  %v8152_v18 = vcombine.low %v400_v8, %v408_v9 }
 0x20f   :  { %3806 = vmatpush1.bf16.msra.mxu0 %v8038_v13  ;;  %3892 = vmatpush1.bf16.msra.mxu1 %v8040_v14  ;;  %v415_v13 = vld [vmem:[#allocation5 + $0xa30] sm:$0xff] }
 0x210   :  { %3807 = vmatprep.subr.bf16.mxu0 %v8055_v15  ;;  %3893 = vmatprep.subr.bf16.mxu1 %v8057_v16  ;;  %v423_v14 = vld [vmem:[#allocation5 + $0xa70] sm:$0xff]  ;;  %v416_v15 = vld [vmem:[#allocation5 + $0xa38] sm:$0xff] }
 0x211   :  { %v424_v16 = vld [vmem:[#allocation5 + $0xa78] sm:$0xff]  ;;  %v8167_v19 = vcombine.high %v415_v13, %v423_v14  ;;  %v8166_v26 = vcombine.low %v415_v13, %v423_v14 }
 0x212   :  { %v8168_v30 = vcombine.low %v416_v15, %v424_v16 }
 0x213   :  { %3808 = vmatpush1.bf16.msra.mxu0 %v8054_v21  ;;  %3894 = vmatpush1.bf16.msra.mxu1 %v8056_v22  ;;  %v439_v21 = vld [vmem:[#allocation5 + $0xaf0] sm:$0xff]  ;;  %v623_v22 = vsub.s32 4, %v10046_v47 }
 0x214   :  { %3809 = vmatprep.subr.bf16.mxu0 %v8071_v23  ;;  %3895 = vmatprep.subr.bf16.mxu1 %v8073_v25  ;;  %v432_v23 = vld [vmem:[#allocation5 + $0xab8] sm:$0xff] }
 0x215   :  { %v440_v25 = vld [vmem:[#allocation5 + $0xaf8] sm:$0xff]  ;;  %v624_v37 = vrot.slane %v10051_v59, %v623_v22 }
 0x216   :  { %v8184_v44 = vcombine.low %v432_v23, %v440_v25 }
 0x217   :  { %3810 = vmatpush1.bf16.msra.mxu0 %v8070_v31  ;;  %3896 = vmatpush1.bf16.msra.mxu1 %v8072_v32  ;;  %v635_v31 = vsub.s32 7, %v10046_v47  ;;  %v8183_v32 = vcombine.high %v431_v20, %v439_v21 }
 0x218   :  { %3811 = vmatprep.subr.bf16.mxu0 %v8087_v33  ;;  %3897 = vmatprep.subr.bf16.mxu1 %v8089_v34  ;;  %v8185_v33 = vcombine.high %v432_v23, %v440_v25  ;;  %v447_v34 = vld [vmem:[#allocation5 + $0xb30] sm:$0xff] }
 0x219   :  { %v8199_v56 = vcombine.high %v447_v34, %v455_v35 }
 0x21b   :  { %3812 = vmatpush1.bf16.msra.mxu0 %v8086_v40  ;;  %3898 = vmatpush1.bf16.msra.mxu1 %v8088_v41  ;;  %v632_v40 = vrot.slane %v10051_v59, %v631_v27  ;;  %v628_v41 = vrot.slane %v10051_v59, %v627_v28 }
 0x21c   :  { %3824 = vmatprep.subr.bf16.mxu0 %v8103_v42  ;;  %3910 = vmatprep.subr.bf16.mxu1 %v8105_v43  ;;  %v8182_v42 = vcombine.low %v431_v20, %v439_v21  ;;  %v636_v43 = vrot.slane %v10051_v59, %v635_v31  ;;  %v8200_v59 = vcombine.low %v448_v38, %v456_v39  ;;  %v480_v20 = vld [vmem:[#allocation5 + $0xc38] sm:$0xff] }
 0x21d   :  { %v488_v21 = vld [vmem:[#allocation5 + $0xc78] sm:$0xff] }
 0x21e   :  { %3814 = vmatmul.mubr.bf16.vlgmr.msra.gmra.mrb[12].mxu0 %v10038_v29  ;;  %3900 = vmatmul.mubr.bf16.vlgmr.msra.gmra.mrb[12].mxu1 %v10038_v29  ;;  %v8136_v29 = vcombine.low %v384_v57, %v392_v0  ;;  %v472_v57 = vld [vmem:[#allocation5 + $0xbf8] sm:$0xff]  ;;  %v8233_v39 = vcombine.high %v480_v20, %v488_v21 }
 0x21f   :  { %3825 = vmatpush1.bf16.msra.mxu0 %v8102_v48  ;;  %3911 = vmatpush1.bf16.msra.mxu1 %v8104_v49  ;;  %v463_v48 = vld [vmem:[#allocation5 + $0xbb0] sm:$0xff]  ;;  %v8217_v14 = vcombine.high %v464_v55, %v472_v57 }
 0x220   :  { %3826 = vmatprep.subr.bf16.mxu0 %v8119_v50  ;;  %3912 = vmatprep.subr.bf16.mxu1 %v8121_v51  ;;  %v471_v49 = vld [vmem:[#allocation5 + $0xbf0] sm:$0xff] }
 0x221   :  { %3856 = vmatprep.mubr.bf16.mxu0 %v10042_v36  ;;  %3942 = vmatprep.mubr.bf16.mxu1 %v10042_v36  ;;  %v8169_v36 = vcombine.high %v416_v15, %v424_v16  ;;  %v8214_v13 = vcombine.low %v463_v48, %v471_v49  ;;  %v479_v15 = vld [vmem:[#allocation5 + $0xc30] sm:$0xff] }
 0x222   :  { %v487_v16 = vld [vmem:[#allocation5 + $0xc70] sm:$0xff] }
 0x223   :  { %3827 = vmatpush1.bf16.msra.mxu0 %v8118_v1  ;;  %3913 = vmatpush1.bf16.msra.mxu1 %v8120_v2 }
 0x224   :  { %3828 = vmatprep.subr.bf16.mxu0 %v8135_v4  ;;  %3914 = vmatprep.subr.bf16.mxu1 %v8137_v5  ;;  %v8198_v5 = vcombine.low %v447_v34, %v455_v35  ;;  %v8231_v35 = vcombine.high %v479_v15, %v487_v16 }
 0x227   :  { %3829 = vmatpush1.bf16.msra.mxu0 %v8134_v10  ;;  %3915 = vmatpush1.bf16.msra.mxu1 %v8136_v29  ;;  %v8215_v10 = vcombine.high %v463_v48, %v471_v49  ;;  %v511_v49 = vld [vmem:[#allocation5 + $0xd30] sm:$0xff] }
 0x228   :  { %3830 = vmatprep.subr.bf16.mxu0 %v8151_v11  ;;  %3916 = vmatprep.subr.bf16.mxu1 %v8153_v12 }
 0x22b   :  { %3831 = vmatpush1.bf16.msra.mxu0 %v8150_v17  ;;  %3917 = vmatpush1.bf16.msra.mxu1 %v8152_v18 }
 0x22c   :  { %3832 = vmatprep.subr.bf16.mxu0 %v8167_v19  ;;  %3918 = vmatprep.subr.bf16.mxu1 %v8169_v36  ;;  %v8216_v36 = vcombine.low %v464_v55, %v472_v57 }
 0x22f   :  { %3833 = vmatpush1.bf16.msra.mxu0 %v8166_v26  ;;  %3919 = vmatpush1.bf16.msra.mxu1 %v8168_v30 }
 0x230   :  { %3834 = vmatprep.subr.bf16.mxu0 %v8183_v32  ;;  %3920 = vmatprep.subr.bf16.mxu1 %v8185_v33 }
 0x231   :  { %v3514_v45 = vpop.f32.mrb[4].mxu0  ;;  %v3600_v51 = vpop.f32.mrb[4].mxu1 }
 0x232   :  { %v8874_v50 = vadd.f32 %v3514_v45, %v624_v37  ;;  %v3516_v52 = vpop.f32.mrb[5].mxu0  ;;  %v8878_v0 = vadd.f32 %v3600_v51, %v632_v40  ;;  %v3602_v2 = vpop.f32.mrb[5].mxu1  ;;  %v8232_v45 = vcombine.low %v480_v20, %v488_v21  ;;  %v512_v51 = vld [vmem:[#allocation5 + $0xd38] sm:$0xff] }
 0x233   :  { %v8875_v1 = vadd.f32 %v3516_v52, %v628_v41  ;;  %v3518_v4 = vpop.f32.mrb[6].mxu0  ;;  %3835 = vmatpush1.bf16.msra.mxu0 %v8182_v42  ;;  %v8879_v6 = vadd.f32 %v3602_v2, %v636_v43  ;;  %v3604_v8 = vpop.f32.mrb[6].mxu1  ;;  %3921 = vmatpush1.bf16.msra.mxu1 %v8184_v44  ;;  %v504_v44 = vld [vmem:[#allocation5 + $0xcf8] sm:$0xff]  ;;  %v527_v2 = vld [vmem:[#allocation5 + $0xdb0] sm:$0xff] }
 0x234   :  { %v8876_v7 = vadd.f32 %v3518_v4, %v624_v37  ;;  %v3520_v9 = vpop.f32.mrb[7].mxu0  ;;  %3836 = vmatprep.subr.bf16.mxu0 %v8199_v56  ;;  %v8880_v29 = vadd.f32 %v3604_v8, %v632_v40  ;;  %v3606_v12 = vpop.f32.mrb[7].mxu1  ;;  %3922 = vmatprep.subr.bf16.mxu1 %v8201_v46  ;;  %v3957_v17 = vmax.f32 %v8874_v50, 0.0  ;;  %v3959_v23 = vmax.f32 %v8878_v0, 0.0  ;;  %v495_v40 = vld [vmem:[#allocation5 + $0xcb0] sm:$0xff]  ;;  %v520_v52 = vld [vmem:[#allocation5 + $0xd78] sm:$0xff] }
 0x235   :  { %v8877_v11 = vadd.f32 %v3520_v9, %v628_v41  ;;  %v8881_v19 = vadd.f32 %v3606_v12, %v636_v43  ;;  %v3958_v25 = vmax.f32 %v8875_v1, 0.0  ;;  %v3960_v32 = vmax.f32 %v8879_v6, 0.0  ;;  %v503_v41 = vld [vmem:[#allocation5 + $0xcf0] sm:$0xff]  ;;  %v496_v43 = vld [vmem:[#allocation5 + $0xcb8] sm:$0xff] }
 0x236   :  { %v3973_v18 = vmax.f32 %v8876_v7, 0.0  ;;  %v3975_v26 = vmax.f32 %v8880_v29, 0.0  ;;  %v8230_v56 = vcombine.low %v479_v15, %v487_v16  ;;  %v8247_v46 = vcombine.high %v495_v40, %v503_v41  ;;  %v519_v50 = vld [vmem:[#allocation5 + $0xd70] sm:$0xff]  ;;  %v552_v12 = vld [vmem:[#allocation5 + $0xe78] sm:$0xff] }
 0x237   :  { %v3974_v30 = vmax.f32 %v8877_v11, 0.0  ;;  %3837 = vmatpush1.bf16.msra.mxu0 %v8198_v5  ;;  %v3976_v34 = vmax.f32 %v8881_v19, 0.0  ;;  %3923 = vmatpush1.bf16.msra.mxu1 %v8200_v59  ;;  %v8249_v48 = vcombine.high %v496_v43, %v504_v44  ;;  %v8246_v55 = vcombine.low %v495_v40, %v503_v41  ;;  %v535_v4 = vld [vmem:[#allocation5 + $0xdf0] sm:$0xff]  ;;  %v528_v5 = vld [vmem:[#allocation5 + $0xdb8] sm:$0xff] }
 0x238   :  { %v10102_v33 = vpack.c.bf16 %v3973_v18, %v3957_v17  ;;  %3838 = vmatprep.subr.bf16.mxu0 %v8215_v10  ;;  %v10104_v37 = vpack.c.bf16 %v3975_v26, %v3959_v23  ;;  %3924 = vmatprep.subr.bf16.mxu1 %v8217_v14  ;;  %v8248_v57 = vcombine.low %v496_v43, %v504_v44  ;;  %v536_v59 = vld [vmem:[#allocation5 + $0xdf8] sm:$0xff]  ;;  %v543_v10 = vld [vmem:[#allocation5 + $0xe30] sm:$0xff] }
 0x239   :  { %v10106_v38 = vpack.c.bf16 %v3974_v30, %v3958_v25  ;;  %v10108_v42 = vpack.c.bf16 %v3976_v34, %v3960_v32  ;;  %v8263_v0 = vcombine.high %v511_v49, %v519_v50  ;;  %v8265_v1 = vcombine.high %v512_v51, %v520_v52  ;;  %v551_v29 = vld [vmem:[#allocation5 + $0xe70] sm:$0xff]  ;;  %v544_v11 = vld [vmem:[#allocation5 + $0xe38] sm:$0xff] }
 0x23a   :  { %v8262_v6 = vcombine.low %v511_v49, %v519_v50  ;;  %v8264_v7 = vcombine.low %v512_v51, %v520_v52  ;;  %v8279_v8 = vcombine.high %v527_v2, %v535_v4  ;;  %v8281_v9 = vcombine.high %v528_v5, %v536_v59  ;;  %v559_v17 = vld [vmem:[#allocation5 + $0xeb0] sm:$0xff]  ;;  %v560_v19 = vld [vmem:[#allocation5 + $0xeb8] sm:$0xff] }
 0x23b   :  { %3839 = vmatpush1.bf16.msra.mxu0 %v8214_v13  ;;  %3925 = vmatpush1.bf16.msra.mxu1 %v8216_v36  ;;  %v8278_v13 = vcombine.low %v527_v2, %v535_v4  ;;  %v8280_v14 = vcombine.low %v528_v5, %v536_v59  ;;  %v8295_v15 = vcombine.high %v543_v10, %v551_v29  ;;  %v567_v18 = vld [vmem:[#allocation5 + $0xef0] sm:$0xff]  ;;  %v568_v36 = vld [vmem:[#allocation5 + $0xef8] sm:$0xff] }
 0x23c   :  { %3840 = vmatprep.subr.bf16.mxu0 %v8231_v35  ;;  %3926 = vmatprep.subr.bf16.mxu1 %v8233_v39  ;;  %v8297_v16 = vcombine.high %v544_v11, %v552_v12  ;;  %v8294_v20 = vcombine.low %v543_v10, %v551_v29  ;;  %v8296_v21 = vcombine.low %v544_v11, %v552_v12  ;;  %v575_v26 = vld [vmem:[#allocation5 + $0xf30] sm:$0xff]  ;;  %v576_v32 = vld [vmem:[#allocation5 + $0xf38] sm:$0xff] }
 0x23d   :  { %v8311_v23 = vcombine.high %v559_v17, %v567_v18  ;;  %v8313_v25 = vcombine.high %v560_v19, %v568_v36  ;;  %v583_v30 = vld [vmem:[#allocation5 + $0xf70] sm:$0xff]  ;;  %v584_v34 = vld [vmem:[#allocation5 + $0xf78] sm:$0xff]  ;;  %v8310_v35 = vcombine.low %v559_v17, %v567_v18  ;;  %v8312_v39 = vcombine.low %v560_v19, %v568_v36 }
 0x23e   :  { %v8327_v40 = vcombine.high %v575_v26, %v583_v30  ;;  %v8329_v41 = vcombine.high %v576_v32, %v584_v34  ;;  %v591_v43 = vld [vmem:[#allocation5 + $0xfb0] sm:$0xff]  ;;  %v9021_v4 = vld [vmem:[#allocation8 + $0x2c] ss:$16 sps:$4 sm:$0xff]   ;;  %v9019_v59 = vld [vmem:[#allocation8 + $0x28] ss:$16 sps:$4 sm:$0xff]  }
 0x23f   :  { %3841 = vmatpush1.bf16.msra.mxu0 %v8230_v56  ;;  %3927 = vmatpush1.bf16.msra.mxu1 %v8232_v45  ;;  %v599_v44 = vld [vmem:[#allocation5 + $0xff0] sm:$0xff]  ;;  %v592_v56 = vld [vmem:[#allocation5 + $0xfb8] sm:$0xff] }
 0x240   :  { %3842 = vmatprep.subr.bf16.mxu0 %v8247_v46  ;;  %3928 = vmatprep.subr.bf16.mxu1 %v8249_v48  ;;  %v600_v45 = vld [vmem:[#allocation5 + $0xff8] sm:$0xff]  ;;  %v8326_v46 = vcombine.low %v575_v26, %v583_v30  ;;  %v8328_v48 = vcombine.low %v576_v32, %v584_v34  ;;  %v8343_v49 = vcombine.high %v591_v43, %v599_v44  ;;  %v9018_v2 = vld [vmem:[#allocation8 + $0x24] ss:$16 sps:$4 sm:$0xff]   ;;  %v9016_v5 = vld [vmem:[#allocation8 + $0x20] ss:$16 sps:$4 sm:$0xff]  }
 0x241   :  { %v8345_v50 = vcombine.high %v592_v56, %v600_v45  ;;  %v8342_v51 = vcombine.low %v591_v43, %v599_v44  ;;  %v8344_v52 = vcombine.low %v592_v56, %v600_v45  ;;  %v9030_v10 = vld [vmem:[#allocation8 + $0x64] ss:$16 sps:$4 sm:$0xff]   ;;  %v9028_v29 = vld [vmem:[#allocation8 + $0x60] ss:$16 sps:$4 sm:$0xff]   ;;  %v9031_v11 = vld [vmem:[#allocation8 + $0x68] ss:$16 sps:$4 sm:$0xff]  }
 0x242   :  { %v9036_v12 = vld [vmem:[#allocation8 + $0x84] ss:$16 sps:$4 sm:$0xff]   ;;  %v9040_v17 = vld [vmem:[#allocation8 + $0xa0] ss:$16 sps:$4 sm:$0xff]   ;;  %v9043_v18 = vld [vmem:[#allocation8 + $0xa8] ss:$16 sps:$4 sm:$0xff]  }
 0x243   :  { %3843 = vmatpush1.bf16.msra.mxu0 %v8246_v55  ;;  %3929 = vmatpush1.bf16.msra.mxu1 %v8248_v57  ;;  %v9012_v55 = vld [vmem:[#allocation8 + $0x4] ss:$16 sps:$4 sm:$0xff]   ;;  %v9015_v57 = vld [vmem:[#allocation8 + $0xc] ss:$16 sps:$4 sm:$0xff]   ;;  %v9052_v26 = vld [vmem:[#allocation8 + $0xe0] ss:$16 sps:$4 sm:$0xff]  }
 0x244   :  { %3844 = vmatprep.subr.bf16.mxu0 %v8263_v0  ;;  %3930 = vmatprep.subr.bf16.mxu1 %v8265_v1  ;;  %v9010_v0 = vld [vmem:[#allocation8] ss:$16 sps:$4 sm:$0xff]   ;;  %v9013_v1 = vld [vmem:[#allocation8 + $0x8] ss:$16 sps:$4 sm:$0xff]   ;;  %v9048_v19 = vld [vmem:[#allocation8 + $0xc4] ss:$16 sps:$4 sm:$0xff]  }
 0x245   :  { %v9051_v36 = vld [vmem:[#allocation8 + $0xcc] ss:$16 sps:$4 sm:$0xff]   ;;  %v9055_v30 = vld [vmem:[#allocation8 + $0xe8] ss:$16 sps:$4 sm:$0xff]   ;;  %v9060_v32 = vld [vmem:[#allocation8 + $0x104] ss:$16 sps:$4 sm:$0xff]  }
 0x246   :  { %v9063_v34 = vld [vmem:[#allocation8 + $0x10c] ss:$16 sps:$4 sm:$0xff]   ;;  %v9064_v43 = vld [vmem:[#allocation8 + $0x120] ss:$16 sps:$4 sm:$0xff]   ;;  %v9067_v44 = vld [vmem:[#allocation8 + $0x128] ss:$16 sps:$4 sm:$0xff]  }
 0x247   :  { %3845 = vmatpush1.bf16.msra.mxu0 %v8262_v6  ;;  %3931 = vmatpush1.bf16.msra.mxu1 %v8264_v7  ;;  %v9024_v6 = vld [vmem:[#allocation8 + $0x44] ss:$16 sps:$4 sm:$0xff]   ;;  %v9027_v7 = vld [vmem:[#allocation8 + $0x4c] ss:$16 sps:$4 sm:$0xff]  }
 0x248   :  { %3846 = vmatprep.subr.bf16.mxu0 %v8279_v8  ;;  %3932 = vmatprep.subr.bf16.mxu1 %v8281_v9  ;;  %v9022_v8 = vld [vmem:[#allocation8 + $0x40] ss:$16 sps:$4 sm:$0xff]   ;;  %v9025_v9 = vld [vmem:[#allocation8 + $0x48] ss:$16 sps:$4 sm:$0xff]   ;;  %v9072_v56 = vld [vmem:[#allocation8 + $0x144] ss:$16 sps:$4 sm:$0xff]  }
 0x249   :  { %v9075_v45 = vld [vmem:[#allocation8 + $0x14c] ss:$16 sps:$4 sm:$0xff]  }
 0x24b   :  { %3847 = vmatpush1.bf16.msra.mxu0 %v8278_v13  ;;  %3933 = vmatpush1.bf16.msra.mxu1 %v8280_v14  ;;  %v9039_v13 = vld [vmem:[#allocation8 + $0x8c] ss:$16 sps:$4 sm:$0xff]   ;;  %v9037_v14 = vld [vmem:[#allocation8 + $0x88] ss:$16 sps:$4 sm:$0xff]  }
 0x24c   :  { %3848 = vmatprep.subr.bf16.mxu0 %v8295_v15  ;;  %3934 = vmatprep.subr.bf16.mxu1 %v8297_v16  ;;  %v9042_v15 = vld [vmem:[#allocation8 + $0xa4] ss:$16 sps:$4 sm:$0xff]   ;;  %v9045_v16 = vld [vmem:[#allocation8 + $0xac] ss:$16 sps:$4 sm:$0xff]  }
 0x24f   :  { %3849 = vmatpush1.bf16.msra.mxu0 %v8294_v20  ;;  %3935 = vmatpush1.bf16.msra.mxu1 %v8296_v21  ;;  %v9046_v20 = vld [vmem:[#allocation8 + $0xc0] ss:$16 sps:$4 sm:$0xff]   ;;  %v9049_v21 = vld [vmem:[#allocation8 + $0xc8] ss:$16 sps:$4 sm:$0xff]  }
 0x250   :  { %3850 = vmatprep.subr.bf16.mxu0 %v8311_v23  ;;  %3936 = vmatprep.subr.bf16.mxu1 %v8313_v25  ;;  %v9054_v23 = vld [vmem:[#allocation8 + $0xe4] ss:$16 sps:$4 sm:$0xff]   ;;  %v9057_v25 = vld [vmem:[#allocation8 + $0xec] ss:$16 sps:$4 sm:$0xff]  }
 0x253   :  { %3851 = vmatpush1.bf16.msra.mxu0 %v8310_v35  ;;  %3937 = vmatpush1.bf16.msra.mxu1 %v8312_v39  ;;  %v9058_v35 = vld [vmem:[#allocation8 + $0x100] ss:$16 sps:$4 sm:$0xff]   ;;  %v9061_v39 = vld [vmem:[#allocation8 + $0x108] ss:$16 sps:$4 sm:$0xff]  }
 0x254   :  { %3852 = vmatprep.subr.bf16.mxu0 %v8327_v40  ;;  %3938 = vmatprep.subr.bf16.mxu1 %v8329_v41  ;;  %v9066_v40 = vld [vmem:[#allocation8 + $0x124] ss:$16 sps:$4 sm:$0xff]   ;;  %v9069_v41 = vld [vmem:[#allocation8 + $0x12c] ss:$16 sps:$4 sm:$0xff]  }
 0x257   :  { %3853 = vmatpush1.bf16.msra.mxu0 %v8326_v46  ;;  %3939 = vmatpush1.bf16.msra.mxu1 %v8328_v48  ;;  %v9070_v46 = vld [vmem:[#allocation8 + $0x140] ss:$16 sps:$4 sm:$0xff]   ;;  %v9073_v48 = vld [vmem:[#allocation8 + $0x148] ss:$16 sps:$4 sm:$0xff]  }
 0x258   :  { %3854 = vmatprep.subr.bf16.mxu0 %v8343_v49  ;;  %3940 = vmatprep.subr.bf16.mxu1 %v8345_v50  ;;  %v9078_v49 = vld [vmem:[#allocation8 + $0x164] ss:$16 sps:$4 sm:$0xff]   ;;  %v9081_v50 = vld [vmem:[#allocation8 + $0x16c] ss:$16 sps:$4 sm:$0xff]  }
 0x25b   :  { %3855 = vmatpush1.bf16.msra.mxu0 %v8342_v51  ;;  %3941 = vmatpush1.bf16.msra.mxu1 %v8344_v52  ;;  %v9076_v51 = vld [vmem:[#allocation8 + $0x160] ss:$16 sps:$4 sm:$0xff]   ;;  %v9079_v52 = vld [vmem:[#allocation8 + $0x168] ss:$16 sps:$4 sm:$0xff]  }
 0x25c   :  { %7095 = vmatprep.subr.bf16.mxu0 %v9012_v55  ;;  %7439 = vmatprep.subr.bf16.mxu1 %v9015_v57  ;;  %v9084_v55 = vld [vmem:[#allocation8 + $0x184] ss:$16 sps:$4 sm:$0xff]   ;;  %v9087_v57 = vld [vmem:[#allocation8 + $0x18c] ss:$16 sps:$4 sm:$0xff]  }
 0x25e   :  { %3857 = vmatmul.mubr.bf16.vlgmr.msra.gmra.mrb[12].mxu0 %v10078_v24  ;;  %3943 = vmatmul.mubr.bf16.vlgmr.msra.gmra.mrb[12].mxu1 %v10078_v24  ;;  %v9033_v24 = vld [vmem:[#allocation8 + $0x6c] ss:$16 sps:$4 sm:$0xff]  }
 0x25f   :  { %7096 = vmatpush1.bf16.msra.mxu0 %v9010_v0  ;;  %7127 = vmatprep.mubr.bf16.mxu0 %v10074_v62  ;;  %v9082_v0 = vld [vmem:[#allocation8 + $0x180] ss:$16 sps:$4 sm:$0xff]  }
 0x260   :  { %7440 = vmatpush1.bf16.msra.mxu1 %v9013_v1  ;;  %7471 = vmatprep.mubr.bf16.mxu1 %v10074_v62  ;;  %v9034_v62 = vld [vmem:[#allocation8 + $0x80] ss:$16 sps:$4 sm:$0xff]   ;;  %v9085_v1 = vld [vmem:[#allocation8 + $0x188] ss:$16 sps:$4 sm:$0xff]  }
 0x261   :  { %7097 = vmatprep.subr.bf16.mxu0 %v9018_v2  ;;  %7441 = vmatprep.subr.bf16.mxu1 %v9021_v4  ;;  %v9090_v2 = vld [vmem:[#allocation8 + $0x1a4] ss:$16 sps:$4 sm:$0xff]   ;;  %v9093_v4 = vld [vmem:[#allocation8 + $0x1ac] ss:$16 sps:$4 sm:$0xff]  }
 0x263   :  { %7098 = vmatpush1.bf16.msra.mxu0 %v9016_v5  ;;  %v9088_v5 = vld [vmem:[#allocation8 + $0x1a0] ss:$16 sps:$4 sm:$0xff]  }
 0x264   :  { %7442 = vmatpush1.bf16.msra.mxu1 %v9019_v59  ;;  %7099 = vmatprep.subr.bf16.mxu0 %v9024_v6  ;;  %v9091_v59 = vld [vmem:[#allocation8 + $0x1a8] ss:$16 sps:$4 sm:$0xff]   ;;  %v9096_v6 = vld [vmem:[#allocation8 + $0x1c4] ss:$16 sps:$4 sm:$0xff]  }
 0x265   :  { %7443 = vmatprep.subr.bf16.mxu1 %v9027_v7  ;;  %v9099_v7 = vld [vmem:[#allocation8 + $0x1cc] ss:$16 sps:$4 sm:$0xff]  }
 0x267   :  { %7100 = vmatpush1.bf16.msra.mxu0 %v9022_v8  ;;  %v9094_v8 = vld [vmem:[#allocation8 + $0x1c0] ss:$16 sps:$4 sm:$0xff]  }
 0x268   :  { %7444 = vmatpush1.bf16.msra.mxu1 %v9025_v9  ;;  %7101 = vmatprep.subr.bf16.mxu0 %v9030_v10  ;;  %v9097_v9 = vld [vmem:[#allocation8 + $0x1c8] ss:$16 sps:$4 sm:$0xff]   ;;  %v9102_v10 = vld [vmem:[#allocation8 + $0x1e4] ss:$16 sps:$4 sm:$0xff]  }
 0x269   :  { %7445 = vmatprep.subr.bf16.mxu1 %v9033_v24  ;;  %v9105_v24 = vld [vmem:[#allocation8 + $0x1ec] ss:$16 sps:$4 sm:$0xff]  }
 0x26b   :  { %7102 = vmatpush1.bf16.msra.mxu0 %v9028_v29  ;;  %v9100_v29 = vld [vmem:[#allocation8 + $0x1e0] ss:$16 sps:$4 sm:$0xff]  }
 0x26c   :  { %7446 = vmatpush1.bf16.msra.mxu1 %v9031_v11  ;;  %7103 = vmatprep.subr.bf16.mxu0 %v9036_v12  ;;  %v9103_v11 = vld [vmem:[#allocation8 + $0x1e8] ss:$16 sps:$4 sm:$0xff]   ;;  %v9108_v12 = vld [vmem:[#allocation8 + $0x204] ss:$16 sps:$4 sm:$0xff]  }
 0x26d   :  { %7447 = vmatprep.subr.bf16.mxu1 %v9039_v13  ;;  %v9111_v13 = vld [vmem:[#allocation8 + $0x20c] ss:$16 sps:$4 sm:$0xff]  }
 0x26f   :  { %7104 = vmatpush1.bf16.msra.mxu0 %v9034_v62  ;;  %v9106_v62 = vld [vmem:[#allocation8 + $0x200] ss:$16 sps:$4 sm:$0xff]  }
 0x270   :  { %7448 = vmatpush1.bf16.msra.mxu1 %v9037_v14  ;;  %7105 = vmatprep.subr.bf16.mxu0 %v9042_v15  ;;  %v9109_v14 = vld [vmem:[#allocation8 + $0x208] ss:$16 sps:$4 sm:$0xff]   ;;  %v9114_v15 = vld [vmem:[#allocation8 + $0x224] ss:$16 sps:$4 sm:$0xff]  }
 0x271   :  { %7449 = vmatprep.subr.bf16.mxu1 %v9045_v16  ;;  %v9117_v16 = vld [vmem:[#allocation8 + $0x22c] ss:$16 sps:$4 sm:$0xff]  }
 0x273   :  { %7106 = vmatpush1.bf16.msra.mxu0 %v9040_v17  ;;  %v9112_v17 = vld [vmem:[#allocation8 + $0x220] ss:$16 sps:$4 sm:$0xff]  }
 0x274   :  { %7450 = vmatpush1.bf16.msra.mxu1 %v9043_v18  ;;  %7107 = vmatprep.subr.bf16.mxu0 %v9048_v19  ;;  %v9115_v18 = vld [vmem:[#allocation8 + $0x228] ss:$16 sps:$4 sm:$0xff]   ;;  %v9120_v19 = vld [vmem:[#allocation8 + $0x244] ss:$16 sps:$4 sm:$0xff]  }
 0x275   :  { %7451 = vmatprep.subr.bf16.mxu1 %v9051_v36  ;;  %v9123_v36 = vld [vmem:[#allocation8 + $0x24c] ss:$16 sps:$4 sm:$0xff]  }
 0x277   :  { %7108 = vmatpush1.bf16.msra.mxu0 %v9046_v20  ;;  %v9118_v20 = vld [vmem:[#allocation8 + $0x240] ss:$16 sps:$4 sm:$0xff]  }
 0x278   :  { %7452 = vmatpush1.bf16.msra.mxu1 %v9049_v21  ;;  %7109 = vmatprep.subr.bf16.mxu0 %v9054_v23  ;;  %v9121_v21 = vld [vmem:[#allocation8 + $0x248] ss:$16 sps:$4 sm:$0xff]   ;;  %v9126_v23 = vld [vmem:[#allocation8 + $0x264] ss:$16 sps:$4 sm:$0xff]  }
 0x279   :  { %7453 = vmatprep.subr.bf16.mxu1 %v9057_v25  ;;  %v9124_v25 = vld [vmem:[#allocation8 + $0x260] ss:$16 sps:$4 sm:$0xff]  }
 0x27b   :  { %7110 = vmatpush1.bf16.msra.mxu0 %v9052_v26  ;;  %v9127_v26 = vld [vmem:[#allocation8 + $0x268] ss:$16 sps:$4 sm:$0xff]  }
 0x27c   :  { %7454 = vmatpush1.bf16.msra.mxu1 %v9055_v30  ;;  %7111 = vmatprep.subr.bf16.mxu0 %v9060_v32  ;;  %v9132_v30 = vld [vmem:[#allocation8 + $0x284] ss:$16 sps:$4 sm:$0xff]   ;;  %v9135_v32 = vld [vmem:[#allocation8 + $0x28c] ss:$16 sps:$4 sm:$0xff]  }
 0x27d   :  { %7455 = vmatprep.subr.bf16.mxu1 %v9063_v34  ;;  %v10118_v34 = vld [vmem:[#allocation7 + $0x8] sm:$0xff] }
 0x27f   :  { %7112 = vmatpush1.bf16.msra.mxu0 %v9058_v35  ;;  %v9133_v35 = vld [vmem:[#allocation8 + $0x288] ss:$16 sps:$4 sm:$0xff]  }
 0x280   :  { %7456 = vmatpush1.bf16.msra.mxu1 %v9061_v39  ;;  %7113 = vmatprep.subr.bf16.mxu0 %v9066_v40  ;;  %v9138_v39 = vld [vmem:[#allocation8 + $0x2a4] ss:$16 sps:$4 sm:$0xff]   ;;  %v9141_v40 = vld [vmem:[#allocation8 + $0x2ac] ss:$16 sps:$4 sm:$0xff]  }
 0x281   :  { %7457 = vmatprep.subr.bf16.mxu1 %v9069_v41  ;;  %v640_v41 = vrot.slane %v10118_v34, %v10049_v54 }
 0x283   :  { %7114 = vmatpush1.bf16.msra.mxu0 %v9064_v43  ;;  %v648_v43 = vrot.slane %v10118_v34, %v10054_v60 }
 0x284   :  { %7458 = vmatpush1.bf16.msra.mxu1 %v9067_v44  ;;  %7115 = vmatprep.subr.bf16.mxu0 %v9072_v56  ;;  %v644_v44 = vrot.slane %v10118_v34, %v10057_v61  ;;  %v9136_v56 = vld [vmem:[#allocation8 + $0x2a0] ss:$16 sps:$4 sm:$0xff]  }
 0x285   :  { %7459 = vmatprep.subr.bf16.mxu1 %v9075_v45  ;;  %v652_v45 = vrot.slane %v10118_v34, %v10060_v63 }
 0x287   :  { %7116 = vmatpush1.bf16.msra.mxu0 %v9070_v46  ;;  %v9139_v46 = vld [vmem:[#allocation8 + $0x2a8] ss:$16 sps:$4 sm:$0xff]  }
 0x288   :  { %7460 = vmatpush1.bf16.msra.mxu1 %v9073_v48  ;;  %7117 = vmatprep.subr.bf16.mxu0 %v9078_v49  ;;  %v9144_v48 = vld [vmem:[#allocation8 + $0x2c4] ss:$16 sps:$4 sm:$0xff]  }
 0x289   :  { %7461 = vmatprep.subr.bf16.mxu1 %v9081_v50  ;;  %v9147_v50 = vld [vmem:[#allocation8 + $0x2cc] ss:$16 sps:$4 sm:$0xff]  }
 0x28b   :  { %7118 = vmatpush1.bf16.msra.mxu0 %v9076_v51 }
 0x28c   :  { %7462 = vmatpush1.bf16.msra.mxu1 %v9079_v52  ;;  %7119 = vmatprep.subr.bf16.mxu0 %v9084_v55 }
 0x28d   :  { %7463 = vmatprep.subr.bf16.mxu1 %v9087_v57 }
 0x28f   :  { %7120 = vmatpush1.bf16.msra.mxu0 %v9082_v0 }
 0x290   :  { %7464 = vmatpush1.bf16.msra.mxu1 %v9085_v1  ;;  %7121 = vmatprep.subr.bf16.mxu0 %v9090_v2 }
 0x291   :  { %7465 = vmatprep.subr.bf16.mxu1 %v9093_v4  ;;  %v9142_v4 = vld [vmem:[#allocation8 + $0x2c0] ss:$16 sps:$4 sm:$0xff]  }
 0x293   :  { %7122 = vmatpush1.bf16.msra.mxu0 %v9088_v5 }
 0x294   :  { %7466 = vmatpush1.bf16.msra.mxu1 %v9091_v59  ;;  %7123 = vmatprep.subr.bf16.mxu0 %v9096_v6 }
 0x295   :  { %7467 = vmatprep.subr.bf16.mxu1 %v9099_v7 }
 0x297   :  { %7124 = vmatpush1.bf16.msra.mxu0 %v9094_v8  ;;  %v9145_v8 = vld [vmem:[#allocation8 + $0x2c8] ss:$16 sps:$4 sm:$0xff]  }
 0x298   :  { %7468 = vmatpush1.bf16.msra.mxu1 %v9097_v9  ;;  %7125 = vmatprep.subr.bf16.mxu0 %v9102_v10  ;;  %v9150_v9 = vld [vmem:[#allocation8 + $0x2e4] ss:$16 sps:$4 sm:$0xff]  }
 0x299   :  { %7469 = vmatprep.subr.bf16.mxu1 %v9105_v24 }
 0x29b   :  { %7126 = vmatpush1.bf16.msra.mxu0 %v9100_v29 }
 0x29c   :  { %7470 = vmatpush1.bf16.msra.mxu1 %v9103_v11  ;;  %7138 = vmatprep.subr.bf16.mxu0 %v9108_v12  ;;  %v9153_v11 = vld [vmem:[#allocation8 + $0x2ec] ss:$16 sps:$4 sm:$0xff]  }
 0x29d   :  { %7482 = vmatprep.subr.bf16.mxu1 %v9111_v13 }
 0x29e   :  { %7128 = vmatmul.mubr.bf16.vlgmr.msra.gmra.mrb[16].mxu0 %v10070_v53 }
 0x29f   :  { %7472 = vmatmul.mubr.bf16.vlgmr.msra.gmra.mrb[16].mxu1 %v10070_v53  ;;  %7139 = vmatpush1.bf16.msra.mxu0 %v9106_v62  ;;  %v9129_v53 = vld [vmem:[#allocation8 + $0x26c] ss:$16 sps:$4 sm:$0xff]  }
 0x2a0   :  { %7170 = vmatprep.mubr.bf16.mxu0 %v10076_v3  ;;  %7483 = vmatpush1.bf16.msra.mxu1 %v9109_v14 }
 0x2a1   :  { %7514 = vmatprep.mubr.bf16.mxu1 %v10076_v3  ;;  %7140 = vmatprep.subr.bf16.mxu0 %v9114_v15  ;;  %v9130_v3 = vld [vmem:[#allocation8 + $0x280] ss:$16 sps:$4 sm:$0xff]  }
 0x2a2   :  { %7484 = vmatprep.subr.bf16.mxu1 %v9117_v16 }
 0x2a3   :  { %7141 = vmatpush1.bf16.msra.mxu0 %v9112_v17 }
 0x2a4   :  { %7485 = vmatpush1.bf16.msra.mxu1 %v9115_v18  ;;  %7142 = vmatprep.subr.bf16.mxu0 %v9120_v19  ;;  %v9148_v18 = vld [vmem:[#allocation8 + $0x2e0] ss:$16 sps:$4 sm:$0xff]  }
 0x2a5   :  { %7486 = vmatprep.subr.bf16.mxu1 %v9123_v36 }
 0x2a7   :  { %7143 = vmatpush1.bf16.msra.mxu0 %v9118_v20 }
 0x2a8   :  { %7487 = vmatpush1.bf16.msra.mxu1 %v9121_v21  ;;  %7144 = vmatprep.subr.bf16.mxu0 %v9126_v23  ;;  %v9151_v21 = vld [vmem:[#allocation8 + $0x2e8] ss:$16 sps:$4 sm:$0xff]   ;;  %v9156_v23 = vld [vmem:[#allocation8 + $0x304] ss:$16 sps:$4 sm:$0xff]  }
 0x2a9   :  { %7488 = vmatprep.subr.bf16.mxu1 %v9129_v53 }
 0x2ab   :  { %7145 = vmatpush1.bf16.msra.mxu0 %v9124_v25 }
 0x2ac   :  { %7489 = vmatpush1.bf16.msra.mxu1 %v9127_v26  ;;  %7146 = vmatprep.subr.bf16.mxu0 %v9132_v30  ;;  %v9159_v26 = vld [vmem:[#allocation8 + $0x30c] ss:$16 sps:$4 sm:$0xff]  }
 0x2ad   :  { %7490 = vmatprep.subr.bf16.mxu1 %v9135_v32  ;;  %v9154_v32 = vld [vmem:[#allocation8 + $0x300] ss:$16 sps:$4 sm:$0xff]  }
 0x2af   :  { %7147 = vmatpush1.bf16.msra.mxu0 %v9130_v3  ;;  %v9157_v3 = vld [vmem:[#allocation8 + $0x308] ss:$16 sps:$4 sm:$0xff]  }
 0x2b0   :  { %7491 = vmatpush1.bf16.msra.mxu1 %v9133_v35  ;;  %7148 = vmatprep.subr.bf16.mxu0 %v9138_v39  ;;  %v9162_v35 = vld [vmem:[#allocation8 + $0x324] ss:$16 sps:$4 sm:$0xff]   ;;  %v9165_v39 = vld [vmem:[#allocation8 + $0x32c] ss:$16 sps:$4 sm:$0xff]  }
 0x2b1   :  { %v3686_v49 = vpop.f32.mrb[8].mxu0  ;;  %7492 = vmatprep.subr.bf16.mxu1 %v9141_v40  ;;  %v3772_v52 = vpop.f32.mrb[8].mxu1  ;;  %v9160_v40 = vld [vmem:[#allocation8 + $0x320] ss:$16 sps:$4 sm:$0xff]  }
 0x2b2   :  { %v8882_v51 = vadd.f32 %v3686_v49, %v640_v41  ;;  %v3688_v55 = vpop.f32.mrb[9].mxu0  ;;  %v8886_v57 = vadd.f32 %v3772_v52, %v648_v43  ;;  %v3774_v1 = vpop.f32.mrb[9].mxu1  ;;  %v9172_v49 = vld [vmem:[#allocation8 + $0x360] ss:$16 sps:$4 sm:$0xff]   ;;  %v9183_v52 = vld [vmem:[#allocation8 + $0x38c] ss:$16 sps:$4 sm:$0xff]  }
 0x2b3   :  { %v8883_v0 = vadd.f32 %v3688_v55, %v644_v44  ;;  %v3690_v2 = vpop.f32.mrb[10].mxu0  ;;  %7149 = vmatpush1.bf16.msra.mxu0 %v9136_v56  ;;  %v8887_v5 = vadd.f32 %v3774_v1, %v652_v45  ;;  %v3776_v6 = vpop.f32.mrb[10].mxu1  ;;  %v9166_v56 = vld [vmem:[#allocation8 + $0x340] ss:$16 sps:$4 sm:$0xff]   ;;  %v9189_v1 = vld [vmem:[#allocation8 + $0x3ac] ss:$16 sps:$4 sm:$0xff]  }
 0x2b4   :  { %v8884_v59 = vadd.f32 %v3690_v2, %v640_v41  ;;  %7493 = vmatpush1.bf16.msra.mxu1 %v9139_v46  ;;  %v3692_v7 = vpop.f32.mrb[11].mxu0  ;;  %7150 = vmatprep.subr.bf16.mxu0 %v9144_v48  ;;  %v8888_v10 = vadd.f32 %v3776_v6, %v648_v43  ;;  %v3778_v29 = vpop.f32.mrb[11].mxu1  ;;  %v3961_v12 = vmax.f32 %v8882_v51, 0.0  ;;  %v3963_v14 = vmax.f32 %v8886_v57, 0.0  ;;  %v9163_v41 = vld [vmem:[#allocation8 + $0x328] ss:$16 sps:$4 sm:$0xff]  }
 0x2b5   :  { %v8885_v24 = vadd.f32 %v3692_v7, %v644_v44  ;;  %7494 = vmatprep.subr.bf16.mxu1 %v9147_v50  ;;  %v8889_v62 = vadd.f32 %v3778_v29, %v652_v45  ;;  %v3962_v15 = vmax.f32 %v8883_v0, 0.0  ;;  %v3964_v19 = vmax.f32 %v8887_v5, 0.0  ;;  %v9168_v43 = vld [vmem:[#allocation8 + $0x344] ss:$16 sps:$4 sm:$0xff]   ;;  %v9171_v44 = vld [vmem:[#allocation8 + $0x34c] ss:$16 sps:$4 sm:$0xff]  }
 0x2b6   :  { %v3977_v13 = vmax.f32 %v8884_v59, 0.0  ;;  %v3979_v16 = vmax.f32 %v8888_v10, 0.0  ;;  %v9169_v45 = vld [vmem:[#allocation8 + $0x348] ss:$16 sps:$4 sm:$0xff]   ;;  %v9174_v46 = vld [vmem:[#allocation8 + $0x364] ss:$16 sps:$4 sm:$0xff]  }
 0x2b7   :  { %v3978_v17 = vmax.f32 %v8885_v24, 0.0  ;;  %7151 = vmatpush1.bf16.msra.mxu0 %v9142_v4  ;;  %v3980_v20 = vmax.f32 %v8889_v62, 0.0  ;;  %v9177_v48 = vld [vmem:[#allocation8 + $0x36c] ss:$16 sps:$4 sm:$0xff]   ;;  %v9175_v50 = vld [vmem:[#allocation8 + $0x368] ss:$16 sps:$4 sm:$0xff]  }
 0x2b8   :  { %v10128_v36 = vpack.c.bf16 %v3977_v13, %v3961_v12  ;;  %7495 = vmatpush1.bf16.msra.mxu1 %v9145_v8  ;;  %7152 = vmatprep.subr.bf16.mxu0 %v9150_v9  ;;  %v10130_v53 = vpack.c.bf16 %v3979_v16, %v3963_v14  ;;  %v9180_v51 = vld [vmem:[#allocation8 + $0x384] ss:$16 sps:$4 sm:$0xff]   ;;  %v9178_v55 = vld [vmem:[#allocation8 + $0x380] ss:$16 sps:$4 sm:$0xff]   ;;  %v9181_v57 = vld [vmem:[#allocation8 + $0x388] ss:$16 sps:$4 sm:$0xff]  }
 0x2b9   :  { %v10132_v25 = vpack.c.bf16 %v3978_v17, %v3962_v15  ;;  %7496 = vmatprep.subr.bf16.mxu1 %v9153_v11  ;;  %v10134_v30 = vpack.c.bf16 %v3980_v20, %v3964_v19  ;;  %v9186_v0 = vld [vmem:[#allocation8 + $0x3a4] ss:$16 sps:$4 sm:$0xff]   ;;  %v9184_v2 = vld [vmem:[#allocation8 + $0x3a0] ss:$16 sps:$4 sm:$0xff]   ;;  %v9187_v4 = vld [vmem:[#allocation8 + $0x3a8] ss:$16 sps:$4 sm:$0xff]  }
 0x2ba   :  { %v9192_v5 = vld [vmem:[#allocation8 + $0x3c4] ss:$16 sps:$4 sm:$0xff]   ;;  %v9195_v59 = vld [vmem:[#allocation8 + $0x3cc] ss:$16 sps:$4 sm:$0xff]   ;;  %v9190_v6 = vld [vmem:[#allocation8 + $0x3c0] ss:$16 sps:$4 sm:$0xff]  }
 0x2bb   :  { %7153 = vmatpush1.bf16.msra.mxu0 %v9148_v18  ;;  %v9193_v7 = vld [vmem:[#allocation8 + $0x3c8] ss:$16 sps:$4 sm:$0xff]   ;;  %v9198_v8 = vld [vmem:[#allocation8 + $0x3e4] ss:$16 sps:$4 sm:$0xff]   ;;  %v9201_v9 = vld [vmem:[#allocation8 + $0x3ec] ss:$16 sps:$4 sm:$0xff]  }
 0x2bc   :  { %7497 = vmatpush1.bf16.msra.mxu1 %v9151_v21  ;;  %7154 = vmatprep.subr.bf16.mxu0 %v9156_v23  ;;  %v9196_v10 = vld [vmem:[#allocation8 + $0x3e0] ss:$16 sps:$4 sm:$0xff]   ;;  %v9199_v24 = vld [vmem:[#allocation8 + $0x3e8] ss:$16 sps:$4 sm:$0xff]   ;;  %v9204_v29 = vld [vmem:[#allocation8 + $0x404] ss:$16 sps:$4 sm:$0xff]  }
 0x2bd   :  { %7498 = vmatprep.subr.bf16.mxu1 %v9159_v26  ;;  %v9207_v11 = vld [vmem:[#allocation8 + $0x40c] ss:$16 sps:$4 sm:$0xff]   ;;  %v9202_v12 = vld [vmem:[#allocation8 + $0x400] ss:$16 sps:$4 sm:$0xff]   ;;  %v9205_v13 = vld [vmem:[#allocation8 + $0x408] ss:$16 sps:$4 sm:$0xff]  }
 0x2be   :  { %v9210_v62 = vld [vmem:[#allocation8 + $0x424] ss:$16 sps:$4 sm:$0xff]   ;;  %v9213_v14 = vld [vmem:[#allocation8 + $0x42c] ss:$16 sps:$4 sm:$0xff]   ;;  %v9208_v15 = vld [vmem:[#allocation8 + $0x420] ss:$16 sps:$4 sm:$0xff]  }
 0x2bf   :  { %7155 = vmatpush1.bf16.msra.mxu0 %v9154_v32  ;;  %v9211_v16 = vld [vmem:[#allocation8 + $0x428] ss:$16 sps:$4 sm:$0xff]   ;;  %v9216_v17 = vld [vmem:[#allocation8 + $0x444] ss:$16 sps:$4 sm:$0xff]   ;;  %v9219_v18 = vld [vmem:[#allocation8 + $0x44c] ss:$16 sps:$4 sm:$0xff]  }
 0x2c0   :  { %7499 = vmatpush1.bf16.msra.mxu1 %v9157_v3  ;;  %7156 = vmatprep.subr.bf16.mxu0 %v9162_v35  ;;  %v9214_v19 = vld [vmem:[#allocation8 + $0x440] ss:$16 sps:$4 sm:$0xff]   ;;  %v9217_v20 = vld [vmem:[#allocation8 + $0x448] ss:$16 sps:$4 sm:$0xff]   ;;  %v9222_v21 = vld [vmem:[#allocation8 + $0x464] ss:$16 sps:$4 sm:$0xff]  }
 0x2c1   :  { %7500 = vmatprep.subr.bf16.mxu1 %v9165_v39  ;;  %v9220_v23 = vld [vmem:[#allocation8 + $0x460] ss:$16 sps:$4 sm:$0xff]   ;;  %v9223_v26 = vld [vmem:[#allocation8 + $0x468] ss:$16 sps:$4 sm:$0xff]   ;;  %v9228_v32 = vld [vmem:[#allocation8 + $0x484] ss:$16 sps:$4 sm:$0xff]  }
 0x2c2   :  { %v9231_v3 = vld [vmem:[#allocation8 + $0x48c] ss:$16 sps:$4 sm:$0xff]   ;;  %v9229_v35 = vld [vmem:[#allocation8 + $0x488] ss:$16 sps:$4 sm:$0xff]   ;;  %v9234_v39 = vld [vmem:[#allocation8 + $0x4a4] ss:$16 sps:$4 sm:$0xff]  }
 0x2c3   :  { %7157 = vmatpush1.bf16.msra.mxu0 %v9160_v40  ;;  %v9237_v40 = vld [vmem:[#allocation8 + $0x4ac] ss:$16 sps:$4 sm:$0xff]  }
 0x2c4   :  { %7501 = vmatpush1.bf16.msra.mxu1 %v9163_v41  ;;  %7158 = vmatprep.subr.bf16.mxu0 %v9168_v43  ;;  %v9232_v41 = vld [vmem:[#allocation8 + $0x4a0] ss:$16 sps:$4 sm:$0xff]   ;;  %v9235_v43 = vld [vmem:[#allocation8 + $0x4a8] ss:$16 sps:$4 sm:$0xff]  }
 0x2c5   :  { %7502 = vmatprep.subr.bf16.mxu1 %v9171_v44  ;;  %v9240_v44 = vld [vmem:[#allocation8 + $0x4c4] ss:$16 sps:$4 sm:$0xff]  }
 0x2c7   :  { %7159 = vmatpush1.bf16.msra.mxu0 %v9166_v56  ;;  %v9243_v56 = vld [vmem:[#allocation8 + $0x4cc] ss:$16 sps:$4 sm:$0xff]  }
 0x2c8   :  { %7503 = vmatpush1.bf16.msra.mxu1 %v9169_v45  ;;  %7160 = vmatprep.subr.bf16.mxu0 %v9174_v46  ;;  %v9238_v45 = vld [vmem:[#allocation8 + $0x4c0] ss:$16 sps:$4 sm:$0xff]   ;;  %v9241_v46 = vld [vmem:[#allocation8 + $0x4c8] ss:$16 sps:$4 sm:$0xff]  }
 0x2c9   :  { %7504 = vmatprep.subr.bf16.mxu1 %v9177_v48  ;;  %v9246_v48 = vld [vmem:[#allocation8 + $0x4e4] ss:$16 sps:$4 sm:$0xff]  }
 0x2cb   :  { %7161 = vmatpush1.bf16.msra.mxu0 %v9172_v49  ;;  %v9249_v49 = vld [vmem:[#allocation8 + $0x4ec] ss:$16 sps:$4 sm:$0xff]  }
 0x2cc   :  { %7505 = vmatpush1.bf16.msra.mxu1 %v9175_v50  ;;  %7162 = vmatprep.subr.bf16.mxu0 %v9180_v51  ;;  %v9244_v50 = vld [vmem:[#allocation8 + $0x4e0] ss:$16 sps:$4 sm:$0xff]   ;;  %v9247_v51 = vld [vmem:[#allocation8 + $0x4e8] ss:$16 sps:$4 sm:$0xff]  }
 0x2cd   :  { %7506 = vmatprep.subr.bf16.mxu1 %v9183_v52  ;;  %v9252_v52 = vld [vmem:[#allocation8 + $0x504] ss:$16 sps:$4 sm:$0xff]  }
 0x2cf   :  { %7163 = vmatpush1.bf16.msra.mxu0 %v9178_v55  ;;  %v9255_v55 = vld [vmem:[#allocation8 + $0x50c] ss:$16 sps:$4 sm:$0xff]  }
 0x2d0   :  { %7507 = vmatpush1.bf16.msra.mxu1 %v9181_v57  ;;  %7164 = vmatprep.subr.bf16.mxu0 %v9186_v0  ;;  %v9250_v57 = vld [vmem:[#allocation8 + $0x500] ss:$16 sps:$4 sm:$0xff]   ;;  %v9253_v0 = vld [vmem:[#allocation8 + $0x508] ss:$16 sps:$4 sm:$0xff]  }
 0x2d1   :  { %7508 = vmatprep.subr.bf16.mxu1 %v9189_v1  ;;  %v9258_v1 = vld [vmem:[#allocation8 + $0x524] ss:$16 sps:$4 sm:$0xff]  }
 0x2d3   :  { %7165 = vmatpush1.bf16.msra.mxu0 %v9184_v2  ;;  %v9261_v2 = vld [vmem:[#allocation8 + $0x52c] ss:$16 sps:$4 sm:$0xff]  }
 0x2d4   :  { %7509 = vmatpush1.bf16.msra.mxu1 %v9187_v4  ;;  %7166 = vmatprep.subr.bf16.mxu0 %v9192_v5  ;;  %v9256_v4 = vld [vmem:[#allocation8 + $0x520] ss:$16 sps:$4 sm:$0xff]   ;;  %v9259_v5 = vld [vmem:[#allocation8 + $0x528] ss:$16 sps:$4 sm:$0xff]  }
 0x2d5   :  { %7510 = vmatprep.subr.bf16.mxu1 %v9195_v59  ;;  %v9264_v59 = vld [vmem:[#allocation8 + $0x544] ss:$16 sps:$4 sm:$0xff]  }
 0x2d7   :  { %7167 = vmatpush1.bf16.msra.mxu0 %v9190_v6  ;;  %v9267_v6 = vld [vmem:[#allocation8 + $0x54c] ss:$16 sps:$4 sm:$0xff]  }
 0x2d8   :  { %7511 = vmatpush1.bf16.msra.mxu1 %v9193_v7  ;;  %7168 = vmatprep.subr.bf16.mxu0 %v9198_v8  ;;  %v9262_v7 = vld [vmem:[#allocation8 + $0x540] ss:$16 sps:$4 sm:$0xff]   ;;  %v9265_v8 = vld [vmem:[#allocation8 + $0x548] ss:$16 sps:$4 sm:$0xff]  }
 0x2d9   :  { %7512 = vmatprep.subr.bf16.mxu1 %v9201_v9  ;;  %v9270_v9 = vld [vmem:[#allocation8 + $0x564] ss:$16 sps:$4 sm:$0xff]  }
 0x2db   :  { %7169 = vmatpush1.bf16.msra.mxu0 %v9196_v10  ;;  %v9273_v10 = vld [vmem:[#allocation8 + $0x56c] ss:$16 sps:$4 sm:$0xff]  }
 0x2dc   :  { %7513 = vmatpush1.bf16.msra.mxu1 %v9199_v24  ;;  %7181 = vmatprep.subr.bf16.mxu0 %v9204_v29  ;;  %v9268_v24 = vld [vmem:[#allocation8 + $0x560] ss:$16 sps:$4 sm:$0xff]   ;;  %v9271_v29 = vld [vmem:[#allocation8 + $0x568] ss:$16 sps:$4 sm:$0xff]  }
 0x2dd   :  { %7525 = vmatprep.subr.bf16.mxu1 %v9207_v11  ;;  %v9276_v11 = vld [vmem:[#allocation8 + $0x584] ss:$16 sps:$4 sm:$0xff]  }
 0x2de   :  { %7171 = vmatmul.mubr.bf16.vlgmr.msra.gmra.mrb[16].mxu0 %v10072_v58 }
 0x2df   :  { %7515 = vmatmul.mubr.bf16.vlgmr.msra.gmra.mrb[16].mxu1 %v10072_v58  ;;  %7182 = vmatpush1.bf16.msra.mxu0 %v9202_v12  ;;  %v9225_v58 = vld [vmem:[#allocation8 + $0x46c] ss:$16 sps:$4 sm:$0xff]  }
 0x2e0   :  { %7213 = vmatprep.mubr.bf16.mxu0 %v10106_v38  ;;  %7526 = vmatpush1.bf16.msra.mxu1 %v9205_v13  ;;  %v9279_v12 = vld [vmem:[#allocation8 + $0x58c] ss:$16 sps:$4 sm:$0xff]   ;;  %v9274_v13 = vld [vmem:[#allocation8 + $0x580] ss:$16 sps:$4 sm:$0xff]  }
 0x2e1   :  { %7557 = vmatprep.mubr.bf16.mxu1 %v10106_v38  ;;  %7183 = vmatprep.subr.bf16.mxu0 %v9210_v62  ;;  %v9226_v38 = vld [vmem:[#allocation8 + $0x480] ss:$16 sps:$4 sm:$0xff]   ;;  %v9277_v62 = vld [vmem:[#allocation8 + $0x588] ss:$16 sps:$4 sm:$0xff]  }
 0x2e2   :  { %7527 = vmatprep.subr.bf16.mxu1 %v9213_v14  ;;  %v9282_v14 = vld [vmem:[#allocation8 + $0x5a4] ss:$16 sps:$4 sm:$0xff]  }
 0x2e3   :  { %7184 = vmatpush1.bf16.msra.mxu0 %v9208_v15  ;;  %v9285_v15 = vld [vmem:[#allocation8 + $0x5ac] ss:$16 sps:$4 sm:$0xff]  }
 0x2e4   :  { %7528 = vmatpush1.bf16.msra.mxu1 %v9211_v16  ;;  %7185 = vmatprep.subr.bf16.mxu0 %v9216_v17  ;;  %v9280_v16 = vld [vmem:[#allocation8 + $0x5a0] ss:$16 sps:$4 sm:$0xff]   ;;  %v9283_v17 = vld [vmem:[#allocation8 + $0x5a8] ss:$16 sps:$4 sm:$0xff]  }
 0x2e5   :  { %7529 = vmatprep.subr.bf16.mxu1 %v9219_v18  ;;  %v9288_v18 = vld [vmem:[#allocation8 + $0x5c4] ss:$16 sps:$4 sm:$0xff]  }
 0x2e7   :  { %7186 = vmatpush1.bf16.msra.mxu0 %v9214_v19  ;;  %v9291_v19 = vld [vmem:[#allocation8 + $0x5cc] ss:$16 sps:$4 sm:$0xff]  }
 0x2e8   :  { %7530 = vmatpush1.bf16.msra.mxu1 %v9217_v20  ;;  %7187 = vmatprep.subr.bf16.mxu0 %v9222_v21  ;;  %v9286_v20 = vld [vmem:[#allocation8 + $0x5c0] ss:$16 sps:$4 sm:$0xff]   ;;  %v9289_v21 = vld [vmem:[#allocation8 + $0x5c8] ss:$16 sps:$4 sm:$0xff]  }
 0x2e9   :  { %7531 = vmatprep.subr.bf16.mxu1 %v9225_v58  ;;  %v9294_v58 = vld [vmem:[#allocation8 + $0x5e4] ss:$16 sps:$4 sm:$0xff]  }
 0x2eb   :  { %7188 = vmatpush1.bf16.msra.mxu0 %v9220_v23  ;;  %v9297_v23 = vld [vmem:[#allocation8 + $0x5ec] ss:$16 sps:$4 sm:$0xff]  }
 0x2ec   :  { %7532 = vmatpush1.bf16.msra.mxu1 %v9223_v26  ;;  %7189 = vmatprep.subr.bf16.mxu0 %v9228_v32  ;;  %v9292_v26 = vld [vmem:[#allocation8 + $0x5e0] ss:$16 sps:$4 sm:$0xff]   ;;  %v9295_v32 = vld [vmem:[#allocation8 + $0x5e8] ss:$16 sps:$4 sm:$0xff]  }
 0x2ed   :  { %7533 = vmatprep.subr.bf16.mxu1 %v9231_v3  ;;  %v9300_v3 = vld [vmem:[#allocation8 + $0x604] ss:$16 sps:$4 sm:$0xff]  }
 0x2ef   :  { %7190 = vmatpush1.bf16.msra.mxu0 %v9226_v38  ;;  %v9303_v38 = vld [vmem:[#allocation8 + $0x60c] ss:$16 sps:$4 sm:$0xff]  }
 0x2f0   :  { %7534 = vmatpush1.bf16.msra.mxu1 %v9229_v35  ;;  %7191 = vmatprep.subr.bf16.mxu0 %v9234_v39  ;;  %v9298_v35 = vld [vmem:[#allocation8 + $0x600] ss:$16 sps:$4 sm:$0xff]   ;;  %v9301_v39 = vld [vmem:[#allocation8 + $0x608] ss:$16 sps:$4 sm:$0xff]  }
 0x2f1   :  { %7535 = vmatprep.subr.bf16.mxu1 %v9237_v40  ;;  %v9306_v40 = vld [vmem:[#allocation8 + $0x624] ss:$16 sps:$4 sm:$0xff]  }
 0x2f3   :  { %7192 = vmatpush1.bf16.msra.mxu0 %v9232_v41  ;;  %v9309_v41 = vld [vmem:[#allocation8 + $0x62c] ss:$16 sps:$4 sm:$0xff]  }
 0x2f4   :  { %7536 = vmatpush1.bf16.msra.mxu1 %v9235_v43  ;;  %7193 = vmatprep.subr.bf16.mxu0 %v9240_v44  ;;  %v9304_v43 = vld [vmem:[#allocation8 + $0x620] ss:$16 sps:$4 sm:$0xff]   ;;  %v9307_v44 = vld [vmem:[#allocation8 + $0x628] ss:$16 sps:$4 sm:$0xff]  }
 0x2f5   :  { %7537 = vmatprep.subr.bf16.mxu1 %v9243_v56  ;;  %v9312_v56 = vld [vmem:[#allocation8 + $0x644] ss:$16 sps:$4 sm:$0xff]  }
 0x2f7   :  { %7194 = vmatpush1.bf16.msra.mxu0 %v9238_v45  ;;  %v9315_v45 = vld [vmem:[#allocation8 + $0x64c] ss:$16 sps:$4 sm:$0xff]  }
 0x2f8   :  { %7538 = vmatpush1.bf16.msra.mxu1 %v9241_v46  ;;  %7195 = vmatprep.subr.bf16.mxu0 %v9246_v48  ;;  %v9310_v46 = vld [vmem:[#allocation8 + $0x640] ss:$16 sps:$4 sm:$0xff]   ;;  %v9313_v48 = vld [vmem:[#allocation8 + $0x648] ss:$16 sps:$4 sm:$0xff]  }
 0x2f9   :  { %7539 = vmatprep.subr.bf16.mxu1 %v9249_v49  ;;  %v9318_v49 = vld [vmem:[#allocation8 + $0x664] ss:$16 sps:$4 sm:$0xff]  }
 0x2fb   :  { %7196 = vmatpush1.bf16.msra.mxu0 %v9244_v50  ;;  %v9316_v50 = vld [vmem:[#allocation8 + $0x660] ss:$16 sps:$4 sm:$0xff]  }
 0x2fc   :  { %7540 = vmatpush1.bf16.msra.mxu1 %v9247_v51  ;;  %7197 = vmatprep.subr.bf16.mxu0 %v9252_v52  ;;  %v9319_v51 = vld [vmem:[#allocation8 + $0x668] ss:$16 sps:$4 sm:$0xff]   ;;  %v9324_v52 = vld [vmem:[#allocation8 + $0x684] ss:$16 sps:$4 sm:$0xff]  }
 0x2fd   :  { %7541 = vmatprep.subr.bf16.mxu1 %v9255_v55  ;;  %v9327_v55 = vld [vmem:[#allocation8 + $0x68c] ss:$16 sps:$4 sm:$0xff]  }
 0x2ff   :  { %7198 = vmatpush1.bf16.msra.mxu0 %v9250_v57  ;;  %v9325_v57 = vld [vmem:[#allocation8 + $0x688] ss:$16 sps:$4 sm:$0xff]  }
 0x300   :  { %7542 = vmatpush1.bf16.msra.mxu1 %v9253_v0  ;;  %7199 = vmatprep.subr.bf16.mxu0 %v9258_v1  ;;  %v9330_v0 = vld [vmem:[#allocation8 + $0x6a4] ss:$16 sps:$4 sm:$0xff]   ;;  %v9333_v1 = vld [vmem:[#allocation8 + $0x6ac] ss:$16 sps:$4 sm:$0xff]  }
 0x301   :  { %7543 = vmatprep.subr.bf16.mxu1 %v9261_v2  ;;  %v656_v2 = vrot.slane %v10118_v34, %v623_v22  ;;  %v9339_v22 = vld [vmem:[#allocation8 + $0x6cc] ss:$16 sps:$4 sm:$0xff]  }
 0x303   :  { %7200 = vmatpush1.bf16.msra.mxu0 %v9256_v4  ;;  %v664_v4 = vrot.slane %v10118_v34, %v631_v27 }
 0x304   :  { %7544 = vmatpush1.bf16.msra.mxu1 %v9259_v5  ;;  %7201 = vmatprep.subr.bf16.mxu0 %v9264_v59  ;;  %v660_v5 = vrot.slane %v10118_v34, %v627_v28  ;;  %v9328_v59 = vld [vmem:[#allocation8 + $0x6a0] ss:$16 sps:$4 sm:$0xff]  }
 0x305   :  { %7545 = vmatprep.subr.bf16.mxu1 %v9267_v6  ;;  %v668_v6 = vrot.slane %v10118_v34, %v635_v31  ;;  %v9334_v28 = vld [vmem:[#allocation8 + $0x6c0] ss:$16 sps:$4 sm:$0xff]   ;;  %v9337_v34 = vld [vmem:[#allocation8 + $0x6c8] ss:$16 sps:$4 sm:$0xff]  }
 0x307   :  { %7202 = vmatpush1.bf16.msra.mxu0 %v9262_v7  ;;  %v9331_v7 = vld [vmem:[#allocation8 + $0x6a8] ss:$16 sps:$4 sm:$0xff]  }
 0x308   :  { %7546 = vmatpush1.bf16.msra.mxu1 %v9265_v8  ;;  %7203 = vmatprep.subr.bf16.mxu0 %v9270_v9  ;;  %v9336_v8 = vld [vmem:[#allocation8 + $0x6c4] ss:$16 sps:$4 sm:$0xff]  }
 0x309   :  { %7547 = vmatprep.subr.bf16.mxu1 %v9273_v10 }
 0x30b   :  { %7204 = vmatpush1.bf16.msra.mxu0 %v9268_v24 }
 0x30c   :  { %7548 = vmatpush1.bf16.msra.mxu1 %v9271_v29  ;;  %7205 = vmatprep.subr.bf16.mxu0 %v9276_v11 }
 0x30d   :  { %7549 = vmatprep.subr.bf16.mxu1 %v9279_v12 }
 0x30f   :  { %7206 = vmatpush1.bf16.msra.mxu0 %v9274_v13 }
 0x310   :  { %7550 = vmatpush1.bf16.msra.mxu1 %v9277_v62  ;;  %7207 = vmatprep.subr.bf16.mxu0 %v9282_v14 }
 0x311   :  { %7551 = vmatprep.subr.bf16.mxu1 %v9285_v15  ;;  %v9342_v15 = vld [vmem:[#allocation8 + $0x6e4] ss:$16 sps:$4 sm:$0xff]  }
 0x313   :  { %7208 = vmatpush1.bf16.msra.mxu0 %v9280_v16 }
 0x314   :  { %7552 = vmatpush1.bf16.msra.mxu1 %v9283_v17  ;;  %7209 = vmatprep.subr.bf16.mxu0 %v9288_v18 }
 0x315   :  { %7553 = vmatprep.subr.bf16.mxu1 %v9291_v19  ;;  %v9345_v19 = vld [vmem:[#allocation8 + $0x6ec] ss:$16 sps:$4 sm:$0xff]  }
 0x317   :  { %7210 = vmatpush1.bf16.msra.mxu0 %v9286_v20 }
 0x318   :  { %7554 = vmatpush1.bf16.msra.mxu1 %v9289_v21  ;;  %7211 = vmatprep.subr.bf16.mxu0 %v9294_v58 }
 0x319   :  { %7555 = vmatprep.subr.bf16.mxu1 %v9297_v23 }
 0x31b   :  { %7212 = vmatpush1.bf16.msra.mxu0 %v9292_v26 }
 0x31c   :  { %7556 = vmatpush1.bf16.msra.mxu1 %v9295_v32  ;;  %7224 = vmatprep.subr.bf16.mxu0 %v9300_v3 }
 0x31d   :  { %7568 = vmatprep.subr.bf16.mxu1 %v9303_v38  ;;  %v9340_v38 = vld [vmem:[#allocation8 + $0x6e0] ss:$16 sps:$4 sm:$0xff]  }
 0x31e   :  { %7214 = vmatmul.mubr.bf16.vlgmr.msra.gmra.mrb[16].mxu0 %v10102_v33 }
 0x31f   :  { %7558 = vmatmul.mubr.bf16.vlgmr.msra.gmra.mrb[16].mxu1 %v10102_v33  ;;  %7225 = vmatpush1.bf16.msra.mxu0 %v9298_v35  ;;  %v9321_v33 = vld [vmem:[#allocation8 + $0x66c] ss:$16 sps:$4 sm:$0xff]  }
 0x320   :  { %7256 = vmatprep.mubr.bf16.mxu0 %v10108_v42  ;;  %7569 = vmatpush1.bf16.msra.mxu1 %v9301_v39 }
 0x321   :  { %7600 = vmatprep.mubr.bf16.mxu1 %v10108_v42  ;;  %7226 = vmatprep.subr.bf16.mxu0 %v9306_v40  ;;  %v9322_v42 = vld [vmem:[#allocation8 + $0x680] ss:$16 sps:$4 sm:$0xff]  }
 0x322   :  { %7570 = vmatprep.subr.bf16.mxu1 %v9309_v41  ;;  %v9343_v41 = vld [vmem:[#allocation8 + $0x6e8] ss:$16 sps:$4 sm:$0xff]  }
 0x323   :  { %7227 = vmatpush1.bf16.msra.mxu0 %v9304_v43  ;;  %v9348_v43 = vld [vmem:[#allocation8 + $0x704] ss:$16 sps:$4 sm:$0xff]  }
 0x324   :  { %7571 = vmatpush1.bf16.msra.mxu1 %v9307_v44  ;;  %7228 = vmatprep.subr.bf16.mxu0 %v9312_v56 }
 0x325   :  { %7572 = vmatprep.subr.bf16.mxu1 %v9315_v45  ;;  %v9351_v45 = vld [vmem:[#allocation8 + $0x70c] ss:$16 sps:$4 sm:$0xff]  }
 0x327   :  { %7229 = vmatpush1.bf16.msra.mxu0 %v9310_v46 }
 0x328   :  { %7573 = vmatpush1.bf16.msra.mxu1 %v9313_v48  ;;  %7230 = vmatprep.subr.bf16.mxu0 %v9318_v49  ;;  %v9346_v48 = vld [vmem:[#allocation8 + $0x700] ss:$16 sps:$4 sm:$0xff]   ;;  %v9349_v49 = vld [vmem:[#allocation8 + $0x708] ss:$16 sps:$4 sm:$0xff]  }
 0x329   :  { %7574 = vmatprep.subr.bf16.mxu1 %v9321_v33  ;;  %v9354_v33 = vld [vmem:[#allocation8 + $0x724] ss:$16 sps:$4 sm:$0xff]  }
 0x32b   :  { %7231 = vmatpush1.bf16.msra.mxu0 %v9316_v50  ;;  %v9357_v50 = vld [vmem:[#allocation8 + $0x72c] ss:$16 sps:$4 sm:$0xff]  }
 0x32c   :  { %7575 = vmatpush1.bf16.msra.mxu1 %v9319_v51  ;;  %7232 = vmatprep.subr.bf16.mxu0 %v9324_v52  ;;  %v9352_v51 = vld [vmem:[#allocation8 + $0x720] ss:$16 sps:$4 sm:$0xff]   ;;  %v9355_v52 = vld [vmem:[#allocation8 + $0x728] ss:$16 sps:$4 sm:$0xff]  }
 0x32d   :  { %7576 = vmatprep.subr.bf16.mxu1 %v9327_v55  ;;  %v9360_v55 = vld [vmem:[#allocation8 + $0x744] ss:$16 sps:$4 sm:$0xff]  }
 0x32f   :  { %7233 = vmatpush1.bf16.msra.mxu0 %v9322_v42  ;;  %v9363_v42 = vld [vmem:[#allocation8 + $0x74c] ss:$16 sps:$4 sm:$0xff]  }
 0x330   :  { %7577 = vmatpush1.bf16.msra.mxu1 %v9325_v57  ;;  %7234 = vmatprep.subr.bf16.mxu0 %v9330_v0  ;;  %v9358_v57 = vld [vmem:[#allocation8 + $0x740] ss:$16 sps:$4 sm:$0xff]   ;;  %v9361_v0 = vld [vmem:[#allocation8 + $0x748] ss:$16 sps:$4 sm:$0xff]  }
 0x331   :  { %v3858_v9 = vpop.f32.mrb[12].mxu0  ;;  %7578 = vmatprep.subr.bf16.mxu1 %v9333_v1  ;;  %v3944_v24 = vpop.f32.mrb[12].mxu1  ;;  %v9366_v1 = vld [vmem:[#allocation8 + $0x764] ss:$16 sps:$4 sm:$0xff]  }
 0x332   :  { %v8890_v10 = vadd.f32 %v3858_v9, %v656_v2  ;;  %v3860_v29 = vpop.f32.mrb[13].mxu0  ;;  %v8894_v27 = vadd.f32 %v3944_v24, %v664_v4  ;;  %v3946_v12 = vpop.f32.mrb[13].mxu1  ;;  %v9378_v9 = vld [vmem:[#allocation8 + $0x7a4] ss:$16 sps:$4 sm:$0xff]   ;;  %v9379_v24 = vld [vmem:[#allocation8 + $0x7a8] ss:$16 sps:$4 sm:$0xff]  }
 0x333   :  { %v8891_v11 = vadd.f32 %v3860_v29, %v660_v5  ;;  %v3862_v13 = vpop.f32.mrb[14].mxu0  ;;  %7235 = vmatpush1.bf16.msra.mxu0 %v9328_v59  ;;  %v8895_v62 = vadd.f32 %v3946_v12, %v668_v6  ;;  %v3948_v47 = vpop.f32.mrb[14].mxu1  ;;  %v9372_v59 = vld [vmem:[#allocation8 + $0x784] ss:$16 sps:$4 sm:$0xff]   ;;  %v9385_v12 = vld [vmem:[#allocation8 + $0x7c8] ss:$16 sps:$4 sm:$0xff]  }
 0x334   :  { %v8892_v14 = vadd.f32 %v3862_v13, %v656_v2  ;;  %7579 = vmatpush1.bf16.msra.mxu1 %v9331_v7  ;;  %v3864_v31 = vpop.f32.mrb[15].mxu0  ;;  %7236 = vmatprep.subr.bf16.mxu0 %v9336_v8  ;;  %v8896_v16 = vadd.f32 %v3948_v47, %v664_v4  ;;  %v3950_v18 = vpop.f32.mrb[15].mxu1  ;;  %v3965_v20 = vmax.f32 %v8890_v10, 0.0  ;;  %v3967_v23 = vmax.f32 %v8894_v27, 0.0  ;;  %v9369_v2 = vld [vmem:[#allocation8 + $0x76c] ss:$16 sps:$4 sm:$0xff]  }
 0x335   :  { %v8893_v17 = vadd.f32 %v3864_v31, %v660_v5  ;;  %7580 = vmatprep.subr.bf16.mxu1 %v9339_v22  ;;  %v8897_v58 = vadd.f32 %v3950_v18, %v668_v6  ;;  %v3966_v26 = vmax.f32 %v8891_v11, 0.0  ;;  %v3968_v35 = vmax.f32 %v8895_v62, 0.0  ;;  %v9364_v4 = vld [vmem:[#allocation8 + $0x760] ss:$16 sps:$4 sm:$0xff]   ;;  %v9367_v5 = vld [vmem:[#allocation8 + $0x768] ss:$16 sps:$4 sm:$0xff]  }
 0x336   :  { %v3981_v21 = vmax.f32 %v8892_v14, 0.0  ;;  %v3983_v32 = vmax.f32 %v8896_v16, 0.0  ;;  %v9375_v6 = vld [vmem:[#allocation8 + $0x78c] ss:$16 sps:$4 sm:$0xff]   ;;  %v9370_v7 = vld [vmem:[#allocation8 + $0x780] ss:$16 sps:$4 sm:$0xff]  }
 0x337   :  { %v3982_v3 = vmax.f32 %v8893_v17, 0.0  ;;  %7237 = vmatpush1.bf16.msra.mxu0 %v9334_v28  ;;  %v3984_v40 = vmax.f32 %v8897_v58, 0.0  ;;  %v9373_v8 = vld [vmem:[#allocation8 + $0x788] ss:$16 sps:$4 sm:$0xff]   ;;  %v9381_v22 = vld [vmem:[#allocation8 + $0x7ac] ss:$16 sps:$4 sm:$0xff]  }
 0x338   :  { %v10156_v39 = vpack.c.bf16 %v3981_v21, %v3965_v20  ;;  %7581 = vmatpush1.bf16.msra.mxu1 %v9337_v34  ;;  %7238 = vmatprep.subr.bf16.mxu0 %v9342_v15  ;;  %v10158_v44 = vpack.c.bf16 %v3983_v32, %v3967_v23  ;;  %v9376_v10 = vld [vmem:[#allocation8 + $0x7a0] ss:$16 sps:$4 sm:$0xff]   ;;  %v9384_v29 = vld [vmem:[#allocation8 + $0x7c4] ss:$16 sps:$4 sm:$0xff]   ;;  %v9387_v27 = vld [vmem:[#allocation8 + $0x7cc] ss:$16 sps:$4 sm:$0xff]  }
 0x339   :  { %v10160_v56 = vpack.c.bf16 %v3982_v3, %v3966_v26  ;;  %7582 = vmatprep.subr.bf16.mxu1 %v9345_v19  ;;  %v10162_v46 = vpack.c.bf16 %v3984_v40, %v3968_v35  ;;  %v9382_v11 = vld [vmem:[#allocation8 + $0x7c0] ss:$16 sps:$4 sm:$0xff]   ;;  %v9390_v13 = vld [vmem:[#allocation8 + $0x7e4] ss:$16 sps:$4 sm:$0xff]   ;;  %v9393_v28 = vld [vmem:[#allocation8 + $0x7ec] ss:$16 sps:$4 sm:$0xff]  }
 0x33a   :  { %v9388_v62 = vld [vmem:[#allocation8 + $0x7e0] ss:$16 sps:$4 sm:$0xff]   ;;  %v9391_v14 = vld [vmem:[#allocation8 + $0x7e8] ss:$16 sps:$4 sm:$0xff]   ;;  %v9396_v47 = vld [vmem:[#allocation8 + $0x804] ss:$16 sps:$4 sm:$0xff]  }
 0x33b   :  { %7239 = vmatpush1.bf16.msra.mxu0 %v9340_v38  ;;  %v9399_v31 = vld [vmem:[#allocation8 + $0x80c] ss:$16 sps:$4 sm:$0xff]   ;;  %v9394_v34 = vld [vmem:[#allocation8 + $0x800] ss:$16 sps:$4 sm:$0xff]   ;;  %v9397_v15 = vld [vmem:[#allocation8 + $0x808] ss:$16 sps:$4 sm:$0xff]  }
 0x33c   :  { %7583 = vmatpush1.bf16.msra.mxu1 %v9343_v41  ;;  %7240 = vmatprep.subr.bf16.mxu0 %v9348_v43  ;;  %v9402_v16 = vld [vmem:[#allocation8 + $0x824] ss:$16 sps:$4 sm:$0xff]   ;;  %v9405_v17 = vld [vmem:[#allocation8 + $0x82c] ss:$16 sps:$4 sm:$0xff]   ;;  %v9400_v18 = vld [vmem:[#allocation8 + $0x820] ss:$16 sps:$4 sm:$0xff]  }
 0x33d   :  { %7584 = vmatprep.subr.bf16.mxu1 %v9351_v45  ;;  %v9403_v19 = vld [vmem:[#allocation8 + $0x828] ss:$16 sps:$4 sm:$0xff]   ;;  %v9408_v20 = vld [vmem:[#allocation8 + $0x844] ss:$16 sps:$4 sm:$0xff]   ;;  %v9411_v21 = vld [vmem:[#allocation8 + $0x84c] ss:$16 sps:$4 sm:$0xff]  }
 0x33e   :  { %v9406_v58 = vld [vmem:[#allocation8 + $0x840] ss:$16 sps:$4 sm:$0xff]   ;;  %v9409_v23 = vld [vmem:[#allocation8 + $0x848] ss:$16 sps:$4 sm:$0xff]   ;;  %v9414_v26 = vld [vmem:[#allocation8 + $0x864] ss:$16 sps:$4 sm:$0xff]  }
 0x33f   :  { %7241 = vmatpush1.bf16.msra.mxu0 %v9346_v48  ;;  %v9412_v32 = vld [vmem:[#allocation8 + $0x860] ss:$16 sps:$4 sm:$0xff]   ;;  %v9415_v3 = vld [vmem:[#allocation8 + $0x868] ss:$16 sps:$4 sm:$0xff]   ;;  %v9420_v38 = vld [vmem:[#allocation8 + $0x884] ss:$16 sps:$4 sm:$0xff]  }
 0x340   :  { %7585 = vmatpush1.bf16.msra.mxu1 %v9349_v49  ;;  %7242 = vmatprep.subr.bf16.mxu0 %v9354_v33  ;;  %v9423_v35 = vld [vmem:[#allocation8 + $0x88c] ss:$16 sps:$4 sm:$0xff]   ;;  %v9421_v40 = vld [vmem:[#allocation8 + $0x888] ss:$16 sps:$4 sm:$0xff]   ;;  %v9426_v41 = vld [vmem:[#allocation8 + $0x8a4] ss:$16 sps:$4 sm:$0xff]  }
 0x341   :  { %7586 = vmatprep.subr.bf16.mxu1 %v9357_v50  ;;  %v9429_v43 = vld [vmem:[#allocation8 + $0x8ac] ss:$16 sps:$4 sm:$0xff]   ;;  %v9424_v45 = vld [vmem:[#allocation8 + $0x8a0] ss:$16 sps:$4 sm:$0xff]   ;;  %v9427_v48 = vld [vmem:[#allocation8 + $0x8a8] ss:$16 sps:$4 sm:$0xff]  }
 0x342   :  { %v9432_v49 = vld [vmem:[#allocation8 + $0x8c4] ss:$16 sps:$4 sm:$0xff]   ;;  %v9435_v33 = vld [vmem:[#allocation8 + $0x8cc] ss:$16 sps:$4 sm:$0xff]   ;;  %v9430_v50 = vld [vmem:[#allocation8 + $0x8c0] ss:$16 sps:$4 sm:$0xff]  }
 0x343   :  { %7243 = vmatpush1.bf16.msra.mxu0 %v9352_v51  ;;  %v9433_v51 = vld [vmem:[#allocation8 + $0x8c8] ss:$16 sps:$4 sm:$0xff]  }
 0x344   :  { %7587 = vmatpush1.bf16.msra.mxu1 %v9355_v52  ;;  %7244 = vmatprep.subr.bf16.mxu0 %v9360_v55  ;;  %v9438_v52 = vld [vmem:[#allocation8 + $0x8e4] ss:$16 sps:$4 sm:$0xff]   ;;  %v9441_v55 = vld [vmem:[#allocation8 + $0x8ec] ss:$16 sps:$4 sm:$0xff]  }
 0x345   :  { %7588 = vmatprep.subr.bf16.mxu1 %v9363_v42  ;;  %v9436_v42 = vld [vmem:[#allocation8 + $0x8e0] ss:$16 sps:$4 sm:$0xff]  }
 0x347   :  { %7245 = vmatpush1.bf16.msra.mxu0 %v9358_v57  ;;  %v9439_v57 = vld [vmem:[#allocation8 + $0x8e8] ss:$16 sps:$4 sm:$0xff]  }
 0x348   :  { %7589 = vmatpush1.bf16.msra.mxu1 %v9361_v0  ;;  %7246 = vmatprep.subr.bf16.mxu0 %v9366_v1  ;;  %v9444_v0 = vld [vmem:[#allocation8 + $0x904] ss:$16 sps:$4 sm:$0xff]   ;;  %v9447_v1 = vld [vmem:[#allocation8 + $0x90c] ss:$16 sps:$4 sm:$0xff]  }
 0x349   :  { %7590 = vmatprep.subr.bf16.mxu1 %v9369_v2  ;;  %v9442_v2 = vld [vmem:[#allocation8 + $0x900] ss:$16 sps:$4 sm:$0xff]  }
 0x34b   :  { %7247 = vmatpush1.bf16.msra.mxu0 %v9364_v4  ;;  %v9445_v4 = vld [vmem:[#allocation8 + $0x908] ss:$16 sps:$4 sm:$0xff]  }
 0x34c   :  { %7591 = vmatpush1.bf16.msra.mxu1 %v9367_v5  ;;  %7248 = vmatprep.subr.bf16.mxu0 %v9372_v59  ;;  %v9450_v5 = vld [vmem:[#allocation8 + $0x924] ss:$16 sps:$4 sm:$0xff]   ;;  %v9453_v59 = vld [vmem:[#allocation8 + $0x92c] ss:$16 sps:$4 sm:$0xff]  }
 0x34d   :  { %7592 = vmatprep.subr.bf16.mxu1 %v9375_v6  ;;  %v9448_v6 = vld [vmem:[#allocation8 + $0x920] ss:$16 sps:$4 sm:$0xff]  }
 0x34f   :  { %7249 = vmatpush1.bf16.msra.mxu0 %v9370_v7  ;;  %v9451_v7 = vld [vmem:[#allocation8 + $0x928] ss:$16 sps:$4 sm:$0xff]  }
 0x350   :  { %7593 = vmatpush1.bf16.msra.mxu1 %v9373_v8  ;;  %7250 = vmatprep.subr.bf16.mxu0 %v9378_v9  ;;  %v9456_v8 = vld [vmem:[#allocation8 + $0x944] ss:$16 sps:$4 sm:$0xff]   ;;  %v9459_v9 = vld [vmem:[#allocation8 + $0x94c] ss:$16 sps:$4 sm:$0xff]  }
 0x351   :  { %7594 = vmatprep.subr.bf16.mxu1 %v9381_v22  ;;  %v9454_v22 = vld [vmem:[#allocation8 + $0x940] ss:$16 sps:$4 sm:$0xff]  }
 0x353   :  { %7251 = vmatpush1.bf16.msra.mxu0 %v9376_v10  ;;  %v9457_v10 = vld [vmem:[#allocation8 + $0x948] ss:$16 sps:$4 sm:$0xff]  }
 0x354   :  { %7595 = vmatpush1.bf16.msra.mxu1 %v9379_v24  ;;  %7252 = vmatprep.subr.bf16.mxu0 %v9384_v29  ;;  %v9462_v24 = vld [vmem:[#allocation8 + $0x964] ss:$16 sps:$4 sm:$0xff]   ;;  %v9465_v29 = vld [vmem:[#allocation8 + $0x96c] ss:$16 sps:$4 sm:$0xff]  }
 0x355   :  { %7596 = vmatprep.subr.bf16.mxu1 %v9387_v27  ;;  %v9460_v27 = vld [vmem:[#allocation8 + $0x960] ss:$16 sps:$4 sm:$0xff]  }
 0x357   :  { %7253 = vmatpush1.bf16.msra.mxu0 %v9382_v11  ;;  %v9463_v11 = vld [vmem:[#allocation8 + $0x968] ss:$16 sps:$4 sm:$0xff]  }
 0x358   :  { %7597 = vmatpush1.bf16.msra.mxu1 %v9385_v12  ;;  %7254 = vmatprep.subr.bf16.mxu0 %v9390_v13  ;;  %v9468_v12 = vld [vmem:[#allocation8 + $0x984] ss:$16 sps:$4 sm:$0xff]   ;;  %v9471_v13 = vld [vmem:[#allocation8 + $0x98c] ss:$16 sps:$4 sm:$0xff]  }
 0x359   :  { %7598 = vmatprep.subr.bf16.mxu1 %v9393_v28  ;;  %v9466_v28 = vld [vmem:[#allocation8 + $0x980] ss:$16 sps:$4 sm:$0xff]  }
 0x35b   :  { %7255 = vmatpush1.bf16.msra.mxu0 %v9388_v62  ;;  %v9469_v62 = vld [vmem:[#allocation8 + $0x988] ss:$16 sps:$4 sm:$0xff]  }
 0x35c   :  { %7599 = vmatpush1.bf16.msra.mxu1 %v9391_v14  ;;  %7267 = vmatprep.subr.bf16.mxu0 %v9396_v47  ;;  %v9474_v14 = vld [vmem:[#allocation8 + $0x9a4] ss:$16 sps:$4 sm:$0xff]   ;;  %v9477_v47 = vld [vmem:[#allocation8 + $0x9ac] ss:$16 sps:$4 sm:$0xff]  }
 0x35d   :  { %7611 = vmatprep.subr.bf16.mxu1 %v9399_v31  ;;  %v9472_v31 = vld [vmem:[#allocation8 + $0x9a0] ss:$16 sps:$4 sm:$0xff]  }
 0x35e   :  { %7257 = vmatmul.mubr.bf16.vlgmr.msra.gmra.mrb[16].mxu0 %v10104_v37 }
 0x35f   :  { %7601 = vmatmul.mubr.bf16.vlgmr.msra.gmra.mrb[16].mxu1 %v10104_v37  ;;  %7268 = vmatpush1.bf16.msra.mxu0 %v9394_v34  ;;  %v9417_v37 = vld [vmem:[#allocation8 + $0x86c] ss:$16 sps:$4 sm:$0xff]   ;;  %v9475_v34 = vld [vmem:[#allocation8 + $0x9a8] ss:$16 sps:$4 sm:$0xff]  }
 0x360   :  { %7299 = vmatprep.mubr.bf16.mxu0 %v10132_v25  ;;  %7612 = vmatpush1.bf16.msra.mxu1 %v9397_v15  ;;  %v9480_v15 = vld [vmem:[#allocation8 + $0x9c4] ss:$16 sps:$4 sm:$0xff]  }
 0x361   :  { %7643 = vmatprep.mubr.bf16.mxu1 %v10132_v25  ;;  %7269 = vmatprep.subr.bf16.mxu0 %v9402_v16  ;;  %v9418_v25 = vld [vmem:[#allocation8 + $0x880] ss:$16 sps:$4 sm:$0xff]   ;;  %v9483_v16 = vld [vmem:[#allocation8 + $0x9cc] ss:$16 sps:$4 sm:$0xff]  }
 0x362   :  { %7613 = vmatprep.subr.bf16.mxu1 %v9405_v17  ;;  %v9478_v17 = vld [vmem:[#allocation8 + $0x9c0] ss:$16 sps:$4 sm:$0xff]  }
 0x363   :  { %7270 = vmatpush1.bf16.msra.mxu0 %v9400_v18  ;;  %v9481_v18 = vld [vmem:[#allocation8 + $0x9c8] ss:$16 sps:$4 sm:$0xff]  }
 0x364   :  { %7614 = vmatpush1.bf16.msra.mxu1 %v9403_v19  ;;  %7271 = vmatprep.subr.bf16.mxu0 %v9408_v20  ;;  %v9486_v19 = vld [vmem:[#allocation8 + $0x9e4] ss:$16 sps:$4 sm:$0xff]   ;;  %v9489_v20 = vld [vmem:[#allocation8 + $0x9ec] ss:$16 sps:$4 sm:$0xff]  }
 0x365   :  { %7615 = vmatprep.subr.bf16.mxu1 %v9411_v21  ;;  %v9484_v21 = vld [vmem:[#allocation8 + $0x9e0] ss:$16 sps:$4 sm:$0xff]  }
 0x367   :  { %7272 = vmatpush1.bf16.msra.mxu0 %v9406_v58  ;;  %v9487_v58 = vld [vmem:[#allocation8 + $0x9e8] ss:$16 sps:$4 sm:$0xff]  }
 0x368   :  { %7616 = vmatpush1.bf16.msra.mxu1 %v9409_v23  ;;  %7273 = vmatprep.subr.bf16.mxu0 %v9414_v26  ;;  %v9492_v23 = vld [vmem:[#allocation8 + $0xa04] ss:$16 sps:$4 sm:$0xff]   ;;  %v9495_v26 = vld [vmem:[#allocation8 + $0xa0c] ss:$16 sps:$4 sm:$0xff]  }
 0x369   :  { %7617 = vmatprep.subr.bf16.mxu1 %v9417_v37  ;;  %v9490_v37 = vld [vmem:[#allocation8 + $0xa00] ss:$16 sps:$4 sm:$0xff]  }
 0x36b   :  { %7274 = vmatpush1.bf16.msra.mxu0 %v9412_v32  ;;  %v9493_v32 = vld [vmem:[#allocation8 + $0xa08] ss:$16 sps:$4 sm:$0xff]  }
 0x36c   :  { %7618 = vmatpush1.bf16.msra.mxu1 %v9415_v3  ;;  %7275 = vmatprep.subr.bf16.mxu0 %v9420_v38  ;;  %v9498_v3 = vld [vmem:[#allocation8 + $0xa24] ss:$16 sps:$4 sm:$0xff]   ;;  %v9501_v38 = vld [vmem:[#allocation8 + $0xa2c] ss:$16 sps:$4 sm:$0xff]  }
 0x36d   :  { %7619 = vmatprep.subr.bf16.mxu1 %v9423_v35  ;;  %v9496_v35 = vld [vmem:[#allocation8 + $0xa20] ss:$16 sps:$4 sm:$0xff]  }
 0x36f   :  { %7276 = vmatpush1.bf16.msra.mxu0 %v9418_v25  ;;  %v9499_v25 = vld [vmem:[#allocation8 + $0xa28] ss:$16 sps:$4 sm:$0xff]  }
 0x370   :  { %7620 = vmatpush1.bf16.msra.mxu1 %v9421_v40  ;;  %7277 = vmatprep.subr.bf16.mxu0 %v9426_v41  ;;  %v9504_v40 = vld [vmem:[#allocation8 + $0xa44] ss:$16 sps:$4 sm:$0xff]   ;;  %v9507_v41 = vld [vmem:[#allocation8 + $0xa4c] ss:$16 sps:$4 sm:$0xff]  }
 0x371   :  { %7621 = vmatprep.subr.bf16.mxu1 %v9429_v43  ;;  %v9502_v43 = vld [vmem:[#allocation8 + $0xa40] ss:$16 sps:$4 sm:$0xff]  }
 0x373   :  { %7278 = vmatpush1.bf16.msra.mxu0 %v9424_v45  ;;  %v9505_v45 = vld [vmem:[#allocation8 + $0xa48] ss:$16 sps:$4 sm:$0xff]  }
 0x374   :  { %7622 = vmatpush1.bf16.msra.mxu1 %v9427_v48  ;;  %7279 = vmatprep.subr.bf16.mxu0 %v9432_v49  ;;  %v9510_v48 = vld [vmem:[#allocation8 + $0xa64] ss:$16 sps:$4 sm:$0xff]   ;;  %v9508_v49 = vld [vmem:[#allocation8 + $0xa60] ss:$16 sps:$4 sm:$0xff]  }
 0x375   :  { %7623 = vmatprep.subr.bf16.mxu1 %v9435_v33  ;;  %v9511_v33 = vld [vmem:[#allocation8 + $0xa68] ss:$16 sps:$4 sm:$0xff]  }
 0x377   :  { %7280 = vmatpush1.bf16.msra.mxu0 %v9430_v50  ;;  %v9516_v50 = vld [vmem:[#allocation8 + $0xa84] ss:$16 sps:$4 sm:$0xff]  }
 0x378   :  { %7624 = vmatpush1.bf16.msra.mxu1 %v9433_v51  ;;  %7281 = vmatprep.subr.bf16.mxu0 %v9438_v52  ;;  %v9519_v51 = vld [vmem:[#allocation8 + $0xa8c] ss:$16 sps:$4 sm:$0xff]   ;;  %v9517_v52 = vld [vmem:[#allocation8 + $0xa88] ss:$16 sps:$4 sm:$0xff]  }
 0x379   :  { %7625 = vmatprep.subr.bf16.mxu1 %v9441_v55  ;;  %v9522_v55 = vld [vmem:[#allocation8 + $0xaa4] ss:$16 sps:$4 sm:$0xff]  }
 0x37b   :  { %7282 = vmatpush1.bf16.msra.mxu0 %v9436_v42  ;;  %v9525_v42 = vld [vmem:[#allocation8 + $0xaac] ss:$16 sps:$4 sm:$0xff]  }
 0x37c   :  { %7626 = vmatpush1.bf16.msra.mxu1 %v9439_v57  ;;  %7283 = vmatprep.subr.bf16.mxu0 %v9444_v0  ;;  %v9520_v57 = vld [vmem:[#allocation8 + $0xaa0] ss:$16 sps:$4 sm:$0xff]   ;;  %v9523_v0 = vld [vmem:[#allocation8 + $0xaa8] ss:$16 sps:$4 sm:$0xff]  }
 0x37d   :  { %7627 = vmatprep.subr.bf16.mxu1 %v9447_v1  ;;  %v9528_v1 = vld [vmem:[#allocation8 + $0xac4] ss:$16 sps:$4 sm:$0xff]  }
 0x37f   :  { %7284 = vmatpush1.bf16.msra.mxu0 %v9442_v2  ;;  %v9531_v2 = vld [vmem:[#allocation8 + $0xacc] ss:$16 sps:$4 sm:$0xff]  }
 0x380   :  { %7628 = vmatpush1.bf16.msra.mxu1 %v9445_v4  ;;  %7285 = vmatprep.subr.bf16.mxu0 %v9450_v5  ;;  %v9526_v4 = vld [vmem:[#allocation8 + $0xac0] ss:$16 sps:$4 sm:$0xff]   ;;  %v9529_v5 = vld [vmem:[#allocation8 + $0xac8] ss:$16 sps:$4 sm:$0xff]  }
 0x381   :  { %7629 = vmatprep.subr.bf16.mxu1 %v9453_v59  ;;  %v9534_v59 = vld [vmem:[#allocation8 + $0xae4] ss:$16 sps:$4 sm:$0xff]  }
 0x383   :  { %7286 = vmatpush1.bf16.msra.mxu0 %v9448_v6  ;;  %v9537_v6 = vld [vmem:[#allocation8 + $0xaec] ss:$16 sps:$4 sm:$0xff]  }
 0x384   :  { %7630 = vmatpush1.bf16.msra.mxu1 %v9451_v7  ;;  %7287 = vmatprep.subr.bf16.mxu0 %v9456_v8  ;;  %v9532_v7 = vld [vmem:[#allocation8 + $0xae0] ss:$16 sps:$4 sm:$0xff]   ;;  %v9535_v8 = vld [vmem:[#allocation8 + $0xae8] ss:$16 sps:$4 sm:$0xff]  }
 0x385   :  { %7631 = vmatprep.subr.bf16.mxu1 %v9459_v9  ;;  %v9540_v9 = vld [vmem:[#allocation8 + $0xb04] ss:$16 sps:$4 sm:$0xff]  }
 0x387   :  { %7288 = vmatpush1.bf16.msra.mxu0 %v9454_v22  ;;  %v9543_v22 = vld [vmem:[#allocation8 + $0xb0c] ss:$16 sps:$4 sm:$0xff]  }
 0x388   :  { %7632 = vmatpush1.bf16.msra.mxu1 %v9457_v10  ;;  %7289 = vmatprep.subr.bf16.mxu0 %v9462_v24  ;;  %v9538_v10 = vld [vmem:[#allocation8 + $0xb00] ss:$16 sps:$4 sm:$0xff]   ;;  %v9541_v24 = vld [vmem:[#allocation8 + $0xb08] ss:$16 sps:$4 sm:$0xff]  }
 0x389   :  { %7633 = vmatprep.subr.bf16.mxu1 %v9465_v29  ;;  %v9546_v29 = vld [vmem:[#allocation8 + $0xb24] ss:$16 sps:$4 sm:$0xff]  }
 0x38b   :  { %7290 = vmatpush1.bf16.msra.mxu0 %v9460_v27  ;;  %v9549_v27 = vld [vmem:[#allocation8 + $0xb2c] ss:$16 sps:$4 sm:$0xff]  }
 0x38c   :  { %7634 = vmatpush1.bf16.msra.mxu1 %v9463_v11  ;;  %7291 = vmatprep.subr.bf16.mxu0 %v9468_v12  ;;  %v9544_v11 = vld [vmem:[#allocation8 + $0xb20] ss:$16 sps:$4 sm:$0xff]   ;;  %v9547_v12 = vld [vmem:[#allocation8 + $0xb28] ss:$16 sps:$4 sm:$0xff]  }
 0x38d   :  { %7635 = vmatprep.subr.bf16.mxu1 %v9471_v13  ;;  %v9552_v13 = vld [vmem:[#allocation8 + $0xb44] ss:$16 sps:$4 sm:$0xff]  }
 0x38f   :  { %7292 = vmatpush1.bf16.msra.mxu0 %v9466_v28  ;;  %v9555_v28 = vld [vmem:[#allocation8 + $0xb4c] ss:$16 sps:$4 sm:$0xff]  }
 0x390   :  { %7636 = vmatpush1.bf16.msra.mxu1 %v9469_v62  ;;  %7293 = vmatprep.subr.bf16.mxu0 %v9474_v14  ;;  %v9550_v62 = vld [vmem:[#allocation8 + $0xb40] ss:$16 sps:$4 sm:$0xff]   ;;  %v9553_v14 = vld [vmem:[#allocation8 + $0xb48] ss:$16 sps:$4 sm:$0xff]  }
 0x391   :  { %7637 = vmatprep.subr.bf16.mxu1 %v9477_v47  ;;  %v9558_v47 = vld [vmem:[#allocation8 + $0xb64] ss:$16 sps:$4 sm:$0xff]  }
 0x393   :  { %7294 = vmatpush1.bf16.msra.mxu0 %v9472_v31  ;;  %v9561_v31 = vld [vmem:[#allocation8 + $0xb6c] ss:$16 sps:$4 sm:$0xff]  }
 0x394   :  { %7638 = vmatpush1.bf16.msra.mxu1 %v9475_v34  ;;  %7295 = vmatprep.subr.bf16.mxu0 %v9480_v15  ;;  %v9556_v34 = vld [vmem:[#allocation8 + $0xb60] ss:$16 sps:$4 sm:$0xff]   ;;  %v9559_v15 = vld [vmem:[#allocation8 + $0xb68] ss:$16 sps:$4 sm:$0xff]  }
 0x395   :  { %7639 = vmatprep.subr.bf16.mxu1 %v9483_v16  ;;  %v9564_v16 = vld [vmem:[#allocation8 + $0xb84] ss:$16 sps:$4 sm:$0xff]  }
 0x397   :  { %7296 = vmatpush1.bf16.msra.mxu0 %v9478_v17  ;;  %v9567_v17 = vld [vmem:[#allocation8 + $0xb8c] ss:$16 sps:$4 sm:$0xff]  }
 0x398   :  { %7640 = vmatpush1.bf16.msra.mxu1 %v9481_v18  ;;  %7297 = vmatprep.subr.bf16.mxu0 %v9486_v19  ;;  %v9562_v18 = vld [vmem:[#allocation8 + $0xb80] ss:$16 sps:$4 sm:$0xff]   ;;  %v9565_v19 = vld [vmem:[#allocation8 + $0xb88] ss:$16 sps:$4 sm:$0xff]  }
 0x399   :  { %7641 = vmatprep.subr.bf16.mxu1 %v9489_v20  ;;  %v9570_v20 = vld [vmem:[#allocation8 + $0xba4] ss:$16 sps:$4 sm:$0xff]  }
 0x39b   :  { %7298 = vmatpush1.bf16.msra.mxu0 %v9484_v21  ;;  %v9573_v21 = vld [vmem:[#allocation8 + $0xbac] ss:$16 sps:$4 sm:$0xff]  }
 0x39c   :  { %7642 = vmatpush1.bf16.msra.mxu1 %v9487_v58  ;;  %7310 = vmatprep.subr.bf16.mxu0 %v9492_v23  ;;  %v9568_v58 = vld [vmem:[#allocation8 + $0xba0] ss:$16 sps:$4 sm:$0xff]   ;;  %v9571_v23 = vld [vmem:[#allocation8 + $0xba8] ss:$16 sps:$4 sm:$0xff]  }
 0x39d   :  { %7654 = vmatprep.subr.bf16.mxu1 %v9495_v26  ;;  %v9576_v26 = vld [vmem:[#allocation8 + $0xbc4] ss:$16 sps:$4 sm:$0xff]  }
 0x39e   :  { %7300 = vmatmul.mubr.bf16.vlgmr.msra.gmra.mrb[16].mxu0 %v10128_v36 }
 0x39f   :  { %7644 = vmatmul.mubr.bf16.vlgmr.msra.gmra.mrb[16].mxu1 %v10128_v36  ;;  %7311 = vmatpush1.bf16.msra.mxu0 %v9490_v37  ;;  %v9513_v36 = vld [vmem:[#allocation8 + $0xa6c] ss:$16 sps:$4 sm:$0xff]  }
 0x3a0   :  { %7342 = vmatprep.mubr.bf16.mxu0 %v10134_v30  ;;  %7655 = vmatpush1.bf16.msra.mxu1 %v9493_v32  ;;  %v9579_v37 = vld [vmem:[#allocation8 + $0xbcc] ss:$16 sps:$4 sm:$0xff]   ;;  %v9574_v32 = vld [vmem:[#allocation8 + $0xbc0] ss:$16 sps:$4 sm:$0xff]  }
 0x3a1   :  { %7686 = vmatprep.mubr.bf16.mxu1 %v10134_v30  ;;  %7312 = vmatprep.subr.bf16.mxu0 %v9498_v3  ;;  %v9514_v30 = vld [vmem:[#allocation8 + $0xa80] ss:$16 sps:$4 sm:$0xff]   ;;  %v9577_v3 = vld [vmem:[#allocation8 + $0xbc8] ss:$16 sps:$4 sm:$0xff]  }
 0x3a2   :  { %7656 = vmatprep.subr.bf16.mxu1 %v9501_v38  ;;  %v9582_v38 = vld [vmem:[#allocation8 + $0xbe4] ss:$16 sps:$4 sm:$0xff]  }
 0x3a3   :  { %7313 = vmatpush1.bf16.msra.mxu0 %v9496_v35  ;;  %v9585_v35 = vld [vmem:[#allocation8 + $0xbec] ss:$16 sps:$4 sm:$0xff]  }
 0x3a4   :  { %7657 = vmatpush1.bf16.msra.mxu1 %v9499_v25  ;;  %7314 = vmatprep.subr.bf16.mxu0 %v9504_v40  ;;  %v9580_v25 = vld [vmem:[#allocation8 + $0xbe0] ss:$16 sps:$4 sm:$0xff]   ;;  %v9583_v40 = vld [vmem:[#allocation8 + $0xbe8] ss:$16 sps:$4 sm:$0xff]  }
 0x3a5   :  { %7658 = vmatprep.subr.bf16.mxu1 %v9507_v41  ;;  %v9588_v41 = vld [vmem:[#allocation8 + $0xc04] ss:$16 sps:$4 sm:$0xff]  }
 0x3a7   :  { %7315 = vmatpush1.bf16.msra.mxu0 %v9502_v43  ;;  %v9591_v43 = vld [vmem:[#allocation8 + $0xc0c] ss:$16 sps:$4 sm:$0xff]  }
 0x3a8   :  { %7659 = vmatpush1.bf16.msra.mxu1 %v9505_v45  ;;  %7316 = vmatprep.subr.bf16.mxu0 %v9510_v48  ;;  %v9586_v45 = vld [vmem:[#allocation8 + $0xc00] ss:$16 sps:$4 sm:$0xff]   ;;  %v9589_v48 = vld [vmem:[#allocation8 + $0xc08] ss:$16 sps:$4 sm:$0xff]  }
 0x3a9   :  { %7660 = vmatprep.subr.bf16.mxu1 %v9513_v36  ;;  %v9594_v36 = vld [vmem:[#allocation8 + $0xc24] ss:$16 sps:$4 sm:$0xff]  }
 0x3ab   :  { %7317 = vmatpush1.bf16.msra.mxu0 %v9508_v49  ;;  %v9597_v49 = vld [vmem:[#allocation8 + $0xc2c] ss:$16 sps:$4 sm:$0xff]  }
 0x3ac   :  { %7661 = vmatpush1.bf16.msra.mxu1 %v9511_v33  ;;  %7318 = vmatprep.subr.bf16.mxu0 %v9516_v50  ;;  %v9592_v33 = vld [vmem:[#allocation8 + $0xc20] ss:$16 sps:$4 sm:$0xff]   ;;  %v9595_v50 = vld [vmem:[#allocation8 + $0xc28] ss:$16 sps:$4 sm:$0xff]  }
 0x3ad   :  { %7662 = vmatprep.subr.bf16.mxu1 %v9519_v51  ;;  %v9600_v51 = vld [vmem:[#allocation8 + $0xc44] ss:$16 sps:$4 sm:$0xff]  }
 0x3af   :  { %7319 = vmatpush1.bf16.msra.mxu0 %v9514_v30  ;;  %v9603_v30 = vld [vmem:[#allocation8 + $0xc4c] ss:$16 sps:$4 sm:$0xff]  }
 0x3b0   :  { %7663 = vmatpush1.bf16.msra.mxu1 %v9517_v52  ;;  %7320 = vmatprep.subr.bf16.mxu0 %v9522_v55  ;;  %v9598_v52 = vld [vmem:[#allocation8 + $0xc40] ss:$16 sps:$4 sm:$0xff]   ;;  %v9601_v55 = vld [vmem:[#allocation8 + $0xc48] ss:$16 sps:$4 sm:$0xff]  }
 0x3b1   :  { %7664 = vmatprep.subr.bf16.mxu1 %v9525_v42  ;;  %v9606_v42 = vld [vmem:[#allocation8 + $0xc64] ss:$16 sps:$4 sm:$0xff]  }
 0x3b3   :  { %7321 = vmatpush1.bf16.msra.mxu0 %v9520_v57  ;;  %v9604_v57 = vld [vmem:[#allocation8 + $0xc60] ss:$16 sps:$4 sm:$0xff]  }
 0x3b4   :  { %7665 = vmatpush1.bf16.msra.mxu1 %v9523_v0  ;;  %7322 = vmatprep.subr.bf16.mxu0 %v9528_v1  ;;  %v9607_v0 = vld [vmem:[#allocation8 + $0xc68] ss:$16 sps:$4 sm:$0xff]   ;;  %v9612_v1 = vld [vmem:[#allocation8 + $0xc84] ss:$16 sps:$4 sm:$0xff]  }
 0x3b5   :  { %7666 = vmatprep.subr.bf16.mxu1 %v9531_v2  ;;  %v9615_v2 = vld [vmem:[#allocation8 + $0xc8c] ss:$16 sps:$4 sm:$0xff]  }
 0x3b7   :  { %7323 = vmatpush1.bf16.msra.mxu0 %v9526_v4  ;;  %v9613_v4 = vld [vmem:[#allocation8 + $0xc88] ss:$16 sps:$4 sm:$0xff]  }
 0x3b8   :  { %7667 = vmatpush1.bf16.msra.mxu1 %v9529_v5  ;;  %7324 = vmatprep.subr.bf16.mxu0 %v9534_v59  ;;  %v9618_v5 = vld [vmem:[#allocation8 + $0xca4] ss:$16 sps:$4 sm:$0xff]   ;;  %v9621_v59 = vld [vmem:[#allocation8 + $0xcac] ss:$16 sps:$4 sm:$0xff]  }
 0x3b9   :  { %7668 = vmatprep.subr.bf16.mxu1 %v9537_v6  ;;  %v9616_v6 = vld [vmem:[#allocation8 + $0xca0] ss:$16 sps:$4 sm:$0xff]  }
 0x3bb   :  { %7325 = vmatpush1.bf16.msra.mxu0 %v9532_v7  ;;  %v9619_v7 = vld [vmem:[#allocation8 + $0xca8] ss:$16 sps:$4 sm:$0xff]  }
 0x3bc   :  { %7669 = vmatpush1.bf16.msra.mxu1 %v9535_v8  ;;  %7326 = vmatprep.subr.bf16.mxu0 %v9540_v9  ;;  %v9624_v8 = vld [vmem:[#allocation8 + $0xcc4] ss:$16 sps:$4 sm:$0xff]   ;;  %v9627_v9 = vld [vmem:[#allocation8 + $0xccc] ss:$16 sps:$4 sm:$0xff]  }
 0x3bd   :  { %7670 = vmatprep.subr.bf16.mxu1 %v9543_v22  ;;  %v9622_v22 = vld [vmem:[#allocation8 + $0xcc0] ss:$16 sps:$4 sm:$0xff]  }
 0x3bf   :  { %7327 = vmatpush1.bf16.msra.mxu0 %v9538_v10  ;;  %v9625_v10 = vld [vmem:[#allocation8 + $0xcc8] ss:$16 sps:$4 sm:$0xff]  }
 0x3c0   :  { %7671 = vmatpush1.bf16.msra.mxu1 %v9541_v24  ;;  %7328 = vmatprep.subr.bf16.mxu0 %v9546_v29  ;;  %v9630_v24 = vld [vmem:[#allocation8 + $0xce4] ss:$16 sps:$4 sm:$0xff]   ;;  %v9633_v29 = vld [vmem:[#allocation8 + $0xcec] ss:$16 sps:$4 sm:$0xff]  }
 0x3c1   :  { %7672 = vmatprep.subr.bf16.mxu1 %v9549_v27  ;;  %v9628_v27 = vld [vmem:[#allocation8 + $0xce0] ss:$16 sps:$4 sm:$0xff]  }
 0x3c3   :  { %7329 = vmatpush1.bf16.msra.mxu0 %v9544_v11  ;;  %v9631_v11 = vld [vmem:[#allocation8 + $0xce8] ss:$16 sps:$4 sm:$0xff]  }
 0x3c4   :  { %7673 = vmatpush1.bf16.msra.mxu1 %v9547_v12  ;;  %7330 = vmatprep.subr.bf16.mxu0 %v9552_v13  ;;  %v9636_v12 = vld [vmem:[#allocation8 + $0xd04] ss:$16 sps:$4 sm:$0xff]   ;;  %v9639_v13 = vld [vmem:[#allocation8 + $0xd0c] ss:$16 sps:$4 sm:$0xff]  }
 0x3c5   :  { %7674 = vmatprep.subr.bf16.mxu1 %v9555_v28  ;;  %v9634_v28 = vld [vmem:[#allocation8 + $0xd00] ss:$16 sps:$4 sm:$0xff]  }
 0x3c7   :  { %7331 = vmatpush1.bf16.msra.mxu0 %v9550_v62  ;;  %v9637_v62 = vld [vmem:[#allocation8 + $0xd08] ss:$16 sps:$4 sm:$0xff]  }
 0x3c8   :  { %7675 = vmatpush1.bf16.msra.mxu1 %v9553_v14  ;;  %7332 = vmatprep.subr.bf16.mxu0 %v9558_v47  ;;  %v9642_v14 = vld [vmem:[#allocation8 + $0xd24] ss:$16 sps:$4 sm:$0xff]   ;;  %v9645_v47 = vld [vmem:[#allocation8 + $0xd2c] ss:$16 sps:$4 sm:$0xff]  }
 0x3c9   :  { %7676 = vmatprep.subr.bf16.mxu1 %v9561_v31  ;;  %v9640_v31 = vld [vmem:[#allocation8 + $0xd20] ss:$16 sps:$4 sm:$0xff]  }
 0x3cb   :  { %7333 = vmatpush1.bf16.msra.mxu0 %v9556_v34  ;;  %v9643_v34 = vld [vmem:[#allocation8 + $0xd28] ss:$16 sps:$4 sm:$0xff]  }
 0x3cc   :  { %7677 = vmatpush1.bf16.msra.mxu1 %v9559_v15  ;;  %7334 = vmatprep.subr.bf16.mxu0 %v9564_v16  ;;  %v9648_v15 = vld [vmem:[#allocation8 + $0xd44] ss:$16 sps:$4 sm:$0xff]   ;;  %v9651_v16 = vld [vmem:[#allocation8 + $0xd4c] ss:$16 sps:$4 sm:$0xff]  }
 0x3cd   :  { %7678 = vmatprep.subr.bf16.mxu1 %v9567_v17  ;;  %v9646_v17 = vld [vmem:[#allocation8 + $0xd40] ss:$16 sps:$4 sm:$0xff]  }
 0x3cf   :  { %7335 = vmatpush1.bf16.msra.mxu0 %v9562_v18  ;;  %v9649_v18 = vld [vmem:[#allocation8 + $0xd48] ss:$16 sps:$4 sm:$0xff]  }
 0x3d0   :  { %7679 = vmatpush1.bf16.msra.mxu1 %v9565_v19  ;;  %7336 = vmatprep.subr.bf16.mxu0 %v9570_v20  ;;  %v9654_v19 = vld [vmem:[#allocation8 + $0xd64] ss:$16 sps:$4 sm:$0xff]   ;;  %v9657_v20 = vld [vmem:[#allocation8 + $0xd6c] ss:$16 sps:$4 sm:$0xff]  }
 0x3d1   :  { %7680 = vmatprep.subr.bf16.mxu1 %v9573_v21  ;;  %v9652_v21 = vld [vmem:[#allocation8 + $0xd60] ss:$16 sps:$4 sm:$0xff]  }
 0x3d3   :  { %7337 = vmatpush1.bf16.msra.mxu0 %v9568_v58  ;;  %v9655_v58 = vld [vmem:[#allocation8 + $0xd68] ss:$16 sps:$4 sm:$0xff]  }
 0x3d4   :  { %7681 = vmatpush1.bf16.msra.mxu1 %v9571_v23  ;;  %7338 = vmatprep.subr.bf16.mxu0 %v9576_v26  ;;  %v9660_v23 = vld [vmem:[#allocation8 + $0xd84] ss:$16 sps:$4 sm:$0xff]   ;;  %v9663_v26 = vld [vmem:[#allocation8 + $0xd8c] ss:$16 sps:$4 sm:$0xff]  }
 0x3d5   :  { %7682 = vmatprep.subr.bf16.mxu1 %v9579_v37  ;;  %v9658_v37 = vld [vmem:[#allocation8 + $0xd80] ss:$16 sps:$4 sm:$0xff]  }
 0x3d7   :  { %7339 = vmatpush1.bf16.msra.mxu0 %v9574_v32  ;;  %v9661_v32 = vld [vmem:[#allocation8 + $0xd88] ss:$16 sps:$4 sm:$0xff]  }
 0x3d8   :  { %7683 = vmatpush1.bf16.msra.mxu1 %v9577_v3  ;;  %7340 = vmatprep.subr.bf16.mxu0 %v9582_v38  ;;  %v9666_v3 = vld [vmem:[#allocation8 + $0xda4] ss:$16 sps:$4 sm:$0xff]   ;;  %v9669_v38 = vld [vmem:[#allocation8 + $0xdac] ss:$16 sps:$4 sm:$0xff]  }
 0x3d9   :  { %7684 = vmatprep.subr.bf16.mxu1 %v9585_v35  ;;  %v9664_v35 = vld [vmem:[#allocation8 + $0xda0] ss:$16 sps:$4 sm:$0xff]  }
 0x3db   :  { %7341 = vmatpush1.bf16.msra.mxu0 %v9580_v25  ;;  %v9667_v25 = vld [vmem:[#allocation8 + $0xda8] ss:$16 sps:$4 sm:$0xff]  }
 0x3dc   :  { %7685 = vmatpush1.bf16.msra.mxu1 %v9583_v40  ;;  %7353 = vmatprep.subr.bf16.mxu0 %v9588_v41  ;;  %v9672_v40 = vld [vmem:[#allocation8 + $0xdc4] ss:$16 sps:$4 sm:$0xff]   ;;  %v9675_v41 = vld [vmem:[#allocation8 + $0xdcc] ss:$16 sps:$4 sm:$0xff]  }
 0x3dd   :  { %7697 = vmatprep.subr.bf16.mxu1 %v9591_v43  ;;  %v9670_v43 = vld [vmem:[#allocation8 + $0xdc0] ss:$16 sps:$4 sm:$0xff]  }
 0x3de   :  { %7343 = vmatmul.mubr.bf16.vlgmr.msra.gmra.mrb[16].mxu0 %v10130_v53 }
 0x3df   :  { %7687 = vmatmul.mubr.bf16.vlgmr.msra.gmra.mrb[16].mxu1 %v10130_v53  ;;  %7354 = vmatpush1.bf16.msra.mxu0 %v9586_v45  ;;  %v9609_v53 = vld [vmem:[#allocation8 + $0xc6c] ss:$16 sps:$4 sm:$0xff]   ;;  %v9673_v45 = vld [vmem:[#allocation8 + $0xdc8] ss:$16 sps:$4 sm:$0xff]  }
 0x3e0   :  { %7385 = vmatprep.mubr.bf16.mxu0 %v10160_v56  ;;  %7698 = vmatpush1.bf16.msra.mxu1 %v9589_v48  ;;  %v9678_v48 = vld [vmem:[#allocation8 + $0xde4] ss:$16 sps:$4 sm:$0xff]  }
 0x3e1   :  { %7729 = vmatprep.mubr.bf16.mxu1 %v10160_v56  ;;  %7355 = vmatprep.subr.bf16.mxu0 %v9594_v36  ;;  %v9610_v56 = vld [vmem:[#allocation8 + $0xc80] ss:$16 sps:$4 sm:$0xff]   ;;  %v9681_v36 = vld [vmem:[#allocation8 + $0xdec] ss:$16 sps:$4 sm:$0xff]  }
 0x3e2   :  { %7699 = vmatprep.subr.bf16.mxu1 %v9597_v49  ;;  %v9676_v49 = vld [vmem:[#allocation8 + $0xde0] ss:$16 sps:$4 sm:$0xff]  }
 0x3e3   :  { %7356 = vmatpush1.bf16.msra.mxu0 %v9592_v33  ;;  %v9679_v33 = vld [vmem:[#allocation8 + $0xde8] ss:$16 sps:$4 sm:$0xff]  }
 0x3e4   :  { %7700 = vmatpush1.bf16.msra.mxu1 %v9595_v50  ;;  %7357 = vmatprep.subr.bf16.mxu0 %v9600_v51  ;;  %v9684_v50 = vld [vmem:[#allocation8 + $0xe04] ss:$16 sps:$4 sm:$0xff]   ;;  %v9687_v51 = vld [vmem:[#allocation8 + $0xe0c] ss:$16 sps:$4 sm:$0xff]  }
 0x3e5   :  { %7701 = vmatprep.subr.bf16.mxu1 %v9603_v30  ;;  %v9682_v30 = vld [vmem:[#allocation8 + $0xe00] ss:$16 sps:$4 sm:$0xff]  }
 0x3e7   :  { %7358 = vmatpush1.bf16.msra.mxu0 %v9598_v52  ;;  %v9685_v52 = vld [vmem:[#allocation8 + $0xe08] ss:$16 sps:$4 sm:$0xff]  }
 0x3e8   :  { %7702 = vmatpush1.bf16.msra.mxu1 %v9601_v55  ;;  %7359 = vmatprep.subr.bf16.mxu0 %v9606_v42  ;;  %v9690_v55 = vld [vmem:[#allocation8 + $0xe24] ss:$16 sps:$4 sm:$0xff]   ;;  %v9693_v42 = vld [vmem:[#allocation8 + $0xe2c] ss:$16 sps:$4 sm:$0xff]  }
 0x3e9   :  { %7703 = vmatprep.subr.bf16.mxu1 %v9609_v53  ;;  %v9688_v53 = vld [vmem:[#allocation8 + $0xe20] ss:$16 sps:$4 sm:$0xff]  }
 0x3eb   :  { %7360 = vmatpush1.bf16.msra.mxu0 %v9604_v57  ;;  %v9691_v57 = vld [vmem:[#allocation8 + $0xe28] ss:$16 sps:$4 sm:$0xff]  }
 0x3ec   :  { %7704 = vmatpush1.bf16.msra.mxu1 %v9607_v0  ;;  %7361 = vmatprep.subr.bf16.mxu0 %v9612_v1  ;;  %v9696_v0 = vld [vmem:[#allocation8 + $0xe44] ss:$16 sps:$4 sm:$0xff]   ;;  %v9699_v1 = vld [vmem:[#allocation8 + $0xe4c] ss:$16 sps:$4 sm:$0xff]  }
 0x3ed   :  { %7705 = vmatprep.subr.bf16.mxu1 %v9615_v2  ;;  %v9694_v2 = vld [vmem:[#allocation8 + $0xe40] ss:$16 sps:$4 sm:$0xff]  }
 0x3ef   :  { %7362 = vmatpush1.bf16.msra.mxu0 %v9610_v56  ;;  %v9697_v56 = vld [vmem:[#allocation8 + $0xe48] ss:$16 sps:$4 sm:$0xff]  }
 0x3f0   :  { %7706 = vmatpush1.bf16.msra.mxu1 %v9613_v4  ;;  %7363 = vmatprep.subr.bf16.mxu0 %v9618_v5  ;;  %v9702_v4 = vld [vmem:[#allocation8 + $0xe64] ss:$16 sps:$4 sm:$0xff]   ;;  %v9700_v5 = vld [vmem:[#allocation8 + $0xe60] ss:$16 sps:$4 sm:$0xff]  }
 0x3f1   :  { %7707 = vmatprep.subr.bf16.mxu1 %v9621_v59  ;;  %v9703_v59 = vld [vmem:[#allocation8 + $0xe68] ss:$16 sps:$4 sm:$0xff]  }
 0x3f3   :  { %7364 = vmatpush1.bf16.msra.mxu0 %v9616_v6  ;;  %v9708_v6 = vld [vmem:[#allocation8 + $0xe84] ss:$16 sps:$4 sm:$0xff]  }
 0x3f4   :  { %7708 = vmatpush1.bf16.msra.mxu1 %v9619_v7  ;;  %7365 = vmatprep.subr.bf16.mxu0 %v9624_v8  ;;  %v9711_v7 = vld [vmem:[#allocation8 + $0xe8c] ss:$16 sps:$4 sm:$0xff]   ;;  %v9709_v8 = vld [vmem:[#allocation8 + $0xe88] ss:$16 sps:$4 sm:$0xff]  }
 0x3f5   :  { %7709 = vmatprep.subr.bf16.mxu1 %v9627_v9  ;;  %v9714_v9 = vld [vmem:[#allocation8 + $0xea4] ss:$16 sps:$4 sm:$0xff]  }
 0x3f7   :  { %7366 = vmatpush1.bf16.msra.mxu0 %v9622_v22  ;;  %v9717_v22 = vld [vmem:[#allocation8 + $0xeac] ss:$16 sps:$4 sm:$0xff]  }
 0x3f8   :  { %7710 = vmatpush1.bf16.msra.mxu1 %v9625_v10  ;;  %7367 = vmatprep.subr.bf16.mxu0 %v9630_v24  ;;  %v9712_v10 = vld [vmem:[#allocation8 + $0xea0] ss:$16 sps:$4 sm:$0xff]   ;;  %v9715_v24 = vld [vmem:[#allocation8 + $0xea8] ss:$16 sps:$4 sm:$0xff]  }
 0x3f9   :  { %7711 = vmatprep.subr.bf16.mxu1 %v9633_v29  ;;  %v9720_v29 = vld [vmem:[#allocation8 + $0xec4] ss:$16 sps:$4 sm:$0xff]  }
 0x3fb   :  { %7368 = vmatpush1.bf16.msra.mxu0 %v9628_v27  ;;  %v9723_v27 = vld [vmem:[#allocation8 + $0xecc] ss:$16 sps:$4 sm:$0xff]  }
 0x3fc   :  { %7712 = vmatpush1.bf16.msra.mxu1 %v9631_v11  ;;  %7369 = vmatprep.subr.bf16.mxu0 %v9636_v12  ;;  %v9718_v11 = vld [vmem:[#allocation8 + $0xec0] ss:$16 sps:$4 sm:$0xff]   ;;  %v9721_v12 = vld [vmem:[#allocation8 + $0xec8] ss:$16 sps:$4 sm:$0xff]  }
 0x3fd   :  { %7713 = vmatprep.subr.bf16.mxu1 %v9639_v13  ;;  %v9726_v13 = vld [vmem:[#allocation8 + $0xee4] ss:$16 sps:$4 sm:$0xff]  }
 0x3ff   :  { %7370 = vmatpush1.bf16.msra.mxu0 %v9634_v28  ;;  %v9729_v28 = vld [vmem:[#allocation8 + $0xeec] ss:$16 sps:$4 sm:$0xff]  }
 0x400   :  { %7714 = vmatpush1.bf16.msra.mxu1 %v9637_v62  ;;  %7371 = vmatprep.subr.bf16.mxu0 %v9642_v14  ;;  %v9724_v62 = vld [vmem:[#allocation8 + $0xee0] ss:$16 sps:$4 sm:$0xff]   ;;  %v9727_v14 = vld [vmem:[#allocation8 + $0xee8] ss:$16 sps:$4 sm:$0xff]  }
 0x401   :  { %7715 = vmatprep.subr.bf16.mxu1 %v9645_v47  ;;  %v9732_v47 = vld [vmem:[#allocation8 + $0xf04] ss:$16 sps:$4 sm:$0xff]  }
 0x403   :  { %7372 = vmatpush1.bf16.msra.mxu0 %v9640_v31  ;;  %v9735_v31 = vld [vmem:[#allocation8 + $0xf0c] ss:$16 sps:$4 sm:$0xff]  }
 0x404   :  { %7716 = vmatpush1.bf16.msra.mxu1 %v9643_v34  ;;  %7373 = vmatprep.subr.bf16.mxu0 %v9648_v15  ;;  %v9730_v34 = vld [vmem:[#allocation8 + $0xf00] ss:$16 sps:$4 sm:$0xff]   ;;  %v9733_v15 = vld [vmem:[#allocation8 + $0xf08] ss:$16 sps:$4 sm:$0xff]  }
 0x405   :  { %7717 = vmatprep.subr.bf16.mxu1 %v9651_v16  ;;  %v9738_v16 = vld [vmem:[#allocation8 + $0xf24] ss:$16 sps:$4 sm:$0xff]  }
 0x407   :  { %7374 = vmatpush1.bf16.msra.mxu0 %v9646_v17  ;;  %v9741_v17 = vld [vmem:[#allocation8 + $0xf2c] ss:$16 sps:$4 sm:$0xff]  }
 0x408   :  { %7718 = vmatpush1.bf16.msra.mxu1 %v9649_v18  ;;  %7375 = vmatprep.subr.bf16.mxu0 %v9654_v19  ;;  %v9736_v18 = vld [vmem:[#allocation8 + $0xf20] ss:$16 sps:$4 sm:$0xff]   ;;  %v9739_v19 = vld [vmem:[#allocation8 + $0xf28] ss:$16 sps:$4 sm:$0xff]  }
 0x409   :  { %7719 = vmatprep.subr.bf16.mxu1 %v9657_v20  ;;  %v9744_v20 = vld [vmem:[#allocation8 + $0xf44] ss:$16 sps:$4 sm:$0xff]  }
 0x40b   :  { %7376 = vmatpush1.bf16.msra.mxu0 %v9652_v21  ;;  %v9747_v21 = vld [vmem:[#allocation8 + $0xf4c] ss:$16 sps:$4 sm:$0xff]  }
 0x40c   :  { %7720 = vmatpush1.bf16.msra.mxu1 %v9655_v58  ;;  %7377 = vmatprep.subr.bf16.mxu0 %v9660_v23  ;;  %v9742_v58 = vld [vmem:[#allocation8 + $0xf40] ss:$16 sps:$4 sm:$0xff]   ;;  %v9745_v23 = vld [vmem:[#allocation8 + $0xf48] ss:$16 sps:$4 sm:$0xff]  }
 0x40d   :  { %7721 = vmatprep.subr.bf16.mxu1 %v9663_v26  ;;  %v9750_v26 = vld [vmem:[#allocation8 + $0xf64] ss:$16 sps:$4 sm:$0xff]  }
 0x40f   :  { %7378 = vmatpush1.bf16.msra.mxu0 %v9658_v37  ;;  %v9753_v37 = vld [vmem:[#allocation8 + $0xf6c] ss:$16 sps:$4 sm:$0xff]  }
 0x410   :  { %7722 = vmatpush1.bf16.msra.mxu1 %v9661_v32  ;;  %7379 = vmatprep.subr.bf16.mxu0 %v9666_v3  ;;  %v9748_v32 = vld [vmem:[#allocation8 + $0xf60] ss:$16 sps:$4 sm:$0xff]   ;;  %v9751_v3 = vld [vmem:[#allocation8 + $0xf68] ss:$16 sps:$4 sm:$0xff]  }
 0x411   :  { %7723 = vmatprep.subr.bf16.mxu1 %v9669_v38  ;;  %v9756_v38 = vld [vmem:[#allocation8 + $0xf84] ss:$16 sps:$4 sm:$0xff]  }
 0x413   :  { %7380 = vmatpush1.bf16.msra.mxu0 %v9664_v35  ;;  %v9759_v35 = vld [vmem:[#allocation8 + $0xf8c] ss:$16 sps:$4 sm:$0xff]  }
 0x414   :  { %7724 = vmatpush1.bf16.msra.mxu1 %v9667_v25  ;;  %7381 = vmatprep.subr.bf16.mxu0 %v9672_v40  ;;  %v9754_v25 = vld [vmem:[#allocation8 + $0xf80] ss:$16 sps:$4 sm:$0xff]   ;;  %v9757_v40 = vld [vmem:[#allocation8 + $0xf88] ss:$16 sps:$4 sm:$0xff]  }
 0x415   :  { %7725 = vmatprep.subr.bf16.mxu1 %v9675_v41  ;;  %v9762_v41 = vld [vmem:[#allocation8 + $0xfa4] ss:$16 sps:$4 sm:$0xff]  }
 0x417   :  { %7382 = vmatpush1.bf16.msra.mxu0 %v9670_v43  ;;  %v9765_v43 = vld [vmem:[#allocation8 + $0xfac] ss:$16 sps:$4 sm:$0xff]  }
 0x418   :  { %7726 = vmatpush1.bf16.msra.mxu1 %v9673_v45  ;;  %7383 = vmatprep.subr.bf16.mxu0 %v9678_v48  ;;  %v9760_v45 = vld [vmem:[#allocation8 + $0xfa0] ss:$16 sps:$4 sm:$0xff]   ;;  %v9763_v48 = vld [vmem:[#allocation8 + $0xfa8] ss:$16 sps:$4 sm:$0xff]  }
 0x419   :  { %7727 = vmatprep.subr.bf16.mxu1 %v9681_v36  ;;  %v9768_v36 = vld [vmem:[#allocation8 + $0xfc4] ss:$16 sps:$4 sm:$0xff]  }
 0x41b   :  { %7384 = vmatpush1.bf16.msra.mxu0 %v9676_v49  ;;  %v9771_v49 = vld [vmem:[#allocation8 + $0xfcc] ss:$16 sps:$4 sm:$0xff]  }
 0x41c   :  { %7728 = vmatpush1.bf16.msra.mxu1 %v9679_v33  ;;  %7396 = vmatprep.subr.bf16.mxu0 %v9684_v50  ;;  %v9766_v33 = vld [vmem:[#allocation8 + $0xfc0] ss:$16 sps:$4 sm:$0xff]   ;;  %v9769_v50 = vld [vmem:[#allocation8 + $0xfc8] ss:$16 sps:$4 sm:$0xff]  }
 0x41d   :  { %7740 = vmatprep.subr.bf16.mxu1 %v9687_v51  ;;  %v9774_v51 = vld [vmem:[#allocation8 + $0xfe4] ss:$16 sps:$4 sm:$0xff]  }
 0x41e   :  { %7386 = vmatmul.mubr.bf16.vlgmr.msra.gmra.mrb[16].mxu0 %v10156_v39 }
 0x41f   :  { %7730 = vmatmul.mubr.bf16.vlgmr.msra.gmra.mrb[16].mxu1 %v10156_v39  ;;  %7397 = vmatpush1.bf16.msra.mxu0 %v9682_v30  ;;  %v9705_v39 = vld [vmem:[#allocation8 + $0xe6c] ss:$16 sps:$4 sm:$0xff]  }
 0x420   :  { %7428 = vmatprep.mubr.bf16.mxu0 %v10162_v46  ;;  %7741 = vmatpush1.bf16.msra.mxu1 %v9685_v52  ;;  %v9777_v30 = vld [vmem:[#allocation8 + $0xfec] ss:$16 sps:$4 sm:$0xff]   ;;  %v9772_v52 = vld [vmem:[#allocation8 + $0xfe0] ss:$16 sps:$4 sm:$0xff]  }
 0x421   :  { %7772 = vmatprep.mubr.bf16.mxu1 %v10162_v46  ;;  %7398 = vmatprep.subr.bf16.mxu0 %v9690_v55  ;;  %v9706_v46 = vld [vmem:[#allocation8 + $0xe80] ss:$16 sps:$4 sm:$0xff]   ;;  %v9775_v55 = vld [vmem:[#allocation8 + $0xfe8] ss:$16 sps:$4 sm:$0xff]  }
 0x422   :  { %7742 = vmatprep.subr.bf16.mxu1 %v9693_v42  ;;  %v4513_v42 = vld [vmem:[#allocation10] sm:$0xf] }
 0x423   :  { %7399 = vmatpush1.bf16.msra.mxu0 %v9688_v53  ;;  %v4518_v53 = vrot.slane %v4513_v42, %v10049_v54 }
 0x424   :  { %7743 = vmatpush1.bf16.msra.mxu1 %v9691_v57  ;;  %7400 = vmatprep.subr.bf16.mxu0 %v9696_v0  ;;  %v4526_v57 = vrot.slane %v4513_v42, %v10054_v60  ;;  %v4522_v0 = vrot.slane %v4513_v42, %v10057_v61 }
 0x425   :  { %7744 = vmatprep.subr.bf16.mxu1 %v9699_v1  ;;  %v4530_v1 = vrot.slane %v4513_v42, %v10060_v63 }
 0x427   :  { %7401 = vmatpush1.bf16.msra.mxu0 %v9694_v2 }
 0x428   :  { %7745 = vmatpush1.bf16.msra.mxu1 %v9697_v56  ;;  %7402 = vmatprep.subr.bf16.mxu0 %v9702_v4 }
 0x429   :  { %7746 = vmatprep.subr.bf16.mxu1 %v9705_v39 }
 0x42b   :  { %7403 = vmatpush1.bf16.msra.mxu0 %v9700_v5 }
 0x42c   :  { %7747 = vmatpush1.bf16.msra.mxu1 %v9703_v59  ;;  %7404 = vmatprep.subr.bf16.mxu0 %v9708_v6 }
 0x42d   :  { %7748 = vmatprep.subr.bf16.mxu1 %v9711_v7 }
 0x42f   :  { %7405 = vmatpush1.bf16.msra.mxu0 %v9706_v46 }
 0x430   :  { %7749 = vmatpush1.bf16.msra.mxu1 %v9709_v8  ;;  %7406 = vmatprep.subr.bf16.mxu0 %v9714_v9 }
 0x431   :  { %7750 = vmatprep.subr.bf16.mxu1 %v9717_v22 }
 0x433   :  { %7407 = vmatpush1.bf16.msra.mxu0 %v9712_v10 }
 0x434   :  { %7751 = vmatpush1.bf16.msra.mxu1 %v9715_v24  ;;  %7408 = vmatprep.subr.bf16.mxu0 %v9720_v29 }
 0x435   :  { %7752 = vmatprep.subr.bf16.mxu1 %v9723_v27 }
 0x437   :  { %7409 = vmatpush1.bf16.msra.mxu0 %v9718_v11 }
 0x438   :  { %7753 = vmatpush1.bf16.msra.mxu1 %v9721_v12  ;;  %7410 = vmatprep.subr.bf16.mxu0 %v9726_v13 }
 0x439   :  { %7754 = vmatprep.subr.bf16.mxu1 %v9729_v28 }
 0x43b   :  { %7411 = vmatpush1.bf16.msra.mxu0 %v9724_v62 }
 0x43c   :  { %7755 = vmatpush1.bf16.msra.mxu1 %v9727_v14  ;;  %7412 = vmatprep.subr.bf16.mxu0 %v9732_v47 }
 0x43d   :  { %7756 = vmatprep.subr.bf16.mxu1 %v9735_v31 }
 0x43f   :  { %7413 = vmatpush1.bf16.msra.mxu0 %v9730_v34 }
 0x440   :  { %7757 = vmatpush1.bf16.msra.mxu1 %v9733_v15  ;;  %7414 = vmatprep.subr.bf16.mxu0 %v9738_v16 }
 0x441   :  { %7758 = vmatprep.subr.bf16.mxu1 %v9741_v17 }
 0x443   :  { %7415 = vmatpush1.bf16.msra.mxu0 %v9736_v18 }
 0x444   :  { %7759 = vmatpush1.bf16.msra.mxu1 %v9739_v19  ;;  %7416 = vmatprep.subr.bf16.mxu0 %v9744_v20 }
 0x445   :  { %7760 = vmatprep.subr.bf16.mxu1 %v9747_v21 }
 0x447   :  { %7417 = vmatpush1.bf16.msra.mxu0 %v9742_v58 }
 0x448   :  { %7761 = vmatpush1.bf16.msra.mxu1 %v9745_v23  ;;  %7418 = vmatprep.subr.bf16.mxu0 %v9750_v26 }
 0x449   :  { %7762 = vmatprep.subr.bf16.mxu1 %v9753_v37 }
 0x44b   :  { %7419 = vmatpush1.bf16.msra.mxu0 %v9748_v32 }
 0x44c   :  { %7763 = vmatpush1.bf16.msra.mxu1 %v9751_v3  ;;  %7420 = vmatprep.subr.bf16.mxu0 %v9756_v38 }
 0x44d   :  { %7764 = vmatprep.subr.bf16.mxu1 %v9759_v35 }
 0x44f   :  { %7421 = vmatpush1.bf16.msra.mxu0 %v9754_v25 }
 0x450   :  { %7765 = vmatpush1.bf16.msra.mxu1 %v9757_v40  ;;  %7422 = vmatprep.subr.bf16.mxu0 %v9762_v41 }
 0x451   :  { %7766 = vmatprep.subr.bf16.mxu1 %v9765_v43 }
 0x453   :  { %7423 = vmatpush1.bf16.msra.mxu0 %v9760_v45 }
 0x454   :  { %7767 = vmatpush1.bf16.msra.mxu1 %v9763_v48  ;;  %7424 = vmatprep.subr.bf16.mxu0 %v9768_v36 }
 0x455   :  { %7768 = vmatprep.subr.bf16.mxu1 %v9771_v49 }
 0x457   :  { %7425 = vmatpush1.bf16.msra.mxu0 %v9766_v33 }
 0x458   :  { %7769 = vmatpush1.bf16.msra.mxu1 %v9769_v50  ;;  %7426 = vmatprep.subr.bf16.mxu0 %v9774_v51 }
 0x459   :  { %7770 = vmatprep.subr.bf16.mxu1 %v9777_v30 }
 0x45b   :  { %7427 = vmatpush1.bf16.msra.mxu0 %v9772_v52 }
 0x45c   :  { %7771 = vmatpush1.bf16.msra.mxu1 %v9775_v55 }
 0x45e   :  { %7429 = vmatmul.mubr.bf16.vlgmr.msra.gmra.mrb[16].mxu0 %v10158_v44 }
 0x45f   :  { %7773 = vmatmul.mubr.bf16.vlgmr.msra.gmra.mrb[16].mxu1 %v10158_v44 }
 0x531   :  { %v7430_v2 = vpop.f32.mrb[16].mxu0 }
 0x532   :  { %v8898_v56 = vadd.f32 %v7430_v2, %v4518_v53  ;;  %v7774_v4 = vpop.f32.mrb[16].mxu1  ;;  %v7432_v39 = vpop.f32.mrb[17].mxu0 }
 0x533   :  { %v8902_v5 = vadd.f32 %v7774_v4, %v4526_v57  ;;  %v8899_v59 = vadd.f32 %v7432_v39, %v4522_v0  ;;  %v7776_v6 = vpop.f32.mrb[17].mxu1  ;;  %v7434_v7 = vpop.f32.mrb[18].mxu0 }
 0x534   :  { %v8903_v46 = vadd.f32 %v7776_v6, %v4530_v1  ;;  %v8900_v8 = vadd.f32 %v7434_v7, %v4518_v53  ;;  %v7778_v44 = vpop.f32.mrb[18].mxu1  ;;  %v7436_v9 = vpop.f32.mrb[19].mxu0 }
 0x535   :  { %v8862_v22 = vpack.c.bf16 %v8899_v59, %v8898_v56  ;;  %v8904_v54 = vadd.f32 %v7778_v44, %v4526_v57  ;;  %v8901_v10 = vadd.f32 %v7436_v9, %v4522_v0  ;;  %v7780_v60 = vpop.f32.mrb[19].mxu1 }
 0x536   :  { %v8863_v61 = vpack.c.bf16 %v8903_v46, %v8902_v5  ;;  %v8905_v63 = vadd.f32 %v7780_v60, %v4530_v1 }
 0x537   :  { %7807 = vst [vmem:[#allocation11] sm:$0xff] %v8862_v22  ;;  %v8864_v24 = vpack.c.bf16 %v8901_v10, %v8900_v8 }
 0x538   :  { %7808 = vst [vmem:[#allocation11 + $0x8] sm:$0xff] %v8863_v61  ;;  %v8865_v29 = vpack.c.bf16 %v8905_v63, %v8904_v54 }
 0x539   :  { %7809 = vst [vmem:[#allocation11 + $0x10] sm:$0xff] %v8864_v24 }
 0x53a   :  { %7810 = vst [vmem:[#allocation11 + $0x18] sm:$0xff] %v8865_v29 }
 0x53b   :  { %9907 = shalt.err (!%p9904_p2)
}
 0x53c   :  { %s9908_s7 = scalar_lea.hbm %s10206_s5, 512 }
 0x53d   :  { %p9909_p3 = scmp.ne.s32.totalorder %s10206_s5, %s9908_s7  ;;  %p9912_p4 = scmp.lt.u32.totalorder %s9908_s7, %s10206_s5 }
 0x53f   :  { %p9914_p5 = pnand %p9912_p4, %p9909_p3 }
 0x541   :  { %9917 = shalt.err (!%p9914_p5)
}
 0x542   :  { %7822 = dma.vmem_to_hbm [thread:$0]  %s7817_s29, 512, %s10206_s5, [#allocation4], %s9931_s18, %s9931_s18, %s9932_s19  }
 0x543   :  { %9924 = dma.done.wait [#allocation4], 512  }
 0x544   :  { %9925 = vsyncadd [#allocation4], 4294966784 }
 0x545   :  { %7826 = vsyncpa [#allocation3], 1 }
 0x546   :  { %7827 = vsyncpa [#allocation6], 1 }
 0x547   :  { %7828 = vsyncpa [#allocation9], 1 }
 0x548   :  { %7829 = vsyncpa [#allocation4], 1 }

</bundles_post_ra>
